<compile_context>
chip_gen: v6e
topology: v6e:2x2x1
jax: 0.10.0
libtpu: 0.0.40
codegen_flags: <defaults>
</compile_context>

<pallas_src>
import functools
import math

import jax
import jax.numpy as jnp
from jax import lax
from jax.experimental import pallas as pl
from jax.experimental.pallas import tpu as pltpu


# ----------------------------------------------------------------------------
# In-kernel helpers: flat-index row/col and roll-based 3x3 conv taps
# ----------------------------------------------------------------------------
def _row_col(shape, W):
    """row = idx // W, col = idx % W for the flattened (H*W, C) layout."""
    pos = lax.broadcasted_iota(jnp.int32, shape, 0)
    if W & (W - 1) == 0:                       # power of two: VPU shift / and
        row = pos >> (W.bit_length() - 1)
        col = pos & (W - 1)
    else:                                      # general W (vector int div)
        row = pos // W
        col = pos % W
    return row, col


def _tap(x, row, col, dy, dx, H, W):
    """Tap (dy,dx) of a 3x3 SAME conv on the flat (H*W, C) array `x`.

    result[p] = x[p + dy*W + dx] where that position lies inside the image,
    else 0 (== zero padding).  The shift is a pltpu.roll (np.roll semantics),
    the boundary handling is a mask on the wrapped rows/cols.
    """
    HW = x.shape[0]
    d = dy * W + dx
    shifted = pltpu.roll(x, shift=(-d) % HW, axis=0) if d != 0 else x
    mask = None
    if dy < 0:
        mask = row >= -dy
    if dy > 0:
        m = row < H - dy
        mask = m if mask is None else (mask & m)
    if dx < 0:
        m = col >= -dx
        mask = m if mask is None else (mask & m)
    if dx > 0:
        m = col < W - dx
        mask = m if mask is None else (mask & m)
    if mask is None:
        return shifted
    return jnp.where(mask, shifted, jnp.zeros_like(shifted))


_OFFSETS = [(dy, dx) for dy in (-1, 0, 1) for dx in (-1, 0, 1)]


# ----------------------------------------------------------------------------
# Fused kernel: stem conv -> RPN conv -> combined head (all in VMEM)
# ----------------------------------------------------------------------------
def _fused_rpn_kernel(x_ref, ws_ref, bs_ref, wr_ref, br_ref, wh_ref, bh_ref,
                      out_ref, *, H, W, Cin, C, k0_pad):
    HW = H * W

    # --- backbone stem: 3x3 conv as one im2col matmul (+bias, ReLU) ---------
    img = x_ref[0]                                           # (HW, Cin) f32
    r_i, c_i = _row_col((HW, Cin), W)
    taps = [_tap(img, r_i, c_i, dy, dx, H, W) for dy, dx in _OFFSETS]
    pad_k = k0_pad - 9 * Cin
    if pad_k:
        taps.append(jnp.zeros((HW, pad_k), jnp.float32))
    patches = jnp.concatenate(taps, axis=-1).astype(jnp.bfloat16)  # (HW,k0_pad)
    feat = jnp.dot(patches, ws_ref[...], preferred_element_type=jnp.float32)
    feat = jnp.maximum(feat + bs_ref[...], 0.0)              # (HW, C) f32

    # --- RPN 3x3 conv: roll-built taps, K = 9*C matmul -----------------------
    r_f, c_f = _row_col((HW, C), W)
    taps = [_tap(feat, r_f, c_f, dy, dx, H, W) for dy, dx in _OFFSETS]
    patches = jnp.concatenate(taps, axis=-1).astype(jnp.bfloat16)  # (HW, 9C)
    hid = jnp.dot(patches, wr_ref[...], preferred_element_type=jnp.float32)
    hid = jnp.maximum(hid + br_ref[...], 0.0)                # (HW, C) f32

    # --- fused objectness + anchor-delta head, transposed (head_pad, HW) ----
    head = lax.dot_general(
        wh_ref[...], hid.astype(jnp.bfloat16),
        dimension_numbers=(((1,), (1,)), ((), ())),          # W_h @ hid^T
        preferred_element_type=jnp.float32)                  # (head_pad, HW)
    out_ref[0] = (head + bh_ref[...]).astype(out_ref.dtype)


def fused_rpn_forward(img, ws, bs, wr, br, wh, bh, *, H, W, Cin, C, head_pad):
    N, HW, _ = img.shape
    k0_pad = ws.shape[0]
    kern = functools.partial(_fused_rpn_kernel, H=H, W=W, Cin=Cin, C=C,
                             k0_pad=k0_pad)
    flops = 2 * N * HW * (k0_pad * C + 9 * C * C + C * head_pad)
    bytes_accessed = (4 * img.size + 2 * (ws.size + wr.size + wh.size)
                      + 4 * (bs.size + br.size + bh.size)
                      + 4 * N * head_pad * HW)
    return pl.pallas_call(
        kern,
        out_shape=jax.ShapeDtypeStruct((N, head_pad, HW), jnp.float32),
        grid_spec=pltpu.PrefetchScalarGridSpec(
            num_scalar_prefetch=0,
            grid=(N,),
            in_specs=[
                pl.BlockSpec((1, HW, Cin), lambda n: (n, 0, 0)),   # image
                pl.BlockSpec((k0_pad, C), lambda n: (0, 0)),       # stem W
                pl.BlockSpec((1, C), lambda n: (0, 0)),            # stem b
                pl.BlockSpec((9 * C, C), lambda n: (0, 0)),        # rpn W
                pl.BlockSpec((1, C), lambda n: (0, 0)),            # rpn b
                pl.BlockSpec((head_pad, C), lambda n: (0, 0)),     # head W^T
                pl.BlockSpec((head_pad, 1), lambda n: (0, 0)),     # head b
            ],
            out_specs=pl.BlockSpec((1, head_pad, HW), lambda n: (n, 0, 0)),
        ),
        compiler_params=pltpu.CompilerParams(
            dimension_semantics=("parallel",)),
        cost_estimate=pl.CostEstimate(flops=flops, transcendentals=0,
                                      bytes_accessed=bytes_accessed),
    )(img, ws, bs, wr, br, wh, bh)


# ----------------------------------------------------------------------------
# Wrapper-side glue (plain JAX)
# ----------------------------------------------------------------------------
def generate_anchors(H, W, stride, sizes):
    ys = (jnp.arange(H, dtype=jnp.float32) + 0.5) * stride
    xs = (jnp.arange(W, dtype=jnp.float32) + 0.5) * stride
    cy, cx = jnp.meshgrid(ys, xs, indexing="ij")
    ctr = jnp.stack([cx, cy], axis=-1)                       # (H, W, 2)
    anchors = []
    for s in sizes:
        half = s / 2.0
        anchors.append(jnp.concatenate([ctr - half, ctr + half], axis=-1))
    return jnp.stack(anchors, axis=2).reshape(H * W * len(sizes), 4)


_BBOX_XFORM_CLIP = math.log(1000.0 / 16.0)    # detectron2 Box2BoxTransform clip


def decode_boxes(anchors, deltas):
    wa = anchors[:, 2] - anchors[:, 0]
    ha = anchors[:, 3] - anchors[:, 1]
    xa = anchors[:, 0] + 0.5 * wa
    ya = anchors[:, 1] + 0.5 * ha
    dx, dy, dw, dh = deltas[..., 0], deltas[..., 1], deltas[..., 2], deltas[..., 3]
    xc = dx * wa + xa
    yc = dy * ha + ya
    w = jnp.exp(jnp.clip(dw, -_BBOX_XFORM_CLIP, _BBOX_XFORM_CLIP)) * wa
    h = jnp.exp(jnp.clip(dh, -_BBOX_XFORM_CLIP, _BBOX_XFORM_CLIP)) * ha
    return jnp.stack([xc - 0.5 * w, yc - 0.5 * h, xc + 0.5 * w, yc + 0.5 * h],
                     axis=-1)


# ----------------------------------------------------------------------------
# ProposalNetwork forward (inference path)
# ----------------------------------------------------------------------------
class ProposalNetworkPallas:
    def __init__(self, key, *, in_ch=3, stem_ch=32, num_anchors=3):
        k1, k2, k3, k4 = jax.random.split(key, 4)
        self.pixel_mean = jnp.array([123.675, 116.280, 103.530], jnp.float32)
        self.pixel_std = jnp.array([58.395, 57.120, 57.375], jnp.float32)
        self.A = num_anchors
        self.C = stem_ch
        self.in_ch = in_ch

        # Raw f32 parameters (also used by the plain-JAX reference checks).
        self.w_stem = 0.05 * jax.random.normal(k1, (3, 3, in_ch, stem_ch), jnp.float32)
        self.b_stem = jnp.zeros((stem_ch,), jnp.float32)
        self.w_rpn = 0.05 * jax.random.normal(k2, (3, 3, stem_ch, stem_ch), jnp.float32)
        self.b_rpn = jnp.zeros((stem_ch,), jnp.float32)
        self.w_obj = 0.05 * jax.random.normal(k3, (stem_ch, num_anchors), jnp.float32)
        self.b_obj = jnp.zeros((num_anchors,), jnp.float32)
        self.w_del = 0.05 * jax.random.normal(k4, (stem_ch, 4 * num_anchors), jnp.float32)
        self.b_del = jnp.zeros((4 * num_anchors,), jnp.float32)

        # --- one-time operand prep (bf16 MXU weights, f32 biases) -----------
        # Fold 1/pixel_std into the stem conv (exact: conv is linear and the
        # kernel masks out-of-image taps to zero, matching zero-padding of the
        # normalized image).
        inv_std = (1.0 / self.pixel_std).reshape(1, 1, in_ch, 1)
        w_stem_mat = (self.w_stem * inv_std).reshape(9 * in_ch, stem_ch)
        k0 = 9 * in_ch
        self.k0_pad = ((k0 + 31) // 32) * 32            # pad im2col K to 32
        self.ws_bf = jnp.pad(w_stem_mat, ((0, self.k0_pad - k0), (0, 0))
                             ).astype(jnp.bfloat16)
        self.bs_row = self.b_stem.reshape(1, stem_ch)

        self.wr_bf = self.w_rpn.reshape(9 * stem_ch, stem_ch).astype(jnp.bfloat16)
        self.br_row = self.b_rpn.reshape(1, stem_ch)

        # Fuse objectness + delta heads; keep them transposed so the kernel
        # output is (head_pad, H*W) with H*W lane-dense (head_pad = 16 << 128).
        nh = 5 * num_anchors                             # 3 logits + 12 deltas
        self.head_pad = ((nh + 7) // 8) * 8
        w_head = jnp.concatenate([self.w_obj, self.w_del], axis=1)   # (C, 15)
        b_head = jnp.concatenate([self.b_obj, self.b_del], axis=0)   # (15,)
        self.wh_bf = jnp.pad(w_head.T, ((0, self.head_pad - nh), (0, 0))
                             ).astype(jnp.bfloat16)                  # (16, C)
        self.bh_col = jnp.pad(b_head, (0, self.head_pad - nh)
                              ).reshape(self.head_pad, 1)            # (16, 1)

    def forward(self, images_nchw):
        # PyTorch NCHW -> kernel NHWC (flattened to (N, H*W, Cin)).
        x = jnp.transpose(images_nchw, (0, 2, 3, 1)).astype(jnp.float32)
        N, H, W, Cin = x.shape
        # preprocess_image: mean subtraction only (1/std folded into weights);
        # ImageList padding is a no-op since all inputs share a padded size.
        xc = (x - self.pixel_mean.reshape(1, 1, 1, Cin)).reshape(N, H * W, Cin)
        # backbone + proposal_generator RPN head, fully fused in one kernel.
        out = fused_rpn_forward(xc, self.ws_bf, self.bs_row, self.wr_bf,
                                self.br_row, self.wh_bf, self.bh_col,
                                H=H, W=W, Cin=Cin, C=self.C,
                                head_pad=self.head_pad)      # (N, 16, H*W)
        A = self.A
        logits = jnp.transpose(out[:, :A, :], (0, 2, 1)).reshape(N, H * W * A)
        deltas = jnp.transpose(out[:, A:5 * A, :], (0, 2, 1)).reshape(
            N, H * W * A, 4)
        anchors = generate_anchors(H, W, stride=1.0, sizes=(4.0, 8.0, 16.0))
        boxes = decode_boxes(anchors, deltas)
        # TODO(synk): find_top_rpn_proposals (top-k + NMS) and
        # detector_postprocess Instances rescaling have no clean Pallas
        # equivalent; returning all decoded proposals per image instead.
        processed_results = []
        for i in range(N):
            processed_results.append({
                "proposals": {
                    "proposal_boxes": boxes[i],
                    "objectness_logits": logits[i],
                }
            })
        return processed_results, logits, deltas


# ----------------------------------------------------------------------------
# Plain-JAX references for correctness checks
# ----------------------------------------------------------------------------
def _ref_conv3x3(x_nhwc, w, b, relu):
    y = lax.conv_general_dilated(
        x_nhwc, w, window_strides=(1, 1), padding="SAME",
        dimension_numbers=("NHWC", "HWIO", "NHWC"))
    y = y + b.reshape(1, 1, 1, -1)
    return jnp.maximum(y, 0.0) if relu else y


def _ref_im2col(x_nhwc):
    N, H, W, Cc = x_nhwc.shape
    xp = jnp.pad(x_nhwc, ((0, 0), (1, 1), (1, 1), (0, 0)))
    cols = [xp[:, ky:ky + H, kx:kx + W, :] for ky in range(3) for kx in range(3)]
    return jnp.concatenate(cols, axis=-1).reshape(N * H * W, 9 * Cc)


def _ref_bf16_pipeline(images_nchw, m):
    """Mirrors the kernel math (same bf16 operand casts, f32 accumulation)."""
    x = jnp.transpose(images_nchw, (0, 2, 3, 1)).astype(jnp.float32)
    N, H, W, Cin = x.shape
    xc = x - m.pixel_mean.reshape(1, 1, 1, Cin)
    p0 = _ref_im2col(xc).astype(jnp.bfloat16)                       # (NHW, 27)
    feat = jnp.dot(p0, m.ws_bf[:9 * Cin], preferred_element_type=jnp.float32)
    feat = jnp.maximum(feat + m.bs_row, 0.0)
    p1 = _ref_im2col(feat.reshape(N, H, W, m.C)).astype(jnp.bfloat16)
    hid = jnp.dot(p1, m.wr_bf, preferred_element_type=jnp.float32)
    hid = jnp.maximum(hid + m.br_row, 0.0)
    head = jnp.dot(hid.astype(jnp.bfloat16), m.wh_bf.T,
                   preferred_element_type=jnp.float32) + m.bh_col.reshape(1, -1)
    return head.reshape(N, H * W, m.head_pad)


if __name__ == "__main__":
    key = jax.random.PRNGKey(0)
    k_img, k_model = jax.random.split(key)

    N, Cin, H, W = 2, 3, 16, 16      # small NCHW input (PyTorch convention)
    images = jax.random.uniform(k_img, (N, Cin, H, W), jnp.float32, 0.0, 255.0)

    model = ProposalNetworkPallas(k_model, in_ch=Cin, stem_ch=32, num_anchors=3)
    results, logits, deltas = model.forward(images)
    jax.block_until_ready((logits, deltas))

    A = model.A

    # Tight check: plain-JAX pipeline with identical bf16 operand casting.
    head_ref = _ref_bf16_pipeline(images, model)                 # (N, HW, 16)
    logits_t = head_ref[..., :A].reshape(N, H * W * A)
    deltas_t = head_ref[..., A:5 * A].reshape(N, H * W * A, 4)
    assert jnp.allclose(logits, logits_t, atol=2e-3, rtol=2e-3), (
        float(jnp.max(jnp.abs(logits - logits_t))))
    assert jnp.allclose(deltas, deltas_t, atol=2e-3, rtol=2e-3), (
        float(jnp.max(jnp.abs(deltas - deltas_t))))

    # Loose sanity check vs the unfused full-f32 conv pipeline.
    x = jnp.transpose(images, (0, 2, 3, 1)).astype(jnp.float32)
    xn = (x - model.pixel_mean) / model.pixel_std
    feat_ref = _ref_conv3x3(xn, model.w_stem, model.b_stem, relu=True)
    hid_ref = _ref_conv3x3(feat_ref, model.w_rpn, model.b_rpn, relu=True)
    logits_ref = (jnp.einsum("nhwc,ca->nhwa", hid_ref, model.w_obj)
                  + model.b_obj).reshape(N, H * W * A)
    deltas_ref = (jnp.einsum("nhwc,cd->nhwd", hid_ref, model.w_del)
                  + model.b_del).reshape(N, H * W * A, 4)
    assert jnp.allclose(logits, logits_ref, atol=2e-2, rtol=2e-2), (
        float(jnp.max(jnp.abs(logits - logits_ref))))
    assert jnp.allclose(deltas, deltas_ref, atol=2e-2, rtol=2e-2), (
        float(jnp.max(jnp.abs(deltas - deltas_ref))))

    r0 = results[0]["proposals"]
    assert r0["proposal_boxes"].shape == (H * W * A, 4)
    assert r0["objectness_logits"].shape == (H * W * A,)

    print("KERNEL_OK")
</pallas_src>

<mosaic_0001>
module attributes {stable_mosaic.version = 11 : i64} {
  func.func @_fused_rpn_kernel(%arg0: i32, %arg1: memref<1x256x3xf32, #tpu.memory_space<vmem>>, %arg2: memref<32x32xbf16, #tpu.memory_space<vmem>>, %arg3: memref<1x32xf32, #tpu.memory_space<vmem>>, %arg4: memref<288x32xbf16, #tpu.memory_space<vmem>>, %arg5: memref<1x32xf32, #tpu.memory_space<vmem>>, %arg6: memref<16x32xbf16, #tpu.memory_space<vmem>>, %arg7: memref<16x1xf32, #tpu.memory_space<vmem>>, %arg8: memref<1x16x256xf32, #tpu.memory_space<vmem>>) attributes {dimension_semantics = [#tpu.dimension_semantics<parallel>], iteration_bounds = array<i64: 2>, scalar_prefetch = 0 : i64, scratch_operands = 0 : i64, tpu.core_type = #tpu.core_type<tc>, window_params = [{transform_indices = @transform_0, window_bounds = array<i64: 1, 256, 3>}, {pipeline_mode = #tpu.pipeline_mode<synchronous>, transform_indices = @transform_1, window_bounds = array<i64: 32, 32>}, {pipeline_mode = #tpu.pipeline_mode<synchronous>, transform_indices = @transform_2, window_bounds = array<i64: 1, 32>}, {pipeline_mode = #tpu.pipeline_mode<synchronous>, transform_indices = @transform_3, window_bounds = array<i64: 288, 32>}, {pipeline_mode = #tpu.pipeline_mode<synchronous>, transform_indices = @transform_4, window_bounds = array<i64: 1, 32>}, {pipeline_mode = #tpu.pipeline_mode<synchronous>, transform_indices = @transform_5, window_bounds = array<i64: 16, 32>}, {pipeline_mode = #tpu.pipeline_mode<synchronous>, transform_indices = @transform_6, window_bounds = array<i64: 16, 1>}, {transform_indices = @transform_7, window_bounds = array<i64: 1, 16, 256>}]} {
    %c0 = arith.constant 0 : index
    %c0_0 = arith.constant 0 : index
    %c0_1 = arith.constant 0 : index
    %0 = vector.load %arg1[%c0, %c0_0, %c0_1] : memref<1x256x3xf32, #tpu.memory_space<vmem>>, vector<1x256x3xf32>
    %1 = vector.shape_cast %0 : vector<1x256x3xf32> to vector<256x3xf32>
    %2 = tpu.iota {dimensions = array<i32: 0>} : vector<256x3xi32>
    %c4_i32 = arith.constant 4 : i32
    %3 = vector.broadcast %c4_i32 : i32 to vector<256x3xi32>
    %4 = arith.shrsi %2, %3 : vector<256x3xi32>
    %c15_i32 = arith.constant 15 : i32
    %5 = vector.broadcast %c15_i32 : i32 to vector<256x3xi32>
    %6 = arith.andi %2, %5 : vector<256x3xi32>
    %c17_i32 = arith.constant 17 : i32
    %7 = tpu.dynamic_rotate %1 by %c17_i32 dim 0 : vector<256x3xf32>, i32 -> vector<256x3xf32>
    %c1_i32 = arith.constant 1 : i32
    %8 = vector.broadcast %c1_i32 : i32 to vector<256x3xi32>
    %9 = arith.cmpi sge, %4, %8 : vector<256x3xi32>
    %c1_i32_2 = arith.constant 1 : i32
    %10 = vector.broadcast %c1_i32_2 : i32 to vector<256x3xi32>
    %11 = arith.cmpi sge, %6, %10 : vector<256x3xi32>
    %12 = arith.andi %9, %11 : vector<256x3xi1>
    %cst = arith.constant 0.000000e+00 : f32
    %13 = vector.broadcast %cst : f32 to vector<256x3xf32>
    %14 = arith.select %12, %7, %13 : vector<256x3xi1>, vector<256x3xf32>
    %c16_i32 = arith.constant 16 : i32
    %15 = tpu.dynamic_rotate %1 by %c16_i32 dim 0 : vector<256x3xf32>, i32 -> vector<256x3xf32>
    %c1_i32_3 = arith.constant 1 : i32
    %16 = vector.broadcast %c1_i32_3 : i32 to vector<256x3xi32>
    %17 = arith.cmpi sge, %4, %16 : vector<256x3xi32>
    %cst_4 = arith.constant 0.000000e+00 : f32
    %18 = vector.broadcast %cst_4 : f32 to vector<256x3xf32>
    %19 = arith.select %17, %15, %18 : vector<256x3xi1>, vector<256x3xf32>
    %c15_i32_5 = arith.constant 15 : i32
    %20 = tpu.dynamic_rotate %1 by %c15_i32_5 dim 0 : vector<256x3xf32>, i32 -> vector<256x3xf32>
    %c1_i32_6 = arith.constant 1 : i32
    %21 = vector.broadcast %c1_i32_6 : i32 to vector<256x3xi32>
    %22 = arith.cmpi sge, %4, %21 : vector<256x3xi32>
    %c15_i32_7 = arith.constant 15 : i32
    %23 = vector.broadcast %c15_i32_7 : i32 to vector<256x3xi32>
    %24 = arith.cmpi slt, %6, %23 : vector<256x3xi32>
    %25 = arith.andi %22, %24 : vector<256x3xi1>
    %cst_8 = arith.constant 0.000000e+00 : f32
    %26 = vector.broadcast %cst_8 : f32 to vector<256x3xf32>
    %27 = arith.select %25, %20, %26 : vector<256x3xi1>, vector<256x3xf32>
    %c1_i32_9 = arith.constant 1 : i32
    %28 = tpu.dynamic_rotate %1 by %c1_i32_9 dim 0 : vector<256x3xf32>, i32 -> vector<256x3xf32>
    %c1_i32_10 = arith.constant 1 : i32
    %29 = vector.broadcast %c1_i32_10 : i32 to vector<256x3xi32>
    %30 = arith.cmpi sge, %6, %29 : vector<256x3xi32>
    %cst_11 = arith.constant 0.000000e+00 : f32
    %31 = vector.broadcast %cst_11 : f32 to vector<256x3xf32>
    %32 = arith.select %30, %28, %31 : vector<256x3xi1>, vector<256x3xf32>
    %c255_i32 = arith.constant 255 : i32
    %33 = tpu.dynamic_rotate %1 by %c255_i32 dim 0 : vector<256x3xf32>, i32 -> vector<256x3xf32>
    %c15_i32_12 = arith.constant 15 : i32
    %34 = vector.broadcast %c15_i32_12 : i32 to vector<256x3xi32>
    %35 = arith.cmpi slt, %6, %34 : vector<256x3xi32>
    %cst_13 = arith.constant 0.000000e+00 : f32
    %36 = vector.broadcast %cst_13 : f32 to vector<256x3xf32>
    %37 = arith.select %35, %33, %36 : vector<256x3xi1>, vector<256x3xf32>
    %c241_i32 = arith.constant 241 : i32
    %38 = tpu.dynamic_rotate %1 by %c241_i32 dim 0 : vector<256x3xf32>, i32 -> vector<256x3xf32>
    %c15_i32_14 = arith.constant 15 : i32
    %39 = vector.broadcast %c15_i32_14 : i32 to vector<256x3xi32>
    %40 = arith.cmpi slt, %4, %39 : vector<256x3xi32>
    %c1_i32_15 = arith.constant 1 : i32
    %41 = vector.broadcast %c1_i32_15 : i32 to vector<256x3xi32>
    %42 = arith.cmpi sge, %6, %41 : vector<256x3xi32>
    %43 = arith.andi %40, %42 : vector<256x3xi1>
    %cst_16 = arith.constant 0.000000e+00 : f32
    %44 = vector.broadcast %cst_16 : f32 to vector<256x3xf32>
    %45 = arith.select %43, %38, %44 : vector<256x3xi1>, vector<256x3xf32>
    %c240_i32 = arith.constant 240 : i32
    %46 = tpu.dynamic_rotate %1 by %c240_i32 dim 0 : vector<256x3xf32>, i32 -> vector<256x3xf32>
    %c15_i32_17 = arith.constant 15 : i32
    %47 = vector.broadcast %c15_i32_17 : i32 to vector<256x3xi32>
    %48 = arith.cmpi slt, %4, %47 : vector<256x3xi32>
    %cst_18 = arith.constant 0.000000e+00 : f32
    %49 = vector.broadcast %cst_18 : f32 to vector<256x3xf32>
    %50 = arith.select %48, %46, %49 : vector<256x3xi1>, vector<256x3xf32>
    %c239_i32 = arith.constant 239 : i32
    %51 = tpu.dynamic_rotate %1 by %c239_i32 dim 0 : vector<256x3xf32>, i32 -> vector<256x3xf32>
    %c15_i32_19 = arith.constant 15 : i32
    %52 = vector.broadcast %c15_i32_19 : i32 to vector<256x3xi32>
    %53 = arith.cmpi slt, %4, %52 : vector<256x3xi32>
    %c15_i32_20 = arith.constant 15 : i32
    %54 = vector.broadcast %c15_i32_20 : i32 to vector<256x3xi32>
    %55 = arith.cmpi slt, %6, %54 : vector<256x3xi32>
    %56 = arith.andi %53, %55 : vector<256x3xi1>
    %cst_21 = arith.constant 0.000000e+00 : f32
    %57 = vector.broadcast %cst_21 : f32 to vector<256x3xf32>
    %58 = arith.select %56, %51, %57 : vector<256x3xi1>, vector<256x3xf32>
    %cst_22 = arith.constant 0.000000e+00 : f32
    %59 = vector.broadcast %cst_22 : f32 to vector<256x5xf32>
    %60 = tpu.concatenate %14, %19, %27, %32, %1, %37, %45, %50, %58, %59 in 1 : vector<256x3xf32>, vector<256x3xf32>, vector<256x3xf32>, vector<256x3xf32>, vector<256x3xf32>, vector<256x3xf32>, vector<256x3xf32>, vector<256x3xf32>, vector<256x3xf32>, vector<256x5xf32> -> vector<256x32xf32>
    %61 = arith.truncf %60 : vector<256x32xf32> to vector<256x32xbf16>
    %c0_23 = arith.constant 0 : index
    %c0_24 = arith.constant 0 : index
    %62 = vector.load %arg2[%c0_23, %c0_24] : memref<32x32xbf16, #tpu.memory_space<vmem>>, vector<32x32xbf16>
    %cst_25 = arith.constant dense<0.000000e+00> : vector<256x32xf32>
    %63 = tpu.matmul %61, %62, %cst_25 {dimension_numbers = #tpu.dot_dimension_numbers<[1], [0], [0], [1], [0, 0, 1, 1], [], []>} : vector<256x32xbf16>, vector<32x32xbf16>, vector<256x32xf32> -> vector<256x32xf32>
    %c0_26 = arith.constant 0 : index
    %c0_27 = arith.constant 0 : index
    %64 = vector.load %arg3[%c0_26, %c0_27] : memref<1x32xf32, #tpu.memory_space<vmem>>, vector<1x32xf32>
    %65 = vector.broadcast %64 : vector<1x32xf32> to vector<256x32xf32>
    %66 = arith.addf %63, %65 : vector<256x32xf32>
    %cst_28 = arith.constant 0.000000e+00 : f32
    %67 = vector.broadcast %cst_28 : f32 to vector<256x32xf32>
    %68 = arith.maximumf %66, %67 : vector<256x32xf32>
    %69 = tpu.iota {dimensions = array<i32: 0>} : vector<256x32xi32>
    %c4_i32_29 = arith.constant 4 : i32
    %70 = vector.broadcast %c4_i32_29 : i32 to vector<256x32xi32>
    %71 = arith.shrsi %69, %70 : vector<256x32xi32>
    %c15_i32_30 = arith.constant 15 : i32
    %72 = vector.broadcast %c15_i32_30 : i32 to vector<256x32xi32>
    %73 = arith.andi %69, %72 : vector<256x32xi32>
    %c17_i32_31 = arith.constant 17 : i32
    %74 = tpu.dynamic_rotate %68 by %c17_i32_31 dim 0 : vector<256x32xf32>, i32 -> vector<256x32xf32>
    %c1_i32_32 = arith.constant 1 : i32
    %75 = vector.broadcast %c1_i32_32 : i32 to vector<256x32xi32>
    %76 = arith.cmpi sge, %71, %75 : vector<256x32xi32>
    %c1_i32_33 = arith.constant 1 : i32
    %77 = vector.broadcast %c1_i32_33 : i32 to vector<256x32xi32>
    %78 = arith.cmpi sge, %73, %77 : vector<256x32xi32>
    %79 = arith.andi %76, %78 : vector<256x32xi1>
    %cst_34 = arith.constant 0.000000e+00 : f32
    %80 = vector.broadcast %cst_34 : f32 to vector<256x32xf32>
    %81 = arith.select %79, %74, %80 : vector<256x32xi1>, vector<256x32xf32>
    %c16_i32_35 = arith.constant 16 : i32
    %82 = tpu.dynamic_rotate %68 by %c16_i32_35 dim 0 : vector<256x32xf32>, i32 -> vector<256x32xf32>
    %c1_i32_36 = arith.constant 1 : i32
    %83 = vector.broadcast %c1_i32_36 : i32 to vector<256x32xi32>
    %84 = arith.cmpi sge, %71, %83 : vector<256x32xi32>
    %cst_37 = arith.constant 0.000000e+00 : f32
    %85 = vector.broadcast %cst_37 : f32 to vector<256x32xf32>
    %86 = arith.select %84, %82, %85 : vector<256x32xi1>, vector<256x32xf32>
    %c15_i32_38 = arith.constant 15 : i32
    %87 = tpu.dynamic_rotate %68 by %c15_i32_38 dim 0 : vector<256x32xf32>, i32 -> vector<256x32xf32>
    %c1_i32_39 = arith.constant 1 : i32
    %88 = vector.broadcast %c1_i32_39 : i32 to vector<256x32xi32>
    %89 = arith.cmpi sge, %71, %88 : vector<256x32xi32>
    %c15_i32_40 = arith.constant 15 : i32
    %90 = vector.broadcast %c15_i32_40 : i32 to vector<256x32xi32>
    %91 = arith.cmpi slt, %73, %90 : vector<256x32xi32>
    %92 = arith.andi %89, %91 : vector<256x32xi1>
    %cst_41 = arith.constant 0.000000e+00 : f32
    %93 = vector.broadcast %cst_41 : f32 to vector<256x32xf32>
    %94 = arith.select %92, %87, %93 : vector<256x32xi1>, vector<256x32xf32>
    %c1_i32_42 = arith.constant 1 : i32
    %95 = tpu.dynamic_rotate %68 by %c1_i32_42 dim 0 : vector<256x32xf32>, i32 -> vector<256x32xf32>
    %c1_i32_43 = arith.constant 1 : i32
    %96 = vector.broadcast %c1_i32_43 : i32 to vector<256x32xi32>
    %97 = arith.cmpi sge, %73, %96 : vector<256x32xi32>
    %cst_44 = arith.constant 0.000000e+00 : f32
    %98 = vector.broadcast %cst_44 : f32 to vector<256x32xf32>
    %99 = arith.select %97, %95, %98 : vector<256x32xi1>, vector<256x32xf32>
    %c255_i32_45 = arith.constant 255 : i32
    %100 = tpu.dynamic_rotate %68 by %c255_i32_45 dim 0 : vector<256x32xf32>, i32 -> vector<256x32xf32>
    %c15_i32_46 = arith.constant 15 : i32
    %101 = vector.broadcast %c15_i32_46 : i32 to vector<256x32xi32>
    %102 = arith.cmpi slt, %73, %101 : vector<256x32xi32>
    %cst_47 = arith.constant 0.000000e+00 : f32
    %103 = vector.broadcast %cst_47 : f32 to vector<256x32xf32>
    %104 = arith.select %102, %100, %103 : vector<256x32xi1>, vector<256x32xf32>
    %c241_i32_48 = arith.constant 241 : i32
    %105 = tpu.dynamic_rotate %68 by %c241_i32_48 dim 0 : vector<256x32xf32>, i32 -> vector<256x32xf32>
    %c15_i32_49 = arith.constant 15 : i32
    %106 = vector.broadcast %c15_i32_49 : i32 to vector<256x32xi32>
    %107 = arith.cmpi slt, %71, %106 : vector<256x32xi32>
    %c1_i32_50 = arith.constant 1 : i32
    %108 = vector.broadcast %c1_i32_50 : i32 to vector<256x32xi32>
    %109 = arith.cmpi sge, %73, %108 : vector<256x32xi32>
    %110 = arith.andi %107, %109 : vector<256x32xi1>
    %cst_51 = arith.constant 0.000000e+00 : f32
    %111 = vector.broadcast %cst_51 : f32 to vector<256x32xf32>
    %112 = arith.select %110, %105, %111 : vector<256x32xi1>, vector<256x32xf32>
    %c240_i32_52 = arith.constant 240 : i32
    %113 = tpu.dynamic_rotate %68 by %c240_i32_52 dim 0 : vector<256x32xf32>, i32 -> vector<256x32xf32>
    %c15_i32_53 = arith.constant 15 : i32
    %114 = vector.broadcast %c15_i32_53 : i32 to vector<256x32xi32>
    %115 = arith.cmpi slt, %71, %114 : vector<256x32xi32>
    %cst_54 = arith.constant 0.000000e+00 : f32
    %116 = vector.broadcast %cst_54 : f32 to vector<256x32xf32>
    %117 = arith.select %115, %113, %116 : vector<256x32xi1>, vector<256x32xf32>
    %c239_i32_55 = arith.constant 239 : i32
    %118 = tpu.dynamic_rotate %68 by %c239_i32_55 dim 0 : vector<256x32xf32>, i32 -> vector<256x32xf32>
    %c15_i32_56 = arith.constant 15 : i32
    %119 = vector.broadcast %c15_i32_56 : i32 to vector<256x32xi32>
    %120 = arith.cmpi slt, %71, %119 : vector<256x32xi32>
    %c15_i32_57 = arith.constant 15 : i32
    %121 = vector.broadcast %c15_i32_57 : i32 to vector<256x32xi32>
    %122 = arith.cmpi slt, %73, %121 : vector<256x32xi32>
    %123 = arith.andi %120, %122 : vector<256x32xi1>
    %cst_58 = arith.constant 0.000000e+00 : f32
    %124 = vector.broadcast %cst_58 : f32 to vector<256x32xf32>
    %125 = arith.select %123, %118, %124 : vector<256x32xi1>, vector<256x32xf32>
    %126 = tpu.concatenate %81, %86, %94, %99, %68, %104, %112, %117, %125 in 1 : vector<256x32xf32>, vector<256x32xf32>, vector<256x32xf32>, vector<256x32xf32>, vector<256x32xf32>, vector<256x32xf32>, vector<256x32xf32>, vector<256x32xf32>, vector<256x32xf32> -> vector<256x288xf32>
    %127 = arith.truncf %126 : vector<256x288xf32> to vector<256x288xbf16>
    %c0_59 = arith.constant 0 : index
    %c0_60 = arith.constant 0 : index
    %128 = vector.load %arg4[%c0_59, %c0_60] : memref<288x32xbf16, #tpu.memory_space<vmem>>, vector<288x32xbf16>
    %cst_61 = arith.constant dense<0.000000e+00> : vector<256x32xf32>
    %129 = tpu.matmul %127, %128, %cst_61 {dimension_numbers = #tpu.dot_dimension_numbers<[1], [0], [0], [1], [0, 0, 1, 1], [], []>} : vector<256x288xbf16>, vector<288x32xbf16>, vector<256x32xf32> -> vector<256x32xf32>
    %c0_62 = arith.constant 0 : index
    %c0_63 = arith.constant 0 : index
    %130 = vector.load %arg5[%c0_62, %c0_63] : memref<1x32xf32, #tpu.memory_space<vmem>>, vector<1x32xf32>
    %131 = vector.broadcast %130 : vector<1x32xf32> to vector<256x32xf32>
    %132 = arith.addf %129, %131 : vector<256x32xf32>
    %cst_64 = arith.constant 0.000000e+00 : f32
    %133 = vector.broadcast %cst_64 : f32 to vector<256x32xf32>
    %134 = arith.maximumf %132, %133 : vector<256x32xf32>
    %c0_65 = arith.constant 0 : index
    %c0_66 = arith.constant 0 : index
    %135 = vector.load %arg6[%c0_65, %c0_66] : memref<16x32xbf16, #tpu.memory_space<vmem>>, vector<16x32xbf16>
    %136 = arith.truncf %134 : vector<256x32xf32> to vector<256x32xbf16>
    %cst_67 = arith.constant dense<0.000000e+00> : vector<16x256xf32>
    %137 = tpu.matmul %135, %136, %cst_67 {dimension_numbers = #tpu.dot_dimension_numbers<[1], [1], [0], [0], [0, 0, 1, 0], [], []>} : vector<16x32xbf16>, vector<256x32xbf16>, vector<16x256xf32> -> vector<16x256xf32>
    %c0_68 = arith.constant 0 : index
    %c0_69 = arith.constant 0 : index
    %138 = vector.load %arg7[%c0_68, %c0_69] : memref<16x1xf32, #tpu.memory_space<vmem>>, vector<16x1xf32>
    %139 = vector.broadcast %138 : vector<16x1xf32> to vector<16x256xf32>
    %140 = arith.addf %137, %139 : vector<16x256xf32>
    %c0_70 = arith.constant 0 : index
    %c0_71 = arith.constant 0 : index
    %c0_72 = arith.constant 0 : index
    %141 = vector.load %arg8[%c0_70, %c0_71, %c0_72] : memref<1x16x256xf32, #tpu.memory_space<vmem>>, vector<1x16x256xf32>
    %142 = vector.shape_cast %141 : vector<1x16x256xf32> to vector<16x256xf32>
    %143 = vector.shape_cast %140 : vector<16x256xf32> to vector<1x16x256xf32>
    tpu.vector_store %arg8[%c0_70, %c0_71, %c0_72], %143 {strides = array<i32>} : memref<1x16x256xf32, #tpu.memory_space<vmem>>, vector<1x16x256xf32>,
    return
  }
  func.func @transform_0(%arg0: i32) -> (i32, i32, i32) {
    %c0_i32 = arith.constant 0 : i32
    %c0_i32_0 = arith.constant 0 : i32
    %c0_i32_1 = arith.constant 0 : i32
    return %arg0, %c0_i32, %c0_i32_0 : i32, i32, i32
  }
  func.func @transform_1(%arg0: i32) -> (i32, i32) {
    %c0_i32 = arith.constant 0 : i32
    %c0_i32_0 = arith.constant 0 : i32
    %c0_i32_1 = arith.constant 0 : i32
    return %c0_i32, %c0_i32_0 : i32, i32
  }
  func.func @transform_2(%arg0: i32) -> (i32, i32) {
    %c0_i32 = arith.constant 0 : i32
    %c0_i32_0 = arith.constant 0 : i32
    %c0_i32_1 = arith.constant 0 : i32
    return %c0_i32, %c0_i32_0 : i32, i32
  }
  func.func @transform_3(%arg0: i32) -> (i32, i32) {
    %c0_i32 = arith.constant 0 : i32
    %c0_i32_0 = arith.constant 0 : i32
    %c0_i32_1 = arith.constant 0 : i32
    return %c0_i32, %c0_i32_0 : i32, i32
  }
  func.func @transform_4(%arg0: i32) -> (i32, i32) {
    %c0_i32 = arith.constant 0 : i32
    %c0_i32_0 = arith.constant 0 : i32
    %c0_i32_1 = arith.constant 0 : i32
    return %c0_i32, %c0_i32_0 : i32, i32
  }
  func.func @transform_5(%arg0: i32) -> (i32, i32) {
    %c0_i32 = arith.constant 0 : i32
    %c0_i32_0 = arith.constant 0 : i32
    %c0_i32_1 = arith.constant 0 : i32
    return %c0_i32, %c0_i32_0 : i32, i32
  }
  func.func @transform_6(%arg0: i32) -> (i32, i32) {
    %c0_i32 = arith.constant 0 : i32
    %c0_i32_0 = arith.constant 0 : i32
    %c0_i32_1 = arith.constant 0 : i32
    return %c0_i32, %c0_i32_0 : i32, i32
  }
  func.func @transform_7(%arg0: i32) -> (i32, i32, i32) {
    %c0_i32 = arith.constant 0 : i32
    %c0_i32_0 = arith.constant 0 : i32
    %c0_i32_1 = arith.constant 0 : i32
    return %arg0, %c0_i32, %c0_i32_0 : i32, i32, i32
  }
}

</mosaic_0001>

<bundles_post_ra>
// kernel: tpu_custom_call.1
= control target key start
LH: loop header
LB: loop body
LE: loop exit
PB: predicated region body
PF: predicated region fallthrough
CT: control target
= control target key end

     0   :  { %12 = vsyncpa [#allocation3], 0  ;;  %s12028_s0 = inlined_call_operand.vmem [shape: f32[2,256,3], index: 0, kind: input, shape index: {}]   ;;  %s12029_s1 = inlined_call_operand.vmem [shape: bf16[32,32], index: 1, kind: input, shape index: {}]   ;;  %s12030_s2 = inlined_call_operand.vmem [shape: f32[1,32], index: 2, kind: input, shape index: {}]   ;;  %s12031_s3 = inlined_call_operand.vmem [shape: bf16[288,32], index: 3, kind: input, shape index: {}]   ;;  %s12032_s4 = inlined_call_operand.vmem [shape: f32[1,32], index: 4, kind: input, shape index: {}]   ;;  %s12033_s5 = inlined_call_operand.vmem [shape: bf16[16,32], index: 5, kind: input, shape index: {}]   ;;  %s12034_s6 = inlined_call_operand.vmem [shape: f32[16,1], index: 6, kind: input, shape index: {}]   ;;  %s12035_s7 = inlined_call_operand.hbm [shape: f32[2,16,256], index: 7, kind: output, shape index: {}]  }
   0x1   :  { %14 = vsyncpa [#allocation3 + $0x1], 0  ;;  %s6458_s24 = smov 0   ;;  %s6460_s25 = smov 0  }
   0x2   :  { %s6462_s26 = smov 0   ;;  %s6464_s27 = smov 0  }
   0x3 LB: > { %s6479_s28 = sadd.s32 4294967295, %s6401_s27   ;;  %s4807_s29 = sadd.s32 4294967294, %s6401_s27   ;;  %s6401_s27 = sphi %s6464_s27, %s14425_s27   ;;  %s6397_s26 = sphi %s6462_s26, %s14424_s26   ;;  %s6393_s25 = sphi %s6460_s25, %s14423_s25   ;;  %s6389_s24 = sphi %s6458_s24, %s14422_s24  }
   0x4   : > { %s6483_s30 = sadd.s32 1, %s6401_s27   ;;  %s179_s8 = sadd.s32 1, %s6397_s26 }
   0x5   : > { %s176_s9 = ssub.s32 %s6401_s27, %s6483_s30  ;;  %p189_p0 = scmp.ne.s32.totalorder %s6397_s26, %s6393_s25 }
   0x6   : > { %p177_p1 = scmp.eq.s32.totalorder %s176_s9, 0  ;;  %p190_p2 = scmp.eq.s32.totalorder %s6479_s28, 1 }
   0x7   : > { %p195_p3 = scmp.ne.s32.totalorder %s6393_s25, %s6389_s24  ;;  %p196_p4 = scmp.eq.s32.totalorder %s4807_s29, 1 }
   0x8   : > { %s6494_s10 = scalar_select %p177_p1, %s6397_s26, %s179_s8  }
   0x9   : > { %p6496_p5 = por %p190_p2, %p189_p0  ;;  %p6500_p6 = por %p196_p4, %p195_p3 }
   0xa   : > { %p4810_p7 = scmp.ge.s32.totalorder %s6401_s27, 1  ;;  %p240_p8 = scmp.lt.s32.totalorder %s6401_s27, 3 }
   0xc   : > { %p241_p9 = pnand %p4810_p7, %p240_p8 }
   0xe   : > { %244 = sbr.rel (%p241_p9) target bundleno = 1372 (0x55c), region = 48 }
  0x13   : > { %p272_p10 = scmp.lt.s32.totalorder %s6479_s28, 1  ;;  %v310_v0 = vlaneseq  ;;  %v12711_v7 = vmov 0  ;;  %v12715_v11 = vmov 0  ;;  %v12718_v20 = vmov 0  ;;  %s6403_s18 = smov 3  }
  0x14   : > { %v12722_v24 = vmov 0  ;;  %s6404_s19 = smov 6   ;;  %v12726_v37 = vmov 0  ;;  %v12729_v41 = vmov 0  ;;  %v12734_v46 = vmov 0  ;;  %s6405_s20 = smov 9  }
  0x15   : > { %s273_s13 = scalar_select %p272_p10, %s6479_s28, 1  ;;  %v6508_v1 = vshrl.u32 %v310_v0, 7  ;;  %v12737_v50 = vmov 0  ;;  %v12742_v61 = vmov 0 }
  0x16   : > { %s6406_s21 = smov 12   ;;  %s6407_s22 = smov 15  }
  0x17   : > { %s4875_s14 = sshll.u32 %s273_s13, 8  ;;  %v6511_v2 = vadd.s32 8, %v6508_v1  ;;  %v343_v3 = vshra.s32 %v6508_v1, 4  ;;  %v6536_v9 = vadd.s32 248, %v6508_v1  ;;  %vm12041_vm1 = vcmp.lt.s32.totalorder %v6508_v1, 7  ;;  %s6408_s8 = smov 18  }
  0x18   : > { %s6517_s17 = scalar_lea.vmem %s12028_s0, %s4875_s14  ;;  %v6551_v14 = vadd.s32 16, %v6508_v1  ;;  %v6564_v21 = vadd.s32 24, %v6508_v1  ;;  %v375_v38 = vand.u32 15, %v6508_v1  ;;  %vm12040_vm10 = vcmp.lt.s32.totalorder %v6508_v1, 1  ;;  %s6409_s14 = smov 21  }
  0x19   : > { %v6520_v4 = vld [vmem:[%s6517_s17 + $0xf0] sm:$0xff]  ;;  %v6523_v5 = vld [vmem:[%s6517_s17 + $0xf8] sm:$0xff]  ;;  %v344_v6 = vshra.s32 %v6511_v2, 4  ;;  %vm6528_vm0 = vcmp.ge.s32.totalorder %v343_v3, 1  ;;  %v6533_v8 = vld [vmem:[%s6517_s17] sm:$0xff]  ;;  %12714 = vst [vmem:[#allocation7_spill] sm:$0xff] %v6536_v9 }
  0x1a   : > { %12710 = vst [vmem:[#allocation5_spill] sm:$0xff] %v6520_v4  ;;  %v12712_v7 = vsel %vm6528_vm0, 4294967295, %v12711_v7  ;;  %v600_v10 = vsel %vm6528_vm0, %v6520_v4, 0.0  ;;  %v376_v12 = vand.u32 15, %v6511_v2  ;;  %v406_v13 = vand.u32 15, %v6536_v9  ;;  %v6585_v25 = vld [vmem:[%s6517_s17 + $0x8] sm:$0xff] }
  0x1b   : > { %12713 = vst [vmem:[#allocation6_spill] sm:$0xff] %v12712_v7  ;;  %vm6544_vm2 = vcmp.ge.s32.totalorder %v344_v6, 1  ;;  %v632_v16 = vrot.slane %v6533_v8, 1  ;;  %v12049_v17 = vrot.slane %v6520_v4, 1  ;;  %v663_v18 = vrot.slane %v6523_v5, 1  ;;  %v6588_v26 = vld [vmem:[%s6517_s17 + $0x10] sm:$0xff] }
  0x1c   : > { %v12716_v11 = vsel %vm6544_vm2, 4294967295, %v12715_v11  ;;  %v601_v15 = vsel %vm6544_vm2, %v6523_v5, 0.0  ;;  %vm6559_vm3 = vcmp.lt.s32.totalorder %v376_v12, 15  ;;  %vm6576_vm4 = vcmp.lt.s32.totalorder %v406_v13, 15  ;;  %v6659_v51 = vld [vmem:[%s6517_s17 + $0x18] sm:$0xff]  ;;  %v6690_v62 = vld [vmem:[%s6517_s17 + $0x20] sm:$0xff] }
  0x1d   : > { %12717 = vst [vmem:[#allocation8_spill] sm:$0xff] %v12716_v11  ;;  %v5192_v19 = vpack.i.bf16 %v601_v15, %v600_v10  ;;  %v12719_v20 = vsel %vm6559_vm3, 4294967295, %v12718_v20  ;;  %v6570_v22 = vsel %vm12041_vm1, %v12049_v17, %v663_v18  ;;  %v6574_v23 = vsel %vm12041_vm1, %v663_v18, %v632_v16  ;;  %vm12036_vm5 = vmand %vm6544_vm2, %vm6559_vm3  ;;  %v6705_v13 = vld [vmem:[%s6517_s17 + $0x28] sm:$0xff]  ;;  %s6410_s15 = smov 24  }
  0x1e   : > { %12720 = vst [vmem:[#allocation9_spill] sm:$0xff] %v12719_v20  ;;  %12721 = vst [vmem:[#allocation10_spill] sm:$0xff] %v6570_v22  ;;  %v12723_v24 = vsel %vm6576_vm4, 4294967295, %v12722_v24  ;;  %v761_v27 = vsel %vm6528_vm0, %v6570_v22, 0.0  ;;  %v856_v28 = vsel %vm6576_vm4, %v6574_v23, 0.0  ;;  %v762_v29 = vsel %vm12036_vm5, %v6574_v23, 0.0 }
  0x1f   : > { %12724 = vst [vmem:[#allocation11_spill] sm:$0xff] %v12723_v24  ;;  %5193 = vrot.lane.b32.xlu0 %v5192_v19, %s6403_s18  ;;  %v6604_v30 = vpack.i.bf16 %v856_v28, %v6570_v22  ;;  %v5202_v31 = vpack.i.bf16 %v762_v29, %v761_v27  ;;  %v345_v32 = vshra.s32 %v6551_v14, 4  ;;  %v346_v33 = vshra.s32 %v6564_v21, 4 }
  0x20   : > { %v378_v34 = vand.u32 15, %v6564_v21  ;;  %v633_v35 = vrot.slane %v6585_v25, 1  ;;  %v634_v36 = vrot.slane %v6588_v26, 1  ;;  %v407_v39 = vrot.slane %v6533_v8, 7  ;;  %v6795_v21 = vld [vmem:[%s6517_s17 + $0x30] sm:$0xff] }
  0x21   : > { %12725 = vst [vmem:[#allocation12_spill] sm:$0xff] %v6604_v30  ;;  %5203 = vrot.lane.b32.xlu1 %v5202_v31, %s6404_s19  ;;  %vm6614_vm6 = vcmp.ge.s32.totalorder %v345_v32, 1  ;;  %v408_v40 = vrot.slane %v6585_v25, 7  ;;  %vm6623_vm7 = vcmp.ge.s32.totalorder %v346_v33, 1  ;;  %v12050_v48 = vrot.slane %v6523_v5, 7 }
  0x22   : > { %v12727_v37 = vsel %vm6614_vm6, 4294967295, %v12726_v37  ;;  %v12730_v41 = vsel %vm6623_vm7, 4294967295, %v12729_v41  ;;  %v602_v42 = vsel %vm6614_vm6, %v6533_v8, 0.0  ;;  %v6632_v43 = vsel %vm12041_vm1, %v633_v35, %v634_v36 }
  0x23   : > { %12728 = vst [vmem:[#allocation13_spill] sm:$0xff] %v12727_v37  ;;  %12731 = vst [vmem:[#allocation14_spill] sm:$0xff] %v12730_v41  ;;  %v6636_v44 = vsel %vm12041_vm1, %v632_v16, %v633_v35  ;;  %v603_v45 = vsel %vm6623_vm7, %v6585_v25, 0.0  ;;  %vm6641_vm8 = vcmp.lt.s32.totalorder %v378_v34, 15  ;;  %vm6654_vm11 = vcmp.ge.s32.totalorder %v375_v38, 1 }
  0x24   : > { %12732 = vst [vmem:[#allocation15_spill] sm:$0xff] %v6632_v43  ;;  %12733 = vst [vmem:[#allocation16_spill] sm:$0xff] %v6636_v44  ;;  %v12735_v46 = vsel %vm6641_vm8, 4294967295, %v12734_v46  ;;  %v763_v47 = vsel %vm6614_vm6, %v6636_v44, 0.0  ;;  %v5197_v49 = vpack.i.bf16 %v603_v45, %v602_v42  ;;  %v12738_v50 = vsel %vm6654_vm11, 4294967295, %v12737_v50 }
  0x25   : > { %12736 = vst [vmem:[#allocation17_spill] sm:$0xff] %v12735_v46  ;;  %vm12037_vm9 = vmand %vm6623_vm7, %vm6641_vm8  ;;  %v6669_v53 = vsel %vm12040_vm10, %v407_v39, %v408_v40  ;;  %v6675_v54 = vsel %vm12040_vm10, %v12050_v48, %v407_v39  ;;  %v377_v55 = vand.u32 15, %v6551_v14  ;;  %v409_v59 = vrot.slane %v6588_v26, 7 }
  0x26   : > { %12739 = vst [vmem:[#allocation18_spill] sm:$0xff] %v12738_v50  ;;  %v764_v52 = vsel %vm12037_vm9, %v6632_v43, 0.0  ;;  %12740 = vst [vmem:[#allocation19_spill] sm:$0xff] %v6669_v53  ;;  %5198 = vrot.lane.b32.xlu0 %v5197_v49, %s6403_s18  ;;  %v793_v57 = vsel %vm6654_vm11, %v6675_v54, 0.0  ;;  %v410_v60 = vrot.slane %v6659_v51, 7  ;;  %v5217_v10 = vpack.i.bf16 %v6585_v25, %v6533_v8 }
  0x27   : > { %12741 = vst [vmem:[#allocation20_spill] sm:$0xff] %v6675_v54  ;;  %v5207_v56 = vpack.i.bf16 %v764_v52, %v763_v47  ;;  %v5212_v58 = vpack.i.bf16 %v6669_v53, %v793_v57  ;;  %vm6685_vm12 = vcmp.ge.s32.totalorder %v377_v55, 1  ;;  %v6699_v0 = vsel %vm12040_vm10, %v408_v40, %v409_v59 }
  0x28   : > { %v12743_v61 = vsel %vm6685_vm12, 4294967295, %v12742_v61  ;;  %v6695_v63 = vsel %vm12040_vm10, %v409_v59, %v410_v60  ;;  %v635_v12 = vrot.slane %v6659_v51, 1  ;;  %v795_v15 = vsel %vm6685_vm12, %v6699_v0, 0.0  ;;  %v6314_v59 = vld [vmem:[%s12029_s1 + $0x8] sm:$0xff]  }
  0x29   : > { %12744 = vst [vmem:[#allocation21_spill] sm:$0xff] %v12743_v61  ;;  %5208 = vrot.lane.b32.xlu1 %v5207_v56, %s6404_s19  ;;  %12745 = vst [vmem:[#allocation22_spill] sm:$0xff] %v6695_v63  ;;  %v826_v16 = vsel %vm6559_vm3, %v6632_v43, 0.0  ;;  %v636_v18 = vrot.slane %v6690_v62, 1  ;;  %vm6717_vm13 = vcmp.lt.s32.totalorder %v343_v3, 15  ;;  %v12746_v8 = vmov 0  ;;  %5043 = vmatprep.subr.bf16.mxu0 %v6314_v59 }
  0x2a   : > { %5213 = vrot.lane.b32.xlu0 %v5212_v58, %s6405_s20  ;;  %v12747_v8 = vsel %vm6717_vm13, 4294967295, %v12746_v8  ;;  %v5222_v19 = vpack.i.bf16 %v6695_v63, %v795_v15  ;;  %vm6724_vm14 = vcmp.lt.s32.totalorder %v344_v6, 15  ;;  %v12749_v25 = vmov 0  ;;  %vm12038_vm15 = vmand %vm6717_vm13, %vm6654_vm11  ;;  %5044 = vmatpush3.bf16.msra.mxu0 %v6314_v59 }
  0x2b   : > { %12748 = vst [vmem:[#allocation23_spill] sm:$0xff] %v12747_v8  ;;  %v12750_v25 = vsel %vm6724_vm14, 4294967295, %v12749_v25  ;;  %v6733_v27 = vadd.s32 40, %v6508_v1  ;;  %v6737_v3 = vsel %vm12041_vm1, %v635_v12, %v636_v18  ;;  %v411_v28 = vrot.slane %v6690_v62, 7 }
  0x2c   : > { %12751 = vst [vmem:[#allocation24_spill] sm:$0xff] %v12750_v25  ;;  %v5227_v2 = vpack.i.bf16 %v6659_v51, %v6588_v26  ;;  %v5232_v6 = vpack.i.bf16 %v826_v16, %v6636_v44  ;;  %v6746_v29 = vsel %vm12041_vm1, %v634_v36, %v635_v12  ;;  %v412_v31 = vrot.slane %v6705_v13, 7 }
  0x2d   : > { %5223 = vrot.lane.b32.xlu1 %v5222_v19, %s6405_s20  ;;  %v828_v34 = vsel %vm6641_vm8, %v6737_v3, 0.0  ;;  %v921_v35 = vsel %vm12038_vm15, %v6699_v0, 0.0  ;;  %v922_v36 = vsel %vm6724_vm14, %v6695_v63, 0.0  ;;  %vm6764_vm5 = vcmp.lt.s32.totalorder %v345_v32, 15 }
  0x2e   : > { %5218 = vrot.lane.b32.xlu0 %v5217_v10, %s6406_s21  ;;  %v12752_v38 = vmov 0  ;;  %v6772_v39 = vsel %vm12040_vm10, %v411_v28, %v412_v31  ;;  %v6776_v40 = vsel %vm12040_vm10, %v410_v60, %v411_v28  ;;  %vm6780_vm9 = vcmp.lt.s32.totalorder %v346_v33, 15  ;;  %vm12039_vm15 = vmand %vm6764_vm5, %vm6685_vm12 }
  0x2f   : > { %v12753_v38 = vsel %vm6764_vm5, 4294967295, %v12752_v38  ;;  %12755 = vst [vmem:[#allocation26_spill] sm:$0xff] %v6772_v39  ;;  %v12756_v42 = vmov 0  ;;  %v348_v14 = vshra.s32 %v6733_v27, 4  ;;  %v5237_v32 = vpack.i.bf16 %v828_v34, %v6746_v29  ;;  %vm12044_vm10 = vmand %vm6724_vm14, %vm6559_vm3 }
  0x30   : > { %12754 = vst [vmem:[#allocation25_spill] sm:$0xff] %v12753_v38  ;;  %v12757_v42 = vsel %vm6780_vm9, 4294967295, %v12756_v42  ;;  %v5242_v45 = vpack.i.bf16 %v922_v36, %v921_v35  ;;  %v6792_v47 = vadd.s32 56, %v6508_v1  ;;  %v923_v33 = vsel %vm12039_vm15, %v6776_v40, 0.0 }
  0x31   : > { %12758 = vst [vmem:[#allocation27_spill] sm:$0xff] %v12757_v42  ;;  %5228 = vrot.lane.b32.xlu1 %v5227_v2, %s6406_s21  ;;  %v924_v49 = vsel %vm6780_vm9, %v6772_v39, 0.0  ;;  %v953_v52 = vsel %vm6717_vm13, %v6588_v26, 0.0  ;;  %v6811_v55 = vadd.s32 32, %v6508_v1  ;;  %v954_v56 = vsel %vm6724_vm14, %v6659_v51, 0.0 }
  0x32   : > { %5233 = vrot.lane.b32.xlu0 %v5232_v6, %s6407_s22  ;;  %v637_v57 = vrot.slane %v6705_v13, 1  ;;  %v6818_v58 = vadd.s32 48, %v6508_v1  ;;  %vm6825_vm15 = vcmp.ge.s32.totalorder %v348_v14, 1  ;;  %v12759_v60 = vmov 0 }
  0x33   : > { %v12760_v60 = vsel %vm6825_vm15, 4294967295, %v12759_v60  ;;  %v347_v10 = vshra.s32 %v6811_v55, 4  ;;  %v12063_v12 = vrot.slane %v6795_v21, 1  ;;  %v12062_v15 = vshra.s32 %v6792_v47, 4 }
  0x34   : > { %12761 = vst [vmem:[#allocation28_spill] sm:$0xff] %v12760_v60  ;;  %v5247_v16 = vpack.i.bf16 %v924_v49, %v923_v33  ;;  %v380_v19 = vand.u32 15, %v6733_v27  ;;  %v5252_v28 = vpack.i.bf16 %v954_v56, %v953_v52  ;;  %v955_v2 = vsel %vm6764_vm5, %v6690_v62, 0.0  ;;  %v6315_v33 = vld [vmem:[%s12029_s1] sm:$0xff]  }
  0x35   : > { %5238 = vrot.lane.b32.xlu1 %v5237_v32, %s6407_s22  ;;  %v956_v6 = vsel %vm6780_vm9, %v6705_v13, 0.0  ;;  %v1017_v34 = vsel %vm6717_vm13, %v6746_v29, 0.0  ;;  %v1018_v35 = vsel %vm12044_vm10, %v6737_v3, 0.0  ;;  %vm6856_vm1 = vcmp.ge.s32.totalorder %v347_v10, 1  ;;  %vm12055_vm13 = vmand %vm6780_vm9, %vm6641_vm8  ;;  %5045 = vmatprep.subr.bf16.mxu0 %v6315_v33 }
  0x36   : > { %5243 = vrot.lane.b32.xlu0 %v5242_v45, %s6408_s8  ;;  %v12762_v36 = vmov 0  ;;  %vm12765_vm4 = vcmp.lt.s32.totalorder %v6508_v1, 7  ;;  %v349_v45 = vshra.s32 %v6818_v58, 4  ;;  %v12767_v52 = vmov 0  ;;  %5046 = vmatpush3.bf16.msra.mxu0 %v6315_v33 }
  0x37   : > { %v12763_v36 = vsel %vm6856_vm1, 4294967295, %v12762_v36  ;;  %v6862_v32 = vsel %vm12765_vm4, %v636_v18, %v637_v57  ;;  %vm12766_vm10 = vmmov %vm12765_vm4  ;;  %v382_v18 = vand.u32 15, %v6792_v47  ;;  %vm6881_vm4 = vcmp.ge.s32.totalorder %v12062_v15, 1 }
  0x38   : > { %12764 = vst [vmem:[#allocation29_spill] sm:$0xff] %v12763_v36  ;;  %v6872_v49 = vsel %vm12766_vm10, %v637_v57, %v12063_v12  ;;  %v12768_v52 = vsel %vm6881_vm4, 4294967295, %v12767_v52  ;;  %v5257_v56 = vpack.i.bf16 %v956_v6, %v955_v2  ;;  %vm6886_vm3 = vcmp.lt.s32.totalorder %v380_v19, 15 }
  0x39   : > { %12769 = vst [vmem:[#allocation30_spill] sm:$0xff] %v12768_v52  ;;  %5248 = vrot.lane.b32.xlu1 %v5247_v16, %s6408_s8  ;;  %v12770_v59 = vmov 0  ;;  %v5262_v57 = vpack.i.bf16 %v1018_v35, %v1017_v34  ;;  %v604_v17 = vsel %vm6856_vm1, %v6588_v26, 0.0  ;;  %v605_v48 = vsel %vm6825_vm15, %v6659_v51, 0.0 }
  0x3a   : > { %v12771_v59 = vsel %vm6886_vm3, 4294967295, %v12770_v59  ;;  %5253 = vrot.lane.b32.xlu0 %v5252_v28, %s6409_s14  ;;  %v1019_v16 = vsel %vm6764_vm5, %v6862_v32, 0.0  ;;  %v1020_v19 = vsel %vm12055_vm13, %v6872_v49, 0.0  ;;  %vm6908_vm10 = vcmp.ge.s32.totalorder %v349_v45, 1  ;;  %vm12058_vm5 = vmand %vm6825_vm15, %vm6886_vm3 }
  0x3b   : > { %12772 = vst [vmem:[#allocation31_spill] sm:$0xff] %v12771_v59  ;;  %v12773_v26 = vmov 0  ;;  %vm6916_vm14 = vcmp.lt.s32.totalorder %v382_v18, 15  ;;  %v12776_v51 = vmov 0  ;;  %v379_v28 = vand.u32 15, %v6811_v55 }
  0x3c   : > { %v12774_v26 = vsel %vm6908_vm10, 4294967295, %v12773_v26  ;;  %v12777_v51 = vsel %vm6916_vm14, 4294967295, %v12776_v51  ;;  %v5267_v2 = vpack.i.bf16 %v605_v48, %v604_v17  ;;  %v5272_v6 = vpack.i.bf16 %v1020_v19, %v1019_v16  ;;  %vm12061_vm13 = vmand %vm6881_vm4, %vm6916_vm14  ;;  %v6943_v48 = vld [vmem:[%s6517_s17 + $0x38] sm:$0xff] }
  0x3d   : > { %12775 = vst [vmem:[#allocation32_spill] sm:$0xff] %v12774_v26  ;;  %12778 = vst [vmem:[#allocation33_spill] sm:$0xff] %v12777_v51  ;;  %5258 = vrot.lane.b32.xlu1 %v5257_v56, %s6409_s14  ;;  %v606_v34 = vsel %vm6908_vm10, %v6690_v62, 0.0  ;;  %v607_v35 = vsel %vm6881_vm4, %v6705_v13, 0.0  ;;  %v765_v33 = vsel %vm6856_vm1, %v6746_v29, 0.0  ;;  %v766_v17 = vsel %vm12058_vm5, %v6737_v3, 0.0 }
  0x3e   : > { %5263 = vrot.lane.b32.xlu0 %v5262_v57, %s6410_s15  ;;  %v381_v18 = vand.u32 15, %v6818_v58  ;;  %v413_v56 = vrot.slane %v6795_v21, 7  ;;  %vm6947_vm9 = vcmp.ge.s32.totalorder %v379_v28, 1  ;;  %v12779_v29 = vmov 0 }
  0x3f   : > { %v12780_v29 = vsel %vm6947_vm9, 4294967295, %v12779_v29  ;;  %v5277_v57 = vpack.i.bf16 %v607_v35, %v606_v34  ;;  %v5282_v3 = vpack.i.bf16 %v766_v17, %v765_v33  ;;  %v767_v16 = vsel %vm6908_vm10, %v6862_v32, 0.0  ;;  %v6977_v35 = vld [vmem:[%s6517_s17 + $0x40] sm:$0xff] }
  0x40   : > { %12781 = vst [vmem:[#allocation34_spill] sm:$0xff] %v12780_v29  ;;  %v768_v19 = vsel %vm12061_vm13, %v6872_v49, 0.0  ;;  %v414_v28 = vrot.slane %v6943_v48, 7  ;;  %vm12782_vm5 = vcmp.lt.s32.totalorder %v6508_v1, 1  ;;  %vm6972_vm8 = vcmp.ge.s32.totalorder %v381_v18, 1 }
  0x41   : > { %5268 = vrot.lane.b32.xlu1 %v5267_v2, %s6403_s18  ;;  %v797_v2 = vsel %vm6947_vm9, %v6776_v40, 0.0  ;;  %v12784_v34 = vmov 0  ;;  %v5287_v33 = vpack.i.bf16 %v768_v19, %v767_v16  ;;  %vm12787_vm13 = vmmov %vm12782_vm5  ;;  %v639_v18 = vrot.slane %v6943_v48, 1 }
  0x42   : > { %5273 = vrot.lane.b32.xlu0 %v5272_v6, %s6410_s15  ;;  %v6970_v6 = vsel %vm12782_vm5, %v412_v31, %v413_v56  ;;  %v12785_v34 = vsel %vm6972_vm8, 4294967295, %v12784_v34  ;;  %v5292_v17 = vpack.i.bf16 %v6772_v39, %v797_v2  ;;  %v6984_v15 = vsel %vm12787_vm13, %v413_v56, %v414_v28 }
  0x43   : > { %12783 = vst [vmem:[#allocation35_spill] sm:$0xff] %v6970_v6  ;;  %12786 = vst [vmem:[#allocation36_spill] sm:$0xff] %v12785_v34  ;;  %v799_v31 = vsel %vm6972_vm8, %v6970_v6, 0.0  ;;  %v640_v12 = vrot.slane %v6977_v35, 1  ;;  %vm6993_vm5 = vcmp.lt.s32.totalorder %v347_v10, 15  ;;  %v5302_v16 = vpack.i.bf16 %v6705_v13, %v6690_v62 }
  0x44   : > { %12788 = vst [vmem:[#allocation37_spill] sm:$0xff] %v6984_v15  ;;  %v5297_v56 = vpack.i.bf16 %v6984_v15, %v799_v31  ;;  %v830_v19 = vsel %vm6886_vm3, %v6872_v49, 0.0  ;;  %vm12792_vm13 = vcmp.lt.s32.totalorder %v6508_v1, 7  ;;  %v415_v10 = vrot.slane %v6977_v35, 7  ;;  %vm12801_vm6 = vmand %vm6993_vm5, %vm6947_vm9 }
  0x45   : > { %5278 = vrot.lane.b32.xlu1 %v5277_v57, %s6403_s18  ;;  %v12789_v57 = vmov 0  ;;  %v7010_v55 = vsel %vm12792_vm13, %v639_v18, %v640_v12  ;;  %vm7020_vm1 = vcmp.lt.s32.totalorder %v348_v14, 15  ;;  %v12793_v62 = vmov 0 }
  0x46   : > { %5283 = vrot.lane.b32.xlu0 %v5282_v3, %s6404_s19  ;;  %v12790_v57 = vsel %vm6993_vm5, 4294967295, %v12789_v57  ;;  %v6998_v3 = vld [vmem:[%s6517_s17 + $0x48] sm:$0xff]  ;;  %v12794_v62 = vsel %vm7020_vm1, 4294967295, %v12793_v62  ;;  %vm7026_vm13 = vcmp.lt.s32.totalorder %v349_v45, 15  ;;  %v12796_v13 = vmov 0 }
  0x47   : > { %12791 = vst [vmem:[#allocation38_spill] sm:$0xff] %v12790_v57  ;;  %v12074_v2 = vrot.slane %v6998_v3, 7  ;;  %12795 = vst [vmem:[#allocation39_spill] sm:$0xff] %v12794_v62  ;;  %v12797_v13 = vsel %vm7026_vm13, 4294967295, %v12796_v13  ;;  %v5307_v49 = vpack.i.bf16 %v6943_v48, %v6795_v21  ;;  %v5312_v27 = vpack.i.bf16 %v830_v19, %v6862_v32  ;;  %v7077_v19 = vld [vmem:[%s6517_s17 + $0x50] sm:$0xff] }
  0x48   : > { %12798 = vst [vmem:[#allocation40_spill] sm:$0xff] %v12797_v13  ;;  %v12799_v14 = vrot.slane %v6795_v21, 1  ;;  %vm12800_vm10 = vcmp.lt.s32.totalorder %v6508_v1, 7  ;;  %v832_v58 = vsel %vm6916_vm14, %v7010_v55, 0.0  ;;  %v925_v45 = vsel %vm12801_vm6, %v6970_v6, 0.0  ;;  %vm12087_vm6 = vmand %vm7026_vm13, %vm6972_vm8 }
  0x49   : > { %5288 = vrot.lane.b32.xlu1 %v5287_v33, %s6404_s19  ;;  %v926_v32 = vsel %vm7020_vm1, %v6984_v15, 0.0  ;;  %v959_v38 = vsel %vm7026_vm13, %v6977_v35, 0.0  ;;  %v12814_v8 = vmov 0  ;;  %v12818_v59 = vmov 0 }
  0x4a   : > { %5293 = vrot.lane.b32.xlu0 %v5292_v17, %s6405_s20  ;;  %v7039_v33 = vsel %vm12800_vm10, %v12799_v14, %v639_v18  ;;  %vm12802_vm10 = vcmp.lt.s32.totalorder %v6508_v1, 1  ;;  %v12806_v18 = vshra.s32 %v6792_v47, 4  ;;  %v7080_v14 = vadd.s32 64, %v6508_v1 }
  0x4b   : > { %v7057_v17 = vsel %vm12802_vm10, %v415_v10, %v12074_v2  ;;  %vm12804_vm12 = vmmov %vm12802_vm10  ;;  %v5317_v47 = vpack.i.bf16 %v832_v58, %v7039_v33  ;;  %v641_v58 = vrot.slane %v6998_v3, 1  ;;  %v1021_v42 = vsel %vm6993_vm5, %v7039_v33, 0.0 }
  0x4c   : > { %12803 = vst [vmem:[#allocation41_spill] sm:$0xff] %v7057_v17  ;;  %v7061_v31 = vsel %vm12804_vm12, %v414_v28, %v415_v10  ;;  %vm7065_vm2 = vcmp.lt.s32.totalorder %v12806_v18, 15  ;;  %v7085_v28 = vadd.s32 88, %v6508_v1  ;;  %v5322_v10 = vpack.i.bf16 %v926_v32, %v925_v45  ;;  %vm12090_vm12 = vmand %vm7020_vm1, %vm6886_vm3 }
  0x4d   : > { %5298 = vrot.lane.b32.xlu1 %v5297_v56, %s6405_s20  ;;  %12805 = vst [vmem:[#allocation42_spill] sm:$0xff] %v7061_v31  ;;  %v12807_v56 = vmov 0  ;;  %v927_v18 = vsel %vm12087_vm6, %v7061_v31, 0.0  ;;  %v928_v2 = vsel %vm7065_vm2, %v7057_v17, 0.0  ;;  %v7106_v32 = vadd.s32 80, %v6508_v1  ;;  %vm12828_vm3 = vmand %vm7065_vm2, %vm6916_vm14 }
  0x4e   : > { %5303 = vrot.lane.b32.xlu0 %v5302_v16, %s6406_s21  ;;  %v12808_v56 = vsel %vm7065_vm2, 4294967295, %v12807_v56  ;;  %v7074_v16 = vadd.s32 72, %v6508_v1  ;;  %v5327_v20 = vpack.i.bf16 %v928_v2, %v927_v18  ;;  %v960_v25 = vsel %vm7065_vm2, %v6998_v3, 0.0 }
  0x4f   : > { %12809 = vst [vmem:[#allocation43_spill] sm:$0xff] %v12808_v56  ;;  %v1022_v2 = vsel %vm12090_vm12, %v7010_v55, 0.0  ;;  %vm12811_vm10 = vcmp.lt.s32.totalorder %v6508_v1, 7  ;;  %v12825_v62 = vmov 0  ;;  %v12847_v30 = vmov 0 }
  0x50   : > { %v384_v46 = vand.u32 15, %v7074_v16  ;;  %vm12812_vm6 = vmmov %vm12811_vm10  ;;  %v12850_v24 = vmov 0  ;;  %vm12853_vm8 = vcmp.lt.s32.totalorder %v6508_v1, 1  ;;  %v7330_v44 = vadd.s32 120, %v6508_v1 }
  0x51   : > { %5308 = vrot.lane.b32.xlu1 %v5307_v49, %s6406_s21  ;;  %v957_v49 = vsel %vm6993_vm5, %v6795_v21, 0.0  ;;  %v7141_v18 = vsel %vm12812_vm6, %v640_v12, %v641_v58  ;;  %v12821_v12 = vmov 0  ;;  %v12874_v9 = vrot.slane %v7077_v19, 1 }
  0x52   : > { %5313 = vrot.lane.b32.xlu0 %v5312_v27, %s6407_s22  ;;  %v958_v27 = vsel %vm7020_vm1, %v6943_v48, 0.0  ;;  %vm7160_vm6 = vcmp.lt.s32.totalorder %v384_v46, 15  ;;  %v1023_v46 = vsel %vm7026_vm13, %v7141_v18, 0.0  ;;  %v12960_v7 = vmov 0 }
  0x53   : > { %v5332_v45 = vpack.i.bf16 %v958_v27, %v957_v49  ;;  %v12813_v27 = vshra.s32 %v7074_v16, 4  ;;  %v12822_v12 = vsel %vm7160_vm6, 4294967295, %v12821_v12  ;;  %v5337_v49 = vpack.i.bf16 %v960_v25, %v959_v38 }
  0x54   : > { %12823 = vst [vmem:[#allocation46_spill] sm:$0xff] %v12822_v12  ;;  %v12974_v50 = vmov 0 }
  0x55   : > { %5318 = vrot.lane.b32.xlu1 %v5317_v47, %s6407_s22  ;;  %v12810_v47 = vrot.slane %v7077_v19, 1  ;;  %vm7150_vm12 = vcmp.ge.s32.totalorder %v12813_v27, 1  ;;  %v12824_v27 = vshra.s32 %v7085_v28, 4 }
  0x56   : > { %5323 = vrot.lane.b32.xlu0 %v5322_v10, %s6408_s8  ;;  %v12815_v8 = vsel %vm7150_vm12, 4294967295, %v12814_v8  ;;  %v609_v38 = vsel %vm7150_vm12, %v6943_v48, 0.0 }
  0x57   : > { %v7137_v10 = vsel %vm12811_vm10, %v641_v58, %v12810_v47  ;;  %12816 = vst [vmem:[#allocation44_spill] sm:$0xff] %v12815_v8  ;;  %v12817_v47 = vshra.s32 %v7080_v14, 4  ;;  %v386_v58 = vand.u32 15, %v7085_v28  ;;  %vm7168_vm5 = vcmp.ge.s32.totalorder %v12824_v27, 1 }
  0x58   : > { %v12826_v62 = vsel %vm7168_vm5, 4294967295, %v12825_v62  ;;  %v611_v27 = vsel %vm7168_vm5, %v6998_v3, 0.0  ;;  %v12895_v8 = vmov 0 }
  0x59   : > { %vm7156_vm10 = vcmp.ge.s32.totalorder %v12817_v47, 1  ;;  %5328 = vrot.lane.b32.xlu1 %v5327_v20, %s6408_s8  ;;  %12827 = vst [vmem:[#allocation47_spill] sm:$0xff] %v12826_v62  ;;  %v5342_v47 = vpack.i.bf16 %v1022_v2, %v1021_v42  ;;  %v1024_v20 = vsel %vm12828_vm3, %v7137_v10, 0.0  ;;  %v12829_v42 = vshra.s32 %v7106_v32, 4  ;;  %vm12114_vm3 = vmand %vm7150_vm12, %vm7160_vm6 }
  0x5a   : > { %v12819_v59 = vsel %vm7156_vm10, 4294967295, %v12818_v59  ;;  %5333 = vrot.lane.b32.xlu0 %v5332_v45, %s6409_s14  ;;  %v608_v25 = vsel %vm7156_vm10, %v6795_v21, 0.0  ;;  %v12830_v45 = vmov 0  ;;  %v383_v2 = vand.u32 15, %v7080_v14 }
  0x5b   : > { %12820 = vst [vmem:[#allocation45_spill] sm:$0xff] %v12819_v59  ;;  %vm7190_vm1 = vcmp.ge.s32.totalorder %v12829_v42, 1  ;;  %vm7199_vm13 = vcmp.lt.s32.totalorder %v386_v58, 15  ;;  %v12833_v21 = vmov 0  ;;  %v5347_v48 = vpack.i.bf16 %v1024_v20, %v1023_v46 }
  0x5c   : > { %v12831_v45 = vsel %vm7190_vm1, 4294967295, %v12830_v45  ;;  %v12834_v21 = vsel %vm7199_vm13, 4294967295, %v12833_v21  ;;  %v5352_v42 = vpack.i.bf16 %v609_v38, %v608_v25  ;;  %v610_v13 = vsel %vm7190_vm1, %v6977_v35, 0.0  ;;  %vm12118_vm2 = vmand %vm7168_vm5, %vm7199_vm13 }
  0x5d   : > { %12832 = vst [vmem:[#allocation48_spill] sm:$0xff] %v12831_v45  ;;  %12835 = vst [vmem:[#allocation49_spill] sm:$0xff] %v12834_v21  ;;  %5338 = vrot.lane.b32.xlu1 %v5337_v49, %s6409_s14  ;;  %v769_v58 = vsel %vm7156_vm10, %v7039_v33, 0.0  ;;  %v770_v49 = vsel %vm12114_vm3, %v7010_v55, 0.0  ;;  %v7221_v46 = vadd.s32 232, %v6508_v1  ;;  %vm7227_vm14 = vcmp.ge.s32.totalorder %v383_v2, 1 }
  0x5e   : > { %5343 = vrot.lane.b32.xlu0 %v5342_v47, %s6410_s15  ;;  %v12837_v47 = vmov 0  ;;  %v7232_v33 = vld [vmem:[%s6517_s17 + $0x58] sm:$0xff]  ;;  %v385_v20 = vand.u32 15, %v7106_v32  ;;  %v417_v25 = vrot.slane %v7077_v19, 7  ;;  %v7237_v55 = vadd.s32 224, %v6508_v1  ;;  %v7951_v45 = vld [vmem:[%s6517_s17 + $0xa8] sm:$0xff] }
  0x5f   : > { %12836 = vst [vmem:[#allocation50_spill] sm:$0xff] %v7221_v46  ;;  %v12838_v47 = vsel %vm7227_vm14, 4294967295, %v12837_v47  ;;  %v404_v38 = vand.u32 15, %v7221_v46  ;;  %v5357_v56 = vpack.i.bf16 %v611_v27, %v610_v13  ;;  %v5362_v51 = vpack.i.bf16 %v770_v49, %v769_v58  ;;  %v7267_v49 = vld [vmem:[%s6517_s17 + $0x60] sm:$0xff] }
  0x60   : > { %12839 = vst [vmem:[#allocation51_spill] sm:$0xff] %v12838_v47  ;;  %12840 = vst [vmem:[#allocation52_spill] sm:$0xff] %v7237_v55  ;;  %v771_v2 = vsel %vm7190_vm1, %v7141_v18, 0.0  ;;  %v772_v57 = vsel %vm12118_vm2, %v7137_v10, 0.0  ;;  %v801_v43 = vsel %vm7227_vm14, %v7061_v31, 0.0  ;;  %v418_v13 = vrot.slane %v7232_v33, 7 }
  0x61   : > { %5348 = vrot.lane.b32.xlu1 %v5347_v48, %s6410_s15  ;;  %v12125_v48 = vshra.s32 %v7221_v46, 4  ;;  %v12841_v27 = vrot.slane %v6998_v3, 7  ;;  %vm12842_vm3 = vcmp.lt.s32.totalorder %v6508_v1, 1  ;;  %vm7262_vm1 = vcmp.ge.s32.totalorder %v385_v20, 1 }
  0x62   : > { %5353 = vrot.lane.b32.xlu0 %v5352_v42, %s6403_s18  ;;  %v12844_v58 = vmov 0  ;;  %vm7270_vm2 = vcmp.lt.s32.totalorder %v404_v38, 15  ;;  %v5367_v20 = vpack.i.bf16 %v772_v57, %v771_v2  ;;  %v7289_v38 = vsel %vm12853_vm8, %v417_v25, %v418_v13  ;;  %v7314_v57 = vld [vmem:[%s6517_s17 + $0x68] sm:$0xff] }
  0x63   : > { %v7260_v42 = vsel %vm12842_vm3, %v12841_v27, %v417_v25  ;;  %v12845_v58 = vsel %vm7262_vm1, 4294967295, %v12844_v58  ;;  %v12848_v30 = vsel %vm7270_vm2, 4294967295, %v12847_v30  ;;  %vm7276_vm10 = vcmp.lt.s32.totalorder %v12125_v48, 15  ;;  %12854 = vst [vmem:[#allocation57_spill] sm:$0xff] %v7289_v38 }
  0x64   : > { %12843 = vst [vmem:[#allocation53_spill] sm:$0xff] %v7260_v42  ;;  %12846 = vst [vmem:[#allocation54_spill] sm:$0xff] %v12845_v58  ;;  %v12851_v24 = vsel %vm7276_vm10, 4294967295, %v12850_v24  ;;  %v5372_v27 = vpack.i.bf16 %v7057_v17, %v801_v43  ;;  %v803_v48 = vsel %vm7262_vm1, %v7260_v42, 0.0  ;;  %v12855_v43 = vshra.s32 %v7080_v14, 4  ;;  %v7569_v17 = vld [vmem:[%s6517_s17 + $0xe8] sm:$0xff] }
  0x65   : > { %12849 = vst [vmem:[#allocation55_spill] sm:$0xff] %v12848_v30  ;;  %12852 = vst [vmem:[#allocation56_spill] sm:$0xff] %v12851_v24  ;;  %5358 = vrot.lane.b32.xlu1 %v5357_v56, %s6403_s18  ;;  %v643_v56 = vrot.slane %v7232_v33, 1  ;;  %v12856_v2 = vmov 0  ;;  %v12859_v25 = vshra.s32 %v7237_v55, 4  ;;  %v12860_v46 = vmov 0 }
  0x66   : > { %vm12134_vm3 = vmand %vm7276_vm10, %vm7270_vm2  ;;  %5363 = vrot.lane.b32.xlu0 %v5362_v51, %s6404_s19  ;;  %vm7298_vm9 = vcmp.lt.s32.totalorder %v12855_v43, 15  ;;  %v7311_v31 = vadd.s32 104, %v6508_v1  ;;  %v5382_v14 = vpack.i.bf16 %v6998_v3, %v6977_v35  ;;  %v12864_v51 = vrot.slane %v7267_v49, 1  ;;  %12916 = vst [vmem:[#allocation73_spill] sm:$0xff] %v7569_v17 }
  0x67   : > { %v12857_v2 = vsel %vm7298_vm9, 4294967295, %v12856_v2  ;;  %vm7306_vm8 = vcmp.lt.s32.totalorder %v12859_v25, 15  ;;  %v7325_v43 = vsel %vm12134_vm3, %v6574_v23, 0.0  ;;  %v5377_v25 = vpack.i.bf16 %v7289_v38, %v803_v48  ;;  %vm12876_vm2 = vmand %vm7298_vm9, %vm7227_vm14 }
  0x68   : > { %12858 = vst [vmem:[#allocation58_spill] sm:$0xff] %v12857_v2  ;;  %v12861_v46 = vsel %vm7306_vm8, 4294967295, %v12860_v46  ;;  %12863 = vst [vmem:[#allocation60_spill] sm:$0xff] %v7325_v43  ;;  %vm12865_vm8 = vcmp.lt.s32.totalorder %v6508_v1, 7  ;;  %v12866_v23 = vshra.s32 %v7074_v16, 4  ;;  %v419_v48 = vrot.slane %v7267_v49, 7 }
  0x69   : > { %12862 = vst [vmem:[#allocation59_spill] sm:$0xff] %v12861_v46  ;;  %5368 = vrot.lane.b32.xlu1 %v5367_v20, %s6404_s19  ;;  %v7339_v24 = vsel %vm12865_vm8, %v643_v56, %v12864_v51  ;;  %v12867_v20 = vmov 0  ;;  %v834_v3 = vsel %vm7160_vm6, %v7137_v10, 0.0  ;;  %v12871_v51 = vmov 0 }
  0x6a   : > { %5373 = vrot.lane.b32.xlu0 %v5372_v27, %s6405_s20  ;;  %vm7343_vm3 = vcmp.lt.s32.totalorder %v12866_v23, 15  ;;  %v12870_v27 = vshra.s32 %v7106_v32, 4  ;;  %v5387_v35 = vpack.i.bf16 %v7232_v33, %v7077_v19  ;;  %vm12875_vm10 = vcmp.lt.s32.totalorder %v6508_v1, 7 }
  0x6b   : > { %v12868_v20 = vsel %vm7343_vm3, 4294967295, %v12867_v20  ;;  %v7375_v10 = vsel %vm12875_vm10, %v12874_v9, %v643_v56  ;;  %v836_v32 = vsel %vm7199_vm13, %v7339_v24, 0.0  ;;  %v930_v23 = vsel %vm7343_vm3, %v7289_v38, 0.0  ;;  %v7426_v38 = vld [vmem:[%s6517_s17 + $0x70] sm:$0xff]  ;;  %vm12170_vm4 = vmand %vm7343_vm3, %vm7160_vm6 }
  0x6c   : > { %12869 = vst [vmem:[#allocation61_spill] sm:$0xff] %v12868_v20  ;;  %vm7361_vm8 = vcmp.lt.s32.totalorder %v12870_v27, 15  ;;  %v929_v27 = vsel %vm12876_vm2, %v7260_v42, 0.0  ;;  %v5392_v56 = vpack.i.bf16 %v834_v3, %v7141_v18  ;;  %vm12877_vm10 = vcmp.lt.s32.totalorder %v6508_v1, 1 }
  0x6d   : > { %v12872_v51 = vsel %vm7361_vm8, 4294967295, %v12871_v51  ;;  %5378 = vrot.lane.b32.xlu1 %v5377_v25, %s6405_s20  ;;  %v7395_v25 = vsel %vm12877_vm10, %v418_v13, %v419_v48  ;;  %v7402_v30 = vadd.s32 96, %v6508_v1  ;;  %v7405_v16 = vadd.s32 112, %v6508_v1  ;;  %vm12880_vm2 = vmmov %vm12877_vm10 }
  0x6e   : > { %12873 = vst [vmem:[#allocation62_spill] sm:$0xff] %v12872_v51  ;;  %5383 = vrot.lane.b32.xlu0 %v5382_v14, %s6406_s21  ;;  %12878 = vst [vmem:[#allocation63_spill] sm:$0xff] %v7395_v25  ;;  %v12879_v13 = vrot.slane %v7314_v57, 7  ;;  %v12882_v9 = vshra.s32 %v7085_v28, 4  ;;  %v12883_v42 = vmov 0  ;;  %v12886_v14 = vshra.s32 %v7311_v31, 4 }
  0x6f   : > { %v12887_v55 = vmov 0  ;;  %v5397_v18 = vpack.i.bf16 %v836_v32, %v7375_v10  ;;  %v5402_v43 = vpack.i.bf16 %v930_v23, %v929_v27  ;;  %v12890_v28 = vshra.s32 %v7330_v44, 4  ;;  %vm12894_vm12 = vmand %vm7361_vm8, %vm7262_vm1 }
  0x70   : > { %v7417_v3 = vsel %vm12880_vm2, %v419_v48, %v12879_v13  ;;  %vm7421_vm10 = vcmp.lt.s32.totalorder %v12882_v9, 15  ;;  %vm7430_vm15 = vcmp.ge.s32.totalorder %v12886_v14, 1  ;;  %v388_v48 = vand.u32 15, %v7311_v31 }
  0x71   : > { %12881 = vst [vmem:[#allocation64_spill] sm:$0xff] %v7417_v3  ;;  %v12884_v42 = vsel %vm7421_vm10, 4294967295, %v12883_v42  ;;  %v12888_v55 = vsel %vm7430_vm15, 4294967295, %v12887_v55  ;;  %5388 = vrot.lane.b32.xlu1 %v5387_v35, %s6406_s21  ;;  %vm7439_vm2 = vcmp.ge.s32.totalorder %v12890_v28, 1  ;;  %v12891_v9 = vmov 0 }
  0x72   : > { %12885 = vst [vmem:[#allocation65_spill] sm:$0xff] %v12884_v42  ;;  %12889 = vst [vmem:[#allocation66_spill] sm:$0xff] %v12888_v55  ;;  %v12892_v9 = vsel %vm7439_vm2, 4294967295, %v12891_v9  ;;  %v931_v14 = vsel %vm12894_vm12, %v7395_v25, 0.0  ;;  %v645_v35 = vrot.slane %v7314_v57, 1  ;;  %v390_v23 = vand.u32 15, %v7330_v44  ;;  %5393 = vrot.lane.b32.xlu0 %v5392_v56, %s6407_s22 }
  0x73   : > { %12893 = vst [vmem:[#allocation67_spill] sm:$0xff] %v12892_v9  ;;  %v932_v32 = vsel %vm7421_vm10, %v7417_v3, 0.0  ;;  %v355_v13 = vshra.s32 %v7402_v30, 4  ;;  %v961_v22 = vsel %vm7298_vm9, %v7077_v19, 0.0  ;;  %v962_v46 = vsel %vm7343_vm3, %v7232_v33, 0.0 }
  0x74   : > { %v963_v56 = vsel %vm7361_vm8, %v7267_v49, 0.0  ;;  %v964_v27 = vsel %vm7421_vm10, %v7314_v57, 0.0  ;;  %v1025_v28 = vsel %vm7298_vm9, %v7375_v10, 0.0  ;;  %v1026_v15 = vsel %vm12170_vm4, %v7339_v24, 0.0 }
  0x75   : > { %vm7483_vm12 = vcmp.lt.s32.totalorder %v388_v48, 15  ;;  %v387_v39 = vand.u32 15, %v7402_v30  ;;  %5398 = vrot.lane.b32.xlu1 %v5397_v18, %s6407_s22  ;;  %v5407_v2 = vpack.i.bf16 %v932_v32, %v931_v14  ;;  %v12898_v20 = vrot.slane %v7267_v49, 1  ;;  %v7548_v32 = vld [vmem:[%s6517_s17 + $0x78] sm:$0xff] }
  0x76   : > { %v12896_v8 = vsel %vm7483_vm12, 4294967295, %v12895_v8  ;;  %vm12899_vm9 = vcmp.lt.s32.totalorder %v6508_v1, 7  ;;  %vm7498_vm4 = vcmp.lt.s32.totalorder %v390_v23, 15  ;;  %v12900_v48 = vmov 0  ;;  %5403 = vrot.lane.b32.xlu0 %v5402_v43, %s6408_s8  ;;  %v7534_v23 = vld [vmem:[%s6517_s17 + $0x80] sm:$0xff] }
  0x77   : > { %12897 = vst [vmem:[#allocation68_spill] sm:$0xff] %v12896_v8  ;;  %v7496_v12 = vsel %vm12899_vm9, %v12898_v20, %v645_v35  ;;  %v12901_v48 = vsel %vm7498_vm4, 4294967295, %v12900_v48  ;;  %v5412_v30 = vpack.i.bf16 %v962_v46, %v961_v22  ;;  %v12903_v52 = vrot.slane %v7426_v38, 1  ;;  %vm12904_vm6 = vmmov %vm12899_vm9 }
  0x78   : > { %12902 = vst [vmem:[#allocation69_spill] sm:$0xff] %v12901_v48  ;;  %vm7513_vm3 = vcmp.ge.s32.totalorder %v355_v13, 1  ;;  %v12905_v20 = vmov 0  ;;  %v12908_v14 = vshra.s32 %v7405_v16, 4  ;;  %v12909_v43 = vmov 0  ;;  %vm12203_vm9 = vmand %vm7439_vm2, %vm7498_vm4 }
  0x79   : > { %v7507_v18 = vsel %vm12904_vm6, %v645_v35, %v12903_v52  ;;  %v12906_v20 = vsel %vm7513_vm3, 4294967295, %v12905_v20  ;;  %v5417_v22 = vpack.i.bf16 %v964_v27, %v963_v56  ;;  %v5422_v46 = vpack.i.bf16 %v1026_v15, %v1025_v28  ;;  %5408 = vrot.lane.b32.xlu1 %v5407_v2, %s6408_s8  ;;  %vm12915_vm6 = vmand %vm7421_vm10, %vm7199_vm13 }
  0x7a   : > { %12907 = vst [vmem:[#allocation70_spill] sm:$0xff] %v12906_v20  ;;  %vm7519_vm5 = vcmp.ge.s32.totalorder %v12908_v14, 1  ;;  %v613_v52 = vsel %vm7430_vm15, %v7232_v33, 0.0  ;;  %v615_v35 = vsel %vm7439_vm2, %v7314_v57, 0.0  ;;  %v1027_v15 = vsel %vm7361_vm8, %v7496_v12, 0.0  ;;  %5413 = vrot.lane.b32.xlu0 %v5412_v30, %s6409_s14 }
  0x7b   : > { %v12910_v43 = vsel %vm7519_vm5, 4294967295, %v12909_v43  ;;  %vm7543_vm1 = vcmp.ge.s32.totalorder %v387_v39, 1  ;;  %v12912_v33 = vmov 0  ;;  %v389_v27 = vand.u32 15, %v7405_v16 }
  0x7c   : > { %12911 = vst [vmem:[#allocation71_spill] sm:$0xff] %v12910_v43  ;;  %v12913_v33 = vsel %vm7543_vm1, 4294967295, %v12912_v33  ;;  %v421_v28 = vrot.slane %v7426_v38, 7  ;;  %v1028_v56 = vsel %vm12915_vm6, %v7507_v18, 0.0  ;;  %v612_v39 = vsel %vm7513_vm3, %v7077_v19, 0.0  ;;  %vm12917_vm6 = vmand %vm7430_vm15, %vm7483_vm12 }
  0x7d   : > { %12914 = vst [vmem:[#allocation72_spill] sm:$0xff] %v12913_v33  ;;  %v614_v14 = vsel %vm7519_vm5, %v7267_v49, 0.0  ;;  %v7566_v51 = vadd.s32 136, %v6508_v1  ;;  %v773_v2 = vsel %vm7513_vm3, %v7375_v10, 0.0  ;;  %v774_v19 = vsel %vm12917_vm6, %v7339_v24, 0.0  ;;  %5418 = vrot.lane.b32.xlu1 %v5417_v22, %s6409_s14  ;;  %v7622_v22 = vld [vmem:[%s6517_s17 + $0x88] sm:$0xff] }
  0x7e   : > { %v647_v42 = vrot.slane %v7548_v32, 1  ;;  %v775_v62 = vsel %vm7519_vm5, %v7496_v12, 0.0  ;;  %v776_v10 = vsel %vm12203_vm9, %v7507_v18, 0.0  ;;  %v805_v30 = vsel %vm7543_vm1, %v7395_v25, 0.0  ;;  %5423 = vrot.lane.b32.xlu0 %v5422_v46, %s6410_s15 }
  0x7f   : > { %v422_v24 = vrot.slane %v7548_v32, 7  ;;  %v5427_v55 = vpack.i.bf16 %v1028_v56, %v1027_v15  ;;  %v12918_v21 = vrot.slane %v7314_v57, 7  ;;  %vm12919_vm6 = vcmp.lt.s32.totalorder %v6508_v1, 1 }
  0x80   : > { %vm7602_vm10 = vcmp.ge.s32.totalorder %v389_v27, 1  ;;  %v12921_v9 = vmov 0  ;;  %v5432_v63 = vpack.i.bf16 %v613_v52, %v612_v39  ;;  %v5437_v25 = vpack.i.bf16 %v615_v35, %v614_v14 }
  0x81   : > { %v7600_v43 = vsel %vm12919_vm6, %v12918_v21, %v421_v28  ;;  %v12922_v9 = vsel %vm7602_vm10, 4294967295, %v12921_v9  ;;  %v5442_v60 = vpack.i.bf16 %v774_v19, %v773_v2  ;;  %v12213_v6 = vshra.s32 %v7566_v51, 4  ;;  %5428 = vrot.lane.b32.xlu1 %v5427_v55, %s6410_s15 }
  0x82   : > { %12920 = vst [vmem:[#allocation74_spill] sm:$0xff] %v7600_v43  ;;  %12923 = vst [vmem:[#allocation75_spill] sm:$0xff] %v12922_v9  ;;  %v5447_v15 = vpack.i.bf16 %v776_v10, %v775_v62  ;;  %v5452_v56 = vpack.i.bf16 %v7417_v3, %v805_v30  ;;  %v12924_v21 = vrot.slane %v7534_v23, 1  ;;  %vm12925_vm6 = vcmp.lt.s32.totalorder %v6508_v1, 7  ;;  %5433 = vrot.lane.b32.xlu0 %v5432_v63, %s6403_s18 }
  0x83   : > { %vm7617_vm9 = vcmp.lt.s32.totalorder %v355_v13, 15  ;;  %v12926_v20 = vmov 0  ;;  %vm12929_vm8 = vcmp.lt.s32.totalorder %v6508_v1, 1  ;;  %v807_v62 = vsel %vm7602_vm10, %v7600_v43, 0.0 }
  0x84   : > { %v7615_v27 = vsel %vm12925_vm6, %v647_v42, %v12924_v21  ;;  %v12927_v20 = vsel %vm7617_vm9, 4294967295, %v12926_v20  ;;  %v7626_v52 = vsel %vm12929_vm8, %v421_v28, %v422_v24  ;;  %v838_v13 = vsel %vm7483_vm12, %v7507_v18, 0.0  ;;  %vm12212_vm6 = vmand %vm6528_vm0, %vm6654_vm11 }
  0x85   : > { %12928 = vst [vmem:[#allocation76_spill] sm:$0xff] %v12927_v20  ;;  %12930 = vst [vmem:[#allocation77_spill] sm:$0xff] %v7626_v52  ;;  %v12931_v35 = vrot.slane %v6523_v5, 7  ;;  %v12932_v28 = vrot.slane %v6520_v4, 7  ;;  %v12935_v2 = vrot.slane %v7569_v17, 7  ;;  %v12938_v19 = vshra.s32 %v7311_v31, 4  ;;  %5438 = vrot.lane.b32.xlu1 %v5437_v25, %s6403_s18 }
  0x86   : > { %vm12936_vm13 = vmmov %vm12929_vm8  ;;  %v12939_v10 = vmov 0  ;;  %v7663_v5 = vadd.s32 152, %v6508_v1  ;;  %v12942_v30 = vrot.slane %v7426_v38, 1  ;;  %v423_v31 = vrot.slane %v7534_v23, 7  ;;  %5443 = vrot.lane.b32.xlu0 %v5442_v60, %s6404_s19 }
  0x87   : > { %v7646_v39 = vsel %vm12929_vm8, %v12932_v28, %v12931_v35  ;;  %v12934_v14 = vmov %v12932_v28  ;;  %vm7658_vm2 = vcmp.lt.s32.totalorder %v12938_v19, 15  ;;  %vm12943_vm8 = vcmp.lt.s32.totalorder %v6508_v1, 7 }
  0x88   : > { %12933 = vst [vmem:[#allocation78_spill] sm:$0xff] %v7646_v39  ;;  %v7654_v18 = vsel %vm12936_vm13, %v12935_v2, %v12934_v14  ;;  %v12940_v10 = vsel %vm7658_vm2, 4294967295, %v12939_v10  ;;  %v7670_v21 = vsel %vm12943_vm8, %v12942_v30, %v647_v42  ;;  %v840_v35 = vsel %vm7498_vm4, %v7615_v27, 0.0 }
  0x89   : > { %12937 = vst [vmem:[#allocation79_spill] sm:$0xff] %v7654_v18  ;;  %12941 = vst [vmem:[#allocation80_spill] sm:$0xff] %v12940_v10  ;;  %v12226_v55 = vrot.slane %v7622_v22, 7  ;;  %vm7684_vm8 = vcmp.ge.s32.totalorder %v12213_v6, 1  ;;  %v12944_v42 = vmov 0  ;;  %v5457_v28 = vpack.i.bf16 %v7626_v52, %v807_v62  ;;  %v7732_v62 = vld [vmem:[%s6517_s17 + $0x90] sm:$0xff]  ;;  %5448 = vrot.lane.b32.xlu1 %v5447_v15, %s6404_s19 }
  0x8a   : > { %v12945_v42 = vsel %vm7684_vm8, 4294967295, %v12944_v42  ;;  %v7692_v2 = vpack.i.bf16 %v838_v13, %v7496_v12  ;;  %v12947_v19 = vshra.s32 %v7405_v16, 4  ;;  %v12948_v30 = vmov 0  ;;  %5453 = vrot.lane.b32.xlu0 %v5452_v56, %s6405_s20 }
  0x8b   : > { %12946 = vst [vmem:[#allocation81_spill] sm:$0xff] %v12945_v42  ;;  %v7706_v63 = vsel %vm12212_vm6, %v7654_v18, 0.0  ;;  %vm12951_vm15 = vnez %v12716_v11  ;;  %v934_v12 = vsel %vm7658_vm2, %v7626_v52, 0.0  ;;  %v7715_v16 = vadd.s32 128, %v6508_v1  ;;  %vm12952_vm6 = vmand %vm7617_vm9, %vm7543_vm1 }
  0x8c   : > { %vm7696_vm13 = vcmp.lt.s32.totalorder %v12947_v19, 15  ;;  %v7718_v13 = vpack.i.bf16 %v840_v35, %v7670_v21  ;;  %v933_v19 = vsel %vm12952_vm6, %v7600_v43, 0.0  ;;  %vm12953_vm0 = vnez %v12743_v61 }
  0x8d   : > { %v12949_v30 = vsel %vm7696_vm13, 4294967295, %v12948_v30  ;;  %vm12954_vm11 = vnez %v12727_v37  ;;  %v7735_v14 = vadd.s32 144, %v6508_v1  ;;  %vm12955_vm3 = vcmp.lt.s32.totalorder %v6508_v1, 1  ;;  %5458 = vrot.lane.b32.xlu1 %v5457_v28, %s6405_s20 }
  0x8e   : > { %12950 = vst [vmem:[#allocation82_spill] sm:$0xff] %v12949_v30  ;;  %v7742_v35 = vsel %vm12955_vm3, %v423_v31, %v12226_v55  ;;  %vm12957_vm6 = vmmov %vm12955_vm3  ;;  %v12959_v6 = vshra.s32 %v7330_v44, 4  ;;  %v392_v25 = vand.u32 15, %v7566_v51  ;;  %v966_v44 = vsel %vm7658_vm2, %v7548_v32, 0.0 }
  0x8f   : > { %12956 = vst [vmem:[#allocation83_spill] sm:$0xff] %v7742_v35  ;;  %v7746_v46 = vsel %vm12957_vm6, %v422_v24, %v423_v31  ;;  %v965_v24 = vsel %vm7617_vm9, %v7426_v38, 0.0  ;;  %v394_v31 = vand.u32 15, %v7663_v5  ;;  %v7768_v55 = vpack.i.bf16 %v934_v12, %v933_v19  ;;  %vm12963_vm3 = vmand %vm12954_vm11, %vm12953_vm0 }
  0x90   : > { %12958 = vst [vmem:[#allocation84_spill] sm:$0xff] %v7746_v46  ;;  %vm7750_vm5 = vcmp.lt.s32.totalorder %v12959_v6, 15  ;;  %v649_v6 = vrot.slane %v7622_v22, 1  ;;  %v7776_v60 = vsel %vm12963_vm3, %v6675_v54, 0.0  ;;  %vm12246_vm6 = vmand %vm7658_vm2, %vm7483_vm12  ;;  %v12964_v12 = vshra.s32 %v7663_v5, 4 }
  0x91   : > { %v12961_v7 = vsel %vm7750_vm5, 4294967295, %v12960_v7  ;;  %v12965_v19 = vmov 0  ;;  %vm12968_vm3 = vmand %vm7696_vm13, %vm7602_vm10  ;;  %v936_v37 = vsel %vm7750_vm5, %v7742_v35, 0.0  ;;  %v7801_v43 = vpack.i.bf16 %v966_v44, %v965_v24 }
  0x92   : > { %12962 = vst [vmem:[#allocation85_spill] sm:$0xff] %v12961_v7  ;;  %vm7786_vm1 = vcmp.ge.s32.totalorder %v12964_v12, 1  ;;  %v935_v61 = vsel %vm12968_vm3, %v7746_v46, 0.0  ;;  %v967_v12 = vsel %vm7696_vm13, %v7534_v23, 0.0  ;;  %v968_v52 = vsel %vm7750_vm5, %v7622_v22, 0.0 }
  0x93   : > { %v12966_v19 = vsel %vm7786_vm1, 4294967295, %v12965_v19  ;;  %vm7809_vm3 = vcmp.lt.s32.totalorder %v392_v25, 15  ;;  %v12969_v54 = vmov 0  ;;  %v1029_v15 = vsel %vm7617_vm9, %v7670_v21, 0.0 }
  0x94   : > { %12967 = vst [vmem:[#allocation86_spill] sm:$0xff] %v12966_v19  ;;  %v12970_v54 = vsel %vm7809_vm3, 4294967295, %v12969_v54  ;;  %v1030_v24 = vsel %vm12246_vm6, %v7615_v27, 0.0  ;;  %v12972_v44 = vrot.slane %v7534_v23, 1  ;;  %vm12973_vm0 = vcmp.lt.s32.totalorder %v6508_v1, 7 }
  0x95   : > { %12971 = vst [vmem:[#allocation87_spill] sm:$0xff] %v12970_v54  ;;  %vm7829_vm11 = vcmp.lt.s32.totalorder %v394_v31, 15  ;;  %v7833_v56 = vpack.i.bf16 %v936_v37, %v935_v61  ;;  %v12977_v20 = vshra.s32 %v7715_v16, 4  ;;  %v12978_v10 = vmov 0  ;;  %vm12982_vm6 = vmmov %vm12973_vm0 }
  0x96   : > { %v7827_v25 = vsel %vm12973_vm0, %v12972_v44, %v649_v6  ;;  %v12975_v50 = vsel %vm7829_vm11, 4294967295, %v12974_v50  ;;  %v12981_v8 = vrot.slane %v7732_v62, 1  ;;  %vm12256_vm0 = vmand %vm7750_vm5, %vm7498_vm4  ;;  %v391_v37 = vand.u32 15, %v7715_v16 }
  0x97   : > { %12976 = vst [vmem:[#allocation88_spill] sm:$0xff] %v12975_v50  ;;  %vm7837_vm9 = vcmp.ge.s32.totalorder %v12977_v20, 1  ;;  %v7852_v61 = vpack.i.bf16 %v968_v52, %v967_v12  ;;  %v12983_v20 = vshra.s32 %v7735_v14, 4  ;;  %v12984_v31 = vmov 0 }
  0x98   : > { %v12979_v10 = vsel %vm7837_vm9, 4294967295, %v12978_v10  ;;  %v7845_v18 = vsel %vm12982_vm6, %v649_v6, %v12981_v8  ;;  %v7865_v8 = vld [vmem:[%s6517_s17 + $0x98] sm:$0xff]  ;;  %v393_v6 = vand.u32 15, %v7735_v14  ;;  %v425_v44 = vrot.slane %v7732_v62, 7 }
  0x99   : > { %12980 = vst [vmem:[#allocation89_spill] sm:$0xff] %v12979_v10  ;;  %vm7856_vm12 = vcmp.ge.s32.totalorder %v12983_v20, 1  ;;  %v7870_v52 = vpack.i.bf16 %v1030_v24, %v1029_v15  ;;  %v617_v12 = vsel %vm7684_vm8, %v7548_v32, 0.0  ;;  %v1031_v20 = vsel %vm7696_vm13, %v7827_v25, 0.0  ;;  %vm12993_vm13 = vmand %vm7786_vm1, %vm7829_vm11 }
  0x9a   : > { %v12985_v31 = vsel %vm7856_vm12, 4294967295, %v12984_v31  ;;  %v619_v3 = vsel %vm7786_vm1, %v7622_v22, 0.0  ;;  %v12987_v28 = vpack.i.bf16 %v7314_v57, %v7267_v49  ;;  %v616_v15 = vsel %vm7837_vm9, %v7426_v38, 0.0  ;;  %v7905_v49 = vld [vmem:[%s6517_s17 + $0xa0] sm:$0xff] }
  0x9b   : > { %12986 = vst [vmem:[#allocation90_spill] sm:$0xff] %v12985_v31  ;;  %v1032_v24 = vsel %vm12256_vm0, %v7845_v18, 0.0  ;;  %v777_v30 = vsel %vm7837_vm9, %v7670_v21, 0.0  ;;  %v7902_v9 = vadd.s32 168, %v6508_v1  ;;  %v618_v57 = vsel %vm7856_vm12, %v7534_v23, 0.0  ;;  %vm12989_vm0 = vmand %vm7684_vm8, %vm7809_vm3 }
  0x9c   : > { %5463 = vrot.lane.b32.xlu0 %v12987_v28, %s6406_s21  ;;  %v778_v28 = vsel %vm12989_vm0, %v7615_v27, 0.0  ;;  %vm7916_vm6 = vcmp.ge.s32.totalorder %v391_v37, 1  ;;  %v12990_v7 = vmov 0  ;;  %v426_v21 = vrot.slane %v7865_v8, 7 }
  0x9d   : > { %12988 = vst [vmem:[#allocation91_spill] sm:$0xff] %v7902_v9  ;;  %v12991_v7 = vsel %vm7916_vm6, 4294967295, %v12990_v7  ;;  %v779_v48 = vsel %vm7856_vm12, %v7827_v25, 0.0  ;;  %v780_v42 = vsel %vm12993_vm13, %v7845_v18, 0.0  ;;  %v12994_v10 = vrot.slane %v7622_v22, 7 }
  0x9e   : > { %12992 = vst [vmem:[#allocation92_spill] sm:$0xff] %v12991_v7  ;;  %vm12995_vm0 = vcmp.lt.s32.totalorder %v6508_v1, 1  ;;  %vm7936_vm5 = vcmp.ge.s32.totalorder %v393_v6, 1  ;;  %v12997_v37 = vmov 0  ;;  %v13000_v31 = vpack.i.bf16 %v7548_v32, %v7426_v38 }
  0x9f   : > { %v7934_v27 = vsel %vm12995_vm0, %v12994_v10, %v425_v44  ;;  %v12998_v37 = vsel %vm7936_vm5, 4294967295, %v12997_v37  ;;  %v7944_v19 = vpack.i.bf16 %v617_v12, %v616_v15  ;;  %v7946_v33 = vpack.i.bf16 %v1032_v24, %v1031_v20  ;;  %v7955_v10 = vpop.permute.xlu0 %5193  ;;  %vm13001_vm13 = vmmov %vm12995_vm0 }
  0xa0   : > { %12996 = vst [vmem:[#allocation93_spill] sm:$0xff] %v7934_v27  ;;  %12999 = vst [vmem:[#allocation94_spill] sm:$0xff] %v12998_v37  ;;  %5468 = vrot.lane.b32.xlu1 %v13000_v31, %s6406_s21  ;;  %v651_v4 = vrot.slane %v7865_v8, 1  ;;  %v12298_v17 = vrot.slane %v7905_v49, 1  ;;  %5473 = vrot.lane.b32.xlu0 %v7692_v2, %s6407_s22  ;;  %v7957_v6 = vpack.i.bf16 %v619_v3, %v618_v57  ;;  %v809_v38 = vsel %vm7916_vm6, %v7746_v46, 0.0 }
  0xa1   : > { %v7959_v58 = vpack.i.bf16 %v778_v28, %v777_v30  ;;  %v12295_v32 = vshra.s32 %v7902_v9, 4  ;;  %v7965_v31 = vpack.i.bf16 %v780_v42, %v779_v48  ;;  %v7969_v12 = vsel %vm13001_vm13, %v425_v44, %v426_v21  ;;  %v7976_v30 = vpop.permute.xlu1 %5203 }
  0xa2   : > { %13002 = vst [vmem:[#allocation95_spill] sm:$0xff] %v7969_v12  ;;  %v811_v2 = vsel %vm7936_vm5, %v7934_v27, 0.0  ;;  %vm13003_vm0 = vnez %v12780_v29  ;;  %vm13004_vm4 = vnez %v12763_v36  ;;  %v842_v48 = vsel %vm7809_vm3, %v7845_v18, 0.0 }
  0xa3   : > { %v7986_v42 = vadd.s32 184, %v6508_v1  ;;  %v427_v44 = vrot.slane %v7905_v49, 7  ;;  %v7993_v15 = vpack.i.bf16 %v7742_v35, %v809_v38  ;;  %vm13006_vm13 = vcmp.lt.s32.totalorder %v6508_v1, 7 }
  0xa4   : > { %5478 = vrot.lane.b32.xlu1 %v7718_v13, %s6407_s22  ;;  %v8001_v18 = vsel %vm13006_vm13, %v651_v4, %v12298_v17  ;;  %v13007_v57 = vshra.s32 %v7715_v16, 4  ;;  %v13008_v28 = vmov 0  ;;  %5483 = vrot.lane.b32.xlu0 %v7768_v55, %s6408_s8  ;;  %vm8013_vm1 = vcmp.ge.s32.totalorder %v12295_v32, 1  ;;  %vm13018_vm13 = vmand %vm13004_vm4, %vm13003_vm0  ;;  %v8056_v17 = vpop.permute.xlu0 %5198 }
  0xa5   : > { %13005 = vst [vmem:[#allocation96_spill] sm:$0xff] %v7986_v42  ;;  %v13011_v13 = vmov 0  ;;  %v13014_v38 = vshra.s32 %v7735_v14, 4  ;;  %v13015_v24 = vmov 0  ;;  %v8024_v16 = vadd.s32 160, %v6508_v1 }
  0xa6   : > { %vm8005_vm2 = vcmp.lt.s32.totalorder %v13007_v57, 15  ;;  %v13012_v13 = vsel %vm8013_vm1, 4294967295, %v13011_v13  ;;  %v8027_v57 = vld [vmem:[%s6517_s17 + $0xb0] sm:$0xff]  ;;  %v8030_v3 = vadd.s32 176, %v6508_v1  ;;  %v8033_v55 = vpack.i.bf16 %v7969_v12, %v811_v2 }
  0xa7   : > { %v13009_v28 = vsel %vm8005_vm2, 4294967295, %v13008_v28  ;;  %13013 = vst [vmem:[#allocation98_spill] sm:$0xff] %v13012_v13  ;;  %vm8019_vm8 = vcmp.lt.s32.totalorder %v13014_v38, 15  ;;  %v8041_v14 = vsel %vm13018_vm13, %v6699_v0, 0.0  ;;  %v8044_v38 = vpack.i.bf16 %v842_v48, %v7827_v25 }
  0xa8   : > { %13010 = vst [vmem:[#allocation97_spill] sm:$0xff] %v13009_v28  ;;  %v13016_v24 = vsel %vm8019_vm8, 4294967295, %v13015_v24  ;;  %13019 = vst [vmem:[#allocation100_spill] sm:$0xff] %v8041_v14  ;;  %vm13020_vm12 = vnez %v12785_v34  ;;  %vm13021_vm9 = vnez %v12774_v26  ;;  %v13022_v32 = vshra.s32 %v7566_v51, 4  ;;  %5488 = vrot.lane.b32.xlu1 %v7833_v56, %s6408_s8  ;;  %v8096_v56 = vpop.permute.xlu1 %5208  ;;  %5493 = vrot.lane.b32.xlu0 %v7801_v43, %s6409_s14 }
  0xa9   : > { %13017 = vst [vmem:[#allocation99_spill] sm:$0xff] %v13016_v24  ;;  %v13023_v2 = vmov 0  ;;  %v13026_v20 = vrot.slane %v7732_v62, 1  ;;  %vm13027_vm13 = vcmp.lt.s32.totalorder %v6508_v1, 7  ;;  %v844_v25 = vsel %vm7829_vm11, %v8001_v18, 0.0 }
  0xaa   : > { %vm8052_vm14 = vcmp.lt.s32.totalorder %v13022_v32, 15  ;;  %v13028_v32 = vrot.slane %v7951_v45, 7  ;;  %vm13029_vm0 = vcmp.lt.s32.totalorder %v6508_v1, 1  ;;  %v13034_v29 = vmov 0 }
  0xab   : > { %v13024_v2 = vsel %vm8052_vm14, 4294967295, %v13023_v2  ;;  %v8062_v0 = vsel %vm13027_vm13, %v13026_v20, %v651_v4  ;;  %vm13031_vm13 = vmmov %vm13029_vm0  ;;  %v13033_v20 = vshra.s32 %v7663_v5, 4  ;;  %v13040_v34 = vshra.s32 %v7986_v42, 4 }
  0xac   : > { %13025 = vst [vmem:[#allocation101_spill] sm:$0xff] %v13024_v2  ;;  %v8076_v48 = vsel %vm13029_vm0, %v427_v44, %v13028_v32  ;;  %v8082_v4 = vsel %vm13031_vm13, %v426_v21, %v427_v44  ;;  %v653_v32 = vrot.slane %v7951_v45, 1  ;;  %vm13037_vm0 = vmand %vm13021_vm9, %vm13020_vm12  ;;  %v8112_v51 = vpack.i.bf16 %v844_v25, %v8062_v0  ;;  %v8124_v44 = vpop.permute.xlu0 %5213  ;;  %5498 = vrot.lane.b32.xlu1 %v7852_v61, %s6409_s14 }
  0xad   : > { %13030 = vst [vmem:[#allocation102_spill] sm:$0xff] %v8076_v48  ;;  %13032 = vst [vmem:[#allocation103_spill] sm:$0xff] %v8082_v4  ;;  %vm8086_vm4 = vcmp.lt.s32.totalorder %v13033_v20, 15  ;;  %v8106_v5 = vsel %vm13037_vm0, %v6776_v40, 0.0  ;;  %v396_v20 = vand.u32 15, %v7902_v9  ;;  %v938_v40 = vsel %vm8052_vm14, %v7969_v12, 0.0  ;;  %5503 = vrot.lane.b32.xlu0 %v7870_v52, %s6410_s15  ;;  %v8191_v52 = vpop.permute.xlu1 %5223 }
  0xae   : > { %v13035_v29 = vsel %vm8086_vm4, 4294967295, %v13034_v29  ;;  %13038 = vst [vmem:[#allocation105_spill] sm:$0xff] %v8106_v5  ;;  %vm13039_vm13 = vmand %vm8005_vm2, %vm7916_vm6  ;;  %v398_v21 = vand.u32 15, %v7986_v42  ;;  %vm8128_vm10 = vcmp.ge.s32.totalorder %v13040_v34, 1  ;;  %v13041_v25 = vmov 0 }
  0xaf   : > { %13036 = vst [vmem:[#allocation104_spill] sm:$0xff] %v13035_v29  ;;  %v937_v43 = vsel %vm13039_vm13, %v7934_v27, 0.0  ;;  %v13042_v25 = vsel %vm8128_vm10, 4294967295, %v13041_v25  ;;  %vm13044_vm13 = vmand %vm8019_vm8, %vm7936_vm5  ;;  %v940_v36 = vsel %vm8086_vm4, %v8076_v48, 0.0  ;;  %v969_v27 = vsel %vm8005_vm2, %v7732_v62, 0.0 }
  0xb0   : > { %13043 = vst [vmem:[#allocation106_spill] sm:$0xff] %v13042_v25  ;;  %v939_v26 = vsel %vm13044_vm13, %v8082_v4, 0.0  ;;  %v970_v34 = vsel %vm8052_vm14, %v7865_v8, 0.0  ;;  %v971_v12 = vsel %vm8019_vm8, %v7905_v49, 0.0  ;;  %v13045_v46 = vrot.slane %v8027_v57, 1  ;;  %vm13060_vm5 = vmand %vm8052_vm14, %vm7809_vm3  ;;  %v8209_v59 = vpop.permute.xlu0 %5218  ;;  %5508 = vrot.lane.b32.xlu1 %v7944_v19, %s6403_s18  ;;  %v8321_v25 = vld [vmem:[%s6517_s17 + $0xb8] sm:$0xff] }
  0xb1   : > { %vm13046_vm13 = vcmp.lt.s32.totalorder %v6508_v1, 7  ;;  %v13047_v37 = vrot.slane %v7905_v49, 1  ;;  %v13049_v61 = vshra.s32 %v8024_v16, 4  ;;  %v13050_v5 = vmov 0  ;;  %5513 = vrot.lane.b32.xlu0 %v7946_v33, %s6410_s15  ;;  %v8260_v33 = vpop.permute.xlu1 %5228 }
  0xb2   : > { %v8160_v35 = vsel %vm13046_vm13, %v653_v32, %v13045_v46  ;;  %vm13048_vm0 = vmmov %vm13046_vm13  ;;  %v13053_v46 = vshra.s32 %v8030_v3, 4  ;;  %v13054_v14 = vmov 0  ;;  %vm8205_vm6 = vcmp.lt.s32.totalorder %v398_v21, 15 }
  0xb3   : > { %v8166_v7 = vsel %vm13048_vm0, %v13047_v37, %v653_v32  ;;  %vm8176_vm9 = vcmp.ge.s32.totalorder %v13049_v61, 1  ;;  %vm8186_vm0 = vcmp.lt.s32.totalorder %v396_v20, 15  ;;  %v13057_v37 = vmov 0 }
  0xb4   : > { %v13051_v5 = vsel %vm8176_vm9, 4294967295, %v13050_v5  ;;  %vm8182_vm13 = vcmp.ge.s32.totalorder %v13053_v46, 1  ;;  %v13058_v37 = vsel %vm8186_vm0, 4294967295, %v13057_v37  ;;  %v395_v32 = vand.u32 15, %v8024_v16  ;;  %5518 = vrot.lane.b32.xlu1 %v7957_v6, %s6403_s18 }
  0xb5   : > { %13052 = vst [vmem:[#allocation107_spill] sm:$0xff] %v13051_v5  ;;  %v13055_v14 = vsel %vm8182_vm13, 4294967295, %v13054_v14  ;;  %13059 = vst [vmem:[#allocation109_spill] sm:$0xff] %v13058_v37  ;;  %v972_v61 = vsel %vm8086_vm4, %v7951_v45, 0.0  ;;  %v1033_v46 = vsel %vm8005_vm2, %v8062_v0, 0.0  ;;  %v1034_v20 = vsel %vm13060_vm5, %v8001_v18, 0.0  ;;  %5523 = vrot.lane.b32.xlu0 %v7959_v58, %s6404_s19 }
  0xb6   : > { %13056 = vst [vmem:[#allocation108_spill] sm:$0xff] %v13055_v14  ;;  %v13061_v42 = vmov 0  ;;  %v8211_v47 = vpack.i.bf16 %v938_v40, %v937_v43  ;;  %v8213_v9 = vpack.i.bf16 %v940_v36, %v939_v26  ;;  %v1035_v28 = vsel %vm8019_vm8, %v8166_v7, 0.0  ;;  %vm13064_vm5 = vmand %vm8086_vm4, %vm7829_vm11  ;;  %v13174_v14 = vld [vmem:[#allocation105_spill] sm:$0xff] }
  0xb7   : > { %v13062_v42 = vsel %vm8205_vm6, 4294967295, %v13061_v42  ;;  %v1036_v21 = vsel %vm13064_vm5, %v8160_v35, 0.0  ;;  %v620_v36 = vsel %vm8176_vm9, %v7732_v62, 0.0  ;;  %v621_v26 = vsel %vm8013_vm1, %v7865_v8, 0.0  ;;  %vm13069_vm5 = vmand %vm8013_vm1, %vm8186_vm0 }
  0xb8   : > { %13063 = vst [vmem:[#allocation110_spill] sm:$0xff] %v13062_v42  ;;  %v622_v43 = vsel %vm8182_vm13, %v7905_v49, 0.0  ;;  %v623_v40 = vsel %vm8128_vm10, %v7951_v45, 0.0  ;;  %v8244_v19 = vpack.i.bf16 %v970_v34, %v969_v27  ;;  %v8246_v24 = vpack.i.bf16 %v972_v61, %v971_v12  ;;  %vm13070_vm4 = vmand %vm8128_vm10, %vm8205_vm6  ;;  %v8318_v12 = vpop.permute.xlu1 %5238  ;;  %5528 = vrot.lane.b32.xlu1 %v7965_v31, %s6404_s19 }
  0xb9   : > { %v8248_v29 = vpack.i.bf16 %v1034_v20, %v1033_v46  ;;  %vm8254_vm8 = vcmp.ge.s32.totalorder %v395_v32, 1  ;;  %v13065_v50 = vmov 0  ;;  %v5196_v54 = vunpack.i.h.bf16 %v7955_v10  ;;  %v8268_v32 = vpop.permute.xlu0 %5233  ;;  %5533 = vrot.lane.b32.xlu0 %v7993_v15, %s6405_s20 }
  0xba   : > { %v13066_v50 = vsel %vm8254_vm8, 4294967295, %v13065_v50  ;;  %v5195_v2 = vunpack.i.l.bf16 %v7955_v10  ;;  %v8262_v27 = vpack.i.bf16 %v1036_v21, %v1035_v28  ;;  %v5200_v34 = vunpack.i.l.bf16 %v8056_v17 }
  0xbb   : > { %13067 = vst [vmem:[#allocation111_spill] sm:$0xff] %v13066_v50  ;;  %v8270_v61 = vpack.i.bf16 %v621_v26, %v620_v36  ;;  %v8272_v46 = vpack.i.bf16 %v623_v40, %v622_v43  ;;  %v8280_v10 = vsel %vm13069_vm5, %v8001_v18, 0.0  ;;  %v5201_v28 = vunpack.i.h.bf16 %v8056_v17 }
  0xbc   : > { %v8294_v21 = vsel %vm13070_vm4, %v8160_v35, 0.0  ;;  %v5206_v6 = vunpack.i.h.bf16 %v7976_v30  ;;  %v8303_v18 = vadd.s32 192, %v6508_v1  ;;  %v8306_v36 = vadd.s32 200, %v6508_v1  ;;  %v5249_v41 = vpop.permute.xlu1 %5248  ;;  %5538 = vrot.lane.b32.xlu1 %v8033_v55, %s6405_s20 }
  0xbd   : > { %13068 = vst [vmem:[#allocation112_spill] sm:$0xff] %v8272_v46  ;;  %vm13071_vm4 = vcmask 23552   ;;  %v13072_v40 = vsel %vm12951_vm15, %v7646_v39, 0.0  ;;  %v5205_v20 = vunpack.i.l.bf16 %v7976_v30  ;;  %v5210_v58 = vunpack.i.l.bf16 %v8096_v56  ;;  %v5244_v11 = vpop.permute.xlu0 %5243 }
  0xbe   : > { %v2074_v43 = vsel %vm13071_vm4, %v7706_v63, %v5195_v2  ;;  %vm13073_vm5 = vmmov %vm13071_vm4  ;;  %v5211_v63 = vunpack.i.h.bf16 %v8096_v56  ;;  %v5216_v2 = vunpack.i.h.bf16 %v8124_v44  ;;  %v13075_v30 = vsel %vm6623_vm7, %v6669_v53, 0.0 }
  0xbf   : > { %v2075_v17 = vsel %vm13073_vm5, %v13072_v40, %v5196_v54  ;;  %vm13074_vm11 = vmmov %vm13071_vm4  ;;  %v5215_v13 = vunpack.i.l.bf16 %v8124_v44  ;;  %v5226_v39 = vunpack.i.h.bf16 %v8191_v52  ;;  %vm13077_vm12 = vcmask 48128  }
  0xc0   : > { %v2076_v26 = vsel %vm13074_vm11, %v7776_v60, %v5200_v34  ;;  %vm13076_vm5 = vmmov %vm13071_vm4  ;;  %v5225_v60 = vunpack.i.l.bf16 %v8191_v52  ;;  %v2108_v56 = vsel %vm13077_vm12, %v2075_v17, %v5206_v6  ;;  %v5221_v34 = vunpack.i.h.bf16 %v8209_v59  ;;  %v5259_v55 = vpop.permute.xlu1 %5258 }
  0xc1   : > { %v2077_v40 = vsel %vm13076_vm5, %v13075_v30, %v5201_v28  ;;  %v5220_v54 = vunpack.i.l.bf16 %v8209_v59  ;;  %v430_v28 = vrot.slane %v8321_v25, 7  ;;  %vm13078_vm5 = vmmov %vm13077_vm12  ;;  %v5230_v52 = vunpack.i.l.bf16 %v8260_v33  ;;  %v5254_v46 = vpop.permute.xlu0 %5253 }
  0xc2   : > { %v2107_v44 = vsel %vm13078_vm5, %v2074_v43, %v5205_v20  ;;  %vm13079_vm4 = vmmov %vm13078_vm5  ;;  %v5235_v31 = vunpack.i.l.bf16 %v8268_v32  ;;  %vm13081_vm12 = vcmask 72704   ;;  %v5236_v59 = vunpack.i.h.bf16 %v8268_v32 }
  0xc3   : > { %v2109_v30 = vsel %vm13079_vm4, %v2076_v26, %v5210_v58  ;;  %vm13080_vm11 = vmmov %vm13079_vm4  ;;  %v2141_v6 = vsel %vm13081_vm12, %v2108_v56, %v5216_v2  ;;  %v5245_v53 = vunpack.i.l.bf16 %v5244_v11  ;;  %v5246_v43 = vunpack.i.h.bf16 %v5244_v11 }
  0xc4   : > { %v2110_v17 = vsel %vm13080_vm11, %v2077_v40, %v5211_v63  ;;  %vm13082_vm3 = vmmov %vm13081_vm12  ;;  %vm13085_vm4 = vcmask 97280   ;;  %v5256_v2 = vunpack.i.h.bf16 %v5254_v46  ;;  %v5255_v40 = vunpack.i.l.bf16 %v5254_v46 }
  0xc5   : > { %v2140_v15 = vsel %vm13082_vm3, %v2107_v44, %v5215_v13  ;;  %vm13083_vm14 = vmmov %vm13082_vm3  ;;  %v13087_v32 = vpack.i.bf16 %v7622_v22, %v7534_v23  ;;  %v5231_v13 = vunpack.i.h.bf16 %v8260_v33  ;;  %v5241_v56 = vunpack.i.h.bf16 %v8318_v12  ;;  %v5264_v46 = vpop.permute.xlu0 %5263 }
  0xc6   : > { %v2142_v20 = vsel %vm13083_vm14, %v2109_v30, %v5225_v60  ;;  %vm13084_vm5 = vmmov %vm13082_vm3  ;;  %v2173_v58 = vsel %vm13085_vm4, %v2140_v15, %v5220_v54  ;;  %vm13089_vm3 = vcmask 121856   ;;  %v5251_v30 = vunpack.i.h.bf16 %v5249_v41 }
  0xc7   : > { %v2143_v26 = vsel %vm13084_vm5, %v2110_v17, %v5226_v39  ;;  %vm13086_vm11 = vmmov %vm13085_vm4  ;;  %5543 = vrot.lane.b32.xlu0 %v13087_v32, %s6406_s21  ;;  %v2206_v11 = vsel %vm13089_vm3, %v2173_v58, %v5235_v31  ;;  %v5240_v39 = vunpack.i.l.bf16 %v8318_v12  ;;  %vm13091_vm5 = vcmask 146432  }
  0xc8   : > { %v2174_v63 = vsel %vm13086_vm11, %v2141_v6, %v5221_v34  ;;  %vm13088_vm14 = vmmov %vm13085_vm4  ;;  %v5250_v34 = vunpack.i.l.bf16 %v5249_v41  ;;  %v2239_v44 = vsel %vm13091_vm5, %v2206_v11, %v5245_v53  ;;  %v13092_v23 = vpack.i.bf16 %v7865_v8, %v7732_v62  ;;  %v8380_v62 = vpop.permute.xlu1 %5268 }
  0xc9   : > { %v2175_v60 = vsel %vm13088_vm14, %v2142_v20, %v5230_v52  ;;  %vm13090_vm12 = vmmov %vm13089_vm3  ;;  %v5266_v22 = vunpack.i.h.bf16 %v5264_v46  ;;  %v5265_v33 = vunpack.i.l.bf16 %v5264_v46  ;;  %v5261_v31 = vunpack.i.h.bf16 %v5259_v55 }
  0xca   : > { %v2207_v54 = vsel %vm13090_vm12, %v2174_v63, %v5236_v59  ;;  %5548 = vrot.lane.b32.xlu1 %v13092_v23, %s6406_s21  ;;  %vm13093_vm4 = vmmov %vm13091_vm5  ;;  %v5260_v17 = vunpack.i.l.bf16 %v5259_v55  ;;  %vm13094_vm11 = vcmask 171008   ;;  %vm13096_vm3 = vcmask 97280   ;;  %v8389_v63 = vld [vmem:[%s6517_s17 + $0xc0] sm:$0xff] }
  0xcb   : > { %v2240_v52 = vsel %vm13093_vm4, %v2207_v54, %v5246_v43  ;;  %5553 = vrot.lane.b32.xlu0 %v8044_v38, %s6407_s22  ;;  %v2272_v12 = vsel %vm13094_vm11, %v2239_v44, %v5255_v40  ;;  %vm13095_vm14 = vmmov %vm13094_vm11  ;;  %v2176_v41 = vsel %vm13096_vm3, %v2143_v26, %v5231_v13  ;;  %v2208_v6 = vsel %vm13090_vm12, %v2175_v60, %v5240_v39  ;;  %v5274_v38 = vpop.permute.xlu0 %5273 }
  0xcc   : > { %v2273_v53 = vsel %vm13095_vm14, %v2240_v52, %v5256_v2  ;;  %vm13097_vm5 = vcmask 195584   ;;  %vm13099_vm4 = vmmov %vm13090_vm12  ;;  %vm13100_vm2 = vcmask 146432   ;;  %vm13101_vm7 = vcmask 220160   ;;  %v8417_v46 = vpop.permute.xlu1 %5278 }
  0xcd   : > { %v2305_v8 = vsel %vm13097_vm5, %v2272_v12, %v5265_v33  ;;  %vm13098_vm15 = vmmov %vm13097_vm5  ;;  %v2209_v15 = vsel %vm13099_vm4, %v2176_v41, %v5241_v56  ;;  %v2241_v20 = vsel %vm13100_vm2, %v2208_v6, %v5250_v34  ;;  %v5276_v2 = vunpack.i.h.bf16 %v5274_v38  ;;  %v8413_v56 = vld [vmem:[%s6517_s17 + $0xc8] sm:$0xff] }
  0xce   : > { %v2306_v59 = vsel %vm13098_vm15, %v2273_v53, %v5266_v22  ;;  %v2338_v43 = vsel %vm13101_vm7, %v2305_v8, 0.0  ;;  %vm13102_vm11 = vmmov %vm13101_vm7  ;;  %5558 = vrot.lane.b32.xlu1 %v8112_v51, %s6407_s22  ;;  %v5275_v40 = vunpack.i.l.bf16 %v5274_v38  ;;  %vm13104_vm15 = vcmask 171008  }
  0xcf   : > { %v2339_v58 = vsel %vm13102_vm11, %v2306_v59, 0.0  ;;  %vm13103_vm14 = vmmov %vm13100_vm2  ;;  %v2274_v13 = vsel %vm13104_vm15, %v2241_v20, %v5260_v17  ;;  %5563 = vrot.lane.b32.xlu0 %v8211_v47, %s6408_s8  ;;  %v13106_v11 = vrot.slane %v8027_v57, 7  ;;  %v13107_v39 = vrot.slane %v7951_v45, 7  ;;  %v8422_v23 = vpop.permute.xlu0 %5283 }
  0xd0   : > { %v2242_v26 = vsel %vm13103_vm14, %v2209_v15, %v5251_v30  ;;  %v2370_v32 = vpack.c.bf16 %v2339_v58, %v2338_v43  ;;  %vm13105_vm3 = vmmov %vm13104_vm15  ;;  %vm13108_vm7 = vcmp.lt.s32.totalorder %v6508_v1, 1  ;;  %v13110_v51 = vand.u32 15, %v8030_v3 }
  0xd1   : > { %v2275_v60 = vsel %vm13105_vm3, %v2242_v26, %v5261_v31  ;;  %v8404_v55 = vsel %vm13108_vm7, %v13107_v39, %v13106_v11  ;;  %v13111_v54 = vmov 0  ;;  %vm13114_vm12 = vmmov %vm13097_vm5  ;;  %vm13115_vm4 = vcmask 261120   ;;  %v13133_v26 = vld [vmem:[#allocation91_spill] sm:$0xff] }
  0xd2   : > { %13109 = vst [vmem:[#allocation113_spill] sm:$0xff] %v8404_v55  ;;  %vm8408_vm2 = vcmp.ge.s32.totalorder %v13110_v51, 1  ;;  %v2307_v34 = vsel %vm13114_vm12, %v2274_v13, %v5275_v40  ;;  %v2308_v47 = vsel %vm13097_vm5, %v2275_v60, %v5276_v2  ;;  %5047 = vmatprep.mubr.msk.bf16.mxu0 %vm13115_vm4, %v2370_v32  ;;  %v655_v44 = vrot.slane %v8321_v25, 1  ;;  %vm13116_vm14 = vmmov %vm13102_vm11  ;;  %5568 = vrot.lane.b32.xlu1 %v8213_v9, %s6408_s8  ;;  %v13138_v39 = vld [vmem:[#allocation51_spill] sm:$0xff]  ;;  %v13140_v51 = vld [vmem:[#allocation45_spill] sm:$0xff] }
  0xd3   : > { %v13112_v54 = vsel %vm8408_vm2, 4294967295, %v13111_v54  ;;  %v12374_v30 = vrot.slane %v8389_v63, 1  ;;  %v2340_v22 = vsel %vm13102_vm11, %v2307_v34, 0.0  ;;  %v2341_v33 = vsel %vm13116_vm14, %v2308_v47, 0.0  ;;  %vm13118_vm15 = vmmov %vm13108_vm7  ;;  %5573 = vrot.lane.b32.xlu0 %v8244_v19, %s6409_s14  ;;  %v8497_v40 = vpop.permute.xlu0 %5293 }
  0xd4   : > { %13113 = vst [vmem:[#allocation114_spill] sm:$0xff] %v13112_v54  ;;  %v13117_v52 = vmov %v13106_v11  ;;  %v13120_v17 = vshra.s32 %v8024_v16, 4  ;;  %v13121_v12 = vmov 0  ;;  %v2371_v53 = vpack.c.bf16 %v2341_v33, %v2340_v22  ;;  %vm13131_vm12 = vmmov %vm13115_vm4  ;;  %v13145_v33 = vld [vmem:[#allocation96_spill] sm:$0xff] }
  0xd5   : > { %v8432_v31 = vsel %vm13118_vm15, %v13117_v52, %v430_v28  ;;  %v815_v41 = vsel %vm8408_vm2, %v8404_v55, 0.0  ;;  %v431_v6 = vrot.slane %v8389_v63, 7  ;;  %v12373_v8 = vrot.slane %v8413_v56, 7 }
  0xd6   : > { %13119 = vst [vmem:[#allocation115_spill] sm:$0xff] %v8432_v31  ;;  %vm8436_vm3 = vcmp.lt.s32.totalorder %v13120_v17, 15  ;;  %v13124_v16 = vsel %vm8176_vm9, %v8062_v0, 0.0  ;;  %v13125_v9 = vsel %vm8182_vm13, %v8166_v7, 0.0  ;;  %v13126_v20 = vsel %vm8254_vm8, %v8082_v4, 0.0  ;;  %5048 = vmatmul.mubr.msk.bf16.vlgmr.msra.gmra.mxu0 %vm13131_vm12, %v2371_v53  ;;  %5578 = vrot.lane.b32.xlu1 %v8246_v24, %s6409_s14  ;;  %v13152_v17 = vld [vmem:[#allocation48_spill] sm:$0xff] }
  0xd7   : > { %v13122_v12 = vsel %vm8436_vm3, 4294967295, %v13121_v12  ;;  %v8454_v59 = vpack.i.bf16 %v8280_v10, %v13124_v16  ;;  %v8461_v15 = vpack.i.bf16 %v8294_v21, %v13125_v9  ;;  %v8468_v19 = vpack.i.bf16 %v8076_v48, %v13126_v20  ;;  %v8476_v10 = vpop.permute.xlu1 %5288  ;;  %5583 = vrot.lane.b32.xlu0 %v8248_v29, %s6410_s15  ;;  %vm13154_vm13 = vmand %vm8436_vm3, %vm8254_vm8  ;;  %v13155_v20 = vld [vmem:[#allocation35_spill] sm:$0xff]  ;;  %v13169_v4 = vld [vmem:[#allocation30_spill] sm:$0xff] }
  0xd8   : > { %13123 = vst [vmem:[#allocation116_spill] sm:$0xff] %v13122_v12  ;;  %v13127_v38 = vshra.s32 %v8030_v3, 4  ;;  %v13128_v0 = vmov 0  ;;  %vm13132_vm5 = vcmp.lt.s32.totalorder %v6508_v1, 7  ;;  %v13134_v3 = vshra.s32 %v13133_v26, 4 }
  0xd9   : > { %v8485_v58 = vsel %vm13132_vm5, %v655_v44, %v12374_v30  ;;  %v13135_v2 = vmov 0  ;;  %v8501_v13 = vpack.i.bf16 %v8432_v31, %v815_v41  ;;  %v846_v11 = vsel %vm8186_vm0, %v8160_v35, 0.0 }
  0xda   : > { %vm8472_vm7 = vcmp.lt.s32.totalorder %v13127_v38, 15  ;;  %vm8489_vm4 = vcmp.lt.s32.totalorder %v13134_v3, 15  ;;  %vm13139_vm14 = vnez %v13138_v39  ;;  %vm13141_vm15 = vnez %v13140_v51  ;;  %v8581_v3 = vpop.permute.xlu0 %5303  ;;  %5588 = vrot.lane.b32.xlu1 %v8270_v61, %s6403_s18  ;;  %v13164_v51 = vld [vmem:[#allocation22_spill] sm:$0xff] }
  0xdb   : > { %v13129_v0 = vsel %vm8472_vm7, 4294967295, %v13128_v0  ;;  %v13136_v2 = vsel %vm8489_vm4, 4294967295, %v13135_v2  ;;  %v13142_v34 = vrot.slane %v8027_v57, 1  ;;  %vm13143_vm11 = vcmp.lt.s32.totalorder %v6508_v1, 1  ;;  %5593 = vrot.lane.b32.xlu0 %v8262_v27, %s6410_s15 }
  0xdc   : > { %13130 = vst [vmem:[#allocation117_spill] sm:$0xff] %v13129_v0  ;;  %13137 = vst [vmem:[#allocation91_spill] sm:$0xff] %v13136_v2  ;;  %v8524_v22 = vsel %vm13143_vm11, %v431_v6, %v12373_v8  ;;  %v13146_v24 = vshra.s32 %v13145_v33, 4  ;;  %v13147_v52 = vmov 0  ;;  %v941_v53 = vsel %vm13154_vm13, %v8404_v55, 0.0 }
  0xdd   : > { %v8518_v47 = vsel %vm13132_vm5, %v13142_v34, %v655_v44  ;;  %vm13144_vm10 = vmmov %vm13143_vm11  ;;  %v848_v44 = vsel %vm8205_vm6, %v8485_v58, 0.0  ;;  %vm13153_vm11 = vnez %v13152_v17  ;;  %v942_v29 = vsel %vm8489_vm4, %v8432_v31, 0.0  ;;  %v13158_v17 = vld [vmem:[#allocation112_spill] sm:$0xff] }
  0xde   : > { %v8530_v35 = vsel %vm13144_vm10, %v430_v28, %v431_v6  ;;  %vm8534_vm12 = vcmp.lt.s32.totalorder %v13146_v24, 15  ;;  %vm12378_vm5 = vmand %vm8472_vm7, %vm8408_vm2  ;;  %v13150_v28 = vld [vmem:[#allocation54_spill] sm:$0xff]  ;;  %v8561_v41 = vadd.s32 208, %v6508_v1  ;;  %v8563_v6 = vpop.permute.xlu1 %5298  ;;  %v8568_v9 = vpack.i.bf16 %v846_v11, %v8166_v7  ;;  %v5314_v39 = vpop.permute.xlu0 %5313  ;;  %5598 = vrot.lane.b32.xlu1 %v13158_v17, %s6403_s18  ;;  %v13167_v31 = vld [vmem:[#allocation100_spill] sm:$0xff] }
  0xdf   : > { %v13148_v52 = vsel %vm8534_vm12, 4294967295, %v13147_v52  ;;  %vm13151_vm10 = vnez %v13150_v28  ;;  %vm13156_vm13 = vmand %vm13141_vm15, %vm13139_vm14  ;;  %v8579_v26 = vadd.s32 216, %v6508_v1  ;;  %v943_v7 = vsel %vm12378_vm5, %v8530_v35, 0.0  ;;  %5603 = vrot.lane.b32.xlu0 %v8454_v59, %s6404_s19  ;;  %v13171_v59 = vld [vmem:[#allocation26_spill] sm:$0xff] }
  0xe0   : > { %13149 = vst [vmem:[#allocation96_spill] sm:$0xff] %v13148_v52  ;;  %vm12387_vm1 = vmand %vm13153_vm11, %vm13151_vm10  ;;  %v8576_v38 = vsel %vm13156_vm13, %v13155_v20, 0.0  ;;  %v944_v11 = vsel %vm8534_vm12, %v8524_v22, 0.0  ;;  %v973_v34 = vsel %vm8436_vm3, %v8027_v57, 0.0  ;;  %v974_v33 = vsel %vm8489_vm4, %v8321_v25, 0.0  ;;  %v13157_v20 = vld [vmem:[#allocation42_spill] sm:$0xff] }
  0xe1   : > { %v8601_v24 = vpack.i.bf16 %v848_v44, %v8518_v47  ;;  %v8609_v8 = vsel %vm12387_vm1, %v13157_v20, 0.0  ;;  %v8611_v16 = vpack.i.bf16 %v942_v29, %v941_v53  ;;  %v975_v60 = vsel %vm8472_vm7, %v8389_v63, 0.0  ;;  %vm12384_vm13 = vmand %vm8489_vm4, %vm8186_vm0  ;;  %v8629_v53 = vld [vmem:[%s6517_s17 + $0xd0] sm:$0xff] }
  0xe2   : > { %v976_v20 = vsel %vm8534_vm12, %v8413_v56, 0.0  ;;  %v8631_v27 = vpop.permute.xlu1 %5308  ;;  %v8634_v44 = vpack.i.bf16 %v944_v11, %v943_v7  ;;  %v8636_v61 = vpack.i.bf16 %v974_v33, %v973_v34  ;;  %v5271_v21 = vunpack.i.h.bf16 %v8380_v62  ;;  %v5324_v54 = vpop.permute.xlu0 %5323  ;;  %5608 = vrot.lane.b32.xlu1 %v8461_v15, %s6404_s19 }
  0xe3   : > { %v5270_v30 = vunpack.i.l.bf16 %v8380_v62  ;;  %v5281_v32 = vunpack.i.h.bf16 %v8417_v46  ;;  %v5280_v28 = vunpack.i.l.bf16 %v8417_v46  ;;  %v8647_v7 = vpack.i.bf16 %v976_v20, %v975_v60  ;;  %5613 = vrot.lane.b32.xlu0 %v8468_v19, %s6405_s20 }
  0xe4   : > { %v8655_v11 = vsel %vm12384_vm13, %v8485_v58, 0.0  ;;  %v13159_v34 = vrot.slane %v8413_v56, 1  ;;  %v13160_v46 = vrot.slane %v8389_v63, 1  ;;  %vm13161_vm5 = vcmp.lt.s32.totalorder %v6508_v1, 7 }
  0xe5   : > { %v5286_v60 = vunpack.i.h.bf16 %v8422_v23  ;;  %v5285_v17 = vunpack.i.l.bf16 %v8422_v23  ;;  %v5291_v20 = vunpack.i.h.bf16 %v8476_v10  ;;  %v5290_v43 = vunpack.i.l.bf16 %v8476_v10 }
  0xe6   : > { %v8664_v33 = vsel %vm13161_vm5, %v13160_v46, %v13159_v34  ;;  %v5296_v62 = vunpack.i.h.bf16 %v8497_v40  ;;  %v5295_v29 = vunpack.i.l.bf16 %v8497_v40  ;;  %v5319_v37 = vpop.permute.xlu1 %5318  ;;  %v13162_v46 = vld [vmem:[#allocation28_spill] sm:$0xff]  ;;  %vm13166_vm13 = vcmask 23552   ;;  %5618 = vrot.lane.b32.xlu1 %v8501_v13, %s6405_s20 }
  0xe7   : > { %vm13163_vm5 = vnez %v13162_v46  ;;  %vm13168_vm1 = vmmov %vm13166_vm13  ;;  %vm13170_vm0 = vnez %v13169_v4  ;;  %v5301_v34 = vunpack.i.h.bf16 %v8563_v6  ;;  %v5300_v46 = vunpack.i.l.bf16 %v8563_v6  ;;  %v13281_v4 = vld [vmem:[#allocation47_spill] sm:$0xff] }
  0xe8   : > { %v13165_v23 = vsel %vm13163_vm5, %v13164_v51, 0.0  ;;  %v2078_v10 = vsel %vm13168_vm1, %v13167_v31, %v5270_v30  ;;  %v13172_v48 = vsel %vm13170_vm0, %v13171_v59, 0.0  ;;  %vm13173_vm4 = vmmov %vm13168_vm1  ;;  %v5306_v51 = vunpack.i.h.bf16 %v8581_v3 }
  0xe9   : > { %v2079_v55 = vsel %vm13166_vm13, %v13165_v23, %v5271_v21  ;;  %v2081_v40 = vsel %vm13173_vm4, %v13172_v48, %v5281_v32  ;;  %vm13175_vm10 = vmmov %vm13168_vm1  ;;  %v5305_v21 = vunpack.i.l.bf16 %v8581_v3  ;;  %vm13176_vm1 = vcmask 48128  }
  0xea   : > { %v2080_v2 = vsel %vm13175_vm10, %v13174_v14, %v5280_v28  ;;  %v2112_v30 = vsel %vm13176_vm1, %v2079_v55, %v5286_v60  ;;  %vm13177_vm13 = vmmov %vm13176_vm1  ;;  %vm13180_vm10 = vcmask 72704   ;;  %v5316_v6 = vunpack.i.h.bf16 %v5314_v39  ;;  %v5329_v23 = vpop.permute.xlu1 %5328 }
  0xeb   : > { %v2111_v31 = vsel %vm13177_vm13, %v2078_v10, %v5285_v17  ;;  %vm13178_vm4 = vmmov %vm13176_vm1  ;;  %v5315_v3 = vunpack.i.l.bf16 %v5314_v39  ;;  %v13182_v15 = vshra.s32 %v8303_v18, 4  ;;  %v13183_v55 = vmov 0  ;;  %v5334_v39 = vpop.permute.xlu0 %5333 }
  0xec   : > { %v2113_v48 = vsel %vm13178_vm4, %v2080_v2, %v5290_v43  ;;  %vm13179_vm14 = vmmov %vm13176_vm1  ;;  %v2144_v32 = vsel %vm13180_vm10, %v2111_v31, %v5295_v29  ;;  %v5311_v43 = vunpack.i.h.bf16 %v8631_v27  ;;  %v5310_v2 = vunpack.i.l.bf16 %v8631_v27 }
  0xed   : > { %v2114_v14 = vsel %vm13179_vm14, %v2081_v40, %v5291_v20  ;;  %vm13181_vm11 = vmmov %vm13180_vm10  ;;  %vm8706_vm0 = vcmp.ge.s32.totalorder %v13182_v15, 1  ;;  %v5326_v60 = vunpack.i.h.bf16 %v5324_v54  ;;  %v5325_v17 = vunpack.i.l.bf16 %v5324_v54 }
  0xee   : > { %v2145_v28 = vsel %vm13181_vm11, %v2112_v30, %v5296_v62  ;;  %v13184_v55 = vsel %vm8706_vm0, 4294967295, %v13183_v55  ;;  %v13186_v19 = vshra.s32 %v8306_v36, 4  ;;  %v13187_v29 = vmov 0  ;;  %vm13190_vm11 = vmmov %vm13180_vm10 }
  0xef   : > { %13185 = vst [vmem:[#allocation35_spill] sm:$0xff] %v13184_v55  ;;  %v2146_v62 = vsel %vm13190_vm11, %v2113_v48, %v5300_v46  ;;  %vm13191_vm1 = vmmov %vm13180_vm10  ;;  %vm13192_vm13 = vcmask 97280   ;;  %v13194_v54 = vshra.s32 %v8561_v41, 4  ;;  %v13195_v27 = vmov 0 }
  0xf0   : > { %vm8714_vm14 = vcmp.ge.s32.totalorder %v13186_v19, 1  ;;  %v2147_v20 = vsel %vm13191_vm1, %v2114_v14, %v5301_v34  ;;  %v2177_v10 = vsel %vm13192_vm13, %v2144_v32, %v5305_v21  ;;  %vm13193_vm4 = vmmov %vm13192_vm13  ;;  %v5321_v40 = vunpack.i.h.bf16 %v5319_v37 }
  0xf1   : > { %v13188_v29 = vsel %vm8714_vm14, 4294967295, %v13187_v29  ;;  %v2178_v59 = vsel %vm13193_vm4, %v2145_v28, %v5306_v51  ;;  %vm8726_vm10 = vcmp.ge.s32.totalorder %v13194_v54, 1  ;;  %v5320_v30 = vunpack.i.l.bf16 %v5319_v37 }
  0xf2   : > { %13189 = vst [vmem:[#allocation42_spill] sm:$0xff] %v13188_v29  ;;  %v13196_v27 = vsel %vm8726_vm10, 4294967295, %v13195_v27  ;;  %v5336_v31 = vunpack.i.h.bf16 %v5334_v39  ;;  %v5335_v15 = vunpack.i.l.bf16 %v5334_v39  ;;  %v13198_v34 = vpack.i.bf16 %v7951_v45, %v7905_v49  ;;  %v5339_v45 = vpop.permute.xlu1 %5338 }
  0xf3   : > { %13197 = vst [vmem:[#allocation112_spill] sm:$0xff] %v13196_v27  ;;  %v13199_v46 = vshra.s32 %v8579_v26, 4  ;;  %v13200_v51 = vmov 0  ;;  %vm13203_vm1 = vcmask 121856   ;;  %v5331_v48 = vunpack.i.h.bf16 %v5329_v23 }
  0xf4   : > { %5623 = vrot.lane.b32.xlu0 %v13198_v34, %s6406_s21  ;;  %v2210_v13 = vsel %vm13203_vm1, %v2177_v10, %v5315_v3  ;;  %vm13204_vm13 = vmmov %vm13203_vm1  ;;  %v5330_v14 = vunpack.i.l.bf16 %v5329_v23  ;;  %v13205_v37 = vand.u32 15, %v8303_v18  ;;  %v13206_v32 = vmov 0  ;;  %v5344_v3 = vpop.permute.xlu0 %5343 }
  0xf5   : > { %vm8736_vm11 = vcmp.ge.s32.totalorder %v13199_v46, 1  ;;  %v2211_v21 = vsel %vm13204_vm13, %v2178_v59, %v5316_v6  ;;  %vm13209_vm15 = vcmask 97280   ;;  %vm13211_vm2 = vcmask 146432   ;;  %vm13214_vm13 = vmmov %vm13203_vm1 }
  0xf6   : > { %v13201_v51 = vsel %vm8736_vm11, 4294967295, %v13200_v51  ;;  %vm8744_vm4 = vcmp.ge.s32.totalorder %v13205_v37, 1  ;;  %v2179_v49 = vsel %vm13209_vm15, %v2146_v62, %v5310_v2  ;;  %vm13210_vm5 = vmmov %vm13209_vm15  ;;  %v2243_v19 = vsel %vm13211_vm2, %v2210_v13, %v5325_v17  ;;  %v5349_v13 = vpop.permute.xlu1 %5348 }
  0xf7   : > { %13202 = vst [vmem:[#allocation22_spill] sm:$0xff] %v13201_v51  ;;  %v13207_v32 = vsel %vm8744_vm4, 4294967295, %v13206_v32  ;;  %v2180_v28 = vsel %vm13210_vm5, %v2147_v20, %v5311_v43  ;;  %vm13212_vm9 = vmmov %vm13211_vm2  ;;  %v5341_v10 = vunpack.i.h.bf16 %v5339_v45  ;;  %v5340_v6 = vunpack.i.l.bf16 %v5339_v45 }
  0xf8   : > { %13208 = vst [vmem:[#allocation100_spill] sm:$0xff] %v13207_v32  ;;  %v2244_v39 = vsel %vm13212_vm9, %v2211_v21, %v5326_v60  ;;  %v13213_v23 = vpack.i.bf16 %v8321_v25, %v8027_v57  ;;  %v5346_v59 = vunpack.i.h.bf16 %v5344_v3  ;;  %v5345_v54 = vunpack.i.l.bf16 %v5344_v3  ;;  %5633 = vrot.lane.b32.xlu0 %v8568_v9, %s6407_s22  ;;  %vm13217_vm9 = vmmov %vm13211_vm2  ;;  %v8772_v21 = vpop.permute.xlu0 %5353 }
  0xf9   : > { %v2212_v34 = vsel %vm13203_vm1, %v2179_v49, %v5320_v30  ;;  %v2213_v2 = vsel %vm13214_vm13, %v2180_v28, %v5321_v40  ;;  %vm13215_vm15 = vcmask 171008   ;;  %vm13218_vm8 = vcmask 195584  }
  0xfa   : > { %5628 = vrot.lane.b32.xlu1 %v13213_v23, %s6406_s21  ;;  %v2276_v43 = vsel %vm13215_vm15, %v2243_v19, %v5335_v15  ;;  %vm13216_vm5 = vmmov %vm13215_vm15  ;;  %v2245_v60 = vsel %vm13217_vm9, %v2212_v34, %v5330_v14  ;;  %v2246_v62 = vsel %vm13211_vm2, %v2213_v2, %v5331_v48  ;;  %v13220_v30 = vand.u32 15, %v8561_v41  ;;  %v8806_v23 = vld [vmem:[%s6517_s17 + $0xe0] sm:$0xff]  ;;  %v8817_v34 = vld [vmem:[%s6517_s17 + $0xd8] sm:$0xff] }
  0xfb   : > { %v2277_v17 = vsel %vm13216_vm5, %v2244_v39, %v5336_v31  ;;  %v2309_v20 = vsel %vm13218_vm8, %v2276_v43, %v5345_v54  ;;  %vm13219_vm4 = vmmov %vm13218_vm8  ;;  %v13221_v40 = vmov 0  ;;  %v5351_v15 = vunpack.i.h.bf16 %v5349_v13 }
  0xfc   : > { %v2310_v46 = vsel %vm13219_vm4, %v2277_v17, %v5346_v59  ;;  %vm8768_vm1 = vcmp.ge.s32.totalorder %v13220_v30, 1  ;;  %v5350_v31 = vunpack.i.l.bf16 %v5349_v13  ;;  %vm13224_vm13 = vcmask 220160   ;;  %vm13226_vm8 = vmmov %vm13216_vm5  ;;  %5643 = vrot.lane.b32.xlu0 %v8611_v16, %s6408_s8  ;;  %v8808_v16 = vpop.permute.xlu1 %5358  ;;  %v8820_v43 = vpop.permute.xlu0 %5363 }
  0xfd   : > { %v13222_v40 = vsel %vm8768_vm1, 4294967295, %v13221_v40  ;;  %v2342_v9 = vsel %vm13224_vm13, %v2309_v20, 0.0  ;;  %vm13225_vm15 = vmmov %vm13224_vm13  ;;  %v2278_v14 = vsel %vm13216_vm5, %v2245_v60, %v5340_v6  ;;  %v2279_v37 = vsel %vm13226_vm8, %v2246_v62, %v5341_v10 }
  0xfe   : > { %13223 = vst [vmem:[#allocation26_spill] sm:$0xff] %v13222_v40  ;;  %v2343_v48 = vsel %vm13225_vm15, %v2310_v46, 0.0  ;;  %5638 = vrot.lane.b32.xlu1 %v8601_v24, %s6407_s22  ;;  %v13227_v49 = vand.u32 15, %v8306_v36  ;;  %v13228_v28 = vmov 0  ;;  %vm13231_vm9 = vcmask 195584   ;;  %vm12409_vm15 = vmand %vm8534_vm12, %vm8205_vm6 }
  0xff   : > { %v2372_v45 = vpack.c.bf16 %v2343_v48, %v2342_v9  ;;  %v2311_v19 = vsel %vm13231_vm9, %v2278_v14, %v5350_v31  ;;  %vm13232_vm2 = vmmov %vm13231_vm9  ;;  %v624_v3 = vsel %vm8706_vm0, %v8027_v57, 0.0  ;;  %v13233_v24 = vrot.slane %v8629_v53, 1 }
 0x100   : > { %vm8782_vm4 = vcmp.lt.s32.totalorder %v13227_v49, 15  ;;  %v2312_v39 = vsel %vm13232_vm2, %v2279_v37, %v5351_v15  ;;  %v13234_v10 = vrot.slane %v8413_v56, 1  ;;  %vm13235_vm13 = vcmp.lt.s32.totalorder %v6508_v1, 7  ;;  %5653 = vrot.lane.b32.xlu0 %v8636_v61, %s6409_s14 }
 0x101   : > { %v13229_v28 = vsel %vm8782_vm4, 4294967295, %v13228_v28  ;;  %vm13236_vm5 = vcmask 261120   ;;  %vm13237_vm8 = vcmask 220160   ;;  %v625_v54 = vsel %vm8714_vm14, %v8321_v25, 0.0  ;;  %vm12410_vm2 = vmand %vm8714_vm14, %vm8782_vm4 }
 0x102   : > { %13230 = vst [vmem:[#allocation105_spill] sm:$0xff] %v13229_v28  ;;  %v8799_v6 = vsel %vm13235_vm13, %v13234_v10, %v13233_v24  ;;  %5051 = vmatprep.mubr.msk.bf16.mxu0 %vm13236_vm5, %v2372_v45  ;;  %v2344_v57 = vsel %vm13237_vm8, %v2311_v19, 0.0  ;;  %vm13238_vm9 = vmmov %vm13237_vm8  ;;  %v433_v2 = vrot.slane %v8629_v53, 7  ;;  %v1039_v60 = vsel %vm8472_vm7, %v8664_v33, 0.0  ;;  %5648 = vrot.lane.b32.xlu1 %v8634_v44, %s6408_s8  ;;  %v8869_v45 = vpop.permute.xlu1 %5368  ;;  %v8891_v19 = vpop.permute.xlu0 %5373  ;;  %v9352_v28 = vld [vmem:[%s6517_s17 + $0xf8] sm:$0xff] }
 0x103   : > { %v2345_v59 = vsel %vm13238_vm9, %v2312_v39, 0.0  ;;  %v626_v62 = vsel %vm8726_vm10, %v8389_v63, 0.0  ;;  %v13239_v25 = vand.u32 15, %v8579_v26  ;;  %v13240_v20 = vmov 0 }
 0x104   : > { %v2373_v17 = vpack.c.bf16 %v2345_v59, %v2344_v57  ;;  %v1040_v46 = vsel %vm12409_vm15, %v8799_v6, 0.0  ;;  %v627_v13 = vsel %vm8736_vm11, %v8413_v56, 0.0  ;;  %v659_v30 = vrot.slane %v8817_v34, 1 }
 0x105   : > { %vm8834_vm13 = vcmp.lt.s32.totalorder %v13239_v25, 15  ;;  %v12417_v15 = vrot.slane %v8806_v23, 1  ;;  %v13243_v44 = vsel %vm8436_vm3, %v8518_v47, 0.0  ;;  %vm13244_vm8 = vnez %v13207_v32 }
 0x106   : > { %v13241_v20 = vsel %vm8834_vm13, 4294967295, %v13240_v20  ;;  %5052 = vmatmul.mubr.msk.bf16.gmra.mxu0 %vm13236_vm5, %v2373_v17  ;;  %v5662_v31 = vpack.i.bf16 %v8655_v11, %v13243_v44  ;;  %v817_v9 = vsel %vm13244_vm8, %v8530_v35, 0.0  ;;  %v434_v48 = vrot.slane %v8817_v34, 7  ;;  %5658 = vrot.lane.b32.xlu1 %v8647_v7, %s6409_s14  ;;  %v8937_v25 = vpop.permute.xlu1 %5378 }
 0x107   : > { %13242 = vst [vmem:[#allocation118_spill] sm:$0xff] %v13241_v20  ;;  %v13245_v14 = vshra.s32 %v8303_v18, 4  ;;  %v13246_v37 = vmov 0  ;;  %v785_v61 = vsel %vm8706_vm0, %v8518_v47, 0.0  ;;  %v786_v11 = vsel %vm12410_vm2, %v8485_v58, 0.0  ;;  %v13387_v20 = vld [vmem:[#allocation79_spill] sm:$0xff] }
 0x108   : > { %v13249_v18 = vrot.slane %v8413_v56, 7  ;;  %vm13250_vm15 = vcmp.lt.s32.totalorder %v6508_v1, 1  ;;  %v435_v47 = vrot.slane %v8806_v23, 7  ;;  %v5667_v39 = vpack.i.bf16 %v625_v54, %v624_v3  ;;  %5663 = vrot.lane.b32.xlu0 %v5662_v31, %s6410_s15 }
 0x109   : > { %vm8865_vm9 = vcmp.lt.s32.totalorder %v13245_v14, 15  ;;  %v5672_v24 = vpack.i.bf16 %v1040_v46, %v1039_v60  ;;  %v5677_v10 = vpack.i.bf16 %v627_v13, %v626_v62  ;;  %v13252_v58 = vshra.s32 %v8561_v41, 4  ;;  %v13264_v13 = vld [vmem:[#allocation73_spill] sm:$0xff] }
 0x10a   : > { %v13247_v37 = vsel %vm8865_vm9, 4294967295, %v13246_v37  ;;  %v8888_v49 = vsel %vm13250_vm15, %v13249_v18, %v433_v2  ;;  %v13253_v57 = vmov 0  ;;  %v787_v59 = vsel %vm8726_vm10, %v8664_v33, 0.0  ;;  %5668 = vrot.lane.b32.xlu1 %v5667_v39, %s6403_s18 }
 0x10b   : > { %13248 = vst [vmem:[#allocation119_spill] sm:$0xff] %v13247_v37  ;;  %13251 = vst [vmem:[#allocation120_spill] sm:$0xff] %v8888_v49  ;;  %vm8895_vm2 = vcmp.lt.s32.totalorder %v13252_v58, 15  ;;  %v8905_v17 = vpack.i.bf16 %v8524_v22, %v817_v9  ;;  %vm13256_vm15 = vcmp.lt.s32.totalorder %v6508_v1, 7  ;;  %v13257_v41 = vshra.s32 %v8306_v36, 4 }
 0x10c   : > { %v13254_v57 = vsel %vm8895_vm2, 4294967295, %v13253_v57  ;;  %v8911_v3 = vsel %vm13256_vm15, %v659_v30, %v12417_v15  ;;  %v13258_v54 = vmov 0  ;;  %v5682_v7 = vpack.i.bf16 %v786_v11, %v785_v61  ;;  %vm13261_vm15 = vmand %vm8736_vm11, %vm8834_vm13  ;;  %5673 = vrot.lane.b32.xlu0 %v5672_v24, %s6410_s15 }
 0x10d   : > { %13255 = vst [vmem:[#allocation121_spill] sm:$0xff] %v13254_v57  ;;  %vm8915_vm5 = vcmp.lt.s32.totalorder %v13257_v41, 15  ;;  %v788_v60 = vsel %vm13261_vm15, %v8799_v6, 0.0  ;;  %vm13262_vm12 = vcmp.lt.s32.totalorder %v6508_v1, 1  ;;  %v819_v62 = vsel %vm8768_vm1, %v8888_v49, 0.0  ;;  %vm12426_vm6 = vmand %vm8895_vm2, %vm8768_vm1 }
 0x10e   : > { %v13259_v54 = vsel %vm8915_vm5, 4294967295, %v13258_v54  ;;  %v8932_v36 = vsel %vm13262_vm12, %v433_v2, %v434_v48  ;;  %v850_v46 = vsel %vm8782_vm4, %v8799_v6, 0.0  ;;  %v13265_v44 = vrot.slane %v13264_v13, 7  ;;  %vm13266_vm7 = vmmov %vm13262_vm12  ;;  %v8962_v6 = vpop.permute.xlu0 %5383  ;;  %5678 = vrot.lane.b32.xlu1 %v5677_v10, %s6403_s18 }
 0x10f   : > { %13260 = vst [vmem:[#allocation122_spill] sm:$0xff] %v13259_v54  ;;  %13263 = vst [vmem:[#allocation123_spill] sm:$0xff] %v8932_v36  ;;  %v13268_v9 = vshra.s32 %v8579_v26, 4  ;;  %v13269_v14 = vmov 0  ;;  %v13272_v61 = vrot.slane %v8629_v53, 1  ;;  %v852_v26 = vsel %vm8834_vm13, %v8911_v3, 0.0 }
 0x110   : > { %v8946_v31 = vsel %vm13266_vm7, %v435_v47, %v13265_v44  ;;  %vm13267_vm15 = vmmov %vm13266_vm7  ;;  %vm13273_vm7 = vcmp.lt.s32.totalorder %v6508_v1, 7  ;;  %v946_v18 = vsel %vm8915_vm5, %v8932_v36, 0.0  ;;  %v978_v24 = vsel %vm8915_vm5, %v8817_v34, 0.0  ;;  %5683 = vrot.lane.b32.xlu0 %v5682_v7, %s6404_s19  ;;  %v13283_v7 = vld [vmem:[#allocation41_spill] sm:$0xff]  ;;  %v13394_v54 = vld [vmem:[#allocation19_spill] sm:$0xff] }
 0x111   : > { %v8950_v2 = vsel %vm13267_vm15, %v434_v48, %v435_v47  ;;  %vm8954_vm12 = vcmp.lt.s32.totalorder %v13268_v9, 15  ;;  %v8968_v11 = vsel %vm13273_vm7, %v13272_v61, %v659_v30  ;;  %vm13274_vm15 = vmand %vm8865_vm9, %vm13244_vm8  ;;  %v5687_v47 = vpack.i.bf16 %v788_v60, %v787_v59 }
 0x112   : > { %v13270_v14 = vsel %vm8954_vm12, 4294967295, %v13269_v14  ;;  %v945_v48 = vsel %vm13274_vm15, %v8888_v49, 0.0  ;;  %v8984_v30 = vpack.i.bf16 %v8932_v36, %v819_v62  ;;  %v947_v13 = vsel %vm12426_vm6, %v8950_v2, 0.0  ;;  %v9007_v62 = vpop.permute.xlu1 %5388  ;;  %v5394_v52 = vpop.permute.xlu0 %5393 }
 0x113   : > { %13271 = vst [vmem:[#allocation73_spill] sm:$0xff] %v13270_v14  ;;  %v948_v39 = vsel %vm8954_vm12, %v8946_v31, 0.0  ;;  %v977_v59 = vsel %vm8865_vm9, %v8629_v53, 0.0  ;;  %v5355_v60 = vunpack.i.l.bf16 %v8772_v21  ;;  %v9010_v44 = vpack.i.bf16 %v850_v46, %v8664_v33  ;;  %v13278_v46 = vld [vmem:[#allocation37_spill] sm:$0xff]  ;;  %5688 = vrot.lane.b32.xlu1 %v5687_v47, %s6404_s19 }
 0x114   : > { %v9013_v9 = vpack.i.bf16 %v852_v26, %v8968_v11  ;;  %v9015_v61 = vpack.i.bf16 %v946_v18, %v945_v48  ;;  %v5356_v15 = vunpack.i.h.bf16 %v8772_v21  ;;  %v5361_v41 = vunpack.i.h.bf16 %v8808_v16  ;;  %v9030_v26 = vld [vmem:[%s6517_s17 + $0xe8] sm:$0xff]  ;;  %5693 = vrot.lane.b32.xlu0 %v8905_v17, %s6405_s20 }
 0x115   : > { %v5360_v58 = vunpack.i.l.bf16 %v8808_v16  ;;  %v5365_v0 = vunpack.i.l.bf16 %v8820_v43  ;;  %v9022_v42 = vpack.i.bf16 %v948_v39, %v947_v13  ;;  %v9024_v33 = vpack.i.bf16 %v978_v24, %v977_v59 }
 0x116   : > { %v5366_v16 = vunpack.i.h.bf16 %v8820_v43  ;;  %v5371_v48 = vunpack.i.h.bf16 %v8869_v45  ;;  %v5370_v10 = vunpack.i.l.bf16 %v8869_v45  ;;  %v5375_v18 = vunpack.i.l.bf16 %v8891_v19  ;;  %v5399_v59 = vpop.permute.xlu1 %5398  ;;  %v13276_v43 = vld [vmem:[#allocation44_spill] sm:$0xff]  ;;  %v5404_v24 = vpop.permute.xlu0 %5403 }
 0x117   : > { %vm13275_vm7 = vcmask 23552   ;;  %v5376_v39 = vunpack.i.h.bf16 %v8891_v19  ;;  %v9045_v21 = vadd.s32 240, %v6508_v1  ;;  %vm13277_vm15 = vnez %v13276_v43  ;;  %5698 = vrot.lane.b32.xlu1 %v8984_v30, %s6405_s20 }
 0x118   : > { %v2082_v13 = vsel %vm13275_vm7, %v8576_v38, %v5355_v60  ;;  %v13279_v12 = vsel %vm13277_vm15, %v13278_v46, 0.0  ;;  %vm13280_vm6 = vmmov %vm13275_vm7  ;;  %vm13282_vm3 = vnez %v13281_v4  ;;  %vm13287_vm14 = vcmask 48128   ;;  %v13297_v4 = vld [vmem:[#allocation60_spill] sm:$0xff] }
 0x119   : > { %v2083_v45 = vsel %vm13280_vm6, %v13279_v12, %v5356_v15  ;;  %v13284_v49 = vsel %vm13282_vm3, %v13283_v7, 0.0  ;;  %vm13285_vm11 = vmmov %vm13280_vm6  ;;  %v2115_v60 = vsel %vm13287_vm14, %v2082_v13, %v5365_v0  ;;  %v5381_v36 = vunpack.i.h.bf16 %v8937_v25  ;;  %v13293_v7 = vld [vmem:[#allocation59_spill] sm:$0xff] }
 0x11a   : > { %v2085_v38 = vsel %vm13285_vm11, %v13284_v49, %v5361_v41  ;;  %vm13286_vm7 = vmmov %vm13280_vm6  ;;  %v5380_v43 = vunpack.i.l.bf16 %v8937_v25  ;;  %v5386_v46 = vunpack.i.h.bf16 %v8962_v6  ;;  %v5385_v12 = vunpack.i.l.bf16 %v8962_v6  ;;  %v5409_v13 = vpop.permute.xlu1 %5408  ;;  %v13295_v6 = vld [vmem:[#allocation10_spill] sm:$0xff] }
 0x11b   : > { %v2084_v19 = vsel %vm13286_vm7, %v8609_v8, %v5360_v58  ;;  %vm13288_vm6 = vmmov %vm13287_vm14  ;;  %vm13291_vm7 = vcmask 72704   ;;  %v5396_v25 = vunpack.i.h.bf16 %v5394_v52  ;;  %v5395_v58 = vunpack.i.l.bf16 %v5394_v52 }
 0x11c   : > { %v2116_v15 = vsel %vm13288_vm6, %v2083_v45, %v5366_v16  ;;  %vm13289_vm3 = vmmov %vm13288_vm6  ;;  %v2148_v8 = vsel %vm13291_vm7, %v2115_v60, %v5375_v18  ;;  %vm13294_vm15 = vnez %v13293_v7  ;;  %v5406_v18 = vunpack.i.h.bf16 %v5404_v24 }
 0x11d   : > { %v2117_v49 = vsel %vm13289_vm3, %v2084_v19, %v5370_v10  ;;  %vm13290_vm11 = vmmov %vm13289_vm3  ;;  %v13296_v47 = vsel %vm13294_vm15, %v13295_v6, 0.0  ;;  %v5391_v10 = vunpack.i.h.bf16 %v9007_v62  ;;  %v5405_v45 = vunpack.i.l.bf16 %v5404_v24  ;;  %v13303_v24 = vld [vmem:[#allocation52_spill] sm:$0xff] }
 0x11e   : > { %v2118_v41 = vsel %vm13290_vm11, %v2085_v38, %v5371_v48  ;;  %vm13292_vm14 = vmmov %vm13291_vm7  ;;  %v9077_v16 = vpack.i.bf16 %v13297_v4, %v13296_v47  ;;  %v5390_v48 = vunpack.i.l.bf16 %v9007_v62  ;;  %v5414_v38 = vpop.permute.xlu0 %5413  ;;  %vm13300_vm11 = vcmask 97280  }
 0x11f   : > { %v2149_v0 = vsel %vm13292_vm14, %v2116_v15, %v5376_v39  ;;  %vm13298_vm3 = vmmov %vm13291_vm7  ;;  %v2181_v52 = vsel %vm13300_vm11, %v2148_v8, %v5385_v12  ;;  %v5401_v4 = vunpack.i.h.bf16 %v5399_v59  ;;  %v5400_v60 = vunpack.i.l.bf16 %v5399_v59  ;;  %v13308_v12 = vld [vmem:[#allocation50_spill] sm:$0xff] }
 0x120   : > { %v2150_v17 = vsel %vm13298_vm3, %v2117_v49, %v5380_v43  ;;  %vm13299_vm6 = vmmov %vm13298_vm3  ;;  %v5416_v15 = vunpack.i.h.bf16 %v5414_v38  ;;  %v5415_v6 = vunpack.i.l.bf16 %v5414_v38  ;;  %v13302_v62 = vpack.i.bf16 %v8413_v56, %v8389_v63  ;;  %v5419_v63 = vpop.permute.xlu1 %5418 }
 0x121   : > { %v2151_v39 = vsel %vm13299_vm6, %v2118_v41, %v5381_v36  ;;  %vm13301_vm7 = vmmov %vm13300_vm11  ;;  %v13304_v43 = vshra.s32 %v13303_v24, 4  ;;  %v13305_v36 = vmov 0  ;;  %v13310_v49 = vmov 0 }
 0x122   : > { %v2182_v19 = vsel %vm13301_vm7, %v2149_v0, %v5386_v46  ;;  %5703 = vrot.lane.b32.xlu0 %v13302_v62, %s6406_s21  ;;  %v13309_v46 = vshra.s32 %v13308_v12, 4  ;;  %vm13313_vm6 = vcmask 121856   ;;  %v5411_v41 = vunpack.i.h.bf16 %v5409_v13  ;;  %vm13315_vm10 = vmmov %vm13301_vm7  ;;  %v5424_v62 = vpop.permute.xlu0 %5423 }
 0x123   : > { %vm9093_vm14 = vcmp.ge.s32.totalorder %v13304_v43, 1  ;;  %v2214_v30 = vsel %vm13313_vm6, %v2181_v52, %v5395_v58  ;;  %vm13314_vm11 = vmmov %vm13313_vm6  ;;  %v5410_v8 = vunpack.i.l.bf16 %v5409_v13  ;;  %v2183_v56 = vsel %vm13301_vm7, %v2150_v17, %v5390_v48 }
 0x124   : > { %v13306_v36 = vsel %vm9093_vm14, 4294967295, %v13305_v36  ;;  %vm9099_vm3 = vcmp.ge.s32.totalorder %v13309_v46, 1  ;;  %v2215_v59 = vsel %vm13314_vm11, %v2182_v19, %v5396_v25  ;;  %v2184_v0 = vsel %vm13315_vm10, %v2151_v39, %v5391_v10  ;;  %vm13319_vm11 = vmmov %vm13313_vm6  ;;  %v5429_v46 = vpop.permute.xlu1 %5428 }
 0x125   : > { %13307 = vst [vmem:[#allocation37_spill] sm:$0xff] %v13306_v36  ;;  %v13311_v49 = vsel %vm9099_vm3, 4294967295, %v13310_v49  ;;  %vm13316_vm1 = vcmask 146432   ;;  %v5421_v43 = vunpack.i.h.bf16 %v5419_v63  ;;  %v5420_v12 = vunpack.i.l.bf16 %v5419_v63 }
 0x126   : > { %13312 = vst [vmem:[#allocation41_spill] sm:$0xff] %v13311_v49  ;;  %v2247_v47 = vsel %vm13316_vm1, %v2214_v30, %v5405_v45  ;;  %vm13317_vm0 = vmmov %vm13316_vm1  ;;  %v13318_v58 = vpack.i.bf16 %v8817_v34, %v8629_v53  ;;  %v5426_v25 = vunpack.i.h.bf16 %v5424_v62  ;;  %v5425_v52 = vunpack.i.l.bf16 %v5424_v62  ;;  %5713 = vrot.lane.b32.xlu0 %v9010_v44, %s6407_s22 }
 0x127   : > { %v2248_v38 = vsel %vm13317_vm0, %v2215_v59, %v5406_v18  ;;  %v2216_v13 = vsel %vm13313_vm6, %v2183_v56, %v5400_v60  ;;  %v2217_v48 = vsel %vm13319_vm11, %v2184_v0, %v5401_v4  ;;  %vm13320_vm7 = vcmask 171008   ;;  %vm13322_vm1 = vmmov %vm13317_vm0  ;;  %v9123_v59 = vpop.permute.xlu0 %5433 }
 0x128   : > { %5708 = vrot.lane.b32.xlu1 %v13318_v58, %s6406_s21  ;;  %v2280_v10 = vsel %vm13320_vm7, %v2247_v47, %v5415_v6  ;;  %vm13321_vm10 = vmmov %vm13320_vm7  ;;  %v2249_v18 = vsel %vm13317_vm0, %v2216_v13, %v5410_v8  ;;  %v2250_v17 = vsel %vm13322_vm1, %v2217_v48, %v5411_v41  ;;  %vm13323_vm8 = vcmask 195584   ;;  %v13328_v8 = vld [vmem:[#allocation5_spill] sm:$0xff]  ;;  %v9160_v58 = vpop.permute.xlu1 %5438 }
 0x129   : > { %v2281_v45 = vsel %vm13321_vm10, %v2248_v38, %v5416_v15  ;;  %v2313_v39 = vsel %vm13323_vm8, %v2280_v10, %v5425_v52  ;;  %vm13324_vm15 = vmmov %vm13323_vm8  ;;  %v5431_v30 = vunpack.i.h.bf16 %v5429_v46  ;;  %v5430_v60 = vunpack.i.l.bf16 %v5429_v46 }
 0x12a   : > { %v2314_v19 = vsel %vm13324_vm15, %v2281_v45, %v5426_v25  ;;  %vm13325_vm6 = vcmask 220160   ;;  %vm12443_vm7 = vmand %vm8915_vm5, %vm8782_vm4  ;;  %v2282_v44 = vsel %vm13321_vm10, %v2249_v18, %v5420_v12  ;;  %v13329_v63 = vrot.slane %v13328_v8, 1  ;;  %5723 = vrot.lane.b32.xlu0 %v9015_v61, %s6408_s8  ;;  %v13354_v8 = vld [vmem:[#allocation72_spill] sm:$0xff] }
 0x12b   : > { %v2346_v4 = vsel %vm13325_vm6, %v2313_v39, 0.0  ;;  %vm13326_vm11 = vmmov %vm13325_vm6  ;;  %v13330_v56 = vrot.slane %v9030_v26, 1  ;;  %vm13331_vm8 = vcmp.lt.s32.totalorder %v6508_v1, 7  ;;  %v2315_v47 = vsel %vm13324_vm15, %v2282_v44, %v5430_v60  ;;  %v9174_v48 = vpop.permute.xlu0 %5443 }
 0x12c   : > { %v2347_v15 = vsel %vm13326_vm11, %v2314_v19, 0.0  ;;  %vm13327_vm0 = vmmov %vm13321_vm10  ;;  %5718 = vrot.lane.b32.xlu1 %v9013_v9, %s6407_s22  ;;  %v13334_v9 = vrot.slane %v8806_v23, 1  ;;  %v373_v12 = vshra.s32 %v9045_v21, 4  ;;  %vm13336_vm10 = vcmask 261120  }
 0x12d   : > { %v2283_v6 = vsel %vm13327_vm0, %v2250_v17, %v5421_v43  ;;  %v2374_v41 = vpack.c.bf16 %v2347_v15, %v2346_v4  ;;  %v9141_v0 = vsel %vm13331_vm8, %v13330_v56, %v13329_v63  ;;  %vm13332_vm1 = vmmov %vm13324_vm15  ;;  %v13333_v62 = vmov %v13330_v56  ;;  %v13350_v15 = vld [vmem:[#allocation55_spill] sm:$0xff]  ;;  %v13356_v63 = vld [vmem:[#allocation70_spill] sm:$0xff] }
 0x12e   : > { %v2316_v38 = vsel %vm13332_vm1, %v2283_v6, %v5431_v30  ;;  %vm13335_vm6 = vmmov %vm13331_vm8  ;;  %vm13337_vm0 = vcmask 220160   ;;  %v1041_v52 = vsel %vm8865_vm9, %v8968_v11, 0.0  ;;  %v1042_v13 = vsel %vm12443_vm7, %v8911_v3, 0.0  ;;  %5733 = vrot.lane.b32.xlu0 %v9024_v33, %s6409_s14  ;;  %v9219_v6 = vpop.permute.xlu1 %5448  ;;  %v13352_v33 = vld [vmem:[#allocation11_spill] sm:$0xff] }
 0x12f   : > { %v9153_v43 = vsel %vm13335_vm6, %v13334_v9, %v13333_v62  ;;  %vm12442_vm11 = vmand %vm8954_vm12, %vm8834_vm13  ;;  %5055 = vmatprep.mubr.msk.bf16.mxu0 %vm13336_vm10, %v2374_v41  ;;  %v2348_v61 = vsel %vm13337_vm0, %v2315_v47, 0.0  ;;  %v13339_v45 = vsel %vm8895_vm2, %v8806_v23, 0.0  ;;  %v13340_v18 = vsel %vm8954_vm12, %v9030_v26, 0.0  ;;  %v9230_v56 = vpop.permute.xlu0 %5453  ;;  %v13358_v62 = vld [vmem:[#allocation75_spill] sm:$0xff] }
 0x130   : > { %vm13338_vm8 = vmmov %vm13337_vm0  ;;  %v5737_v17 = vpack.i.bf16 %v13340_v18, %v13339_v45  ;;  %5728 = vrot.lane.b32.xlu1 %v9022_v42, %s6408_s8  ;;  %v628_v39 = vsel %vm9093_vm14, %v8629_v53, 0.0  ;;  %v629_v19 = vsel %vm9099_vm3, %v8817_v34, 0.0  ;;  %v1043_v46 = vsel %vm8895_vm2, %v9153_v43, 0.0  ;;  %v13345_v34 = vld [vmem:[#allocation7_spill] sm:$0xff]  ;;  %v13374_v18 = vld [vmem:[#allocation66_spill] sm:$0xff] }
 0x131   : > { %v2349_v25 = vsel %vm13338_vm8, %v2316_v38, 0.0  ;;  %v1044_v30 = vsel %vm12442_vm11, %v9141_v0, 0.0  ;;  %vm13341_vm15 = vmmov %vm13336_vm10  ;;  %v5742_v42 = vpack.i.bf16 %v1042_v13, %v1041_v52  ;;  %vm9204_vm1 = vcmp.ge.s32.totalorder %v373_v12, 1 }
 0x132   : > { %v2375_v10 = vpack.c.bf16 %v2349_v25, %v2348_v61  ;;  %v13342_v53 = vmov 0  ;;  %v13346_v60 = vshra.s32 %v13345_v34, 4  ;;  %v13347_v4 = vmov 0 }
 0x133   : > { %v13343_v53 = vsel %vm9204_vm1, 4294967295, %v13342_v53  ;;  %vm13351_vm10 = vnez %v13350_v15  ;;  %v403_v44 = vand.u32 15, %v13303_v24  ;;  %vm13353_vm8 = vnez %v13352_v33  ;;  %v13360_v24 = vld [vmem:[#allocation71_spill] sm:$0xff]  ;;  %5743 = vrot.lane.b32.xlu0 %v5742_v42, %s6410_s15 }
 0x134   : > { %5056 = vmatmul.mubr.msk.bf16.gmra.mxu0 %vm13341_vm15, %v2375_v10  ;;  %13344 = vst [vmem:[#allocation10_spill] sm:$0xff] %v13343_v53  ;;  %vm9210_vm6 = vcmp.ge.s32.totalorder %v13346_v60, 1  ;;  %v405_v41 = vand.u32 15, %v9045_v21  ;;  %vm13355_vm11 = vnez %v13354_v8  ;;  %vm13357_vm7 = vnez %v13356_v63  ;;  %5738 = vrot.lane.b32.xlu1 %v5737_v17, %s6409_s14  ;;  %vm13365_vm13 = vmand %vm9099_vm3, %vm13351_vm10  ;;  %v9270_v10 = vpop.permute.xlu1 %5458  ;;  %v13381_v60 = vld [vmem:[#allocation63_spill] sm:$0xff] }
 0x135   : > { %v13348_v4 = vsel %vm9210_vm6, 4294967295, %v13347_v4  ;;  %vm12458_vm15 = vmand %vm9210_vm6, %vm13353_vm8  ;;  %v5747_v47 = vpack.i.bf16 %v629_v19, %v628_v39  ;;  %v5752_v38 = vpack.i.bf16 %v1044_v30, %v1043_v46  ;;  %vm13359_vm0 = vnez %v13358_v62  ;;  %v13376_v39 = vld [vmem:[#allocation64_spill] sm:$0xff]  ;;  %v13377_v19 = vld [vmem:[#allocation67_spill] sm:$0xff] }
 0x136   : > { %13349 = vst [vmem:[#allocation60_spill] sm:$0xff] %v13348_v4  ;;  %vm13361_vm12 = vnez %v13360_v24  ;;  %v630_v21 = vsel %vm9204_vm1, %v8806_v23, 0.0  ;;  %v631_v9 = vsel %vm9210_vm6, %v9030_v26, 0.0  ;;  %v789_v61 = vsel %vm9093_vm14, %v8968_v11, 0.0  ;;  %v13379_v30 = vld [vmem:[#allocation53_spill] sm:$0xff]  ;;  %vm13380_vm6 = vmand %vm13357_vm7, %vm13355_vm11 }
 0x137   : > { %vm9246_vm2 = vcmp.lt.s32.totalorder %v373_v12, 15  ;;  %v13362_v25 = vmov 0  ;;  %v790_v52 = vsel %vm13365_vm13, %v8911_v3, 0.0  ;;  %v791_v13 = vsel %vm9204_vm1, %v9153_v43, 0.0  ;;  %v13373_v3 = vld [vmem:[#allocation57_spill] sm:$0xff]  ;;  %vm13382_vm4 = vmand %vm13361_vm12, %vm13359_vm0  ;;  %5753 = vrot.lane.b32.xlu0 %v5752_v38, %s6410_s15 }
 0x138   : > { %v13363_v25 = vsel %vm9246_vm2, 4294967295, %v13362_v25  ;;  %v792_v11 = vsel %vm12458_vm15, %v9141_v0, 0.0  ;;  %vm9266_vm5 = vcmp.ge.s32.totalorder %v403_v44, 1  ;;  %v13366_v12 = vmov 0  ;;  %5748 = vrot.lane.b32.xlu1 %v5747_v47, %s6403_s18 }
 0x139   : > { %13364 = vst [vmem:[#allocation52_spill] sm:$0xff] %v13363_v25  ;;  %v13367_v12 = vsel %vm9266_vm5, 4294967295, %v13366_v12  ;;  %vm9272_vm9 = vcmp.ge.s32.totalorder %v405_v41, 1  ;;  %v13369_v45 = vmov 0  ;;  %vm13372_vm13 = vnez %v13293_v7  ;;  %v9298_v41 = vpop.permute.xlu0 %5463 }
 0x13a   : > { %13368 = vst [vmem:[#allocation50_spill] sm:$0xff] %v13367_v12  ;;  %v13370_v45 = vsel %vm9272_vm9, 4294967295, %v13369_v45  ;;  %vm13375_vm3 = vnez %v13374_v18  ;;  %vm13378_vm15 = vnez %v13377_v19  ;;  %v580_v42 = vsel %vm13380_vm6, %v13379_v30, 0.0  ;;  %vm13393_vm0 = vmand %vm9246_vm2, %vm9272_vm9 }
 0x13b   : > { %13371 = vst [vmem:[#allocation5_spill] sm:$0xff] %v13370_v45  ;;  %v581_v17 = vsel %vm13375_vm3, %v13373_v3, 0.0  ;;  %v583_v46 = vsel %vm13378_vm15, %v13376_v39, 0.0  ;;  %v582_v44 = vsel %vm13382_vm4, %v13381_v60, 0.0  ;;  %v5757_v3 = vpack.i.bf16 %v631_v9, %v630_v21  ;;  %vm13388_vm4 = vmand %vm13372_vm13, %vm9266_vm5  ;;  %v13389_v9 = vld [vmem:[#allocation78_spill] sm:$0xff] }
 0x13c   : > { %v5762_v39 = vpack.i.bf16 %v790_v52, %v789_v61  ;;  %v5767_v30 = vpack.i.bf16 %v792_v11, %v791_v13  ;;  %v13383_v57 = vshra.s32 %v13345_v34, 4  ;;  %v13384_v14 = vmov 0  ;;  %v9323_v34 = vpop.permute.xlu1 %5468  ;;  %v13390_v61 = vld [vmem:[#allocation56_spill] sm:$0xff] }
 0x13d   : > { %v821_v60 = vsel %vm9266_vm5, %v8950_v2, 0.0  ;;  %v823_v47 = vsel %vm9272_vm9, %v13387_v20, 0.0  ;;  %v5782_v21 = vpack.i.bf16 %v9030_v26, %v8806_v23  ;;  %v949_v38 = vsel %vm13388_vm4, %v13387_v20, 0.0  ;;  %v13392_v13 = vld [vmem:[#allocation20_spill] sm:$0xff]  ;;  %v9341_v26 = vld [vmem:[%s6517_s17 + $0xf0] sm:$0xff]  ;;  %v5474_v15 = vpop.permute.xlu0 %5473  ;;  %5758 = vrot.lane.b32.xlu1 %v5757_v3, %s6403_s18  ;;  %s6411_s18 = smov 32  }
 0x13e   : > { %vm9307_vm6 = vcmp.lt.s32.totalorder %v13383_v57, 15  ;;  %v854_v57 = vsel %vm13351_vm10, %v9141_v0, 0.0  ;;  %vm13391_vm15 = vnez %v13390_v61  ;;  %v951_v23 = vsel %vm13393_vm0, %v13392_v13, 0.0  ;;  %5763 = vrot.lane.b32.xlu0 %v5762_v39, %s6404_s19 }
 0x13f   : > { %v13385_v14 = vsel %vm9307_vm6, 4294967295, %v13384_v14  ;;  %v950_v52 = vsel %vm13391_vm15, %v13389_v9, 0.0  ;;  %v981_v0 = vsel %vm13372_vm13, %v9341_v26, 0.0  ;;  %v5436_v11 = vunpack.i.h.bf16 %v9123_v59 }
 0x140   : > { %13386 = vst [vmem:[#allocation7_spill] sm:$0xff] %v13385_v14  ;;  %v5435_v20 = vunpack.i.l.bf16 %v9123_v59  ;;  %v952_v37 = vsel %vm9307_vm6, %v13394_v54, 0.0  ;;  %v982_v13 = vsel %vm13391_vm15, %v9352_v28, 0.0  ;;  %v5441_v62 = vunpack.i.h.bf16 %v9160_v58 }
 0x141   : > { %v5772_v7 = vpack.i.bf16 %v8946_v31, %v821_v60  ;;  %v5777_v8 = vpack.i.bf16 %v13389_v9, %v823_v47  ;;  %v5787_v59 = vpack.i.bf16 %v9352_v28, %v9341_v26  ;;  %v5440_v24 = vunpack.i.l.bf16 %v9160_v58  ;;  %v9371_v60 = vpop.permute.xlu1 %5478  ;;  %5768 = vrot.lane.b32.xlu1 %v5767_v30, %s6404_s19  ;;  %s6412_s19 = smov 96  }
 0x142   : > { %v5445_v54 = vunpack.i.l.bf16 %v9174_v48  ;;  %v5792_v61 = vpack.i.bf16 %v854_v57, %v9153_v43  ;;  %v9367_v19 = vpack.i.bf16 %v950_v52, %v949_v38  ;;  %v5446_v18 = vunpack.i.h.bf16 %v9174_v48  ;;  %v5484_v57 = vpop.permute.xlu0 %5483 }
 0x143   : > { %v5450_v3 = vunpack.i.l.bf16 %v9219_v6  ;;  %v9373_v47 = vpack.i.bf16 %v952_v37, %v951_v23  ;;  %v9375_v9 = vpack.i.bf16 %v982_v13, %v981_v0  ;;  %vm13395_vm0 = vcmask 23552   ;;  %5773 = vrot.lane.b32.xlu0 %v5772_v7, %s6405_s20 }
 0x144   : > { %v2087_v28 = vsel %vm13395_vm0, %v581_v17, %v5436_v11  ;;  %vm13396_vm4 = vmmov %vm13395_vm0  ;;  %v5451_v39 = vunpack.i.h.bf16 %v9219_v6  ;;  %v5455_v43 = vunpack.i.l.bf16 %v9230_v56  ;;  %v5456_v48 = vunpack.i.h.bf16 %v9230_v56 }
 0x145   : > { %v2086_v58 = vsel %vm13396_vm4, %v580_v42, %v5435_v20  ;;  %vm13397_vm15 = vmmov %vm13395_vm0  ;;  %v5461_v52 = vunpack.i.h.bf16 %v9270_v10  ;;  %v5460_v37 = vunpack.i.l.bf16 %v9270_v10  ;;  %v5466_v42 = vunpack.i.h.bf16 %v9298_v41  ;;  %v5489_v10 = vpop.permute.xlu1 %5488  ;;  %5778 = vrot.lane.b32.xlu1 %v5777_v8, %s6405_s20  ;;  %s6413_s20 = smov 64  }
 0x146   : > { %v2089_v38 = vsel %vm13397_vm15, %v583_v46, %v5441_v62  ;;  %vm13398_vm13 = vmmov %vm13395_vm0  ;;  %vm13399_vm0 = vcmask 48128   ;;  %v5465_v6 = vunpack.i.l.bf16 %v9298_v41  ;;  %v5470_v46 = vunpack.i.l.bf16 %v9323_v34  ;;  %v5494_v11 = vpop.permute.xlu0 %5493 }
 0x147   : > { %v2088_v23 = vsel %vm13398_vm13, %v582_v44, %v5440_v24  ;;  %v2119_v17 = vsel %vm13399_vm0, %v2086_v58, %v5445_v54  ;;  %vm13400_vm4 = vmmov %vm13399_vm0  ;;  %v5475_v26 = vunpack.i.l.bf16 %v5474_v15  ;;  %vm13403_vm11 = vcmask 72704   ;;  %5783 = vrot.lane.b32.xlu0 %v5782_v21, %s6406_s21 }
 0x148   : > { %v2120_v62 = vsel %vm13400_vm4, %v2087_v28, %v5446_v18  ;;  %vm13401_vm15 = vmmov %vm13399_vm0  ;;  %v2152_v24 = vsel %vm13403_vm11, %v2119_v17, %v5455_v43  ;;  %v5476_v44 = vunpack.i.h.bf16 %v5474_v15  ;;  %v5485_v0 = vunpack.i.l.bf16 %v5484_v57 }
 0x149   : > { %v2121_v56 = vsel %vm13401_vm15, %v2088_v23, %v5450_v3  ;;  %vm13402_vm10 = vmmov %vm13399_vm0  ;;  %v5486_v18 = vunpack.i.h.bf16 %v5484_v57  ;;  %vm13407_vm4 = vcmask 97280   ;;  %v5496_v3 = vunpack.i.h.bf16 %v5494_v11  ;;  %5788 = vrot.lane.b32.xlu1 %v5787_v59, %s6406_s21 }
 0x14a   : > { %v2122_v30 = vsel %vm13402_vm10, %v2089_v38, %v5451_v39  ;;  %vm13404_vm13 = vmmov %vm13403_vm11  ;;  %v2185_v13 = vsel %vm13407_vm4, %v2152_v24, %v5465_v6  ;;  %v5495_v28 = vunpack.i.l.bf16 %v5494_v11  ;;  %v5471_v15 = vunpack.i.h.bf16 %v9323_v34  ;;  %v5499_v38 = vpop.permute.xlu1 %5498 }
 0x14b   : > { %v2153_v20 = vsel %vm13404_vm13, %v2120_v62, %v5456_v48  ;;  %vm13405_vm0 = vmmov %vm13403_vm11  ;;  %vm13410_vm10 = vcmask 121856   ;;  %v5480_v43 = vunpack.i.l.bf16 %v9371_v60  ;;  %v5481_v8 = vunpack.i.h.bf16 %v9371_v60  ;;  %5793 = vrot.lane.b32.xlu0 %v5792_v61, %s6407_s22 }
 0x14c   : > { %v2154_v41 = vsel %vm13405_vm0, %v2121_v56, %v5460_v37  ;;  %vm13406_vm12 = vmmov %vm13405_vm0  ;;  %v2218_v39 = vsel %vm13410_vm10, %v2185_v13, %v5475_v26  ;;  %vm13412_vm13 = vcmask 146432   ;;  %v5504_v37 = vpop.permute.xlu0 %5503  ;;  %v5491_v21 = vunpack.i.h.bf16 %v5489_v10 }
 0x14d   : > { %v2155_v7 = vsel %vm13406_vm12, %v2122_v30, %v5461_v52  ;;  %vm13408_vm15 = vmmov %vm13407_vm4  ;;  %v2251_v48 = vsel %vm13412_vm13, %v2218_v39, %v5485_v0  ;;  %v5490_v52 = vunpack.i.l.bf16 %v5489_v10  ;;  %v5506_v34 = vunpack.i.h.bf16 %v5504_v37 }
 0x14e   : > { %v2186_v54 = vsel %vm13408_vm15, %v2153_v20, %v5466_v42  ;;  %vm13409_vm11 = vmmov %vm13407_vm4  ;;  %v5505_v17 = vunpack.i.l.bf16 %v5504_v37  ;;  %vm13414_vm4 = vcmask 171008   ;;  %v5501_v62 = vunpack.i.h.bf16 %v5499_v38  ;;  %v5509_v59 = vpop.permute.xlu1 %5508  ;;  %v13423_v20 = vld [vmem:[#allocation12_spill] sm:$0xff] }
 0x14f   : > { %v2187_v58 = vsel %vm13409_vm11, %v2154_v41, %v5470_v46  ;;  %vm13411_vm12 = vmmov %vm13410_vm10  ;;  %v2284_v42 = vsel %vm13414_vm4, %v2251_v48, %v5495_v28  ;;  %v5500_v56 = vunpack.i.l.bf16 %v5499_v38  ;;  %v2188_v60 = vsel %vm13409_vm11, %v2155_v7, %v5471_v15  ;;  %5798 = vrot.lane.b32.xlu1 %v13423_v20, %s6407_s22  ;;  %5803 = vrot.lane.b32.xlu0 %v9367_v19, %s6408_s8  ;;  %v6339_v15 = vld [vmem:[%s6517_s17 + $0x8] sm:$0xff]  ;;  %v13431_v37 = vld [vmem:[#allocation16_spill] sm:$0xff] }
 0x150   : > { %v2219_v57 = vsel %vm13411_vm12, %v2186_v54, %v5476_v44  ;;  %vm13413_vm0 = vmmov %vm13412_vm13  ;;  %v2220_v46 = vsel %vm13410_vm10, %v2187_v58, %v5480_v43  ;;  %vm13416_vm12 = vcmask 195584   ;;  %v5514_v44 = vpop.permute.xlu0 %5513  ;;  %vm13424_vm11 = vcmask 171008  }
 0x151   : > { %v2252_v23 = vsel %vm13413_vm0, %v2219_v57, %v5486_v18  ;;  %vm13415_vm15 = vmmov %vm13414_vm4  ;;  %v2317_v26 = vsel %vm13416_vm12, %v2284_v42, %v5505_v17  ;;  %vm13419_vm4 = vcmask 146432   ;;  %v5516_v41 = vunpack.i.h.bf16 %v5514_v44 }
 0x152   : > { %v2285_v6 = vsel %vm13415_vm15, %v2252_v23, %v5496_v3  ;;  %vm13417_vm13 = vmmov %vm13416_vm12  ;;  %v2253_v24 = vsel %vm13419_vm4, %v2220_v46, %v5490_v52  ;;  %vm13420_vm15 = vcmask 220160   ;;  %v5515_v7 = vunpack.i.l.bf16 %v5514_v44  ;;  %v6338_v3 = vld [vmem:[%s6517_s17] sm:$0xff]  ;;  %v5519_v38 = vpop.permute.xlu1 %5518  ;;  %s269_s17 = sand.u32 1, %s6393_s25  }
 0x153   : > { %v2318_v10 = vsel %vm13417_vm13, %v2285_v6, %v5506_v34  ;;  %vm13418_vm0 = vmmov %vm13410_vm10  ;;  %v2350_v0 = vsel %vm13420_vm15, %v2317_v26, 0.0  ;;  %v2286_v13 = vsel %vm13424_vm11, %v2253_v24, %v5500_v56  ;;  %v983_v28 = vsel %vm9246_vm2, %v6338_v3, 0.0  ;;  %5808 = vrot.lane.b32.xlu1 %v9373_v47, %s6408_s8  ;;  %5813 = vrot.lane.b32.xlu0 %v9375_v9, %s6409_s14  ;;  %v13436_v56 = vld [vmem:[#allocation89_spill] sm:$0xff]  ;;  %s4811_s21 = sshll.u32 %s269_s17, 5  ;;  %s11988_s8 = scalar_lea.sflag [#allocation3], %s269_s17 }
 0x154   : > { %v2221_v30 = vsel %vm13418_vm0, %v2188_v60, %v5481_v8  ;;  %vm13421_vm3 = vmmov %vm13420_vm15  ;;  %v984_v58 = vsel %vm9307_vm6, %v6339_v15, 0.0  ;;  %v5524_v19 = vpop.permute.xlu0 %5523  ;;  %v1047_v23 = vsel %vm9246_vm2, %v13431_v37, 0.0  ;;  %v5511_v46 = vunpack.i.h.bf16 %v5509_v59  ;;  %v13443_v44 = vld [vmem:[#allocation81_spill] sm:$0xff]  ;;  %s271_s22 = scalar_lea.vmem [#allocation2], %s4811_s21 }
 0x155   : > { %v2351_v61 = vsel %vm13421_vm3, %v2318_v10, 0.0  ;;  %vm13422_vm7 = vmmov %vm13419_vm4  ;;  %v5817_v48 = vpack.i.bf16 %v984_v58, %v983_v28  ;;  %v5510_v26 = vunpack.i.l.bf16 %v5509_v59  ;;  %v13438_v10 = vld [vmem:[#allocation94_spill] sm:$0xff]  ;;  %v5521_v20 = vunpack.i.h.bf16 %v5519_v38  ;;  %s4745_s23 = sshll.u32 %s271_s22, 4  ;;  %s11981_s23 = int_to_ptr.vmem [resolvable:$true] %s4745_s23 }
 0x156   : > { %v2254_v11 = vsel %vm13422_vm7, %v2221_v30, %v5491_v21  ;;  %v2376_v18 = vpack.c.bf16 %v2351_v61, %v2350_v0  ;;  %vm13425_vm10 = vmmov %vm13424_vm11  ;;  %v13432_v21 = vld [vmem:[#allocation15_spill] sm:$0xff]  ;;  %v5529_v17 = vpop.permute.xlu1 %5528  ;;  %v13440_v30 = vld [vmem:[#allocation90_spill] sm:$0xff]  ;;  %v5525_v28 = vunpack.i.l.bf16 %v5524_v19  ;;  %s6341_s9 = scalar_lea.vmem %s11981_s23, 512 }
 0x157   : > { %v2287_v54 = vsel %vm13425_vm10, %v2254_v11, %v5501_v62  ;;  %vm13426_vm3 = vmmov %vm13416_vm12  ;;  %vm13428_vm12 = vcmask 261120   ;;  %5818 = vrot.lane.b32.xlu1 %v5817_v48, %s6409_s14  ;;  %5823 = vrot.lane.b32.xlu0 %v9077_v16, %s6410_s15  ;;  %v13434_v62 = vld [vmem:[#allocation92_spill] sm:$0xff]  ;;  %vm13437_vm10 = vnez %v13436_v56  ;;  %v13442_v16 = vld [vmem:[#allocation77_spill] sm:$0xff]  ;;  %v5530_v15 = vunpack.i.l.bf16 %v5529_v17  ;;  %p6342_p11 = scmp.ne.s32.totalorder %s11981_s23, %s6341_s9 }
 0x158   : > { %v2320_v39 = vsel %vm13426_vm3, %v2287_v54, %v5516_v41  ;;  %vm13427_vm7 = vmmov %vm13426_vm3  ;;  %5059 = vmatprep.mubr.msk.bf16.mxu0 %vm13428_vm12, %v2376_v18  ;;  %v5534_v47 = vpop.permute.xlu0 %5533  ;;  %vm13435_vm11 = vnez %v13434_v62  ;;  %v13445_v61 = vld [vmem:[#allocation74_spill] sm:$0xff]  ;;  %v13446_v41 = vld [vmem:[#allocation83_spill] sm:$0xff]  ;;  %v5520_v18 = vunpack.i.l.bf16 %v5519_v38 }
 0x159   : > { %v2319_v43 = vsel %vm13427_vm7, %v2286_v13, %v5515_v7  ;;  %vm12486_vm13 = vmand %vm9307_vm6, %vm13353_vm8  ;;  %vm13439_vm7 = vnez %v13438_v10  ;;  %v13447_v59 = vld [vmem:[#allocation86_spill] sm:$0xff]  ;;  %v5526_v13 = vunpack.i.h.bf16 %v5524_v19  ;;  %v13449_v54 = vld [vmem:[#allocation84_spill] sm:$0xff]  ;;  %p6343_p12 = pnand %p6342_p11, %p6496_p5 }
 0x15a   : > { %vm13429_vm0 = vmmov %vm13420_vm15  ;;  %v1048_v34 = vsel %vm12486_vm13, %v13432_v21, 0.0  ;;  %v5539_v9 = vpop.permute.xlu1 %5538  ;;  %vm13450_vm13 = vcmask 23552  }
 0x15b   : > { %v2352_v57 = vsel %vm13429_vm0, %v2319_v43, 0.0  ;;  %vm13430_vm4 = vmmov %vm13429_vm0  ;;  %v5827_v42 = vpack.i.bf16 %v1048_v34, %v1047_v23  ;;  %v5541_v37 = vunpack.i.h.bf16 %v5539_v9  ;;  %v5540_v23 = vunpack.i.l.bf16 %v5539_v9  ;;  %p6344_p13 = pneg %p6343_p12 }
 0x15c   : > { %v2353_v8 = vsel %vm13430_vm4, %v2320_v39, 0.0  ;;  %vm13433_vm15 = vmmov %vm13428_vm12  ;;  %v5544_v6 = vpop.permute.xlu0 %5543  ;;  %vm13441_vm12 = vnez %v13440_v30  ;;  %vm13444_vm4 = vnez %v13443_v44 }
 0x15d   : > { %v2377_v52 = vpack.c.bf16 %v2353_v8, %v2352_v57  ;;  %5828 = vrot.lane.b32.xlu1 %v5827_v42, %s6410_s15  ;;  %vm12487_vm3 = vmand %vm13437_vm10, %vm13435_vm11  ;;  %v585_v0 = vsel %vm13444_vm4, %v13442_v16, 0.0  ;;  %v5531_v57 = vunpack.i.h.bf16 %v5529_v17  ;;  %v5535_v8 = vunpack.i.l.bf16 %v5534_v47 }
 0x15e   : > { %v9467_v60 = vpop.permute.xlu1 %5548  ;;  %vm12490_vm0 = vmand %vm13441_vm12, %vm13439_vm7  ;;  %v584_v11 = vsel %vm12487_vm3, %v13445_v61, 0.0  ;;  %v2091_v39 = vsel %vm13450_vm13, %v585_v0, %v5511_v46  ;;  %vm13454_vm10 = vcmask 48128   ;;  %v5546_v42 = vunpack.i.h.bf16 %v5544_v6 }
 0x15f   : > { %5060 = vmatmul.mubr.msk.bf16.gmra.mxu0 %vm13433_vm15, %v2377_v52  ;;  %vm13448_vm15 = vnez %v13447_v59  ;;  %v586_v3 = vsel %vm12490_vm0, %v13449_v54, 0.0  ;;  %vm13451_vm3 = vmmov %vm13450_vm13  ;;  %v5536_v52 = vunpack.i.h.bf16 %v5534_v47  ;;  %v2124_v34 = vsel %vm13454_vm10, %v2091_v39, %v5526_v13 }
 0x160   : > { %v5554_v24 = vpop.permute.xlu0 %5553  ;;  %v587_v7 = vsel %vm13448_vm15, %v13446_v41, 0.0  ;;  %v2090_v43 = vsel %vm13451_vm3, %v584_v11, %v5510_v26  ;;  %vm13452_vm11 = vmmov %vm13451_vm3  ;;  %v5545_v19 = vunpack.i.l.bf16 %v5544_v6  ;;  %v5550_v26 = vunpack.i.l.bf16 %v9467_v60 }
 0x161   : > { %v2093_v38 = vsel %vm13452_vm11, %v587_v7, %v5521_v20  ;;  %vm13453_vm15 = vmmov %vm13451_vm3  ;;  %v5555_v17 = vunpack.i.l.bf16 %v5554_v24  ;;  %vm13458_vm11 = vcmask 72704   ;;  %v5556_v11 = vunpack.i.h.bf16 %v5554_v24 }
 0x162   : > { %v5559_v58 = vpop.permute.xlu1 %5558  ;;  %v2092_v21 = vsel %vm13453_vm15, %v586_v3, %v5520_v18  ;;  %vm13455_vm0 = vmmov %vm13454_vm10  ;;  %vm13475_vm4 = vcmask 220160  }
 0x163   : > { %v2123_v16 = vsel %vm13455_vm0, %v2090_v43, %v5525_v28  ;;  %vm13456_vm7 = vmmov %vm13455_vm0  ;;  %v5560_v43 = vunpack.i.l.bf16 %v5559_v58 }
 0x164   : > { %v5564_v48 = vpop.permute.xlu0 %5563  ;;  %v2125_v46 = vsel %vm13456_vm7, %v2092_v21, %v5530_v15  ;;  %vm13457_vm13 = vmmov %vm13455_vm0  ;;  %v2156_v47 = vsel %vm13458_vm11, %v2123_v16, %v5535_v8  ;;  %vm13462_vm0 = vcmask 97280   ;;  %v5551_v15 = vunpack.i.h.bf16 %v9467_v60 }
 0x165   : > { %v2126_v61 = vsel %vm13457_vm13, %v2093_v38, %v5531_v57  ;;  %v5565_v9 = vunpack.i.l.bf16 %v5564_v48  ;;  %vm13459_vm3 = vmmov %vm13458_vm11  ;;  %v5566_v18 = vunpack.i.h.bf16 %v5564_v48  ;;  %v2189_v13 = vsel %vm13462_vm0, %v2156_v47, %v5545_v19 }
 0x166   : > { %v5569_v0 = vpop.permute.xlu1 %5568  ;;  %v2157_v41 = vsel %vm13459_vm3, %v2124_v34, %v5536_v52  ;;  %vm13460_vm10 = vmmov %vm13459_vm3  ;;  %vm13465_vm11 = vcmask 121856   ;;  %v5561_v38 = vunpack.i.h.bf16 %v5559_v58 }
 0x167   : > { %v2158_v7 = vsel %vm13460_vm10, %v2125_v46, %v5540_v23  ;;  %vm13461_vm15 = vmmov %vm13459_vm3  ;;  %v2222_v24 = vsel %vm13465_vm11, %v2189_v13, %v5555_v17  ;;  %vm13467_vm10 = vcmask 146432   ;;  %v5570_v48 = vunpack.i.l.bf16 %v5569_v0 }
 0x168   : > { %v5574_v20 = vpop.permute.xlu0 %5573  ;;  %v2159_v6 = vsel %vm13461_vm15, %v2126_v61, %v5541_v37  ;;  %vm13463_vm7 = vmmov %vm13462_vm0  ;;  %v2255_v52 = vsel %vm13467_vm10, %v2222_v24, %v5565_v9  ;;  %v5571_v21 = vunpack.i.h.bf16 %v5569_v0 }
 0x169   : > { %v2190_v54 = vsel %vm13463_vm7, %v2157_v41, %v5546_v42  ;;  %v5576_v3 = vunpack.i.h.bf16 %v5574_v20  ;;  %v5575_v28 = vunpack.i.l.bf16 %v5574_v20  ;;  %vm13464_vm13 = vmmov %vm13462_vm0  ;;  %vm13469_vm0 = vcmask 171008  }
 0x16a   : > { %v2191_v39 = vsel %vm13464_vm13, %v2158_v7, %v5550_v26  ;;  %v5579_v57 = vpop.permute.xlu1 %5578  ;;  %vm13466_vm3 = vmmov %vm13465_vm11  ;;  %v2192_v26 = vsel %vm13464_vm13, %v2159_v6, %v5551_v15  ;;  %vm13478_vm13 = vcmask 171008  }
 0x16b   : > { %v2223_v8 = vsel %vm13466_vm3, %v2190_v54, %v5556_v11  ;;  %vm13468_vm15 = vmmov %vm13467_vm10  ;;  %v2288_v60 = vsel %vm13469_vm0, %v2255_v52, %v5575_v28  ;;  %v5581_v16 = vunpack.i.h.bf16 %v5579_v57  ;;  %v5580_v46 = vunpack.i.l.bf16 %v5579_v57 }
 0x16c   : > { %v5584_v37 = vpop.permute.xlu0 %5583  ;;  %v2256_v23 = vsel %vm13468_vm15, %v2223_v8, %v5566_v18  ;;  %vm13470_vm7 = vmmov %vm13469_vm0 }
 0x16d   : > { %v5586_v34 = vunpack.i.h.bf16 %v5584_v37  ;;  %v5585_v42 = vunpack.i.l.bf16 %v5584_v37  ;;  %v2289_v19 = vsel %vm13470_vm7, %v2256_v23, %v5576_v3  ;;  %vm13471_vm11 = vmmov %vm13466_vm3  ;;  %vm13472_vm3 = vcmask 195584  }
 0x16e   : > { %v2224_v17 = vsel %vm13471_vm11, %v2191_v39, %v5560_v43  ;;  %vm13473_vm10 = vmmov %vm13472_vm3  ;;  %v5589_v47 = vpop.permute.xlu1 %5588 }
 0x16f   : > { %v2321_v58 = vsel %vm13472_vm3, %v2288_v60, %v5585_v42  ;;  %v2322_v61 = vsel %vm13473_vm10, %v2289_v19, %v5586_v34  ;;  %vm13474_vm12 = vmmov %vm13471_vm11  ;;  %v2257_v0 = vsel %vm13468_vm15, %v2224_v17, %v5570_v48  ;;  %v5590_v34 = vunpack.i.l.bf16 %v5589_v47  ;;  %v13487_v42 = vld [vmem:[#allocation114_spill] sm:$0xff]  ;;  %v13489_v60 = vld [vmem:[#allocation108_spill] sm:$0xff] }
 0x170   : > { %v2225_v11 = vsel %vm13474_vm12, %v2192_v26, %v5561_v38  ;;  %v5594_v9 = vpop.permute.xlu0 %5593  ;;  %v2354_v20 = vsel %vm13475_vm4, %v2321_v58, 0.0  ;;  %vm13476_vm0 = vmmov %vm13475_vm4  ;;  %v2290_v54 = vsel %vm13478_vm13, %v2257_v0, %v5580_v46  ;;  %vm13481_vm12 = vcmask 261120   ;;  %v13492_v46 = vld [vmem:[#allocation98_spill] sm:$0xff]  ;;  %v13494_v17 = vld [vmem:[#allocation93_spill] sm:$0xff] }
 0x171   : > { %v2355_v41 = vsel %vm13476_vm0, %v2322_v61, 0.0  ;;  %vm13477_vm7 = vmmov %vm13468_vm15  ;;  %v5596_v18 = vunpack.i.h.bf16 %v5594_v9  ;;  %v5595_v6 = vunpack.i.l.bf16 %v5594_v9 }
 0x172   : > { %v2258_v7 = vsel %vm13477_vm7, %v2225_v11, %v5571_v21  ;;  %v2378_v13 = vpack.c.bf16 %v2355_v41, %v2354_v20  ;;  %vm13479_vm11 = vmmov %vm13478_vm13  ;;  %v5599_v39 = vpop.permute.xlu1 %5598  ;;  %vm13485_vm7 = vnez %v13066_v50  ;;  %vm13486_vm13 = vnez %v13051_v5  ;;  %v13495_v11 = vld [vmem:[#allocation102_spill] sm:$0xff]  ;;  %v13498_v41 = vld [vmem:[#allocation103_spill] sm:$0xff] }
 0x173   : > { %v2291_v3 = vsel %vm13479_vm11, %v2258_v7, %v5581_v16  ;;  %vm13480_vm10 = vmmov %vm13472_vm3  ;;  %v5591_v21 = vunpack.i.h.bf16 %v5589_v47  ;;  %v13491_v16 = vld [vmem:[#allocation95_spill] sm:$0xff]  ;;  %v5601_v61 = vunpack.i.h.bf16 %v5599_v39  ;;  %v13496_v47 = vld [vmem:[#allocation106_spill] sm:$0xff]  ;;  %v5600_v9 = vunpack.i.l.bf16 %v5599_v39 }
 0x174   : > { %v2324_v28 = vsel %vm13472_vm3, %v2291_v3, %v5596_v18  ;;  %v2323_v15 = vsel %vm13480_vm10, %v2290_v54, %v5595_v6  ;;  %5063 = vmatprep.mubr.msk.bf16.mxu0 %vm13481_vm12, %v2378_v13  ;;  %v5604_v24 = vpop.permute.xlu0 %5603  ;;  %vm13482_vm4 = vmmov %vm13476_vm0  ;;  %vm13488_vm3 = vnez %v13487_v42  ;;  %vm13490_vm10 = vnez %v13489_v60 }
 0x175   : > { %v2356_v43 = vsel %vm13482_vm4, %v2323_v15, 0.0  ;;  %vm13483_vm15 = vmmov %vm13476_vm0  ;;  %vm13493_vm4 = vnez %v13492_v46  ;;  %v5606_v20 = vunpack.i.h.bf16 %v5604_v24  ;;  %v5605_v18 = vunpack.i.l.bf16 %v5604_v24 }
 0x176   : > { %v2357_v57 = vsel %vm13483_vm15, %v2324_v28, 0.0  ;;  %v5609_v38 = vpop.permute.xlu1 %5608  ;;  %vm13484_vm0 = vmmov %vm13481_vm12  ;;  %v589_v26 = vsel %vm13493_vm4, %v13491_v16, 0.0  ;;  %vm13497_vm15 = vnez %v13496_v47  ;;  %vm13503_vm4 = vcmask 48128   ;;  %v13712_v47 = vld [vmem:[#allocation47_spill] sm:$0xff] }
 0x177   : > { %v2379_v8 = vpack.c.bf16 %v2357_v57, %v2356_v43  ;;  %vm12493_vm11 = vmand %vm13486_vm13, %vm13485_vm7  ;;  %v591_v0 = vsel %vm13497_vm15, %v13495_v11, 0.0  ;;  %v5610_v6 = vunpack.i.l.bf16 %v5609_v38  ;;  %v5611_v28 = vunpack.i.h.bf16 %v5609_v38 }
 0x178   : > { %v5614_v52 = vpop.permute.xlu0 %5613  ;;  %vm12495_vm12 = vmand %vm13490_vm10, %vm13488_vm3  ;;  %v588_v58 = vsel %vm12493_vm11, %v13494_v17, 0.0  ;;  %vm13524_vm13 = vcmask 220160  }
 0x179   : > { %5064 = vmatmul.mubr.msk.bf16.gmra.mxu0 %vm13484_vm0, %v2379_v8  ;;  %v590_v7 = vsel %vm12495_vm12, %v13498_v41, 0.0  ;;  %vm13499_vm0 = vcmask 23552   ;;  %v5615_v15 = vunpack.i.l.bf16 %v5614_v52  ;;  %v5616_v57 = vunpack.i.h.bf16 %v5614_v52  ;;  %vm13504_vm12 = vmmov %vm13503_vm4 }
 0x17a   : > { %v5619_v48 = vpop.permute.xlu1 %5618  ;;  %v2095_v54 = vsel %vm13499_vm0, %v589_v26, %v5591_v21  ;;  %vm13500_vm11 = vmmov %vm13499_vm0 }
 0x17b   : > { %v2094_v3 = vsel %vm13500_vm11, %v588_v58, %v5590_v34  ;;  %vm13501_vm15 = vmmov %vm13499_vm0  ;;  %v5621_v8 = vunpack.i.h.bf16 %v5619_v48  ;;  %v5620_v16 = vunpack.i.l.bf16 %v5619_v48  ;;  %v2128_v11 = vsel %vm13503_vm4, %v2095_v54, %v5606_v20 }
 0x17c   : > { %v5624_v37 = vpop.permute.xlu0 %5623  ;;  %v2097_v39 = vsel %vm13501_vm15, %v591_v0, %v5601_v61  ;;  %vm13502_vm7 = vmmov %vm13499_vm0  ;;  %v2127_v60 = vsel %vm13504_vm12, %v2094_v3, %v5605_v18  ;;  %vm13507_vm15 = vcmask 72704   ;;  %vm13511_vm12 = vcmask 97280  }
 0x17d   : > { %v2096_v17 = vsel %vm13502_vm7, %v590_v7, %v5600_v9  ;;  %v5626_v41 = vunpack.i.h.bf16 %v5624_v37  ;;  %v5625_v24 = vunpack.i.l.bf16 %v5624_v37  ;;  %vm13505_vm10 = vmmov %vm13503_vm4  ;;  %v2160_v52 = vsel %vm13507_vm15, %v2127_v60, %v5615_v15 }
 0x17e   : > { %v9535_v23 = vpop.permute.xlu1 %5628  ;;  %v2129_v21 = vsel %vm13505_vm10, %v2096_v17, %v5610_v6  ;;  %vm13506_vm11 = vmmov %vm13503_vm4 }
 0x17f   : > { %v5630_v34 = vunpack.i.l.bf16 %v9535_v23  ;;  %v2130_v58 = vsel %vm13506_vm11, %v2097_v39, %v5611_v28  ;;  %vm13508_vm7 = vmmov %vm13507_vm15  ;;  %v2193_v18 = vsel %vm13511_vm12, %v2160_v52, %v5625_v24  ;;  %v5631_v28 = vunpack.i.h.bf16 %v9535_v23 }
 0x180   : > { %v5634_v19 = vpop.permute.xlu0 %5633  ;;  %v2161_v9 = vsel %vm13508_vm7, %v2128_v11, %v5616_v57  ;;  %vm13509_vm4 = vmmov %vm13508_vm7  ;;  %vm13514_vm15 = vcmask 121856  }
 0x181   : > { %v5635_v38 = vunpack.i.l.bf16 %v5634_v19  ;;  %v5636_v61 = vunpack.i.h.bf16 %v5634_v19  ;;  %v2162_v20 = vsel %vm13509_vm4, %v2129_v21, %v5620_v16  ;;  %vm13510_vm0 = vmmov %vm13509_vm4  ;;  %vm13516_vm4 = vcmask 146432  }
 0x182   : > { %v5639_v13 = vpop.permute.xlu1 %5638  ;;  %v2163_v37 = vsel %vm13510_vm0, %v2130_v58, %v5621_v8  ;;  %vm13512_vm10 = vmmov %vm13511_vm12  ;;  %vm13518_vm12 = vcmask 171008  }
 0x183   : > { %v2194_v6 = vsel %vm13512_vm10, %v2161_v9, %v5626_v41  ;;  %vm13513_vm11 = vmmov %vm13512_vm10  ;;  %v2226_v19 = vsel %vm13514_vm15, %v2193_v18, %v5635_v38  ;;  %v5640_v15 = vunpack.i.l.bf16 %v5639_v13  ;;  %v5641_v16 = vunpack.i.h.bf16 %v5639_v13 }
 0x184   : > { %v5644_v43 = vpop.permute.xlu0 %5643  ;;  %v2195_v60 = vsel %vm13513_vm11, %v2162_v20, %v5630_v34  ;;  %vm13515_vm7 = vmmov %vm13514_vm15  ;;  %v2196_v52 = vsel %vm13513_vm11, %v2163_v37, %v5631_v28  ;;  %vm13527_vm11 = vcmask 171008  }
 0x185   : > { %v5645_v48 = vunpack.i.l.bf16 %v5644_v43  ;;  %v5646_v7 = vunpack.i.h.bf16 %v5644_v43  ;;  %v2227_v57 = vsel %vm13515_vm7, %v2194_v6, %v5636_v61  ;;  %vm13517_vm0 = vmmov %vm13516_vm4 }
 0x186   : > { %v5649_v26 = vpop.permute.xlu1 %5648  ;;  %vm13519_vm10 = vmmov %vm13518_vm12 }
 0x187   : > { %v2259_v8 = vsel %vm13516_vm4, %v2226_v19, %v5645_v48  ;;  %v5650_v43 = vunpack.i.l.bf16 %v5649_v26  ;;  %v2260_v11 = vsel %vm13517_vm0, %v2227_v57, %v5646_v7  ;;  %v5651_v41 = vunpack.i.h.bf16 %v5649_v26  ;;  %vm13520_vm15 = vmmov %vm13515_vm7 }
 0x188   : > { %v5654_v0 = vpop.permute.xlu0 %5653  ;;  %v2228_v61 = vsel %vm13520_vm15, %v2195_v60, %v5640_v15  ;;  %vm13521_vm7 = vcmask 195584   ;;  %vm13523_vm3 = vmmov %vm13520_vm15 }
 0x189   : > { %v5656_v54 = vunpack.i.h.bf16 %v5654_v0  ;;  %v5655_v3 = vunpack.i.l.bf16 %v5654_v0  ;;  %vm13522_vm4 = vmmov %vm13521_vm7  ;;  %v2229_v9 = vsel %vm13523_vm3, %v2196_v52, %v5641_v16  ;;  %v2261_v26 = vsel %vm13517_vm0, %v2228_v61, %v5650_v43  ;;  %v13540_v61 = vld [vmem:[#allocation113_spill] sm:$0xff] }
 0x18a   : > { %v5659_v39 = vpop.permute.xlu1 %5658  ;;  %vm13528_vm15 = vmmov %vm13527_vm11  ;;  %vm13530_vm3 = vcmask 261120  }
 0x18b   : > { %v2292_v23 = vsel %vm13518_vm12, %v2259_v8, %v5655_v3  ;;  %v2293_v34 = vsel %vm13519_vm10, %v2260_v11, %v5656_v54  ;;  %v5661_v58 = vunpack.i.h.bf16 %v5659_v39  ;;  %v5660_v38 = vunpack.i.l.bf16 %v5659_v39  ;;  %vm13525_vm12 = vmmov %vm13524_vm13 }
 0x18c   : > { %v5664_v17 = vpop.permute.xlu0 %5663  ;;  %vm13526_vm10 = vmmov %vm13517_vm0 }
 0x18d   : > { %v5666_v24 = vunpack.i.h.bf16 %v5664_v17  ;;  %v5665_v21 = vunpack.i.l.bf16 %v5664_v17  ;;  %v2262_v6 = vsel %vm13526_vm10, %v2229_v9, %v5651_v41  ;;  %v2294_v28 = vsel %vm13527_vm11, %v2261_v26, %v5660_v38  ;;  %vm13532_vm0 = vmmov %vm13525_vm12  ;;  %v13538_v38 = vld [vmem:[#allocation115_spill] sm:$0xff] }
 0x18e   : > { %v5669_v0 = vpop.permute.xlu1 %5668  ;;  %v2295_v60 = vsel %vm13528_vm15, %v2262_v6, %v5661_v58  ;;  %vm13534_vm10 = vnez %v13207_v32  ;;  %vm13535_vm11 = vnez %v13184_v55 }
 0x18f   : > { %v2325_v13 = vsel %vm13521_vm7, %v2292_v23, %v5665_v21  ;;  %v2326_v48 = vsel %vm13522_vm4, %v2293_v34, %v5666_v24  ;;  %vm13529_vm7 = vmmov %vm13522_vm4  ;;  %v5671_v23 = vunpack.i.h.bf16 %v5669_v0  ;;  %v5670_v34 = vunpack.i.l.bf16 %v5669_v0 }
 0x190   : > { %v5674_v20 = vpop.permute.xlu0 %5673  ;;  %v2358_v7 = vsel %vm13524_vm13, %v2325_v13, 0.0  ;;  %v2359_v18 = vsel %vm13525_vm12, %v2326_v48, 0.0  ;;  %vm13531_vm13 = vmmov %vm13525_vm12 }
 0x191   : > { %v5676_v54 = vunpack.i.h.bf16 %v5674_v20  ;;  %v5675_v37 = vunpack.i.l.bf16 %v5674_v20  ;;  %v2380_v3 = vpack.c.bf16 %v2359_v18, %v2358_v7  ;;  %vm13533_vm12 = vmmov %vm13530_vm3 }
 0x192   : > { %v5679_v39 = vpop.permute.xlu1 %5678  ;;  %vm12500_vm15 = vmand %vm13535_vm11, %vm13534_vm10  ;;  %vm13566_vm10 = vcmask 220160  }
 0x193   : > { %v2328_v19 = vsel %vm13529_vm7, %v2295_v60, %v5676_v54  ;;  %v2327_v15 = vsel %vm13522_vm4, %v2294_v28, %v5675_v37  ;;  %5067 = vmatprep.mubr.msk.bf16.mxu0 %vm13530_vm3, %v2380_v3  ;;  %vm13536_vm7 = vnez %v13222_v40  ;;  %vm13537_vm4 = vnez %v13196_v27 }
 0x194   : > { %v5684_v57 = vpop.permute.xlu0 %5683  ;;  %v2360_v16 = vsel %vm13531_vm13, %v2327_v15, 0.0  ;;  %v2361_v8 = vsel %vm13532_vm0, %v2328_v19, 0.0  ;;  %vm12502_vm3 = vmand %vm13537_vm4, %vm13536_vm7  ;;  %vm13539_vm13 = vnez %v13188_v29  ;;  %v592_v13 = vsel %vm12500_vm15, %v13540_v61, 0.0 }
 0x195   : > { %v2381_v43 = vpack.c.bf16 %v2361_v8, %v2360_v16  ;;  %v593_v52 = vsel %vm13539_vm13, %v13538_v38, 0.0  ;;  %v5681_v48 = vunpack.i.h.bf16 %v5679_v39  ;;  %vm13541_vm0 = vnez %v13201_v51  ;;  %v13625_v51 = vld [vmem:[#allocation17_spill] sm:$0xff] }
 0x196   : > { %v5689_v17 = vpop.permute.xlu1 %5688  ;;  %v595_v9 = vsel %vm13541_vm0, %v8524_v22, 0.0  ;;  %v5680_v26 = vunpack.i.l.bf16 %v5679_v39  ;;  %v5686_v20 = vunpack.i.h.bf16 %v5684_v57  ;;  %v594_v0 = vsel %vm12502_vm3, %v8530_v35, 0.0 }
 0x197   : > { %5068 = vmatmul.mubr.msk.bf16.gmra.mxu0 %vm13533_vm12, %v2381_v43  ;;  %v5685_v7 = vunpack.i.l.bf16 %v5684_v57  ;;  %v5690_v18 = vunpack.i.l.bf16 %v5689_v17  ;;  %vm13542_vm12 = vcmask 23552   ;;  %v5691_v3 = vunpack.i.h.bf16 %v5689_v17 }
 0x198   : > { %v5694_v11 = vpop.permute.xlu0 %5693  ;;  %v2099_v54 = vsel %vm13542_vm12, %v593_v52, %v5671_v23  ;;  %vm13543_vm15 = vmmov %vm13542_vm12  ;;  %vm13546_vm13 = vcmask 48128  }
 0x199   : > { %v2098_v37 = vsel %vm13543_vm15, %v592_v13, %v5670_v34  ;;  %v5695_v28 = vunpack.i.l.bf16 %v5694_v11  ;;  %vm13544_vm0 = vmmov %vm13542_vm12  ;;  %v5696_v19 = vunpack.i.h.bf16 %v5694_v11  ;;  %v2132_v8 = vsel %vm13546_vm13, %v2099_v54, %v5686_v20 }
 0x19a   : > { %v5699_v41 = vpop.permute.xlu1 %5698  ;;  %v2101_v22 = vsel %vm13544_vm0, %v595_v9, %v5681_v48  ;;  %vm13545_vm11 = vmmov %vm13544_vm0  ;;  %vm13550_vm0 = vcmask 72704  }
 0x19b   : > { %v5701_v15 = vunpack.i.h.bf16 %v5699_v41  ;;  %v5700_v39 = vunpack.i.l.bf16 %v5699_v41  ;;  %v2100_v16 = vsel %vm13545_vm11, %v594_v0, %v5680_v26  ;;  %vm13547_vm3 = vmmov %vm13546_vm13 }
 0x19c   : > { %v5704_v24 = vpop.permute.xlu0 %5703  ;;  %v2131_v43 = vsel %vm13547_vm3, %v2098_v37, %v5685_v7  ;;  %vm13548_vm4 = vmmov %vm13547_vm3 }
 0x19d   : > { %v5706_v35 = vunpack.i.h.bf16 %v5704_v24  ;;  %v5705_v57 = vunpack.i.l.bf16 %v5704_v24  ;;  %v2133_v23 = vsel %vm13548_vm4, %v2100_v16, %v5690_v18  ;;  %vm13549_vm15 = vmmov %vm13547_vm3  ;;  %v2164_v11 = vsel %vm13550_vm0, %v2131_v43, %v5695_v28 }
 0x19e   : > { %v9603_v21 = vpop.permute.xlu1 %5708  ;;  %v2134_v52 = vsel %vm13549_vm15, %v2101_v22, %v5691_v3  ;;  %vm13551_vm11 = vmmov %vm13550_vm0  ;;  %vm13554_vm3 = vcmask 97280  }
 0x19f   : > { %v5710_v34 = vunpack.i.l.bf16 %v9603_v21  ;;  %v2165_v48 = vsel %vm13551_vm11, %v2132_v8, %v5696_v19  ;;  %vm13552_vm13 = vmmov %vm13550_vm0  ;;  %v2197_v20 = vsel %vm13554_vm3, %v2164_v11, %v5705_v57  ;;  %v5711_v54 = vunpack.i.h.bf16 %v9603_v21 }
 0x1a0   : > { %v5714_v58 = vpop.permute.xlu0 %5713  ;;  %v2166_v9 = vsel %vm13552_vm13, %v2133_v23, %v5700_v39  ;;  %vm13553_vm12 = vmmov %vm13550_vm0  ;;  %vm13557_vm0 = vcmask 121856   ;;  %vm13559_vm13 = vcmask 146432  }
 0x1a1   : > { %v5715_v17 = vunpack.i.l.bf16 %v5714_v58  ;;  %v5716_v61 = vunpack.i.h.bf16 %v5714_v58  ;;  %v2167_v24 = vsel %vm13553_vm12, %v2134_v52, %v5701_v15  ;;  %vm13555_vm4 = vmmov %vm13554_vm3 }
 0x1a2   : > { %v5719_v6 = vpop.permute.xlu1 %5718  ;;  %v2198_v0 = vsel %vm13555_vm4, %v2165_v48, %v5706_v35  ;;  %vm13556_vm15 = vmmov %vm13554_vm3  ;;  %vm13561_vm3 = vcmask 171008  }
 0x1a3   : > { %v2199_v37 = vsel %vm13556_vm15, %v2166_v9, %v5710_v34  ;;  %v2230_v58 = vsel %vm13557_vm0, %v2197_v20, %v5715_v17  ;;  %v5720_v3 = vunpack.i.l.bf16 %v5719_v6  ;;  %vm13558_vm11 = vmmov %vm13557_vm0  ;;  %v5721_v19 = vunpack.i.h.bf16 %v5719_v6 }
 0x1a4   : > { %v5724_v60 = vpop.permute.xlu0 %5723  ;;  %v2231_v22 = vsel %vm13558_vm11, %v2198_v0, %v5716_v61  ;;  %vm13560_vm12 = vmmov %vm13559_vm13  ;;  %v2200_v17 = vsel %vm13556_vm15, %v2167_v24, %v5711_v54  ;;  %vm13563_vm11 = vcmask 195584   ;;  %vm13569_vm15 = vcmask 171008  }
 0x1a5   : > { %v5725_v41 = vunpack.i.l.bf16 %v5724_v60  ;;  %v5726_v26 = vunpack.i.h.bf16 %v5724_v60  ;;  %vm13562_vm4 = vmmov %vm13561_vm3  ;;  %v2232_v52 = vsel %vm13557_vm0, %v2199_v37, %v5720_v3 }
 0x1a6   : > { %v5729_v38 = vpop.permute.xlu1 %5728  ;;  %vm13565_vm7 = vmmov %vm13557_vm0 }
 0x1a7   : > { %v2263_v15 = vsel %vm13559_vm13, %v2230_v58, %v5725_v41  ;;  %v5730_v60 = vunpack.i.l.bf16 %v5729_v38  ;;  %v2264_v16 = vsel %vm13560_vm12, %v2231_v22, %v5726_v26  ;;  %v5731_v8 = vunpack.i.h.bf16 %v5729_v38  ;;  %vm13564_vm13 = vmmov %vm13563_vm11 }
 0x1a8   : > { %v5734_v13 = vpop.permute.xlu0 %5733  ;;  %v2233_v41 = vsel %vm13565_vm7, %v2200_v17, %v5721_v19  ;;  %vm13570_vm0 = vmmov %vm13569_vm15  ;;  %vm13572_vm7 = vcmask 261120  }
 0x1a9   : > { %v5736_v7 = vunpack.i.h.bf16 %v5734_v13  ;;  %v5735_v18 = vunpack.i.l.bf16 %v5734_v13  ;;  %v2265_v38 = vsel %vm13560_vm12, %v2232_v52, %v5730_v60  ;;  %v13575_v60 = vld [vmem:[#allocation123_spill] sm:$0xff] }
 0x1aa   : > { %v5739_v28 = vpop.permute.xlu1 %5738 }
 0x1ab   : > { %v2296_v21 = vsel %vm13561_vm3, %v2263_v15, %v5735_v18  ;;  %v2297_v43 = vsel %vm13562_vm4, %v2264_v16, %v5736_v7  ;;  %v5741_v23 = vunpack.i.h.bf16 %v5739_v28  ;;  %v5740_v34 = vunpack.i.l.bf16 %v5739_v28  ;;  %vm13567_vm3 = vmmov %vm13566_vm10  ;;  %v9677_v15 = vld [vmem:[%s12030_s2] ss:$0 sm:$0xff] }
 0x1ac   : > { %v5744_v39 = vpop.permute.xlu0 %5743  ;;  %vm13568_vm4 = vmmov %vm13560_vm12 }
 0x1ad   : > { %v5746_v35 = vunpack.i.h.bf16 %v5744_v39  ;;  %v5745_v57 = vunpack.i.l.bf16 %v5744_v39  ;;  %v2266_v26 = vsel %vm13568_vm4, %v2233_v41, %v5731_v8  ;;  %v2298_v7 = vsel %vm13569_vm15, %v2265_v38, %v5740_v34  ;;  %vm13574_vm12 = vmmov %vm13567_vm3 }
 0x1ae   : > { %v5749_v61 = vpop.permute.xlu1 %5748  ;;  %v2299_v18 = vsel %vm13570_vm0, %v2266_v26, %v5741_v23  ;;  %vm12506_vm4 = vmand %vm9204_vm1, %vm9272_vm9  ;;  %vm13576_vm15 = vnez %v13311_v49  ;;  %vm13629_vm9 = vcmask 146432  }
 0x1af   : > { %v2329_v6 = vsel %vm13563_vm11, %v2296_v21, %v5745_v57  ;;  %v2330_v11 = vsel %vm13564_vm13, %v2297_v43, %v5746_v35  ;;  %vm13571_vm13 = vmmov %vm13563_vm11  ;;  %v597_v39 = vsel %vm13576_vm15, %v13575_v60, 0.0  ;;  %v5751_v16 = vunpack.i.h.bf16 %v5749_v61  ;;  %v5049_v57 = vpop.f32.mrf.mxu0  ;;  %v13578_v21 = vld [vmem:[#allocation120_spill] sm:$0xff] }
 0x1b0   : > { %v5754_v13 = vpop.permute.xlu0 %5753  ;;  %v2362_v48 = vsel %vm13566_vm10, %v2329_v6, 0.0  ;;  %v2363_v9 = vsel %vm13567_vm3, %v2330_v11, 0.0  ;;  %vm13573_vm10 = vmmov %vm13567_vm3  ;;  %v5750_v8 = vunpack.i.l.bf16 %v5749_v61  ;;  %v598_v6 = vsel %vm12506_vm4, %v8950_v2, 0.0 }
 0x1b1   : > { %v5756_v20 = vunpack.i.h.bf16 %v5754_v13  ;;  %v5755_v24 = vunpack.i.l.bf16 %v5754_v13  ;;  %v2382_v0 = vpack.c.bf16 %v2363_v9, %v2362_v48  ;;  %vm12507_vm3 = vmand %vm9093_vm14, %vm9266_vm5  ;;  %v2501_v61 = vadd.f32 %v5049_v57, %v9677_v15  ;;  %v2492_v41 = vpop.f32.mrf.mxu0 }
 0x1b2   : > { %v5759_v58 = vpop.permute.xlu1 %5758  ;;  %vm13577_vm0 = vmmov %vm13572_vm7  ;;  %v596_v43 = vsel %vm12507_vm3, %v13578_v21, 0.0  ;;  %vm13621_vm14 = vcmask 146432   ;;  %vm13630_vm5 = vcmask 171008  }
 0x1b3   : > { %v2332_v54 = vsel %vm13563_vm11, %v2299_v18, %v5756_v20  ;;  %v2331_v37 = vsel %vm13571_vm13, %v2298_v7, %v5755_v24  ;;  %5071 = vmatprep.mubr.msk.bf16.mxu0 %vm13572_vm7, %v2382_v0  ;;  %v5761_v23 = vunpack.i.h.bf16 %v5759_v58  ;;  %v5760_v34 = vunpack.i.l.bf16 %v5759_v58  ;;  %v5050_v7 = vpop.f32.mrf.mxu0  ;;  %vm13624_vm15 = vmmov %vm13621_vm14 }
 0x1b4   : > { %v5764_v3 = vpop.permute.xlu0 %5763  ;;  %v2364_v28 = vsel %vm13573_vm10, %v2331_v37, 0.0  ;;  %v2365_v22 = vsel %vm13574_vm12, %v2332_v54, 0.0  ;;  %vm13579_vm11 = vnez %v13348_v4  ;;  %vm13580_vm13 = vcmask 23552  }
 0x1b5   : > { %v2383_v19 = vpack.c.bf16 %v2365_v22, %v2364_v28  ;;  %v5766_v17 = vunpack.i.h.bf16 %v5764_v3  ;;  %v599_v11 = vsel %vm13579_vm11, %v8946_v31, 0.0  ;;  %v5765_v38 = vunpack.i.l.bf16 %v5764_v3  ;;  %vm13581_vm7 = vmmov %vm13580_vm13 }
 0x1b6   : > { %v5769_v35 = vpop.permute.xlu1 %5768  ;;  %v2103_v9 = vsel %vm13580_vm13, %v597_v39, %v5751_v16  ;;  %v2102_v26 = vsel %vm13581_vm7, %v596_v43, %v5750_v8  ;;  %v2493_v0 = vadd.f32 %v9677_v15, %v2492_v41  ;;  %vm13582_vm10 = vmmov %vm13581_vm7  ;;  %v9705_v58 = vmax.f32 %v2501_v61, 0.0 }
 0x1b7   : > { %5072 = vmatmul.mubr.msk.bf16.gmra.mxu0 %vm13577_vm0, %v2383_v19  ;;  %v5771_v13 = vunpack.i.h.bf16 %v5769_v35  ;;  %v5770_v48 = vunpack.i.l.bf16 %v5769_v35  ;;  %v2105_v2 = vsel %vm13582_vm10, %v599_v11, %v5761_v23  ;;  %vm13583_vm12 = vmmov %vm13581_vm7  ;;  %vm13584_vm0 = vcmask 48128   ;;  %v2495_v19 = vpop.f32.mrf.mxu0 }
 0x1b8   : > { %v5774_v52 = vpop.permute.xlu0 %5773  ;;  %v2104_v18 = vsel %vm13583_vm12, %v598_v6, %v5760_v34  ;;  %v2136_v31 = vsel %vm13584_vm0, %v2103_v9, %v5766_v17  ;;  %v2504_v22 = vadd.f32 %v5050_v7, %v9677_v15  ;;  %vm13585_vm13 = vmmov %vm13584_vm0  ;;  %v2496_v8 = vadd.f32 %v9677_v15, %v2495_v19 }
 0x1b9   : > { %v5775_v20 = vunpack.i.l.bf16 %v5774_v52  ;;  %v5776_v54 = vunpack.i.h.bf16 %v5774_v52  ;;  %v2135_v60 = vsel %vm13585_vm13, %v2102_v26, %v5765_v38  ;;  %vm13586_vm7 = vmmov %vm13584_vm0  ;;  %vm13588_vm10 = vcmask 72704  }
 0x1ba   : > { %v5779_v24 = vpop.permute.xlu1 %5778  ;;  %v2137_v39 = vsel %vm13586_vm7, %v2104_v18, %v5770_v48  ;;  %vm13587_vm4 = vmmov %vm13584_vm0  ;;  %v9713_v57 = vmax.f32 %v2493_v0, 0.0  ;;  %v9715_v21 = vmax.f32 %v2504_v22, 0.0  ;;  %v9718_v6 = vmax.f32 %v2496_v8, 0.0 }
 0x1bb   : > { %v5781_v3 = vunpack.i.h.bf16 %v5779_v24  ;;  %v5780_v28 = vunpack.i.l.bf16 %v5779_v24  ;;  %v2138_v16 = vsel %vm13587_vm4, %v2105_v2, %v5771_v13  ;;  %v2168_v35 = vsel %vm13588_vm10, %v2135_v60, %v5775_v20  ;;  %vm13590_vm12 = vmmov %vm13588_vm10  ;;  %v13594_v20 = vld [vmem:[#allocation29_spill] sm:$0xff] }
 0x1bc   : > { %v5784_v37 = vpop.permute.xlu0 %5783  ;;  %13589 = vst [vmem:[#allocation57_spill] sm:$0xff] %v9713_v57  ;;  %v2169_v34 = vsel %vm13590_vm12, %v2136_v31, %v5776_v54  ;;  %13591 = vst [vmem:[#allocation64_spill] sm:$0xff] %v9718_v6  ;;  %v2653_v61 = vrot.slane %v9705_v58, 7  ;;  %v12510_v41 = vrot.slane %v9705_v58, 1  ;;  %v2780_v9 = vrot.slane %v9718_v6, 1  ;;  %v13597_v31 = vld [vmem:[#allocation28_spill] sm:$0xff] }
 0x1bd   : > { %v5785_v43 = vunpack.i.l.bf16 %v5784_v37  ;;  %v5786_v17 = vunpack.i.h.bf16 %v5784_v37  ;;  %vm13592_vm4 = vmmov %vm13588_vm10  ;;  %vm13595_vm13 = vnez %v13594_v20  ;;  %v12511_v0 = vrot.slane %v9713_v57, 1 }
 0x1be   : > { %v5789_v23 = vpop.permute.xlu1 %5788  ;;  %v2170_v38 = vsel %vm13592_vm4, %v2137_v39, %v5780_v28  ;;  %vm13593_vm0 = vmmov %vm13592_vm4  ;;  %v2751_v24 = vsel %vm13595_vm13, %v9705_v58, 0.0  ;;  %vm13596_vm7 = vcmask 97280   ;;  %vm13598_vm10 = vnez %v13597_v31 }
 0x1bf   : > { %v5790_v52 = vunpack.i.l.bf16 %v5789_v23  ;;  %v2171_v13 = vsel %vm13593_vm0, %v2138_v16, %v5781_v3  ;;  %v5791_v48 = vunpack.i.h.bf16 %v5789_v23  ;;  %v2201_v7 = vsel %vm13596_vm7, %v2168_v35, %v5785_v43  ;;  %vm13599_vm12 = vmmov %vm13596_vm7  ;;  %v13601_v16 = vld [vmem:[#allocation24_spill] sm:$0xff] }
 0x1c0   : > { %v5794_v11 = vpop.permute.xlu0 %5793  ;;  %v2752_v54 = vsel %vm13598_vm10, %v9715_v21, 0.0  ;;  %v12514_v37 = vrot.slane %v9715_v21, 7  ;;  %v2202_v3 = vsel %vm13599_vm12, %v2169_v34, %v5786_v17  ;;  %vm13600_vm4 = vmmov %vm13596_vm7  ;;  %vm13602_vm0 = vnez %v13601_v16  ;;  %v13607_v17 = vld [vmem:[#allocation9_spill] sm:$0xff] }
 0x1c1   : > { %v5795_v26 = vunpack.i.l.bf16 %v5794_v11  ;;  %v5796_v2 = vunpack.i.h.bf16 %v5794_v11  ;;  %v2203_v28 = vsel %vm13600_vm4, %v2170_v38, %v5790_v52  ;;  %v5832_v22 = vpack.i.bf16 %v2752_v54, %v2751_v24  ;;  %vm13604_vm3 = vmmov %vm13600_vm4 }
 0x1c2   : > { %v5799_v18 = vpop.permute.xlu1 %5798  ;;  %v2972_v8 = vsel %vm13602_vm0, %v9715_v21, 0.0  ;;  %vm13603_vm7 = vcmp.lt.s32.totalorder %v6508_v1, 7  ;;  %v2204_v43 = vsel %vm13604_vm3, %v2171_v13, %v5791_v48  ;;  %vm13605_vm12 = vcmask 121856   ;;  %v13610_v13 = vld [vmem:[#allocation23_spill] sm:$0xff] }
 0x1c3   : > { %v5801_v39 = vunpack.i.h.bf16 %v5799_v18  ;;  %v9744_v35 = vsel %vm13603_vm7, %v2780_v9, %v12510_v41  ;;  %v2234_v23 = vsel %vm13605_vm12, %v2201_v7, %v5795_v26  ;;  %5833 = vrot.lane.b32.xlu1 %v5832_v22, %s6411_s18  ;;  %vm13606_vm4 = vmmov %vm13603_vm7  ;;  %vm13608_vm1 = vnez %v13607_v17 }
 0x1c4   : > { %v5804_v19 = vpop.permute.xlu0 %5803  ;;  %v9753_v34 = vsel %vm13606_vm4, %v12511_v0, %v2780_v9  ;;  %v2908_v52 = vsel %vm13608_vm1, %v9744_v35, 0.0  ;;  %vm13609_vm11 = vmmov %vm13605_vm12  ;;  %vm13611_vm3 = vnez %v13610_v13  ;;  %v5800_v7 = vunpack.i.l.bf16 %v5799_v18  ;;  %v13614_v0 = vld [vmem:[#allocation14_spill] sm:$0xff] }
 0x1c5   : > { %v2235_v11 = vsel %vm13609_vm11, %v2202_v3, %v5796_v2  ;;  %v5805_v38 = vunpack.i.l.bf16 %v5804_v19  ;;  %v2971_v48 = vsel %vm13611_vm3, %v9705_v58, 0.0  ;;  %v5857_v26 = vpack.i.bf16 %v2908_v52, %v9753_v34  ;;  %vm13613_vm12 = vmmov %vm13609_vm11 }
 0x1c6   : > { %v5809_v24 = vpop.permute.xlu1 %5808  ;;  %v5806_v54 = vunpack.i.h.bf16 %v5804_v19  ;;  %v5837_v22 = vpack.i.bf16 %v2972_v8, %v2971_v48  ;;  %vm13612_vm7 = vcmp.lt.s32.totalorder %v6508_v1, 1  ;;  %v2237_v2 = vsel %vm13613_vm12, %v2204_v43, %v5801_v39  ;;  %v13618_v39 = vld [vmem:[#allocation18_spill] sm:$0xff] }
 0x1c7   : > { %v9767_v9 = vsel %vm13612_vm7, %v2653_v61, %v12514_v37  ;;  %v5811_v3 = vunpack.i.h.bf16 %v5809_v24  ;;  %5858 = vrot.lane.b32.xlu0 %v5857_v26, %s6411_s18  ;;  %vm13615_vm11 = vnez %v13614_v0  ;;  %v13616_v18 = vrot.slane %v9718_v6, 7  ;;  %vm13617_vm4 = vmmov %vm13612_vm7  ;;  %v13622_v37 = vld [vmem:[#allocation13_spill] sm:$0xff] }
 0x1c8   : > { %v5814_v41 = vpop.permute.xlu0 %5813  ;;  %v2750_v60 = vsel %vm13615_vm11, %v9718_v6, 0.0  ;;  %5838 = vrot.lane.b32.xlu1 %v5837_v22, %s6412_s19  ;;  %vm13619_vm7 = vnez %v13618_v39  ;;  %v2940_v48 = vsel %vm13602_vm0, %v9767_v9, 0.0  ;;  %v2267_v26 = vsel %vm13621_vm14, %v2234_v23, %v5805_v38 }
 0x1c9   : > { %v9778_v19 = vsel %vm13617_vm4, %v13616_v18, %v2653_v61  ;;  %v5816_v8 = vunpack.i.h.bf16 %v5814_v41  ;;  %v5815_v52 = vunpack.i.l.bf16 %v5814_v41  ;;  %vm13620_vm12 = vmand %vm13611_vm3, %vm13619_vm7  ;;  %v5810_v61 = vunpack.i.l.bf16 %v5809_v24 }
 0x1ca   : > { %v2939_v43 = vsel %vm13620_vm12, %v9778_v19, 0.0  ;;  %v5819_v18 = vpop.permute.xlu1 %5818  ;;  %vm13623_vm4 = vnez %v13622_v37  ;;  %v2268_v53 = vsel %vm13624_vm15, %v2235_v11, %v5806_v54  ;;  %vm13626_vm14 = vnez %v13625_v51  ;;  %vm13631_vm7 = vmmov %vm13630_vm5  ;;  %v13707_v37 = vld [vmem:[#allocation46_spill] sm:$0xff] }
 0x1cb   : > { %v2749_v22 = vsel %vm13623_vm4, %v9713_v57, 0.0  ;;  %v5862_v41 = vpack.i.bf16 %v2940_v48, %v2939_v43  ;;  %v2845_v49 = vsel %vm13623_vm4, %v9753_v34, 0.0  ;;  %vm13627_vm12 = vmand %vm13615_vm11, %vm13626_vm14  ;;  %v5821_v38 = vunpack.i.h.bf16 %v5819_v18 }
 0x1cc   : > { %v5842_v4 = vpack.i.bf16 %v2750_v60, %v2749_v22  ;;  %v5824_v36 = vpop.permute.xlu0 %5823  ;;  %v2846_v23 = vsel %vm13627_vm12, %v9744_v35, 0.0  ;;  %v5820_v24 = vunpack.i.l.bf16 %v5819_v18  ;;  %vm13628_vm15 = vcmask 121856   ;;  %vm13632_vm4 = vmmov %vm13629_vm9 }
 0x1cd   : > { %v5826_v27 = vunpack.i.h.bf16 %v5824_v36  ;;  %v5825_v45 = vunpack.i.l.bf16 %v5824_v36  ;;  %5863 = vrot.lane.b32.xlu0 %v5862_v41, %s6413_s20  ;;  %v2236_v60 = vsel %vm13628_vm15, %v2203_v28, %v5800_v7  ;;  %v2270_v11 = vsel %vm13629_vm9, %v2237_v2, %v5811_v3  ;;  %vm13637_vm9 = vmmov %vm13630_vm5 }
 0x1ce   : > { %v2300_v54 = vsel %vm13630_vm5, %v2267_v26, %v5815_v52  ;;  %v2301_v43 = vsel %vm13631_vm7, %v2268_v53, %v5816_v8  ;;  %5843 = vrot.lane.b32.xlu1 %v5842_v4, %s6411_s18  ;;  %v2269_v48 = vsel %vm13632_vm4, %v2236_v60, %v5810_v61  ;;  %vm13633_vm12 = vcmask 195584   ;;  %v13638_v4 = vld [vmem:[#allocation21_spill] sm:$0xff] }
 0x1cf   : > { %v2333_v22 = vsel %vm13633_vm12, %v2300_v54, %v5825_v45  ;;  %vm13634_vm11 = vmmov %vm13633_vm12  ;;  %v5829_v36 = vpop.permute.xlu1 %5828  ;;  %v5847_v55 = vpack.i.bf16 %v2846_v23, %v2845_v49  ;;  %vm13635_vm1 = vcmask 220160   ;;  %v2302_v2 = vsel %vm13637_vm9, %v2269_v48, %v5820_v24 }
 0x1d0   : > { %v2334_v18 = vsel %vm13634_vm11, %v2301_v43, %v5826_v27  ;;  %v5831_v12 = vunpack.i.h.bf16 %v5829_v36  ;;  %v5830_v41 = vunpack.i.l.bf16 %v5829_v36  ;;  %v2366_v28 = vsel %vm13635_vm1, %v2333_v22, 0.0  ;;  %vm13636_vm15 = vmmov %vm13635_vm1 }
 0x1d1   : > { %v2367_v7 = vsel %vm13636_vm15, %v2334_v18, 0.0  ;;  %v2303_v53 = vsel %vm13630_vm5, %v2270_v11, %v5821_v38  ;;  %vm13639_vm7 = vnez %v13638_v4  ;;  %vm13640_vm4 = vmmov %vm13634_vm11  ;;  %vm13642_vm12 = vcmask 261120  }
 0x1d2   : > { %v2384_v3 = vpack.c.bf16 %v2367_v7, %v2366_v28  ;;  %v2877_v8 = vsel %vm13639_vm7, %v9778_v19, 0.0  ;;  %v2335_v45 = vsel %vm13640_vm4, %v2302_v2, %v5830_v41  ;;  %vm13641_vm11 = vmmov %vm13640_vm4  ;;  %5848 = vrot.lane.b32.xlu1 %v5847_v55, %s6413_s20  ;;  %v3033_v23 = vsel %vm9246_vm2, %v9753_v34, 0.0  ;;  %v13651_v7 = vld [vmem:[#allocation38_spill] sm:$0xff] }
 0x1d3   : > { %v2336_v27 = vsel %vm13641_vm11, %v2303_v53, %v5831_v12  ;;  %v2368_v49 = vsel %vm13635_vm1, %v2335_v45, 0.0  ;;  %vm13643_vm15 = vmmov %vm13635_vm1  ;;  %v5852_v26 = vpack.i.bf16 %v9767_v9, %v2877_v8  ;;  %v5053_v12 = vpop.f32.mrf.mxu0  ;;  %v2782_v22 = vrot.slane %v9715_v21, 1  ;;  %v13653_v53 = vld [vmem:[#allocation39_spill] sm:$0xff]  ;;  %v13655_v45 = vld [vmem:[#allocation45_spill] sm:$0xff] }
 0x1d4   : > { %5075 = vmatprep.mubr.msk.bf16.mxu0 %vm13642_vm12, %v2384_v3  ;;  %v2369_v52 = vsel %vm13643_vm15, %v2336_v27, 0.0  ;;  %vm13644_vm9 = vmand %vm9307_vm6, %vm13353_vm8  ;;  %v2517_v24 = vadd.f32 %v5053_v12, %v9677_v15  ;;  %vm13652_vm4 = vnez %v13651_v7  ;;  %vm13654_vm11 = vnez %v13653_v53 }
 0x1d5   : > { %v2385_v61 = vpack.c.bf16 %v2369_v52, %v2368_v49  ;;  %v3034_v55 = vsel %vm13644_vm9, %v9744_v35, 0.0  ;;  %vm13645_vm5 = vmmov %vm13642_vm12  ;;  %v2508_v60 = vpop.f32.mrf.mxu0  ;;  %vm13656_vm12 = vnez %v13655_v45  ;;  %v13657_v49 = vld [vmem:[#allocation44_spill] sm:$0xff]  ;;  %vm13659_vm15 = vcmp.lt.s32.totalorder %v6508_v1, 7 }
 0x1d6   : > { %5853 = vrot.lane.b32.xlu1 %v5852_v26, %s6412_s19  ;;  %v9838_v38 = vpack.c.bf16 %v3034_v55, %v3033_v23  ;;  %v2509_v11 = vadd.f32 %v9677_v15, %v2508_v60  ;;  %v9842_v54 = vmax.f32 %v2517_v24, 0.0  ;;  %vm13658_vm1 = vnez %v13657_v49  ;;  %vm13661_vm9 = vmmov %vm13659_vm15  ;;  %v6316_v49 = vld [vmem:[%s12031_s3 + $0x78] sm:$0xff]  }
 0x1d7   : > { %5076 = vmatmul.mubr.msk.bf16.gmra.mxu0 %vm13645_vm5, %v2385_v61  ;;  %v5054_v34 = vpop.f32.mrf.mxu0  ;;  %v13660_v55 = vrot.slane %v9705_v58, 1  ;;  %vm13667_vm2 = vcmp.lt.s32.totalorder %v6508_v1, 7  ;;  %vm13670_vm8 = vcmp.lt.s32.totalorder %v6508_v1, 1  ;;  %v13675_v25 = vrot.slane %v9715_v21, 7  ;;  %5115 = vmatprep.subr.bf16.mxu1 %v6316_v49 }
 0x1d8   : > { %13646 = vst [vmem:[#allocation53_spill] sm:$0xff] %v9838_v38  ;;  %13647 = vst [vmem:[#allocation63_spill] sm:$0xff] %v9842_v54  ;;  %v9844_v43 = vmax.f32 %v2509_v11, 0.0  ;;  %v2520_v48 = vadd.f32 %v5054_v34, %v9677_v15  ;;  %v2975_v2 = vsel %vm13652_vm4, %v9842_v54, 0.0  ;;  %v2755_v27 = vsel %vm13656_vm12, %v9842_v54, 0.0  ;;  %v13662_v11 = vld [vmem:[#allocation31_spill] sm:$0xff]  ;;  %4895 = vmatprep.subr.bf16.mxu0 %v6316_v49 }
 0x1d9   : > { %v2511_v35 = vpop.f32.mrf.mxu0  ;;  %v2839_v12 = vsel %vm13661_vm9, %v13660_v55, %v2782_v22  ;;  %vm13663_vm5 = vnez %v13662_v11  ;;  %v6319_v49 = vld [vmem:[%s12031_s3 + $0x30] sm:$0xff]  }
 0x1da   : > { %13648 = vst [vmem:[#allocation79_spill] sm:$0xff] %v9844_v43  ;;  %v2783_v18 = vrot.slane %v9844_v43, 1  ;;  %v9849_v36 = vmax.f32 %v2520_v48, 0.0  ;;  %v2512_v41 = vadd.f32 %v9677_v15, %v2511_v35  ;;  %v2655_v48 = vrot.slane %v9844_v43, 7 }
 0x1dc   : > { %13649 = vst [vmem:[#allocation78_spill] sm:$0xff] %v9849_v36  ;;  %v9852_v28 = vmax.f32 %v2512_v41, 0.0  ;;  %v2976_v3 = vsel %vm13654_vm11, %v9849_v36, 0.0  ;;  %v2756_v52 = vsel %vm13658_vm1, %v9849_v36, 0.0  ;;  %v2838_v26 = vsel %vm13659_vm15, %v2782_v22, %v2783_v18  ;;  %vm13664_vm15 = vmand %vm13598_vm10, %vm13663_vm5 }
 0x1dd   : > { %v5867_v8 = vpack.i.bf16 %v2976_v3, %v2975_v2  ;;  %v5872_v23 = vpack.i.bf16 %v2756_v52, %v2755_v27  ;;  %v2910_v24 = vsel %vm13626_vm14, %v2838_v26, 0.0  ;;  %v2848_v34 = vsel %vm13664_vm15, %v2838_v26, 0.0  ;;  %v13665_v3 = vld [vmem:[#allocation27_spill] sm:$0xff]  ;;  %v13668_v52 = vld [vmem:[#allocation30_spill] sm:$0xff] }
 0x1de   : > { %13650 = vst [vmem:[#allocation20_spill] sm:$0xff] %v9852_v28  ;;  %v2784_v61 = vrot.slane %v9852_v28, 1  ;;  %v2656_v60 = vrot.slane %v9852_v28, 7  ;;  %v5877_v35 = vpack.i.bf16 %v2910_v24, %v2839_v12  ;;  %v2847_v22 = vsel %vm13595_vm13, %v2839_v12, 0.0  ;;  %v13671_v24 = vld [vmem:[#allocation25_spill] sm:$0xff] }
 0x1df   : > { %5868 = vrot.lane.b32.xlu0 %v5867_v8, %s6412_s19  ;;  %5873 = vrot.lane.b32.xlu1 %v5872_v23, %s6411_s18  ;;  %v12552_v41 = vrot.slane %v9842_v54, 1  ;;  %v5882_v2 = vpack.i.bf16 %v2848_v34, %v2847_v22  ;;  %vm13666_vm9 = vnez %v13665_v3  ;;  %vm13669_vm15 = vnez %v13668_v52  ;;  %v13673_v22 = vld [vmem:[#allocation32_spill] sm:$0xff]  ;;  %v13682_v3 = vld [vmem:[#allocation34_spill] sm:$0xff] }
 0x1e0   : > { %v2974_v8 = vsel %vm13666_vm9, %v9852_v28, 0.0  ;;  %v2837_v27 = vsel %vm13667_vm2, %v2783_v18, %v2784_v61  ;;  %v2754_v23 = vsel %vm13669_vm15, %v9852_v28, 0.0  ;;  %v9898_v55 = vsel %vm13670_vm8, %v2655_v48, %v2656_v60 }
 0x1e1   : > { %vm13672_vm6 = vnez %v13671_v24  ;;  %v2836_v18 = vsel %vm13667_vm2, %v2784_v61, %v12552_v41  ;;  %vm13674_vm10 = vnez %v13673_v22  ;;  %v9915_v33 = vsel %vm13670_vm8, %v13675_v25, %v2655_v48  ;;  %vm13678_vm8 = vmand %vm13666_vm9, %vm13626_vm14 }
 0x1e2   : > { %v2973_v34 = vsel %vm13672_vm6, %v9844_v43, 0.0  ;;  %v2753_v38 = vsel %vm13674_vm10, %v9844_v43, 0.0  ;;  %v2942_v39 = vsel %vm13666_vm9, %v9898_v55, 0.0  ;;  %v3003_v61 = vsel %vm13611_vm3, %v2839_v12, 0.0  ;;  %vm13679_vm3 = vmand %vm13672_vm6, %vm13639_vm7 }
 0x1e3   : > { %5878 = vrot.lane.b32.xlu0 %v5877_v35, %s6411_s18  ;;  %5883 = vrot.lane.b32.xlu1 %v5882_v2, %s6413_s20  ;;  %v5887_v35 = vpack.i.bf16 %v2974_v8, %v2973_v34  ;;  %v3005_v2 = vsel %vm13672_vm6, %v2837_v27, 0.0  ;;  %v5892_v14 = vpack.i.bf16 %v2754_v23, %v2753_v38  ;;  %vm13676_vm2 = vnez %v13607_v17  ;;  %v13684_v34 = vld [vmem:[#allocation33_spill] sm:$0xff] }
 0x1e4   : > { %vm13677_vm13 = vmand %vm13602_vm0, %vm13676_vm2  ;;  %v3006_v38 = vsel %vm13678_vm8, %v2836_v18, 0.0  ;;  %v2941_v13 = vsel %vm13679_vm3, %v9915_v33, 0.0  ;;  %v12551_v48 = vrot.slane %v9849_v36, 7  ;;  %v2912_v23 = vsel %vm13663_vm5, %v2836_v18, 0.0 }
 0x1e5   : > { %v3004_v25 = vsel %vm13677_vm13, %v2838_v26, 0.0  ;;  %v9944_v12 = vpack.c.bf16 %v3006_v38, %v3005_v2  ;;  %v2657_v26 = vrot.slane %v9842_v54, 7  ;;  %v5902_v51 = vpack.i.bf16 %v2942_v39, %v2941_v13 }
 0x1e6   : > { %v9942_v16 = vpack.c.bf16 %v3004_v25, %v3003_v61  ;;  %vm13683_vm13 = vnez %v13682_v3  ;;  %v2849_v24 = vsel %vm13674_vm10, %v2837_v27, 0.0  ;;  %vm13685_vm6 = vnez %v13684_v34 }
 0x1e7   : > { %5888 = vrot.lane.b32.xlu0 %v5887_v35, %s6412_s19  ;;  %5893 = vrot.lane.b32.xlu1 %v5892_v14, %s6411_s18  ;;  %13681 = vst [vmem:[#allocation12_spill] sm:$0xff] %v9944_v12  ;;  %v2879_v14 = vsel %vm13683_vm13, %v9915_v33, 0.0  ;;  %vm13686_vm0 = vmand %vm13669_vm15, %vm13685_vm6  ;;  %vm13687_vm14 = vcmp.lt.s32.totalorder %v6508_v1, 1  ;;  %v5907_v2 = vpack.i.bf16 %v2912_v23, %v2837_v27  ;;  %vm13704_vm7 = vcmp.lt.s32.totalorder %v6508_v1, 7 }
 0x1e8   : > { %13680 = vst [vmem:[#allocation19_spill] sm:$0xff] %v9942_v16  ;;  %v5897_v8 = vpack.i.bf16 %v9898_v55, %v2879_v14  ;;  %v2850_v39 = vsel %vm13686_vm0, %v2836_v18, 0.0  ;;  %v9964_v35 = vsel %vm13687_vm14, %v2656_v60, %v2657_v26  ;;  %vm13688_vm9 = vmmov %vm13687_vm14  ;;  %v13691_v60 = vld [vmem:[#allocation36_spill] sm:$0xff]  ;;  %v13705_v16 = vrot.slane %v9842_v54, 1 }
 0x1e9   : > { %v9971_v61 = vsel %vm13688_vm9, %v2657_v26, %v12551_v48  ;;  %v5917_v25 = vpack.i.bf16 %v2850_v39, %v2849_v24  ;;  %vm13690_vm8 = vmand %vm13652_vm4, %vm13683_vm13  ;;  %vm13692_vm3 = vnez %v13691_v60  ;;  %vm13701_vm9 = vnez %v13356_v63  ;;  %v6330_v63 = vld [vmem:[%s12031_s3 + $0x40] sm:$0xff]  }
 0x1ea   : > { %13689 = vst [vmem:[#allocation16_spill] sm:$0xff] %v9971_v61  ;;  %v2943_v18 = vsel %vm13690_vm8, %v9964_v35, 0.0  ;;  %v2881_v27 = vsel %vm13692_vm3, %v9964_v35, 0.0  ;;  %v2944_v38 = vsel %vm13654_vm11, %v9971_v61, 0.0  ;;  %vm13706_vm2 = vmmov %vm13704_vm7  ;;  %vm13708_vm15 = vnez %v13707_v37 }
 0x1eb   : > { %5903 = vrot.lane.b32.xlu0 %v5902_v51, %s6413_s20  ;;  %5898 = vrot.lane.b32.xlu1 %v5897_v8, %s6412_s19  ;;  %v5912_v13 = vpack.i.bf16 %v2944_v38, %v2943_v18  ;;  %v5922_v26 = vpack.i.bf16 %v9971_v61, %v2881_v27  ;;  %v2786_v27 = vrot.slane %v9849_v36, 1  ;;  %vm13709_vm10 = vmand %vm13658_vm1, %vm13708_vm15  ;;  %v13722_v42 = vrot.slane %v9849_v36, 7 }
 0x1ed   : > { %v2835_v4 = vsel %vm13706_vm2, %v13705_v16, %v2786_v27  ;;  %vm13714_vm2 = vcmp.lt.s32.totalorder %v6508_v1, 1 }
 0x1ef   : > { %5908 = vrot.lane.b32.xlu0 %v5907_v2, %s6411_s18  ;;  %5918 = vrot.lane.b32.xlu1 %v5917_v25, %s6413_s20 }
 0x1f3   : > { %5913 = vrot.lane.b32.xlu0 %v5912_v13, %s6413_s20  ;;  %5923 = vrot.lane.b32.xlu1 %v5922_v26, %s6412_s19 }
 0x1f4   : > { %v5057_v51 = vpop.f32.mrf.mxu0 }
 0x1f5   : > { %v2533_v14 = vadd.f32 %v5057_v51, %v9677_v15 }
 0x1f6   : > { %v2524_v8 = vpop.f32.mrf.mxu0 }
 0x1f7   : > { %v2525_v23 = vadd.f32 %v9677_v15, %v2524_v8  ;;  %v9992_v39 = vmax.f32 %v2533_v14, 0.0  ;;  %v13697_v8 = vld [vmem:[#allocation58_spill] sm:$0xff] }
 0x1f8   : > { %v5058_v24 = vpop.f32.mrf.mxu0  ;;  %vm13698_vm0 = vnez %v13697_v8 }
 0x1f9   : > { %13693 = vst [vmem:[#allocation15_spill] sm:$0xff] %v9992_v39  ;;  %v9994_v2 = vmax.f32 %v2525_v23, 0.0  ;;  %v2536_v25 = vadd.f32 %v5058_v24, %v9677_v15  ;;  %v2979_v14 = vsel %vm13698_vm0, %v9992_v39, 0.0  ;;  %v13699_v23 = vld [vmem:[#allocation61_spill] sm:$0xff]  ;;  %v2759_v41 = vsel %vm13701_vm9, %v9992_v39, 0.0 }
 0x1fa   : > { %v2527_v18 = vpop.f32.mrf.mxu0  ;;  %vm13700_vm14 = vnez %v13699_v23  ;;  %v2789_v17 = vrot.slane %v9992_v39, 1  ;;  %v2661_v11 = vrot.slane %v9992_v39, 7 }
 0x1fb   : > { %13694 = vst [vmem:[#allocation77_spill] sm:$0xff] %v9994_v2  ;;  %v2787_v38 = vrot.slane %v9994_v2, 1  ;;  %v9999_v13 = vmax.f32 %v2536_v25, 0.0  ;;  %v2528_v51 = vadd.f32 %v9677_v15, %v2527_v18  ;;  %v13702_v25 = vld [vmem:[#allocation66_spill] sm:$0xff] }
 0x1fc   : > { %vm13703_vm8 = vnez %v13702_v25 }
 0x1fd   : > { %13695 = vst [vmem:[#allocation74_spill] sm:$0xff] %v9999_v13  ;;  %v10002_v26 = vmax.f32 %v2528_v51, 0.0  ;;  %v2980_v48 = vsel %vm13700_vm14, %v9999_v13, 0.0  ;;  %v2760_v12 = vsel %vm13703_vm8, %v9999_v13, 0.0  ;;  %v2834_v18 = vsel %vm13704_vm7, %v2786_v27, %v2787_v38 }
 0x1fe   : > { %v5927_v24 = vpack.i.bf16 %v2980_v48, %v2979_v14  ;;  %v5932_v51 = vpack.i.bf16 %v2760_v12, %v2759_v41  ;;  %v2914_v48 = vsel %vm13685_vm6, %v2834_v18, 0.0  ;;  %v2852_v40 = vsel %vm13709_vm10, %v2834_v18, 0.0 }
 0x1ff   : > { %13696 = vst [vmem:[#allocation83_spill] sm:$0xff] %v10002_v26  ;;  %v2660_v14 = vrot.slane %v10002_v26, 7  ;;  %v2788_v41 = vrot.slane %v10002_v26, 1  ;;  %v2659_v12 = vrot.slane %v9994_v2, 7  ;;  %v5937_v16 = vpack.i.bf16 %v2914_v48, %v2835_v4  ;;  %v13716_v48 = vld [vmem:[#allocation40_spill] sm:$0xff] }
 0x200   : > { %5928 = vrot.lane.b32.xlu0 %v5927_v24, %s6412_s19  ;;  %5933 = vrot.lane.b32.xlu1 %v5932_v51, %s6411_s18  ;;  %v2851_v27 = vsel %vm13656_vm12, %v2835_v4, 0.0  ;;  %v13710_v24 = vld [vmem:[#allocation43_spill] sm:$0xff]  ;;  %vm13713_vm10 = vnez %v13712_v47  ;;  %vm13717_vm1 = vnez %v13716_v48  ;;  %vm13718_vm12 = vcmp.lt.s32.totalorder %v6508_v1, 7 }
 0x201   : > { %v5942_v54 = vpack.i.bf16 %v2852_v40, %v2851_v27  ;;  %vm13711_vm7 = vnez %v13710_v24  ;;  %v2758_v43 = vsel %vm13713_vm10, %v10002_v26, 0.0  ;;  %v10046_v51 = vsel %vm13714_vm2, %v2659_v12, %v2660_v14  ;;  %vm13719_vm13 = vmmov %vm13718_vm12 }
 0x202   : > { %v2978_v29 = vsel %vm13711_vm7, %v10002_v26, 0.0  ;;  %13715 = vst [vmem:[#allocation84_spill] sm:$0xff] %v10046_v51  ;;  %v2977_v40 = vsel %vm13717_vm1, %v9994_v2, 0.0  ;;  %v2832_v27 = vsel %vm13718_vm12, %v2788_v41, %v2789_v17  ;;  %v13720_v26 = vld [vmem:[#allocation48_spill] sm:$0xff]  ;;  %vm13724_vm12 = vmand %vm13654_vm11, %vm13663_vm5  ;;  %v12575_v34 = vrot.slane %v9999_v13, 7 }
 0x203   : > { %v5947_v28 = vpack.i.bf16 %v2978_v29, %v2977_v40  ;;  %vm13721_vm8 = vnez %v13720_v26  ;;  %v3007_v29 = vsel %vm13652_vm4, %v2835_v4, 0.0  ;;  %vm13726_vm4 = vmand %vm13717_vm1, %vm13692_vm3  ;;  %v2916_v48 = vsel %vm13708_vm15, %v2832_v27, 0.0 }
 0x204   : > { %5938 = vrot.lane.b32.xlu0 %v5937_v16, %s6411_s18  ;;  %5943 = vrot.lane.b32.xlu1 %v5942_v54, %s6413_s20  ;;  %v2833_v16 = vsel %vm13719_vm13, %v2787_v38, %v2788_v41  ;;  %v2757_v32 = vsel %vm13721_vm8, %v9994_v2, 0.0  ;;  %v10065_v54 = vsel %vm13714_vm2, %v13722_v42, %v2659_v12  ;;  %v2946_v38 = vsel %vm13711_vm7, %v10046_v51, 0.0  ;;  %vm13725_vm13 = vmand %vm13711_vm7, %vm13685_vm6 }
 0x205   : > { %13723 = vst [vmem:[#allocation95_spill] sm:$0xff] %v10065_v54  ;;  %v5952_v61 = vpack.i.bf16 %v2758_v43, %v2757_v32  ;;  %v3008_v42 = vsel %vm13724_vm12, %v2834_v18, 0.0  ;;  %v3009_v41 = vsel %vm13717_vm1, %v2833_v16, 0.0  ;;  %v3010_v32 = vsel %vm13725_vm13, %v2832_v27, 0.0  ;;  %v6317_v43 = vld [vmem:[%s12031_s3 + $0x38] sm:$0xff]   ;;  %v13729_v18 = vld [vmem:[#allocation51_spill] sm:$0xff]  ;;  %vm13734_vm6 = vmmov %vm13714_vm2 }
 0x206   : > { %v2945_v4 = vsel %vm13726_vm4, %v10065_v54, 0.0  ;;  %v10101_v7 = vpack.c.bf16 %v3008_v42, %v3007_v29  ;;  %v10103_v53 = vpack.c.bf16 %v3010_v32, %v3009_v41  ;;  %vm13730_vm11 = vnez %v13729_v18  ;;  %5123 = vmatpush3.bf16.msra.mxu1 %v6317_v43  ;;  %4896 = vmatpush3.bf16.msra.mxu0 %v6317_v43  ;;  %v6320_v41 = vld [vmem:[%s12031_s3 + $0x68] sm:$0xff]   ;;  %vm13736_vm7 = vmmov %vm13714_vm2 }
 0x207   : > { %v2883_v12 = vsel %vm13730_vm11, %v10065_v54, 0.0  ;;  %v2853_v40 = vsel %vm13721_vm8, %v2833_v16, 0.0  ;;  %v10126_v42 = vsel %vm13734_vm6, %v2660_v14, %v2661_v11  ;;  %v5967_v32 = vpack.i.bf16 %v2916_v48, %v2833_v16  ;;  %vm13738_vm2 = vmand %vm13698_vm0, %vm13730_vm11  ;;  %v6321_v43 = vld [vmem:[%s12031_s3 + $0x28] sm:$0xff]   ;;  %v6323_v48 = vld [vmem:[%s12031_s3 + $0x20] sm:$0xff]  }
 0x208   : > { %5948 = vrot.lane.b32.xlu0 %v5947_v28, %s6412_s19  ;;  %5953 = vrot.lane.b32.xlu1 %v5952_v61, %s6411_s18  ;;  %v6318_v28 = vld [vmem:[%s12031_s3 + $0x70] sm:$0xff]   ;;  %13727 = vst [vmem:[#allocation93_spill] sm:$0xff] %v10101_v7  ;;  %13728 = vst [vmem:[#allocation102_spill] sm:$0xff] %v10103_v53  ;;  %v5962_v61 = vpack.i.bf16 %v2946_v38, %v2945_v4  ;;  %v5957_v24 = vpack.i.bf16 %v10046_v51, %v2883_v12  ;;  %v13731_v38 = vld [vmem:[#allocation49_spill] sm:$0xff]  ;;  %v2947_v14 = vsel %vm13738_vm2, %v10126_v42, 0.0 }
 0x209   : > { %vm13732_vm1 = vnez %v13731_v38  ;;  %13735 = vst [vmem:[#allocation103_spill] sm:$0xff] %v10126_v42  ;;  %5116 = vmatprep.subr.bf16.mxu1 %v6318_v28  ;;  %4897 = vmatprep.subr.bf16.mxu0 %v6318_v28  ;;  %v10136_v4 = vsel %vm13736_vm7, %v2661_v11, %v12575_v34  ;;  %v13739_v16 = vld [vmem:[#allocation54_spill] sm:$0xff]  ;;  %vm13744_vm13 = vcmp.lt.s32.totalorder %v6508_v1, 7  ;;  %v13748_v34 = vld [vmem:[#allocation80_spill] sm:$0xff]  ;;  %vm13751_vm7 = vnez %v13702_v25  ;;  %v13757_v51 = vld [vmem:[#allocation67_spill] sm:$0xff] }
 0x20a   : > { %vm13733_vm5 = vmand %vm13713_vm10, %vm13732_vm1  ;;  %13737 = vst [vmem:[#allocation115_spill] sm:$0xff] %v10136_v4  ;;  %5124 = vmatpush3.bf16.msra.mxu1 %v6319_v49  ;;  %4898 = vmatpush3.bf16.msra.mxu0 %v6319_v49  ;;  %vm13740_vm12 = vnez %v13739_v16  ;;  %v2948_v11 = vsel %vm13700_vm14, %v10136_v4, 0.0  ;;  %v13752_v7 = vld [vmem:[#allocation68_spill] sm:$0xff]  ;;  %vm13758_vm10 = vnez %v13757_v51  ;;  %v6329_v54 = vld [vmem:[%s12031_s3 + $0x8] sm:$0xff]   ;;  %vm13764_vm11 = vcmp.lt.s32.totalorder %v6508_v1, 7 }
 0x20b   : > { %v2854_v29 = vsel %vm13733_vm5, %v2832_v27, 0.0  ;;  %v2885_v28 = vsel %vm13740_vm12, %v10126_v42, 0.0  ;;  %5117 = vmatprep.subr.bf16.mxu1 %v6320_v41  ;;  %4899 = vmatprep.subr.bf16.mxu0 %v6320_v41  ;;  %v5972_v12 = vpack.i.bf16 %v2948_v11, %v2947_v14  ;;  %vm13749_vm5 = vnez %v13748_v34  ;;  %vm13750_vm6 = vmmov %vm13744_vm13 }
 0x20c   : > { %5963 = vrot.lane.b32.xlu0 %v5962_v61, %s6413_s20  ;;  %5958 = vrot.lane.b32.xlu1 %v5957_v24, %s6412_s19  ;;  %v5977_v27 = vpack.i.bf16 %v2854_v29, %v2853_v40  ;;  %v6322_v61 = vld [vmem:[%s12031_s3 + $0x60] sm:$0xff]   ;;  %v5982_v24 = vpack.i.bf16 %v10136_v4, %v2885_v28  ;;  %vm13753_vm2 = vnez %v13752_v7  ;;  %vm13765_vm3 = vmmov %vm13764_vm11 }
 0x20e   : > { %5125 = vmatpush3.bf16.msra.mxu1 %v6321_v43  ;;  %4900 = vmatpush3.bf16.msra.mxu0 %v6321_v43 }
 0x20f   : > { %5118 = vmatprep.subr.bf16.mxu1 %v6322_v61  ;;  %4901 = vmatprep.subr.bf16.mxu0 %v6322_v61  ;;  %v6324_v61 = vld [vmem:[%s12031_s3 + $0x58] sm:$0xff]  }
 0x210   : > { %5968 = vrot.lane.b32.xlu0 %v5967_v32, %s6411_s18  ;;  %5978 = vrot.lane.b32.xlu1 %v5977_v27, %s6413_s20  ;;  %v2790_v32 = vrot.slane %v9999_v13, 1 }
 0x212   : > { %5126 = vmatpush3.bf16.msra.mxu1 %v6323_v48  ;;  %4902 = vmatpush3.bf16.msra.mxu0 %v6323_v48 }
 0x213   : > { %5119 = vmatprep.subr.bf16.mxu1 %v6324_v61  ;;  %4903 = vmatprep.subr.bf16.mxu0 %v6324_v61  ;;  %v6327_v61 = vld [vmem:[%s12031_s3 + $0x10] sm:$0xff]  }
 0x214   : > { %5973 = vrot.lane.b32.xlu0 %v5972_v12, %s6413_s20  ;;  %5983 = vrot.lane.b32.xlu1 %v5982_v24, %s6412_s19  ;;  %v6325_v12 = vld [vmem:[%s12031_s3 + $0x18] sm:$0xff]  }
 0x216   : > { %5127 = vmatpush3.bf16.msra.mxu1 %v6325_v12  ;;  %4904 = vmatpush3.bf16.msra.mxu0 %v6325_v12 }
 0x21f   : > { %v5061_v49 = vpop.f32.mrf.mxu0 }
 0x220   : > { %v2549_v40 = vadd.f32 %v5061_v49, %v9677_v15 }
 0x221   : > { %v2540_v29 = vpop.f32.mrf.mxu0 }
 0x222   : > { %v2541_v41 = vadd.f32 %v9677_v15, %v2540_v29  ;;  %v10167_v14 = vmax.f32 %v2549_v40, 0.0  ;;  %v10186_v40 = vsel %vm13744_vm13, %v2789_v17, %v2790_v32  ;;  %v6326_v17 = vld [vmem:[%s12031_s3 + $0x50] sm:$0xff]   ;;  %vm13754_vm13 = vmand %vm13751_vm7, %vm13753_vm2  ;;  %vm13762_vm7 = vcmp.lt.s32.totalorder %v6508_v1, 1 }
 0x223   : > { %v5062_v27 = vpop.f32.mrf.mxu0  ;;  %5120 = vmatprep.subr.bf16.mxu1 %v6326_v17  ;;  %4905 = vmatprep.subr.bf16.mxu0 %v6326_v17 }
 0x224   : > { %13741 = vst [vmem:[#allocation113_spill] sm:$0xff] %v10167_v14  ;;  %v10169_v43 = vmax.f32 %v2541_v41, 0.0  ;;  %v2552_v28 = vadd.f32 %v5062_v27, %v9677_v15  ;;  %v13746_v41 = vld [vmem:[#allocation76_spill] sm:$0xff]  ;;  %5128 = vmatpush3.bf16.msra.mxu1 %v6327_v61  ;;  %4906 = vmatpush3.bf16.msra.mxu0 %v6327_v61 }
 0x225   : > { %v2543_v11 = vpop.f32.mrf.mxu0  ;;  %vm13747_vm4 = vnez %v13746_v41 }
 0x226   : > { %13742 = vst [vmem:[#allocation123_spill] sm:$0xff] %v10169_v43  ;;  %v2791_v24 = vrot.slane %v10169_v43, 1  ;;  %v10179_v48 = vmax.f32 %v2552_v28, 0.0  ;;  %v2544_v49 = vadd.f32 %v9677_v15, %v2543_v11  ;;  %v2983_v27 = vsel %vm13747_vm4, %v10167_v14, 0.0 }
 0x228   : > { %13743 = vst [vmem:[#allocation120_spill] sm:$0xff] %v10179_v48  ;;  %v10188_v29 = vmax.f32 %v2544_v49, 0.0  ;;  %v2984_v28 = vsel %vm13749_vm5, %v10179_v48, 0.0  ;;  %v2830_v53 = vsel %vm13750_vm6, %v2790_v32, %v2791_v24  ;;  %v2855_v49 = vsel %vm13701_vm9, %v10186_v40, 0.0  ;;  %vm13763_vm9 = vmmov %vm13762_vm7 }
 0x229   : > { %v5987_v11 = vpack.i.bf16 %v2984_v28, %v2983_v27  ;;  %v2856_v12 = vsel %vm13754_vm13, %v2830_v53, 0.0  ;;  %vm13755_vm6 = vnez %v13443_v44  ;;  %v6328_v27 = vld [vmem:[%s12031_s3 + $0x48] sm:$0xff]   ;;  %v2663_v28 = vrot.slane %v10169_v43, 7 }
 0x22a   : > { %13745 = vst [vmem:[#allocation29_spill] sm:$0xff] %v10188_v29  ;;  %v2764_v32 = vsel %vm13755_vm6, %v10179_v48, 0.0  ;;  %v6002_v39 = vpack.i.bf16 %v2856_v12, %v2855_v49  ;;  %v2664_v2 = vrot.slane %v10188_v29, 7  ;;  %v2792_v36 = vrot.slane %v10188_v29, 1  ;;  %v13759_v12 = vld [vmem:[#allocation71_spill] sm:$0xff]  ;;  %5121 = vmatprep.subr.bf16.mxu1 %v6328_v27  ;;  %4907 = vmatprep.subr.bf16.mxu0 %v6328_v27  ;;  %v13770_v27 = vld [vmem:[#allocation65_spill] sm:$0xff] }
 0x22b   : > { %5988 = vrot.lane.b32.xlu0 %v5987_v11, %s6412_s19  ;;  %vm13756_vm13 = vnez %v13436_v56  ;;  %v2762_v26 = vsel %vm13758_vm10, %v10188_v29, 0.0  ;;  %v12593_v49 = vrot.slane %v10167_v14, 1  ;;  %vm13760_vm8 = vnez %v13759_v12  ;;  %5129 = vmatpush3.bf16.msra.mxu1 %v6329_v54 }
 0x22c   : > { %v2763_v47 = vsel %vm13756_vm13, %v10167_v14, 0.0  ;;  %6003 = vrot.lane.b32.xlu1 %v6002_v39, %s6413_s20  ;;  %v2761_v25 = vsel %vm13760_vm8, %v10169_v43, 0.0  ;;  %v2918_v4 = vsel %vm13732_vm1, %v2830_v53, 0.0  ;;  %v2829_v61 = vsel %vm13765_vm3, %v2791_v24, %v2792_v36  ;;  %v13768_v24 = vld [vmem:[#allocation62_spill] sm:$0xff]  ;;  %5122 = vmatprep.subr.bf16.mxu1 %v6330_v63 }
 0x22d   : > { %v5992_v11 = vpack.i.bf16 %v2764_v32, %v2763_v47  ;;  %v6012_v17 = vpack.i.bf16 %v2762_v26, %v2761_v25  ;;  %v13761_v47 = vrot.slane %v9999_v13, 7  ;;  %v10250_v32 = vsel %vm13763_vm9, %v2663_v28, %v2664_v2  ;;  %v6331_v26 = vld [vmem:[%s12031_s3] sm:$0xff]   ;;  %4908 = vmatpush3.bf16.msra.mxu0 %v6329_v54 }
 0x22e   : > { %v2828_v42 = vsel %vm13764_vm11, %v2792_v36, %v12593_v49  ;;  %v5997_v25 = vpack.i.bf16 %v2918_v4, %v10186_v40  ;;  %vm13769_vm3 = vnez %v13768_v24  ;;  %vm13771_vm11 = vnez %v13770_v27  ;;  %4909 = vmatprep.subr.bf16.mxu0 %v6330_v63  ;;  %v13774_v63 = vld [vmem:[#allocation69_spill] sm:$0xff] }
 0x22f   : > { %5993 = vrot.lane.b32.xlu0 %v5992_v11, %s6411_s18  ;;  %v10246_v39 = vsel %vm13762_vm7, %v13761_v47, %v2663_v28  ;;  %v3011_v28 = vsel %vm13698_vm0, %v10186_v40, 0.0  ;;  %v2665_v11 = vrot.slane %v10167_v14, 7  ;;  %v13766_v47 = vld [vmem:[#allocation72_spill] sm:$0xff]  ;;  %v2981_v49 = vsel %vm13769_vm3, %v10169_v43, 0.0  ;;  %vm13772_vm0 = vmand %vm13700_vm14, %vm13708_vm15  ;;  %5130 = vmatpush3.bf16.msra.mxu1 %v6331_v26 }
 0x230   : > { %6013 = vrot.lane.b32.xlu1 %v6012_v17, %s6411_s18  ;;  %vm13767_vm9 = vnez %v13766_v47  ;;  %v2982_v17 = vsel %vm13771_vm11, %v10188_v29, 0.0  ;;  %v3012_v4 = vsel %vm13772_vm0, %v2830_v53, 0.0  ;;  %v3013_v40 = vsel %vm13769_vm3, %v2829_v61, 0.0  ;;  %vm13773_vm7 = vmand %vm13771_vm11, %vm13732_vm1 }
 0x231   : > { %v2887_v36 = vsel %vm13767_vm9, %v10246_v39, 0.0  ;;  %v3014_v54 = vsel %vm13773_vm7, %v2828_v42, 0.0  ;;  %vm13775_vm13 = vnez %v13774_v63  ;;  %v10297_v23 = vpack.c.bf16 %v3012_v4, %v3011_v28  ;;  %4910 = vmatpush3.bf16.msra.mxu0 %v6331_v26  ;;  %vm13781_vm14 = vmand %vm13769_vm3, %vm13740_vm12 }
 0x232   : > { %v6017_v8 = vpack.i.bf16 %v10250_v32, %v2887_v36  ;;  %vm13776_vm6 = vmand %vm13758_vm10, %vm13775_vm13  ;;  %v10299_v53 = vpack.c.bf16 %v3014_v54, %v3013_v40  ;;  %v6007_v36 = vpack.i.bf16 %v2982_v17, %v2981_v49  ;;  %vm13779_vm15 = vcmp.lt.s32.totalorder %v6508_v1, 1 }
 0x233   : > { %5998 = vrot.lane.b32.xlu0 %v5997_v25, %s6411_s18  ;;  %v2857_v25 = vsel %vm13760_vm8, %v2829_v61, 0.0  ;;  %v2858_v37 = vsel %vm13776_vm6, %v2828_v42, 0.0  ;;  %13777 = vst [vmem:[#allocation28_spill] sm:$0xff] %v10297_v23  ;;  %v10304_v38 = vsel %vm13779_vm15, %v2664_v2, %v2665_v11  ;;  %v12596_v43 = vrot.slane %v10179_v48, 7  ;;  %v13782_v2 = vld [vmem:[#allocation75_spill] sm:$0xff]  ;;  %vm13784_vm6 = vmmov %vm13779_vm15 }
 0x234   : > { %13778 = vst [vmem:[#allocation24_spill] sm:$0xff] %v10299_v53  ;;  %6018 = vrot.lane.b32.xlu1 %v6017_v8, %s6412_s19  ;;  %13780 = vst [vmem:[#allocation23_spill] sm:$0xff] %v10304_v38  ;;  %v2950_v29 = vsel %vm13771_vm11, %v10250_v32, 0.0  ;;  %v6037_v28 = vpack.i.bf16 %v2858_v37, %v2857_v25  ;;  %v2949_v49 = vsel %vm13781_vm14, %v10246_v39, 0.0  ;;  %vm13783_vm1 = vnez %v13782_v2 }
 0x235   : > { %v2889_v17 = vsel %vm13783_vm1, %v10304_v38, 0.0  ;;  %v6022_v8 = vpack.i.bf16 %v2950_v29, %v2949_v49  ;;  %v10325_v26 = vsel %vm13784_vm6, %v2665_v11, %v12596_v43  ;;  %v2920_v24 = vsel %vm13753_vm2, %v2828_v42, 0.0  ;;  %vm13786_vm3 = vmand %vm13747_vm4, %vm13767_vm9  ;;  %v5834_v11 = vpop.permute.xlu1 %5833 }
 0x236   : > { %13785 = vst [vmem:[#allocation14_spill] sm:$0xff] %v10325_v26  ;;  %v6042_v27 = vpack.i.bf16 %v10325_v26, %v2889_v17  ;;  %v6027_v4 = vpack.i.bf16 %v2920_v24, %v2829_v61  ;;  %v2951_v29 = vsel %vm13786_vm3, %v10304_v38, 0.0  ;;  %v2952_v42 = vsel %vm13749_vm5, %v10325_v26, 0.0 }
 0x237   : > { %6008 = vrot.lane.b32.xlu0 %v6007_v36, %s6412_s19  ;;  %v5836_v54 = vunpack.i.h.bf16 %v5834_v11  ;;  %v5835_v25 = vunpack.i.l.bf16 %v5834_v11  ;;  %v6032_v36 = vpack.i.bf16 %v2952_v42, %v2951_v29  ;;  %vm13787_vm11 = vnez %v13594_v20 }
 0x238   : > { %6038 = vrot.lane.b32.xlu1 %v6037_v28, %s6413_s20  ;;  %vm13788_vm0 = vnez %v13682_v3  ;;  %vm13790_vm15 = vnez %v13597_v31  ;;  %vm13791_vm14 = vcmask 261120   ;;  %vm12601_vm3 = vcmask 523264  }
 0x239   : > { %v5065_v40 = vpop.f32.mrf.mxu0  ;;  %vm13789_vm7 = vmand %vm13787_vm11, %vm13788_vm0  ;;  %v2720_v28 = vsel %vm13790_vm15, %v9767_v9, 0.0  ;;  %vm12602_vm11 = vcmask 785408   ;;  %v13806_v53 = vrot.slane %v10167_v14, 1  ;;  %vm13814_vm12 = vnez %v13447_v59 }
 0x23a   : > { %v2719_v61 = vsel %vm13789_vm7, %v9778_v19, 0.0  ;;  %v2565_v49 = vadd.f32 %v5065_v40, %v9677_v15  ;;  %vm13792_vm6 = vmmov %vm13791_vm14  ;;  %v5839_v19 = vpop.permute.xlu1 %5838  ;;  %vm13822_vm9 = vcmp.lt.s32.totalorder %v6508_v1, 7 }
 0x23b   : > { %6023 = vrot.lane.b32.xlu0 %v6022_v8, %s6413_s20  ;;  %v2556_v37 = vpop.f32.mrf.mxu0  ;;  %v10354_v8 = vsel %vm13791_vm14, %v2719_v61, %v5835_v25  ;;  %v10357_v24 = vsel %vm13792_vm6, %v2720_v28, %v5836_v54  ;;  %vm13796_vm0 = vmmov %vm13792_vm6  ;;  %vm13801_vm14 = vcmp.lt.s32.totalorder %v6508_v1, 7 }
 0x23c   : > { %6043 = vrot.lane.b32.xlu1 %v6042_v27, %s6412_s19  ;;  %v2557_v17 = vadd.f32 %v9677_v15, %v2556_v37  ;;  %v5859_v27 = vpop.permute.xlu0 %5858  ;;  %v10363_v40 = vmax.f32 %v2565_v49, 0.0  ;;  %v2794_v37 = vrot.slane %v10179_v48, 1  ;;  %vm13797_vm7 = vmmov %vm13796_vm0 }
 0x23d   : > { %v5066_v20 = vpop.f32.mrf.mxu0  ;;  %v5860_v31 = vunpack.i.l.bf16 %v5859_v27 }
 0x23e   : > { %v10360_v3 = vmax.f32 %v2557_v17, 0.0  ;;  %v2568_v9 = vadd.f32 %v5066_v20, %v9677_v15  ;;  %13794 = vst [vmem:[#allocation38_spill] sm:$0xff] %v10363_v40  ;;  %v5840_v17 = vunpack.i.l.bf16 %v5839_v19  ;;  %v2827_v23 = vsel %vm13801_vm14, %v13806_v53, %v2794_v37 }
 0x23f   : > { %6028 = vrot.lane.b32.xlu0 %v6027_v4, %s6411_s18  ;;  %v5861_v4 = vunpack.i.h.bf16 %v5859_v27  ;;  %v2559_v29 = vpop.f32.mrf.mxu0  ;;  %v3901_v49 = vsel %vm13797_vm7, %v9713_v57, %v5860_v31  ;;  %vm13805_vm7 = vnez %v13492_v46 }
 0x240   : > { %13793 = vst [vmem:[#allocation17_spill] sm:$0xff] %v10360_v3  ;;  %v2795_v11 = vrot.slane %v10360_v3, 1  ;;  %v2560_v42 = vadd.f32 %v9677_v15, %v2559_v29  ;;  %v10367_v54 = vmax.f32 %v2568_v9, 0.0  ;;  %v5864_v25 = vpop.permute.xlu0 %5863  ;;  %v13799_v29 = vld [vmem:[#allocation97_spill] sm:$0xff]  ;;  %v10399_v13 = vpop.permute.xlu1 %5843  ;;  %v2667_v53 = vrot.slane %v10360_v3, 7 }
 0x241   : > { %v5866_v61 = vunpack.i.h.bf16 %v5864_v25  ;;  %v5865_v28 = vunpack.i.l.bf16 %v5864_v25  ;;  %v3902_v27 = vsel %vm13796_vm0, %v9718_v6, %v5861_v4  ;;  %vm13800_vm15 = vnez %v13799_v29 }
 0x242   : > { %13795 = vst [vmem:[#allocation39_spill] sm:$0xff] %v10367_v54  ;;  %v10374_v20 = vmax.f32 %v2560_v42, 0.0  ;;  %v2987_v43 = vsel %vm13800_vm15, %v10363_v40, 0.0  ;;  %v2826_v25 = vsel %vm13801_vm14, %v2794_v37, %v2795_v11  ;;  %vm13804_vm0 = vnez %v13051_v5 }
 0x243   : > { %6033 = vrot.lane.b32.xlu0 %v6032_v36, %s6413_s20  ;;  %v5841_v36 = vunpack.i.h.bf16 %v5839_v19  ;;  %v3933_v15 = vsel %vm12601_vm3, %v3901_v49, %v5865_v28  ;;  %v3934_v9 = vsel %vm12601_vm3, %v3902_v27, %v5866_v61  ;;  %v13802_v19 = vld [vmem:[#allocation101_spill] sm:$0xff]  ;;  %v2767_v31 = vsel %vm13804_vm0, %v10363_v40, 0.0 }
 0x244   : > { %13798 = vst [vmem:[#allocation45_spill] sm:$0xff] %v10374_v20  ;;  %vm13803_vm6 = vnez %v13802_v19  ;;  %v2768_v42 = vsel %vm13805_vm7, %v10367_v54, 0.0  ;;  %v3965_v61 = vsel %vm12602_vm11, %v3933_v15, %v5840_v17  ;;  %v2668_v26 = vrot.slane %v10374_v20, 7  ;;  %vm13823_vm7 = vmmov %vm13822_vm9 }
 0x245   : > { %v2988_v4 = vsel %vm13803_vm6, %v10367_v54, 0.0  ;;  %v6052_v27 = vpack.i.bf16 %v2768_v42, %v2767_v31  ;;  %v3966_v49 = vsel %vm12602_vm11, %v3934_v9, %v5841_v36  ;;  %v2922_v51 = vsel %vm13775_vm13, %v2826_v25, 0.0 }
 0x246   : > { %v6047_v28 = vpack.i.bf16 %v2988_v4, %v2987_v43  ;;  %v3998_v38 = vpack.c.bf16 %v3966_v49, %v3965_v61  ;;  %vm13807_vm3 = vnez %v13443_v44  ;;  %v13808_v43 = vld [vmem:[#allocation87_spill] sm:$0xff]  ;;  %vm13811_vm14 = vnez %v13436_v56  ;;  %v13812_v4 = vld [vmem:[#allocation85_spill] sm:$0xff] }
 0x247   : > { %6053 = vrot.lane.b32.xlu1 %v6052_v27, %s6411_s18  ;;  %vm13809_vm11 = vnez %v13808_v43  ;;  %v2859_v37 = vsel %vm13811_vm14, %v2827_v23, 0.0  ;;  %v6057_v17 = vpack.i.bf16 %v2922_v51, %v2827_v23  ;;  %v2796_v9 = vrot.slane %v10374_v20, 1 }
 0x248   : > { %6048 = vrot.lane.b32.xlu0 %v6047_v28, %s6412_s19  ;;  %vm13810_vm10 = vmand %vm13807_vm3, %vm13809_vm11  ;;  %4276 = vmatprep.mubr.bf16.mxu0 %v3998_v38  ;;  %vm13813_vm8 = vnez %v13812_v4  ;;  %v2766_v42 = vsel %vm13814_vm12, %v10374_v20, 0.0  ;;  %v2797_v51 = vrot.slane %v10363_v40, 1  ;;  %v10427_v38 = vpop.permute.xlu1 %5848  ;;  %v13817_v28 = vld [vmem:[#allocation82_spill] sm:$0xff]  ;;  %vm13819_vm14 = vnez %v13440_v30  ;;  %v13849_v30 = vld [vmem:[#allocation91_spill] sm:$0xff] }
 0x249   : > { %v2860_v36 = vsel %vm13810_vm10, %v2826_v25, 0.0  ;;  %v2986_v31 = vsel %vm13813_vm8, %v10374_v20, 0.0  ;;  %vm13815_vm10 = vcmp.lt.s32.totalorder %v6508_v1, 1  ;;  %vm13818_vm3 = vnez %v13817_v28 }
 0x24a   : > { %v6062_v15 = vpack.i.bf16 %v2860_v36, %v2859_v37  ;;  %v10422_v61 = vsel %vm13815_vm10, %v2667_v53, %v2668_v26  ;;  %v2985_v27 = vsel %vm13818_vm3, %v10360_v3, 0.0  ;;  %v2765_v49 = vsel %vm13819_vm14, %v10360_v3, 0.0 }
 0x24b   : > { %13816 = vst [vmem:[#allocation31_spill] sm:$0xff] %v10422_v61  ;;  %v13820_v36 = vrot.slane %v10179_v48, 7  ;;  %v2954_v20 = vsel %vm13813_vm8, %v10422_v61, 0.0  ;;  %v2824_v14 = vsel %vm13822_vm9, %v2796_v9, %v2797_v51  ;;  %v2825_v44 = vsel %vm13823_vm7, %v2795_v11, %v2796_v9  ;;  %vm13826_vm7 = vmand %vm13749_vm5, %vm13753_vm2 }
 0x24c   : > { %6058 = vrot.lane.b32.xlu0 %v6057_v17, %s6411_s18  ;;  %6063 = vrot.lane.b32.xlu1 %v6062_v15, %s6413_s20  ;;  %v6067_v17 = vpack.i.bf16 %v2986_v31, %v2985_v27  ;;  %v6072_v15 = vpack.i.bf16 %v2766_v42, %v2765_v49  ;;  %v2669_v3 = vrot.slane %v10363_v40, 7  ;;  %v3015_v31 = vsel %vm13747_vm4, %v2827_v23, 0.0  ;;  %vm13828_vm4 = vmand %vm13813_vm8, %vm13775_vm13 }
 0x24d   : > { %v10439_v37 = vsel %vm13815_vm10, %v13820_v36, %v2667_v53  ;;  %vm13824_vm10 = vmand %vm13818_vm3, %vm13783_vm1  ;;  %v12611_v42 = vrot.slane %v10367_v54, 7  ;;  %vm13825_vm9 = vnez %v13434_v62  ;;  %v3016_v9 = vsel %vm13826_vm7, %v2826_v25, 0.0  ;;  %v13830_v25 = vld [vmem:[#allocation88_spill] sm:$0xff] }
 0x24e   : > { %13821 = vst [vmem:[#allocation27_spill] sm:$0xff] %v10439_v37  ;;  %v2953_v53 = vsel %vm13824_vm10, %v10439_v37, 0.0  ;;  %v2891_v11 = vsel %vm13825_vm9, %v10439_v37, 0.0  ;;  %v10469_v36 = vpack.c.bf16 %v3016_v9, %v3015_v31  ;;  %v3017_v41 = vsel %vm13818_vm3, %v2825_v44, 0.0  ;;  %vm13839_vm3 = vmand %vm13800_vm15, %vm13825_vm9 }
 0x24f   : > { %v6082_v27 = vpack.i.bf16 %v2954_v20, %v2953_v53  ;;  %v6077_v49 = vpack.i.bf16 %v10422_v61, %v2891_v11  ;;  %v3018_v23 = vsel %vm13828_vm4, %v2824_v14, 0.0  ;;  %v10478_v20 = vpop.permute.xlu1 %5853  ;;  %v2924_v7 = vsel %vm13809_vm11, %v2824_v14, 0.0  ;;  %v13847_v61 = vld [vmem:[#allocation116_spill] sm:$0xff] }
 0x250   : > { %6068 = vrot.lane.b32.xlu0 %v6067_v17, %s6412_s19  ;;  %6073 = vrot.lane.b32.xlu1 %v6072_v15, %s6411_s18  ;;  %13827 = vst [vmem:[#allocation30_spill] sm:$0xff] %v10469_v36  ;;  %13829 = vst [vmem:[#allocation25_spill] sm:$0xff] %v10478_v20  ;;  %v2861_v34 = vsel %vm13819_vm14, %v2825_v44, 0.0  ;;  %vm13831_vm5 = vnez %v13830_v25  ;;  %v10489_v17 = vpack.c.bf16 %v3018_v23, %v3017_v41  ;;  %vm13834_vm8 = vcmp.lt.s32.totalorder %v6508_v1, 1 }
 0x251   : > { %vm13832_vm2 = vmand %vm13814_vm12, %vm13831_vm5  ;;  %v10495_v63 = vsel %vm13834_vm8, %v2668_v26, %v2669_v3  ;;  %v10497_v4 = vpop.permute.xlu0 %5868  ;;  %v6087_v15 = vpack.i.bf16 %v2924_v7, %v2825_v44  ;;  %vm13840_vm10 = vnez %v13438_v10  ;;  %v2798_v41 = vrot.slane %v10367_v54, 1  ;;  %v13935_v10 = vld [vmem:[#allocation115_spill] sm:$0xff] }
 0x252   : > { %v2862_v28 = vsel %vm13832_vm2, %v2824_v14, 0.0  ;;  %13833 = vst [vmem:[#allocation32_spill] sm:$0xff] %v10489_v17  ;;  %13835 = vst [vmem:[#allocation34_spill] sm:$0xff] %v10495_v63  ;;  %v2955_v26 = vsel %vm13839_vm3, %v10495_v63, 0.0  ;;  %v2893_v44 = vsel %vm13840_vm10, %v10495_v63, 0.0  ;;  %vm13842_vm7 = vcmp.lt.s32.totalorder %v6508_v1, 7 }
 0x253   : > { %13836 = vst [vmem:[#allocation33_spill] sm:$0xff] %v10497_v4  ;;  %v6097_v53 = vpack.i.bf16 %v2862_v28, %v2861_v34  ;;  %vm13837_vm13 = vmmov %vm13834_vm8  ;;  %v10505_v14 = vpop.permute.xlu1 %5873  ;;  %v10528_v34 = vld [vmem:[%s12030_s2] ss:$0 sm:$0xff]  ;;  %vm13845_vm4 = vcmask 261120   ;;  %vm13848_vm8 = vnez %v13847_v61  ;;  %vm13859_vm14 = vcmask 785408  }
 0x254   : > { %6083 = vrot.lane.b32.xlu0 %v6082_v27, %s6413_s20  ;;  %6078 = vrot.lane.b32.xlu1 %v6077_v49, %s6412_s19  ;;  %v10503_v31 = vsel %vm13837_vm13, %v2669_v3, %v12611_v42  ;;  %vm13846_vm2 = vmmov %vm13845_vm4  ;;  %vm13850_vm13 = vnez %v13849_v30  ;;  %vm13887_vm1 = vcmask 523264  }
 0x255   : > { %13838 = vst [vmem:[#allocation36_spill] sm:$0xff] %v10503_v31  ;;  %v2956_v3 = vsel %vm13803_vm6, %v10503_v31, 0.0  ;;  %v5879_v11 = vpop.permute.xlu0 %5878  ;;  %v6102_v49 = vpack.i.bf16 %v10503_v31, %v2893_v44  ;;  %vm13852_vm3 = vmmov %vm13842_vm7 }
 0x256   : > { %v6092_v9 = vpack.i.bf16 %v2956_v3, %v2955_v26  ;;  %v5880_v26 = vunpack.i.l.bf16 %v5879_v11  ;;  %v5881_v3 = vunpack.i.h.bf16 %v5879_v11  ;;  %vm13860_vm9 = vmmov %vm13859_vm14 }
 0x257   : > { %v5069_v27 = vpop.f32.mrf.mxu0  ;;  %v10523_v23 = vpop.permute.xlu1 %5883 }
 0x258   : > { %6088 = vrot.lane.b32.xlu0 %v6087_v15, %s6411_s18  ;;  %6098 = vrot.lane.b32.xlu1 %v6097_v53, %s6413_s20  ;;  %v2581_v28 = vadd.f32 %v10528_v34, %v5069_v27  ;;  %v10541_v27 = vsel %vm13842_vm7, %v2797_v51, %v2798_v41  ;;  %v3903_v63 = vsel %vm13845_vm4, %v9705_v58, %v5880_v26  ;;  %vm13853_vm7 = vcmask 523264  }
 0x259   : > { %v2572_v7 = vpop.f32.mrf.mxu0  ;;  %v5889_v44 = vpop.permute.xlu0 %5888  ;;  %vm13854_vm4 = vmmov %vm13853_vm7 }
 0x25a   : > { %v2573_v15 = vadd.f32 %v10528_v34, %v2572_v7  ;;  %v5891_v51 = vunpack.i.h.bf16 %v5889_v44  ;;  %v5890_v7 = vunpack.i.l.bf16 %v5889_v44 }
 0x25b   : > { %v5070_v53 = vpop.f32.mrf.mxu0  ;;  %v10536_v17 = vpop.permute.xlu1 %5893 }
 0x25c   : > { %6093 = vrot.lane.b32.xlu0 %v6092_v9, %s6413_s20  ;;  %6103 = vrot.lane.b32.xlu1 %v6102_v49, %s6412_s19  ;;  %v10534_v42 = vmax.f32 %v2573_v15, 0.0  ;;  %v2584_v36 = vadd.f32 %v10528_v34, %v5070_v53  ;;  %v10543_v9 = vmax.f32 %v2581_v28, 0.0  ;;  %v2863_v53 = vsel %vm13804_vm0, %v10541_v27, 0.0 }
 0x25d   : > { %v2575_v40 = vpop.f32.mrf.mxu0  ;;  %v5904_v15 = vpop.permute.xlu0 %5903 }
 0x25e   : > { %13841 = vst [vmem:[#allocation58_spill] sm:$0xff] %v10534_v42  ;;  %13843 = vst [vmem:[#allocation61_spill] sm:$0xff] %v10543_v9  ;;  %v2576_v49 = vadd.f32 %v10528_v34, %v2575_v40  ;;  %v10547_v31 = vmax.f32 %v2584_v36, 0.0  ;;  %v5906_v48 = vunpack.i.h.bf16 %v5904_v15  ;;  %v5905_v28 = vunpack.i.l.bf16 %v5904_v15 }
 0x25f   : > { %v5899_v59 = vpop.permute.xlu1 %5898  ;;  %v3904_v40 = vsel %vm13846_vm2, %v9715_v21, %v5881_v3  ;;  %v2671_v36 = vrot.slane %v10534_v42, 7  ;;  %v2991_v5 = vsel %vm13848_vm8, %v10543_v9, 0.0  ;;  %v13851_v26 = vrot.slane %v10534_v42, 1 }
 0x260   : > { %v10549_v11 = vmax.f32 %v2576_v49, 0.0  ;;  %v2992_v58 = vsel %vm13850_vm13, %v10547_v31, 0.0  ;;  %v3935_v21 = vsel %vm13853_vm7, %v3903_v63, %v5905_v28  ;;  %v3936_v44 = vsel %vm13854_vm4, %v3904_v40, %v5906_v48  ;;  %v13856_v49 = vld [vmem:[#allocation109_spill] sm:$0xff]  ;;  %vm13888_vm13 = vmmov %vm13887_vm1 }
 0x261   : > { %v10570_v15 = vsel %vm13852_vm3, %v2798_v41, %v13851_v26  ;;  %v6107_v3 = vpack.i.bf16 %v2992_v58, %v2991_v5  ;;  %vm13855_vm2 = vnez %v13492_v46  ;;  %vm13857_vm0 = vnez %v13856_v49  ;;  %v10620_v58 = vpop.permute.xlu0 %5908 }
 0x262   : > { %13844 = vst [vmem:[#allocation46_spill] sm:$0xff] %v10549_v11  ;;  %vm13858_vm12 = vmand %vm13855_vm2, %vm13857_vm0  ;;  %v3967_v62 = vsel %vm13859_vm14, %v3935_v21, %v5890_v7  ;;  %v3968_v56 = vsel %vm13860_vm9, %v3936_v44, %v5891_v51  ;;  %v2926_v5 = vsel %vm13831_vm5, %v10570_v15, 0.0  ;;  %v5886_v48 = vunpack.i.h.bf16 %v10523_v23  ;;  %v13875_v44 = vld [vmem:[#allocation99_spill] sm:$0xff] }
 0x263   : > { %v2864_v37 = vsel %vm13858_vm12, %v10570_v15, 0.0  ;;  %v5919_v4 = vpop.permute.xlu1 %5918  ;;  %v4001_v41 = vpack.c.bf16 %v3968_v56, %v3967_v62  ;;  %6108 = vrot.lane.b32.xlu0 %v6107_v3, %s6412_s19  ;;  %v13861_v63 = vrot.slane %v10549_v11, 7  ;;  %vm13862_vm12 = vcmp.lt.s32.totalorder %v6508_v1, 1 }
 0x264   : > { %v6117_v20 = vpack.i.bf16 %v2864_v37, %v2863_v53  ;;  %vm13864_vm14 = vnez %v13673_v22  ;;  %vm13865_vm9 = vnez %v13691_v60  ;;  %v6112_v56 = vpack.i.bf16 %v2926_v5, %v10541_v27  ;;  %vm13868_vm7 = vmmov %vm13862_vm12 }
 0x265   : > { %4284 = vmatprep.mubr.bf16.mxu1 %v4001_v41  ;;  %v10592_v7 = vsel %vm13862_vm12, %v2671_v36, %v13861_v63  ;;  %vm13866_vm3 = vmand %vm13864_vm14, %vm13865_vm9  ;;  %v13867_v37 = vrot.slane %v10367_v54, 7  ;;  %v5885_v53 = vunpack.i.l.bf16 %v10523_v23  ;;  %vm13870_vm4 = vnez %v13668_v52 }
 0x266   : > { %6118 = vrot.lane.b32.xlu1 %v6117_v20, %s6413_s20  ;;  %13863 = vst [vmem:[#allocation43_spill] sm:$0xff] %v10592_v7  ;;  %v2721_v62 = vsel %vm13866_vm3, %v9915_v33, 0.0  ;;  %v2722_v51 = vsel %vm13870_vm4, %v9898_v55, 0.0  ;;  %vm13871_vm12 = vnez %v13066_v50  ;;  %v13872_v33 = vld [vmem:[#allocation104_spill] sm:$0xff]  ;;  %v5896_v28 = vunpack.i.h.bf16 %v10536_v17 }
 0x267   : > { %v10605_v20 = vsel %vm13868_vm7, %v13867_v37, %v2671_v36  ;;  %vm13873_vm14 = vnez %v13872_v33  ;;  %v5895_v40 = vunpack.i.l.bf16 %v10536_v17  ;;  %v2800_v36 = vrot.slane %v10549_v11, 1  ;;  %v5924_v23 = vpop.permute.xlu1 %5923  ;;  %6113 = vrot.lane.b32.xlu0 %v6112_v56, %s6411_s18 }
 0x268   : > { %13869 = vst [vmem:[#allocation40_spill] sm:$0xff] %v10605_v20  ;;  %v2895_v22 = vsel %vm13871_vm12, %v10605_v20, 0.0  ;;  %v2990_v60 = vsel %vm13873_vm14, %v10549_v11, 0.0  ;;  %vm13874_vm9 = vcmask 523264   ;;  %v5901_v26 = vunpack.i.h.bf16 %v5899_v59 }
 0x269   : > { %v6127_v52 = vpack.i.bf16 %v10592_v7, %v2895_v22  ;;  %v3841_v55 = vsel %vm13874_vm9, %v10357_v24, %v5886_v48  ;;  %v5900_v21 = vunpack.i.l.bf16 %v5899_v59  ;;  %vm13876_vm3 = vnez %v13875_v44  ;;  %vm13877_vm7 = vmmov %vm13874_vm9 }
 0x26a   : > { %v2989_v3 = vsel %vm13876_vm3, %v10534_v42, 0.0  ;;  %v5921_v41 = vunpack.i.h.bf16 %v5919_v4  ;;  %v5920_v5 = vunpack.i.l.bf16 %v5919_v4  ;;  %v3840_v56 = vsel %vm13877_vm7, %v10354_v8, %v5885_v53  ;;  %vm13882_vm7 = vmand %vm13876_vm3, %vm13840_vm10 }
 0x26b   : > { %6128 = vrot.lane.b32.xlu1 %v6127_v52, %s6412_s19  ;;  %v6122_v63 = vpack.i.bf16 %v2990_v60, %v2989_v3  ;;  %v5926_v37 = vunpack.i.h.bf16 %v5924_v23  ;;  %v5925_v22 = vunpack.i.l.bf16 %v5924_v23  ;;  %v2958_v59 = vsel %vm13873_vm14, %v10592_v7, 0.0  ;;  %v10661_v23 = vpop.permute.xlu0 %5913  ;;  %v13914_v3 = vld [vmem:[#allocation16_spill] sm:$0xff] }
 0x26c   : > { %v2673_v24 = vrot.slane %v10543_v9, 7  ;;  %vm13878_vm4 = vcmask 261120   ;;  %v13880_v4 = vrot.slane %v10543_v9, 1  ;;  %vm13881_vm2 = vcmp.lt.s32.totalorder %v6508_v1, 7 }
 0x26d   : > { %v3810_v48 = vsel %vm13878_vm4, %v2722_v51, %v5896_v28  ;;  %vm13879_vm9 = vmmov %vm13878_vm4  ;;  %6123 = vrot.lane.b32.xlu0 %v6122_v63, %s6412_s19  ;;  %v2674_v8 = vrot.slane %v10547_v31, 7  ;;  %v2957_v53 = vsel %vm13882_vm7, %v10605_v20, 0.0  ;;  %vm13883_vm4 = vcmask 785408  }
 0x26e   : > { %v3809_v17 = vsel %vm13879_vm9, %v2721_v62, %v5895_v40  ;;  %v10644_v60 = vsel %vm13881_vm2, %v2800_v36, %v13880_v4  ;;  %v10654_v51 = vsel %vm13883_vm4, %v3840_v56, %v5900_v21  ;;  %vm13885_vm9 = vmmov %vm13883_vm4  ;;  %v3843_v40 = vsel %vm13888_vm13, %v3810_v48, %v5921_v41 }
 0x26f   : > { %13884 = vst [vmem:[#allocation51_spill] sm:$0xff] %v10654_v51  ;;  %v10657_v62 = vsel %vm13885_vm9, %v3841_v55, %v5901_v26  ;;  %v3842_v28 = vsel %vm13887_vm1, %v3809_v17, %v5920_v5  ;;  %v6132_v52 = vpack.i.bf16 %v2958_v59, %v2957_v53  ;;  %v13889_v63 = vrot.slane %v10534_v42, 1  ;;  %vm13890_vm7 = vmmov %vm13883_vm4  ;;  %v13948_v51 = vld [vmem:[#allocation114_spill] sm:$0xff] }
 0x270   : > { %13886 = vst [vmem:[#allocation49_spill] sm:$0xff] %v10657_v62  ;;  %v2928_v55 = vsel %vm13857_vm0, %v10644_v60, 0.0  ;;  %v10675_v26 = vsel %vm13890_vm7, %v3842_v28, %v5925_v22  ;;  %vm13892_vm1 = vmmov %vm13883_vm4  ;;  %v13894_v17 = vrot.slane %v10549_v11, 7  ;;  %vm13895_vm13 = vcmp.lt.s32.totalorder %v6508_v1, 1 }
 0x271   : > { %v10669_v4 = vsel %vm13881_vm2, %v13889_v63, %v2800_v36  ;;  %13891 = vst [vmem:[#allocation54_spill] sm:$0xff] %v10675_v26  ;;  %v10678_v21 = vsel %vm13892_vm1, %v3843_v40, %v5926_v37  ;;  %6133 = vrot.lane.b32.xlu0 %v6132_v52, %s6413_s20  ;;  %vm13896_vm4 = vmmov %vm13895_vm13  ;;  %v3019_v56 = vsel %vm13800_vm15, %v10541_v27, 0.0  ;;  %v12630_v63 = vrot.slane %v9713_v57, 7  ;;  %v13936_v26 = vld [vmem:[#allocation66_spill] sm:$0xff] }
 0x272   : > { %13893 = vst [vmem:[#allocation76_spill] sm:$0xff] %v10678_v21  ;;  %v10685_v41 = vsel %vm13895_vm13, %v13894_v17, %v2673_v24  ;;  %v10691_v5 = vsel %vm13896_vm4, %v2673_v24, %v2674_v8  ;;  %v10696_v37 = vpop.permute.xlu0 %5928  ;;  %v6137_v22 = vpack.i.bf16 %v2928_v55, %v10669_v4  ;;  %vm13899_vm9 = vmand %vm13803_vm6, %vm13809_vm11  ;;  %v3021_v24 = vsel %vm13876_vm3, %v10669_v4, 0.0  ;;  %v10714_v27 = vpop.permute.xlu1 %5933 }
 0x273   : > { %13897 = vst [vmem:[#allocation80_spill] sm:$0xff] %v10691_v5  ;;  %13898 = vst [vmem:[#allocation68_spill] sm:$0xff] %v10696_v37  ;;  %v3020_v59 = vsel %vm13899_vm9, %v10570_v15, 0.0  ;;  %vm13904_vm6 = vnez %v13849_v30  ;;  %vm13911_vm3 = vnez %v13655_v45  ;;  %vm13912_vm2 = vnez %v13729_v18 }
 0x274   : > { %vm13900_vm15 = vmand %vm13873_vm14, %vm13831_vm5  ;;  %v10722_v43 = vpack.c.bf16 %v3020_v59, %v3019_v56  ;;  %v2960_v25 = vsel %vm13904_vm6, %v10691_v5, 0.0  ;;  %vm13910_vm14 = vnez %v13614_v0  ;;  %v5876_v45 = vunpack.i.h.bf16 %v10505_v14  ;;  %v13944_v5 = vld [vmem:[#allocation47_spill] sm:$0xff] }
 0x275   : > { %v3022_v29 = vsel %vm13900_vm15, %v10644_v60, 0.0  ;;  %vm13901_vm11 = vmand %vm13848_vm8, %vm13871_vm12  ;;  %6138 = vrot.lane.b32.xlu0 %v6137_v22, %s6411_s18  ;;  %v13906_v22 = vrot.slane %v9718_v6, 7  ;;  %v5875_v18 = vunpack.i.l.bf16 %v10505_v14  ;;  %vm13922_vm15 = vcmp.lt.s32.totalorder %v6508_v1, 7  ;;  %v13938_v6 = vld [vmem:[#allocation95_spill] sm:$0xff] }
 0x276   : > { %v2959_v19 = vsel %vm13901_vm11, %v10685_v41, 0.0  ;;  %13902 = vst [vmem:[#allocation71_spill] sm:$0xff] %v10722_v43  ;;  %v10724_v15 = vpack.c.bf16 %v3022_v29, %v3021_v24  ;;  %v10730_v44 = vpop.permute.xlu0 %5938  ;;  %v5944_v53 = vpop.permute.xlu1 %5943  ;;  %vm13907_vm5 = vmmov %vm13896_vm4  ;;  %v13918_v43 = vld [vmem:[#allocation70_spill] sm:$0xff]  ;;  %vm13920_vm4 = vnez %v13766_v47  ;;  %v13925_v47 = vrot.slane %v10543_v9, 1 }
 0x277   : > { %v5073_v33 = vpop.f32.mrf.mxu0  ;;  %v6142_v48 = vpack.i.bf16 %v2960_v25, %v2959_v19  ;;  %v10745_v59 = vsel %vm13907_vm5, %v12630_v63, %v13906_v22  ;;  %vm13913_vm7 = vmand %vm13911_vm3, %vm13912_vm2  ;;  %v13915_v63 = vld [vmem:[#allocation44_spill] sm:$0xff]  ;;  %vm13919_vm13 = vnez %v13918_v43  ;;  %v5945_v43 = vunpack.i.l.bf16 %v5944_v53 }
 0x278   : > { %13903 = vst [vmem:[#allocation72_spill] sm:$0xff] %v10724_v15  ;;  %v2597_v36 = vadd.f32 %v10528_v34, %v5073_v33  ;;  %vm13916_vm1 = vnez %v13915_v63  ;;  %vm13921_vm9 = vmand %vm13919_vm13, %vm13920_vm4  ;;  %vm13941_vm4 = vnez %v13739_v16  ;;  %vm13951_vm12 = vcmask 261120  }
 0x279   : > { %v2588_v28 = vpop.f32.mrf.mxu0  ;;  %6143 = vrot.lane.b32.xlu0 %v6142_v48, %s6413_s20  ;;  %v2802_v48 = vrot.slane %v10547_v31, 1  ;;  %v2724_v15 = vsel %vm13916_vm1, %v13914_v3, 0.0  ;;  %vm13923_vm11 = vmmov %vm13907_vm5  ;;  %vm13937_vm1 = vnez %v13936_v26  ;;  %v5946_v62 = vunpack.i.h.bf16 %v5944_v53 }
 0x27a   : > { %v2589_v40 = vadd.f32 %v10528_v34, %v2588_v28  ;;  %v10737_v17 = vpop.permute.xlu1 %5953  ;;  %v10750_v25 = vpop.permute.xlu0 %5948  ;;  %vm13926_vm5 = vmmov %vm13922_vm15  ;;  %v10800_v20 = vmax.f32 %v2597_v36, 0.0  ;;  %v3812_v21 = vsel %vm13951_vm12, %v2724_v15, %v5876_v45  ;;  %vm13970_vm10 = vcmp.lt.s32.totalorder %v6508_v1, 1 }
 0x27b   : > { %v5074_v52 = vpop.f32.mrf.mxu0  ;;  %13908 = vst [vmem:[#allocation65_spill] sm:$0xff] %v10750_v25  ;;  %v10791_v63 = vsel %vm13926_vm5, %v13925_v47, %v2802_v48  ;;  %vm13930_vm2 = vmmov %vm13923_vm11  ;;  %vm13949_vm5 = vnez %v13948_v51  ;;  %v5956_v37 = vunpack.i.h.bf16 %v10737_v17  ;;  %v5955_v15 = vunpack.i.l.bf16 %v10737_v17 }
 0x27c   : > { %v10735_v55 = vmax.f32 %v2589_v40, 0.0  ;;  %13927 = vst [vmem:[#allocation97_spill] sm:$0xff] %v10791_v63  ;;  %13932 = vst [vmem:[#allocation87_spill] sm:$0xff] %v10800_v20 }
 0x27d   : > { %v2591_v56 = vpop.f32.mrf.mxu0 }
 0x27e   : > { %13905 = vst [vmem:[#allocation62_spill] sm:$0xff] %v10735_v55  ;;  %v2592_v24 = vadd.f32 %v10528_v34, %v2591_v56  ;;  %v2675_v29 = vrot.slane %v10735_v55, 7  ;;  %v2803_v19 = vrot.slane %v10735_v55, 1  ;;  %v5959_v22 = vpop.permute.xlu1 %5958  ;;  %v2723_v56 = vsel %vm13913_vm7, %v9964_v35, 0.0  ;;  %v10803_v54 = vpop.permute.xlu0 %5963 }
 0x27f   : > { %v5961_v57 = vunpack.i.h.bf16 %v5959_v22 }
 0x280   : > { %v10753_v28 = vmax.f32 %v2592_v24, 0.0  ;;  %v13917_v24 = vld [vmem:[#allocation103_spill] sm:$0xff]  ;;  %v10781_v35 = vsel %vm13922_vm15, %v2802_v48, %v2803_v19  ;;  %v10785_v3 = vsel %vm13923_vm11, %v2674_v8, %v2675_v29  ;;  %v2600_v8 = vadd.f32 %v10528_v34, %v5074_v52  ;;  %v13933_v48 = vld [vmem:[#allocation96_spill] sm:$0xff] }
 0x281   : > { %v10774_v40 = vsel %vm13921_vm9, %v13917_v24, 0.0  ;;  %13924 = vst [vmem:[#allocation75_spill] sm:$0xff] %v10785_v3  ;;  %v13928_v24 = vld [vmem:[#allocation110_spill] sm:$0xff]  ;;  %vm13934_vm7 = vnez %v13933_v48  ;;  %v13943_v52 = vld [vmem:[#allocation84_spill] sm:$0xff]  ;;  %vm13945_vm15 = vnez %v13944_v5  ;;  %v5911_v5 = vunpack.i.h.bf16 %v10620_v58  ;;  %v14003_v48 = vld [vmem:[#allocation33_spill] sm:$0xff] }
 0x282   : > { %13909 = vst [vmem:[#allocation69_spill] sm:$0xff] %v10753_v28  ;;  %v2676_v33 = vrot.slane %v10753_v28, 7  ;;  %vm13929_vm3 = vnez %v13928_v24  ;;  %v5979_v46 = vpop.permute.xlu1 %5978  ;;  %v2726_v9 = vsel %vm13945_vm15, %v13943_v52, 0.0  ;;  %v5910_v52 = vunpack.i.l.bf16 %v10620_v58 }
 0x283   : > { %v2930_v7 = vsel %vm13929_vm3, %v10781_v35, 0.0  ;;  %v10837_v53 = vmax.f32 %v2600_v8, 0.0  ;;  %v5871_v0 = vunpack.i.h.bf16 %v14003_v48 }
 0x284   : > { %v10798_v14 = vsel %vm13930_vm2, %v2675_v29, %v2676_v33  ;;  %v6147_v50 = vpack.i.bf16 %v2930_v7, %v10791_v63  ;;  %v13939_v29 = vld [vmem:[#allocation48_spill] sm:$0xff]  ;;  %v13946_v7 = vld [vmem:[#allocation117_spill] sm:$0xff] }
 0x285   : > { %13931 = vst [vmem:[#allocation101_spill] sm:$0xff] %v10798_v14  ;;  %v2962_v47 = vsel %vm13934_vm7, %v10798_v14, 0.0  ;;  %vm13940_vm13 = vnez %v13939_v29  ;;  %vm13947_vm11 = vnez %v13946_v7  ;;  %v2804_v29 = vrot.slane %v10753_v28, 1  ;;  %13954 = vst [vmem:[#allocation85_spill] sm:$0xff] %v10837_v53 }
 0x286   : > { %vm13942_vm9 = vmand %vm13940_vm13, %vm13941_vm4  ;;  %6148 = vrot.lane.b32.xlu0 %v6147_v50, %s6411_s18  ;;  %vm13953_vm4 = vcmask 523264   ;;  %v5984_v45 = vpop.permute.xlu1 %5983  ;;  %v5960_v50 = vunpack.i.l.bf16 %v5959_v22  ;;  %v2677_v22 = vrot.slane %v10800_v20, 7  ;;  %v14001_v7 = vsel %vm13910_vm14, %v10745_v59, 0.0 }
 0x287   : > { %v2725_v36 = vsel %vm13942_vm9, %v13938_v6, 0.0  ;;  %vm13950_vm2 = vmand %vm13947_vm11, %vm13949_vm5  ;;  %vm13957_vm9 = vcmp.lt.s32.totalorder %v6508_v1, 7  ;;  %vm14006_vm14 = vcmask 785408  }
 0x288   : > { %v2961_v14 = vsel %vm13950_vm2, %v10785_v3, 0.0  ;;  %vm13952_vm13 = vmmov %vm13951_vm12  ;;  %v12657_v3 = vrot.slane %v10800_v20, 1 }
 0x289   : > { %v6172_v16 = vpack.i.bf16 %v2962_v47, %v2961_v14  ;;  %v3811_v6 = vsel %vm13952_vm13, %v2723_v56, %v5875_v18  ;;  %v5980_v14 = vunpack.i.l.bf16 %v5979_v46  ;;  %v2994_v56 = vsel %vm13934_vm7, %v10753_v28, 0.0  ;;  %vm13955_vm12 = vmmov %vm13953_vm4  ;;  %v10843_v18 = vpop.permute.xlu0 %5968 }
 0x28a   : > { %v3844_v25 = vsel %vm13953_vm4, %v3811_v6, %v5945_v43  ;;  %v3845_v58 = vsel %vm13955_vm12, %v3812_v21, %v5946_v62  ;;  %13956 = vst [vmem:[#allocation82_spill] sm:$0xff] %v10843_v18  ;;  %v5981_v47 = vunpack.i.h.bf16 %v5979_v46  ;;  %v5985_v43 = vunpack.i.l.bf16 %v5984_v45  ;;  %vm13959_vm15 = vmmov %vm13952_vm13  ;;  %v13963_v18 = vld [vmem:[#allocation105_spill] sm:$0xff] }
 0x28b   : > { %6173 = vrot.lane.b32.xlu0 %v6172_v16, %s6413_s20  ;;  %v10850_v17 = vsel %vm13957_vm9, %v2804_v29, %v12657_v3  ;;  %v3814_v8 = vsel %vm13959_vm15, %v2726_v9, %v5956_v37  ;;  %v5986_v6 = vunpack.i.h.bf16 %v5984_v45  ;;  %v2993_v62 = vsel %vm13947_vm11, %v10735_v55, 0.0  ;;  %vm13960_vm2 = vmmov %vm13952_vm13 }
 0x28c   : > { %13958 = vst [vmem:[#allocation88_spill] sm:$0xff] %v10850_v17  ;;  %v3813_v46 = vsel %vm13960_vm2, %v2725_v36, %v5955_v15  ;;  %v12660_v21 = vrot.slane %v10837_v53, 7  ;;  %v6182_v16 = vpack.i.bf16 %v2994_v56, %v2993_v62  ;;  %vm13961_vm13 = vmmov %vm13957_vm9  ;;  %vm13964_vm12 = vnez %v13963_v18 }
 0x28d   : > { %v10861_v28 = vsel %vm13961_vm13, %v2803_v19, %v2804_v29  ;;  %v3846_v3 = vsel %vm13953_vm4, %v3813_v46, %v5980_v14  ;;  %v2932_v9 = vsel %vm13964_vm12, %v10850_v17, 0.0  ;;  %vm13965_vm9 = vcmask 785408   ;;  %vm13969_vm2 = vmmov %vm13953_vm4  ;;  %v10900_v56 = vpop.permute.xlu0 %5973  ;;  %v13988_v46 = vld [vmem:[#allocation25_spill] sm:$0xff]  ;;  %v13993_v29 = vld [vmem:[#allocation122_spill] sm:$0xff] }
 0x28e   : > { %13962 = vst [vmem:[#allocation116_spill] sm:$0xff] %v10861_v28  ;;  %v10868_v37 = vsel %vm13965_vm9, %v3844_v25, %v5960_v50  ;;  %vm13967_vm15 = vmmov %vm13965_vm9  ;;  %v3847_v36 = vsel %vm13969_vm2, %v3814_v8, %v5981_v47  ;;  %v10877_v19 = vsel %vm13970_vm10, %v2676_v33, %v2677_v22  ;;  %v5846_v25 = vunpack.i.h.bf16 %v10399_v13  ;;  %v13977_v50 = vld [vmem:[#allocation67_spill] sm:$0xff] }
 0x28f   : > { %13966 = vst [vmem:[#allocation91_spill] sm:$0xff] %v10868_v37  ;;  %v10871_v45 = vsel %vm13967_vm15, %v3845_v58, %v5961_v57  ;;  %6183 = vrot.lane.b32.xlu0 %v6182_v16, %s6412_s19  ;;  %13971 = vst [vmem:[#allocation104_spill] sm:$0xff] %v10877_v19  ;;  %vm13974_vm4 = vnez %v13759_v12  ;;  %vm13978_vm10 = vnez %v13977_v50  ;;  %v6192_v58 = vpack.i.bf16 %v2932_v9, %v10861_v28  ;;  %v13983_v8 = vld [vmem:[#allocation119_spill] sm:$0xff] }
 0x290   : > { %13968 = vst [vmem:[#allocation109_spill] sm:$0xff] %v10871_v45  ;;  %vm13972_vm13 = vmmov %vm13965_vm9  ;;  %vm13975_vm9 = vnez %v13782_v2  ;;  %v5851_v47 = vunpack.i.h.bf16 %v10427_v38  ;;  %v5856_v16 = vunpack.i.h.bf16 %v13988_v46  ;;  %vm13994_vm12 = vnez %v13993_v29 }
 0x291   : > { %v10882_v15 = vsel %vm13972_vm13, %v3846_v3, %v5985_v43  ;;  %vm13976_vm15 = vmand %vm13974_vm4, %vm13975_vm9  ;;  %v5915_v3 = vunpack.i.l.bf16 %v10661_v23  ;;  %v5916_v43 = vunpack.i.h.bf16 %v10661_v23  ;;  %vm13984_vm4 = vnez %v13983_v8 }
 0x292   : > { %13973 = vst [vmem:[#allocation99_spill] sm:$0xff] %v10882_v15  ;;  %v10891_v57 = vsel %vm13976_vm15, %v10246_v39, 0.0  ;;  %vm13979_vm2 = vmmov %vm13972_vm13  ;;  %vm13981_vm13 = vcmp.lt.s32.totalorder %v6508_v1, 1  ;;  %v3023_v23 = vsel %vm13848_vm8, %v10791_v63, 0.0  ;;  %v14072_v63 = vld [vmem:[#allocation83_spill] sm:$0xff] }
 0x293   : > { %v10897_v14 = vsel %vm13979_vm2, %v3847_v36, %v5986_v6  ;;  %v10907_v12 = vsel %vm13981_vm13, %v2677_v22, %v12660_v21  ;;  %v13985_v6 = vld [vmem:[#allocation100_spill] sm:$0xff]  ;;  %vm13990_vm2 = vcmask 261120   ;;  %v13991_v36 = vld [vmem:[#allocation79_spill] sm:$0xff]  ;;  %6193 = vrot.lane.b32.xlu0 %v6192_v58, %s6411_s18  ;;  %vm13996_vm8 = vmand %vm13934_vm7, %vm13929_vm3  ;;  %v5870_v21 = vunpack.i.l.bf16 %v14003_v48 }
 0x294   : > { %13980 = vst [vmem:[#allocation16_spill] sm:$0xff] %v10897_v14  ;;  %13982 = vst [vmem:[#allocation44_spill] sm:$0xff] %v10907_v12  ;;  %vm13986_vm9 = vnez %v13985_v6  ;;  %v13989_v22 = vld [vmem:[#allocation20_spill] sm:$0xff]  ;;  %v2964_v33 = vsel %vm13994_vm12, %v10907_v12, 0.0  ;;  %v3026_v61 = vsel %vm13996_vm8, %v10850_v17, 0.0  ;;  %v5936_v48 = vunpack.i.h.bf16 %v10714_v27 }
 0x295   : > { %vm13987_vm15 = vmand %vm13984_vm4, %vm13986_vm9  ;;  %v3906_v9 = vsel %vm13990_vm2, %v13989_v22, %v5911_v5  ;;  %v14046_v17 = vrot.slane %v10837_v53, 7 }
 0x296   : > { %v2963_v62 = vsel %vm13987_vm15, %v10877_v19, 0.0  ;;  %vm13992_vm13 = vmmov %vm13990_vm2  ;;  %vm13997_vm2 = vcmask 523264  }
 0x297   : > { %v3905_v39 = vsel %vm13992_vm13, %v13991_v36, %v5910_v52  ;;  %vm13995_vm15 = vmand %vm13904_vm6, %vm13857_vm0  ;;  %v3025_v52 = vsel %vm13947_vm11, %v10861_v28, 0.0  ;;  %v6202_v22 = vpack.i.bf16 %v2964_v33, %v2963_v62  ;;  %v5077_v14 = vpop.f32.mrf.mxu0  ;;  %v2996_v33 = vsel %vm13994_vm12, %v10837_v53, 0.0 }
 0x298   : > { %v3024_v5 = vsel %vm13995_vm15, %v10781_v35, 0.0  ;;  %v3937_v58 = vsel %vm13997_vm2, %v3905_v39, %v5915_v3  ;;  %v10952_v49 = vpack.c.bf16 %v3026_v61, %v3025_v52  ;;  %vm14002_vm0 = vmmov %vm13992_vm13 }
 0x299   : > { %v10950_v30 = vpack.c.bf16 %v3024_v5, %v3023_v23  ;;  %v3806_v2 = vsel %vm14002_vm0, %v14001_v7, %v5846_v25  ;;  %vm14004_vm6 = vmmov %vm13997_vm2  ;;  %6203 = vrot.lane.b32.xlu0 %v6202_v22, %s6413_s20  ;;  %v2613_v23 = vadd.f32 %v10528_v34, %v5077_v14  ;;  %v14010_v14 = vld [vmem:[#allocation106_spill] sm:$0xff] }
 0x29a   : > { %14000 = vst [vmem:[#allocation110_spill] sm:$0xff] %v10952_v49  ;;  %v3938_v15 = vsel %vm14004_vm6, %v3906_v9, %v5916_v43  ;;  %vm14005_vm7 = vmmov %vm13997_vm2  ;;  %v2604_v43 = vpop.f32.mrf.mxu0  ;;  %v2995_v9 = vsel %vm13984_vm4, %v10800_v20, 0.0  ;;  %vm14011_vm15 = vnez %v14010_v14 }
 0x29b   : > { %13999 = vst [vmem:[#allocation70_spill] sm:$0xff] %v10950_v30  ;;  %v3839_v39 = vsel %vm14005_vm7, %v3806_v2, %v5851_v47  ;;  %vm14007_vm11 = vmmov %vm14006_vm14  ;;  %v2605_v47 = vadd.f32 %v10528_v34, %v2604_v43  ;;  %v6212_v52 = vpack.i.bf16 %v2996_v33, %v2995_v9  ;;  %v2770_v7 = vsel %vm14011_vm15, %v10549_v11, 0.0  ;;  %v14032_v11 = vld [vmem:[#allocation118_spill] sm:$0xff] }
 0x29c   : > { %v10976_v5 = vsel %vm14006_vm14, %v3839_v39, %v5856_v16  ;;  %v10979_v2 = vsel %vm14007_vm11, %v3937_v58, %v5870_v21  ;;  %vm14009_vm13 = vmmov %vm14007_vm11  ;;  %v5935_v16 = vunpack.i.l.bf16 %v10714_v27  ;;  %v5078_v39 = vpop.f32.mrf.mxu0  ;;  %v14012_v21 = vld [vmem:[#allocation108_spill] sm:$0xff]  ;;  %v5940_v33 = vunpack.i.l.bf16 %v10730_v44 }
 0x29d   : > { %v10948_v36 = vpop.permute.xlu0 %5988  ;;  %v10985_v22 = vsel %vm14009_vm13, %v3938_v15, %v5871_v0  ;;  %vm14013_vm8 = vnez %v14012_v21  ;;  %vm14014_vm2 = vmand %vm14011_vm15, %vm13929_vm3  ;;  %v11002_v0 = vmax.f32 %v2605_v47, 0.0  ;;  %v2616_v43 = vadd.f32 %v10528_v34, %v5078_v39  ;;  %6213 = vrot.lane.b32.xlu0 %v6212_v52, %s6412_s19  ;;  %v14020_v47 = vld [vmem:[#allocation42_spill] sm:$0xff] }
 0x29e   : > { %13998 = vst [vmem:[#allocation103_spill] sm:$0xff] %v10948_v36  ;;  %v10969_v25 = vpop.permute.xlu1 %6003  ;;  %v2865_v58 = vsel %vm14013_vm8, %v10669_v4, 0.0  ;;  %v2866_v15 = vsel %vm14014_vm2, %v10644_v60, 0.0  ;;  %v2769_v4 = vsel %vm14013_vm8, %v10534_v42, 0.0  ;;  %v11011_v9 = vmax.f32 %v2613_v23, 0.0  ;;  %v2607_v62 = vpop.f32.mrf.mxu0  ;;  %vm14019_vm3 = vmmov %vm14002_vm0 }
 0x29f   : > { %14015 = vst [vmem:[#allocation115_spill] sm:$0xff] %v11002_v0  ;;  %v11015_v24 = vpack.i.bf16 %v2770_v7, %v2769_v4  ;;  %v11021_v39 = vmax.f32 %v2616_v43, 0.0  ;;  %v2608_v3 = vadd.f32 %v10528_v34, %v2607_v62  ;;  %v11026_v23 = vpack.i.bf16 %v2866_v15, %v2865_v58  ;;  %v14022_v58 = vld [vmem:[#allocation63_spill] sm:$0xff]  ;;  %vm14023_vm7 = vmmov %vm14002_vm0 }
 0x2a0   : > { %14016 = vst [vmem:[#allocation66_spill] sm:$0xff] %v11011_v9  ;;  %v14018_v60 = vsel %vm13937_vm1, %v13935_v10, 0.0  ;;  %v11037_v4 = vsel %vm14002_vm0, %v10774_v40, %v5935_v16  ;;  %v2806_v43 = vrot.slane %v10837_v53, 1  ;;  %vm14021_vm6 = vnez %v14020_v47 }
 0x2a1   : > { %v10982_v61 = vpop.permute.xlu0 %5993  ;;  %14017 = vst [vmem:[#allocation95_spill] sm:$0xff] %v11021_v39  ;;  %v11033_v7 = vsel %vm14019_vm3, %v14018_v60, %v5936_v48  ;;  %v5941_v62 = vunpack.i.h.bf16 %v10730_v44  ;;  %v3907_v26 = vsel %vm14023_vm7, %v14022_v58, %v5940_v33  ;;  %v2810_v10 = vrot.slane %v11021_v39, 1  ;;  %v14024_v44 = vld [vmem:[#allocation6_spill] sm:$0xff]  ;;  %v14026_v58 = vld [vmem:[#allocation8_spill] sm:$0xff] }
 0x2a2   : > { %14008 = vst [vmem:[#allocation96_spill] sm:$0xff] %v10982_v61  ;;  %v11006_v27 = vpop.permute.xlu1 %6013  ;;  %v11047_v15 = vmax.f32 %v2608_v3, 0.0  ;;  %v5966_v48 = vunpack.i.h.bf16 %v10803_v54  ;;  %v2809_v40 = vrot.slane %v11011_v9, 1  ;;  %v2679_v16 = vrot.slane %v11002_v0, 7  ;;  %v14058_v61 = vld [vmem:[#allocation121_spill] sm:$0xff] }
 0x2a3   : > { %vm14025_vm1 = vnez %v14024_v44  ;;  %vm14027_vm14 = vnez %v14026_v58  ;;  %v14028_v30 = vrot.slane %v11002_v0, 1  ;;  %vm14029_vm11 = vcmp.lt.s32.totalorder %v6508_v1, 7 }
 0x2a4   : > { %v2747_v33 = vsel %vm14025_vm1, %v11011_v9, 0.0  ;;  %v2748_v3 = vsel %vm14027_vm14, %v11021_v39, 0.0  ;;  %v5965_v60 = vunpack.i.l.bf16 %v10803_v54  ;;  %v14030_v42 = vrot.slane %v10800_v20, 1  ;;  %vm14031_vm13 = vmmov %vm14029_vm11  ;;  %v14036_v54 = vld [vmem:[#allocation57_spill] sm:$0xff]  ;;  %v14042_v20 = vld [vmem:[#allocation82_spill] sm:$0xff] }
 0x2a5   : > { %v11024_v49 = vpop.permute.xlu0 %5998  ;;  %v11066_v14 = vsel %vm14029_vm11, %v2806_v43, %v14028_v30  ;;  %v6152_v21 = vpack.i.bf16 %v2748_v3, %v2747_v33  ;;  %vm14033_vm2 = vnez %v14032_v11  ;;  %vm14035_vm3 = vmmov %vm14029_vm11  ;;  %v14037_v33 = vrot.slane %v14036_v54, 1 }
 0x2a6   : > { %v11053_v52 = vpop.permute.xlu1 %6018  ;;  %v11073_v34 = vsel %vm14031_vm13, %v14030_v42, %v2806_v43  ;;  %v2934_v12 = vsel %vm14033_vm2, %v11066_v14, 0.0  ;;  %v11083_v30 = vsel %vm14035_vm3, %v2809_v40, %v2810_v10  ;;  %vm14038_vm0 = vmmov %vm14035_vm3  ;;  %v14039_v42 = vrot.slane %v11047_v15, 7 }
 0x2a7   : > { %v6222_v37 = vpack.i.bf16 %v2934_v12, %v11073_v34  ;;  %v11089_v3 = vsel %vm14038_vm0, %v2810_v10, %v14037_v33  ;;  %vm14040_vm7 = vcmp.lt.s32.totalorder %v6508_v1, 1  ;;  %v5971_v45 = vunpack.i.h.bf16 %v14042_v20  ;;  %6153 = vrot.lane.b32.xlu1 %v6152_v21, %s6411_s18  ;;  %v14043_v10 = vld [vmem:[#allocation9_spill] sm:$0xff] }
 0x2a8   : > { %v11095_v43 = vsel %vm14040_vm7, %v2679_v16, %v14039_v42  ;;  %v5970_v12 = vunpack.i.l.bf16 %v14042_v20  ;;  %v2843_v19 = vsel %vm14025_vm1, %v11083_v30, 0.0  ;;  %vm14044_vm11 = vnez %v14043_v10  ;;  %vm14047_vm3 = vmmov %vm14040_vm7  ;;  %v14049_v21 = vld [vmem:[#allocation73_spill] sm:$0xff] }
 0x2a9   : > { %v11078_v36 = vpop.permute.xlu0 %6008  ;;  %14041 = vst [vmem:[#allocation84_spill] sm:$0xff] %v11095_v43  ;;  %vm14045_vm13 = vmand %vm14027_vm14, %vm14044_vm11  ;;  %6223 = vrot.lane.b32.xlu0 %v6222_v37, %s6411_s18  ;;  %v11114_v20 = vsel %vm14047_vm3, %v14046_v17, %v2679_v16  ;;  %vm14050_vm0 = vnez %v14049_v21  ;;  %v14051_v28 = vrot.slane %v14036_v54, 7  ;;  %v14052_v58 = vrot.slane %v11021_v39, 7  ;;  %v14054_v37 = vld [vmem:[#allocation78_spill] sm:$0xff] }
 0x2aa   : > { %14034 = vst [vmem:[#allocation48_spill] sm:$0xff] %v11078_v36  ;;  %v2844_v33 = vsel %vm14045_vm13, %v11089_v3, 0.0  ;;  %14048 = vst [vmem:[#allocation47_spill] sm:$0xff] %v11114_v20  ;;  %v2966_v44 = vsel %vm14050_vm0, %v11095_v43, 0.0  ;;  %vm14055_vm11 = vcmask 261120   ;;  %vm14057_vm13 = vcmask 523264   ;;  %v6039_v16 = vpop.permute.xlu1 %6038 }
 0x2ab   : > { %v6157_v42 = vpack.i.bf16 %v2844_v33, %v2843_v19  ;;  %vm14053_vm7 = vmmov %vm14047_vm3  ;;  %v3908_v19 = vsel %vm14055_vm11, %v14054_v37, %v5941_v62  ;;  %v14056_v33 = vld [vmem:[#allocation65_spill] sm:$0xff]  ;;  %v3939_v17 = vsel %vm14057_vm13, %v3907_v26, %v5965_v60  ;;  %vm14059_vm3 = vnez %v14058_v61  ;;  %v14060_v43 = vld [vmem:[#allocation26_spill] sm:$0xff] }
 0x2ac   : > { %v11125_v10 = vsel %vm14053_vm7, %v14052_v58, %v14051_v28  ;;  %v5951_v53 = vunpack.i.h.bf16 %v14056_v33  ;;  %vm14061_vm15 = vnez %v14060_v43  ;;  %v11140_v28 = vld [vmem:[%s12031_s3 + $0x88] sm:$0xff]   ;;  %v2808_v58 = vrot.slane %v11047_v15, 1  ;;  %v14064_v37 = vld [vmem:[#allocation13_spill] sm:$0xff] }
 0x2ad   : > { %vm14062_vm8 = vmand %vm14059_vm3, %vm14061_vm15  ;;  %14063 = vst [vmem:[#allocation117_spill] sm:$0xff] %v11140_v28  ;;  %vm14065_vm7 = vnez %v14064_v37  ;;  %v14066_v26 = vld [vmem:[#allocation21_spill] sm:$0xff]  ;;  %v14069_v36 = vld [vmem:[#allocation18_spill] sm:$0xff]  ;;  %vm14073_vm1 = vcmask 261120   ;;  %6158 = vrot.lane.b32.xlu1 %v6157_v42, %s6413_s20  ;;  %5079 = vmatprep.subr.bf16.mxu0 %v11140_v28  ;;  %v14080_v42 = vunpack.i.l.bf16 %v13988_v46  ;;  %v6041_v28 = vunpack.i.h.bf16 %v6039_v16 }
 0x2ae   : > { %v2965_v6 = vsel %vm14062_vm8, %v11114_v20, 0.0  ;;  %vm14067_vm11 = vnez %v14066_v26  ;;  %vm14070_vm14 = vnez %v14069_v36  ;;  %v5950_v20 = vunpack.i.l.bf16 %v14056_v33  ;;  %vm14075_vm15 = vmmov %vm14073_vm1  ;;  %v14076_v26 = vld [vmem:[#allocation77_spill] sm:$0xff] }
 0x2af   : > { %v6232_v62 = vpack.i.bf16 %v2966_v44, %v2965_v6  ;;  %vm14068_vm13 = vmand %vm14065_vm7, %vm14067_vm11  ;;  %v2875_v43 = vsel %vm14070_vm14, %v11125_v10, 0.0  ;;  %vm14071_vm8 = vcmask 523264   ;;  %v3910_v54 = vsel %vm14073_vm1, %v14072_v63, %v5971_v45  ;;  %v11157_v6 = vpop.permute.xlu0 %6023 }
 0x2b0   : > { %v2717_v60 = vsel %vm14068_vm13, %v11125_v10, 0.0  ;;  %v3940_v55 = vsel %vm14071_vm8, %v3908_v19, %v5966_v48  ;;  %v14074_v44 = vunpack.i.l.bf16 %v10399_v13  ;;  %vm14077_vm7 = vmmov %vm14073_vm1  ;;  %v5976_v33 = vunpack.i.h.bf16 %v10900_v56 }
 0x2b1   : > { %v3909_v36 = vsel %vm14077_vm7, %v14076_v26, %v5970_v12  ;;  %v5975_v48 = vunpack.i.l.bf16 %v10900_v56  ;;  %6233 = vrot.lane.b32.xlu0 %v6232_v62, %s6413_s20  ;;  %v14078_v63 = vunpack.i.l.bf16 %v10427_v38  ;;  %vm14079_vm1 = vmmov %vm14071_vm8  ;;  %vm14081_vm11 = vcmask 785408  }
 0x2b2   : > { %v3805_v37 = vsel %vm14075_vm15, %v2717_v60, %v14074_v44  ;;  %v6162_v19 = vpack.i.bf16 %v10745_v59, %v2875_v43  ;;  %v2997_v12 = vsel %vm14059_vm3, %v11002_v0, 0.0  ;;  %v2998_v56 = vsel %vm14050_vm0, %v11047_v15, 0.0 }
 0x2b3   : > { %v3838_v45 = vsel %vm14079_vm1, %v3805_v37, %v14078_v63  ;;  %v2681_v62 = vrot.slane %v11011_v9, 7  ;;  %v6242_v60 = vpack.i.bf16 %v2998_v56, %v2997_v12  ;;  %vm14082_vm15 = vcmp.lt.s32.totalorder %v6508_v1, 7  ;;  %v6044_v37 = vpop.permute.xlu1 %6043 }
 0x2b4   : > { %v3871_v13 = vsel %vm14081_vm11, %v3838_v45, %v14080_v42  ;;  %v11185_v46 = vsel %vm14082_vm15, %v2808_v58, %v2809_v40  ;;  %v6006_v44 = vunpack.i.h.bf16 %v10969_v25  ;;  %v6015_v43 = vunpack.i.l.bf16 %v11006_v27  ;;  %6163 = vrot.lane.b32.xlu1 %v6162_v19, %s6412_s19  ;;  %vm14084_vm13 = vmmov %vm14082_vm15 }
 0x2b5   : > { %v4000_v38 = vpack.c.bf16 %v10976_v5, %v3871_v13  ;;  %v14083_v26 = vrot.slane %v11002_v0, 1  ;;  %v14085_v5 = vld [vmem:[#allocation55_spill] sm:$0xff]  ;;  %v6005_v40 = vunpack.i.l.bf16 %v10969_v25  ;;  %v6016_v42 = vunpack.i.h.bf16 %v11006_v27  ;;  %6243 = vrot.lane.b32.xlu0 %v6242_v60, %s6412_s19  ;;  %v11214_v27 = vpop.permute.xlu0 %6028 }
 0x2b6   : > { %vm14086_vm8 = vnez %v14085_v5  ;;  %v6040_v13 = vunpack.i.l.bf16 %v6039_v16  ;;  %v14087_v19 = vrot.slane %v11047_v15, 7  ;;  %vm14088_vm7 = vcmp.lt.s32.totalorder %v6508_v1, 1  ;;  %v14095_v16 = vld [vmem:[#allocation59_spill] sm:$0xff] }
 0x2b7   : > { %v11194_v63 = vsel %vm14084_vm13, %v14083_v26, %v2808_v58  ;;  %v2936_v45 = vsel %vm14086_vm8, %v11185_v46, 0.0  ;;  %4285 = vmatmul.mubr.bf16.vlgmr.msra.gmra.mxu1 %v4000_v38  ;;  %v3941_v58 = vsel %vm14079_vm1, %v3909_v36, %v5975_v48  ;;  %v6021_v56 = vunpack.i.h.bf16 %v11053_v52  ;;  %vm14091_vm11 = vmmov %vm14088_vm7  ;;  %v14097_v48 = vld [vmem:[#allocation50_spill] sm:$0xff] }
 0x2b8   : > { %v11206_v12 = vsel %vm14088_vm7, %v14087_v19, %v2681_v62  ;;  %v6020_v26 = vunpack.i.l.bf16 %v11053_v52  ;;  %v14089_v25 = vpack.c.bf16 %v10985_v22, %v10979_v2  ;;  %v6046_v38 = vunpack.i.h.bf16 %v6044_v37  ;;  %6168 = vrot.lane.b32.xlu1 %v11015_v24, %s6411_s18 }
 0x2b9   : > { %v6045_v60 = vunpack.i.l.bf16 %v6044_v37  ;;  %v6252_v0 = vpack.i.bf16 %v2936_v45, %v11194_v63  ;;  %v14090_v19 = vrot.slane %v11021_v39, 7  ;;  %vm14092_vm15 = vcmask 261120  }
 0x2ba   : > { %4292 = vmatprep.mubr.bf16.mxu1 %v14089_v25  ;;  %v3817_v52 = vsel %vm14092_vm15, %v10891_v57, %v6015_v43  ;;  %vm14093_vm13 = vcmask 785408   ;;  %vm14096_vm1 = vnez %v14095_v16  ;;  %vm14098_vm14 = vnez %v14097_v48  ;;  %v11265_v43 = vpop.permute.xlu0 %6033  ;;  %v14113_v25 = vld [vmem:[#allocation49_spill] sm:$0xff] }
 0x2bb   : > { %v11221_v36 = vsel %vm14091_vm11, %v2681_v62, %v14090_v19  ;;  %v3971_v2 = vsel %vm14093_vm13, %v3939_v17, %v5950_v20  ;;  %vm14094_vm7 = vmmov %vm14093_vm13  ;;  %vm14100_vm11 = vcmask 523264   ;;  %v14102_v24 = vsel %vm13978_vm10, %v10250_v32, 0.0  ;;  %6253 = vrot.lane.b32.xlu0 %v6252_v0, %s6411_s18  ;;  %v14105_v17 = vld [vmem:[#allocation56_spill] sm:$0xff]  ;;  %v14173_v32 = vld [vmem:[#allocation14_spill] sm:$0xff] }
 0x2bc   : > { %v3972_v22 = vsel %vm14094_vm7, %v3940_v55, %v5951_v53  ;;  %vm14099_vm9 = vmand %vm14096_vm1, %vm14098_vm14  ;;  %v3848_v1 = vsel %vm14100_vm11, %v11037_v4, %v6005_v40  ;;  %v3818_v20 = vsel %vm14092_vm15, %v14102_v24, %v6016_v42  ;;  %6178 = vrot.lane.b32.xlu1 %v11026_v23, %s6413_s20  ;;  %v14119_v19 = vsel %vm13949_vm5, %v10685_v41, 0.0  ;;  %v14123_v24 = vld [vmem:[#allocation7_spill] sm:$0xff] }
 0x2bd   : > { %v2967_v37 = vsel %vm14099_vm9, %v11206_v12, 0.0  ;;  %vm14101_vm8 = vmmov %vm14100_vm11  ;;  %vm14106_vm9 = vnez %v14105_v17  ;;  %vm14107_vm11 = vcmask 785408   ;;  %v4007_v45 = vpack.c.bf16 %v3972_v22, %v3971_v2 }
 0x2be   : > { %v3849_v57 = vsel %vm14101_vm8, %v11033_v7, %v6006_v44  ;;  %vm14103_vm13 = vmmov %vm14101_vm8  ;;  %v2968_v62 = vsel %vm14106_vm9, %v11221_v36, 0.0  ;;  %v11251_v4 = vsel %vm14107_vm11, %v3848_v1, %v6020_v26  ;;  %v3000_v40 = vsel %vm14106_vm9, %v11021_v39, 0.0  ;;  %v14186_v39 = vld [vmem:[#allocation123_spill] sm:$0xff] }
 0x2bf   : > { %v3850_v55 = vsel %vm14103_vm13, %v3817_v52, %v6040_v13  ;;  %vm14104_vm7 = vmmov %vm14101_vm8  ;;  %v6262_v50 = vpack.i.bf16 %v2968_v62, %v2967_v37  ;;  %v14112_v13 = vld [vmem:[#allocation68_spill] sm:$0xff]  ;;  %v2999_v22 = vsel %vm14096_vm1, %v11011_v9, 0.0  ;;  %v14121_v37 = vsel %vm14021_vm6, %v10547_v31, 0.0 }
 0x2c0   : > { %v3851_v53 = vsel %vm14104_vm7, %v3818_v20, %v6041_v28  ;;  %vm14108_vm8 = vmmov %vm14107_vm11  ;;  %v5930_v26 = vunpack.i.l.bf16 %v14112_v13  ;;  %v14120_v52 = vld [vmem:[#allocation80_spill] sm:$0xff]  ;;  %vm14124_vm11 = vnez %v14123_v24  ;;  %v6001_v29 = vunpack.i.h.bf16 %v11024_v49 }
 0x2c1   : > { %v11254_v7 = vsel %vm14108_vm8, %v3849_v57, %v6021_v56  ;;  %vm14109_vm10 = vmmov %vm14108_vm8  ;;  %v5931_v56 = vunpack.i.h.bf16 %v14112_v13  ;;  %6263 = vrot.lane.b32.xlu0 %v6262_v50, %s6413_s20  ;;  %v6187_v2 = vpack.i.bf16 %v14120_v52, %v14119_v19  ;;  %v14122_v57 = vld [vmem:[#allocation64_spill] sm:$0xff]  ;;  %v14126_v50 = vld [vmem:[#allocation11_spill] sm:$0xff]  ;;  %v11304_v13 = vpop.permute.xlu0 %6048  ;;  %v3027_v61 = vsel %vm13984_vm4, %v11073_v34, 0.0 }
 0x2c2   : > { %v11259_v44 = vsel %vm14109_vm10, %v3850_v55, %v6045_v60  ;;  %vm14110_vm15 = vmmov %vm14108_vm8  ;;  %v14117_v60 = vld [vmem:[#allocation35_spill] sm:$0xff]  ;;  %v3002_v20 = vsel %vm14124_vm11, %v14122_v57, 0.0  ;;  %v6272_v55 = vpack.i.bf16 %v3000_v40, %v2999_v22  ;;  %v6025_v21 = vunpack.i.l.bf16 %v11157_v6  ;;  %v14137_v19 = vld [vmem:[#allocation52_spill] sm:$0xff] }
 0x2c3   : > { %v11262_v0 = vsel %vm14110_vm15, %v3851_v53, %v6046_v38  ;;  %vm14111_vm13 = vmmov %vm14104_vm7  ;;  %v14114_v38 = vld [vmem:[#allocation51_spill] sm:$0xff]  ;;  %vm14118_vm7 = vnez %v14117_v60  ;;  %v3973_v53 = vsel %vm14108_vm8, %v3941_v58, %v5930_v26  ;;  %vm14127_vm15 = vnez %v14126_v50  ;;  %6188 = vrot.lane.b32.xlu1 %v6187_v2, %s6412_s19  ;;  %v14176_v9 = vld [vmem:[#allocation116_spill] sm:$0xff] }
 0x2c4   : > { %v3942_v28 = vsel %vm14111_vm13, %v3910_v54, %v5976_v33  ;;  %v14115_v54 = vpack.c.bf16 %v14113_v25, %v14114_v38  ;;  %v14116_v33 = vld [vmem:[#allocation61_spill] sm:$0xff]  ;;  %vm14125_vm10 = vmmov %vm14108_vm8  ;;  %v11306_v25 = vpop.permute.xlu1 %6053  ;;  %vm14128_vm13 = vnez %v13963_v18  ;;  %v3029_v58 = vsel %vm14059_vm3, %v11194_v63, 0.0 }
 0x2c5   : > { %v2771_v23 = vsel %vm14118_vm7, %v14116_v33, 0.0  ;;  %v3974_v62 = vsel %vm14125_vm10, %v3942_v28, %v5931_v56  ;;  %vm14129_vm5 = vmand %vm13994_vm12, %vm14128_vm13  ;;  %v3031_v56 = vsel %vm14096_vm1, %v11083_v30, 0.0  ;;  %v6000_v26 = vunpack.i.l.bf16 %v11024_v49  ;;  %6273 = vrot.lane.b32.xlu0 %v6272_v55, %s6412_s19  ;;  %v14143_v55 = vld [vmem:[#allocation23_spill] sm:$0xff] }
 0x2c6   : > { %4293 = vmatmul.mubr.bf16.gmra.mxu1 %v14115_v54  ;;  %v6197_v1 = vpack.i.bf16 %v14121_v37, %v2771_v23  ;;  %v3028_v40 = vsel %vm14129_vm5, %v11066_v14, 0.0  ;;  %vm14130_vm8 = vmand %vm14050_vm0, %vm14033_vm2  ;;  %v6026_v38 = vunpack.i.h.bf16 %v11157_v6  ;;  %vm14133_vm5 = vnez %v14085_v5  ;;  %v14136_v6 = vld [vmem:[#allocation57_spill] sm:$0xff]  ;;  %v11357_v37 = vpop.permute.xlu0 %6058 }
 0x2c7   : > { %4300 = vmatprep.mubr.bf16.mxu1 %v4007_v45  ;;  %v2938_v45 = vsel %vm14127_vm15, %v11089_v3, 0.0  ;;  %v3030_v28 = vsel %vm14130_vm8, %v11185_v46, 0.0  ;;  %v11334_v54 = vpack.c.bf16 %v3028_v40, %v3027_v61  ;;  %vm14134_vm12 = vmand %vm14106_vm9, %vm14133_vm5  ;;  %vm14138_vm0 = vnez %v14137_v19  ;;  %v14160_v19 = vld [vmem:[#allocation112_spill] sm:$0xff] }
 0x2c8   : > { %v11336_v23 = vpack.c.bf16 %v3030_v28, %v3029_v58  ;;  %v3032_v49 = vsel %vm14134_vm12, %v11089_v3, 0.0  ;;  %v6282_v16 = vpack.i.bf16 %v2938_v45, %v11083_v30  ;;  %vm14135_vm4 = vmand %vm14021_vm6, %vm14128_vm13  ;;  %v3001_v2 = vsel %vm14138_vm0, %v14136_v6, 0.0  ;;  %6198 = vrot.lane.b32.xlu1 %v6197_v1, %s6411_s18  ;;  %v6064_v3 = vpop.permute.xlu1 %6063  ;;  %v14140_v30 = vld [vmem:[#allocation5_spill] sm:$0xff]  ;;  %v14151_v58 = vld [vmem:[#allocation15_spill] sm:$0xff] }
 0x2c9   : > { %14131 = vst [vmem:[#allocation114_spill] sm:$0xff] %v11334_v54  ;;  %v2868_v8 = vsel %vm14135_vm4, %v10781_v35, 0.0  ;;  %v11354_v22 = vpack.c.bf16 %v3032_v49, %v3031_v56  ;;  %v4010_v17 = vpack.c.bf16 %v3974_v62, %v3973_v53  ;;  %vm14141_vm3 = vnez %v14140_v30  ;;  %v14144_v45 = vld [vmem:[#allocation89_spill] sm:$0xff]  ;;  %v14146_v53 = vld [vmem:[#allocation92_spill] sm:$0xff]  ;;  %v14149_v62 = vld [vmem:[#allocation74_spill] sm:$0xff] }
 0x2ca   : > { %14132 = vst [vmem:[#allocation105_spill] sm:$0xff] %v11336_v23  ;;  %vm14142_vm1 = vmand %vm14138_vm0, %vm14141_vm3  ;;  %v2970_v35 = vsel %vm14124_vm11, %v10745_v59, 0.0  ;;  %v6302_v57 = vpack.i.bf16 %v3002_v20, %v3001_v2  ;;  %vm14145_vm9 = vnez %v14144_v45  ;;  %vm14147_vm10 = vnez %v14146_v53  ;;  %v14153_v56 = vld [vmem:[#allocation76_spill] sm:$0xff]  ;;  %6283 = vrot.lane.b32.xlu0 %v6282_v16, %s6411_s18  ;;  %v14156_v59 = vld [vmem:[#allocation97_spill] sm:$0xff] }
 0x2cb   : > { %14139 = vst [vmem:[#allocation67_spill] sm:$0xff] %v11354_v22  ;;  %v2969_v18 = vsel %vm14142_vm1, %v11125_v10, 0.0  ;;  %vm14148_vm13 = vmand %vm14145_vm9, %vm14147_vm10  ;;  %vm14150_vm8 = vcmask 261120   ;;  %v14154_v10 = vld [vmem:[#allocation54_spill] sm:$0xff]  ;;  %v2867_v24 = vsel %vm14118_vm7, %v14156_v59, 0.0  ;;  %vm14157_vm11 = vcmask 523264  }
 0x2cc   : > { %v2731_v1 = vsel %vm14148_vm13, %v14143_v55, 0.0  ;;  %v3912_v40 = vsel %vm14150_vm8, %v14149_v62, %v6001_v29  ;;  %vm14152_vm12 = vmmov %vm14150_vm8  ;;  %v14155_v61 = vpack.c.bf16 %v14153_v56, %v14154_v10  ;;  %v6207_v6 = vpack.i.bf16 %v2868_v8, %v2867_v24  ;;  %v14159_v29 = vld [vmem:[#allocation62_spill] sm:$0xff]  ;;  %v14162_v2 = vld [vmem:[#allocation48_spill] sm:$0xff]  ;;  %v11400_v8 = vpop.permute.xlu1 %6073 }
 0x2cd   : > { %v3911_v28 = vsel %vm14152_vm12, %v14151_v58, %v6000_v26  ;;  %vm14158_vm4 = vmmov %vm14157_vm11  ;;  %vm14161_vm0 = vnez %v14160_v19  ;;  %v6011_v55 = vunpack.i.h.bf16 %v14162_v2  ;;  %v6010_v45 = vunpack.i.l.bf16 %v14162_v2  ;;  %v14163_v16 = vld [vmem:[#allocation75_spill] sm:$0xff]  ;;  %v14164_v62 = vld [vmem:[#allocation100_spill] sm:$0xff] }
 0x2ce   : > { %4301 = vmatmul.mubr.bf16.gmra.mxu1 %v14155_v61  ;;  %v3943_v20 = vsel %vm14157_vm11, %v3911_v28, %v6025_v21  ;;  %v3944_v49 = vsel %vm14158_vm4, %v3912_v40, %v6026_v38  ;;  %v2773_v26 = vsel %vm14161_vm0, %v14159_v29, 0.0  ;;  %v6292_v53 = vpack.i.bf16 %v2970_v35, %v2969_v18  ;;  %v14166_v56 = vld [vmem:[#allocation96_spill] sm:$0xff]  ;;  %6208 = vrot.lane.b32.xlu1 %v6207_v6, %s6413_s20  ;;  %v11398_v38 = vpop.permute.xlu0 %6068  ;;  %v14168_v28 = vld [vmem:[#allocation69_spill] sm:$0xff]  ;;  %v14169_v61 = vld [vmem:[#allocation22_spill] sm:$0xff] }
 0x2cf   : > { %4308 = vmatprep.mubr.bf16.mxu1 %v4010_v17  ;;  %vm14165_vm1 = vnez %v14164_v62  ;;  %v5996_v10 = vunpack.i.h.bf16 %v14166_v56  ;;  %v5995_v21 = vunpack.i.l.bf16 %v14166_v56  ;;  %v14167_v17 = vld [vmem:[#allocation101_spill] sm:$0xff]  ;;  %vm14170_vm9 = vnez %v14169_v61  ;;  %v14189_v61 = vld [vmem:[#allocation91_spill] sm:$0xff] }
 0x2d0   : > { %v2899_v58 = vsel %vm14165_vm1, %v14163_v16, 0.0  ;;  %v2774_v18 = vsel %vm14170_vm9, %v14168_v28, 0.0  ;;  %v6031_v35 = vunpack.i.h.bf16 %v11214_v27  ;;  %v6030_v59 = vunpack.i.l.bf16 %v11214_v27  ;;  %6293 = vrot.lane.b32.xlu0 %v6292_v53, %s6413_s20  ;;  %v14174_v22 = vld [vmem:[#allocation81_spill] sm:$0xff]  ;;  %v14177_v53 = vld [vmem:[#allocation88_spill] sm:$0xff]  ;;  %vm14178_vm12 = vmand %vm14170_vm9, %vm14033_vm2 }
 0x2d1   : > { %v6217_v40 = vpack.i.bf16 %v14167_v17, %v2899_v58  ;;  %vm14171_vm10 = vcmask 785408   ;;  %v6036_v2 = vunpack.i.h.bf16 %v11265_v43  ;;  %v6035_v56 = vunpack.i.l.bf16 %v11265_v43 }
 0x2d2   : > { %v3975_v24 = vsel %vm14171_vm10, %v3943_v20, %v6010_v45  ;;  %vm14172_vm13 = vmmov %vm14171_vm10  ;;  %v6066_v42 = vunpack.i.h.bf16 %v6064_v3  ;;  %v6065_v58 = vunpack.i.l.bf16 %v6064_v3  ;;  %vm14175_vm8 = vnez %v14174_v22  ;;  %v6079_v22 = vpop.permute.xlu1 %6078  ;;  %v14184_v45 = vld [vmem:[#allocation29_spill] sm:$0xff]  ;;  %v14398_v30 = vld [vmem:[#allocation67_spill] sm:$0xff] }
 0x2d3   : > { %v3976_v6 = vsel %vm14172_vm13, %v3944_v49, %v6011_v55  ;;  %v2732_v23 = vsel %vm14175_vm8, %v14173_v32, 0.0  ;;  %v6227_v54 = vpack.i.bf16 %v2774_v18, %v2773_v26  ;;  %v2869_v27 = vsel %vm14161_vm0, %v14176_v9, 0.0  ;;  %6218 = vrot.lane.b32.xlu1 %v6217_v40, %s6412_s19  ;;  %v6084_v32 = vpop.permute.xlu0 %6083  ;;  %v14181_v26 = vld [vmem:[#allocation104_spill] sm:$0xff]  ;;  %v14182_v55 = vld [vmem:[#allocation26_spill] sm:$0xff] }
 0x2d4   : > { %v2870_v20 = vsel %vm14178_vm12, %v14177_v53, 0.0  ;;  %vm14179_vm11 = vcmask 261120   ;;  %v4013_v49 = vpack.c.bf16 %v3976_v6, %v3975_v24  ;;  %vm14183_vm10 = vnez %v14182_v55  ;;  %v14188_v53 = vld [vmem:[#allocation109_spill] sm:$0xff]  ;;  %6303 = vrot.lane.b32.xlu0 %v6302_v57, %s6412_s19 }
 0x2d5   : > { %v3820_v43 = vsel %vm14179_vm11, %v2732_v23, %v5996_v10  ;;  %vm14180_vm4 = vmmov %vm14179_vm11  ;;  %v2901_v9 = vsel %vm14183_vm10, %v14181_v26, 0.0  ;;  %v14190_v23 = vpack.c.bf16 %v14188_v53, %v14189_v61  ;;  %v6080_v10 = vunpack.i.l.bf16 %v6079_v22 }
 0x2d6   : > { %v3819_v3 = vsel %vm14180_vm4, %v2731_v1, %v5995_v21  ;;  %vm14185_vm13 = vmmov %vm14180_vm4  ;;  %v6081_v1 = vunpack.i.h.bf16 %v6079_v22  ;;  %vm14191_vm2 = vcmask 523264   ;;  %v6061_v57 = vunpack.i.h.bf16 %v11357_v37 }
 0x2d7   : > { %v3914_v18 = vsel %vm14185_vm13, %v14184_v45, %v6031_v35  ;;  %vm14187_vm8 = vmmov %vm14180_vm4  ;;  %4309 = vmatmul.mubr.bf16.gmra.mxu1 %v14190_v23  ;;  %v14195_v35 = vld [vmem:[#allocation103_spill] sm:$0xff]  ;;  %vm14196_vm13 = vcmask 785408   ;;  %6228 = vrot.lane.b32.xlu1 %v6227_v54, %s6411_s18  ;;  %v6085_v53 = vunpack.i.l.bf16 %v6084_v32  ;;  %v14201_v54 = vld [vmem:[#allocation90_spill] sm:$0xff] }
 0x2d8   : > { %v3913_v11 = vsel %vm14187_vm8, %v14186_v39, %v6030_v59  ;;  %vm14192_vm12 = vmmov %vm14191_vm2  ;;  %4316 = vmatprep.mubr.bf16.mxu1 %v4013_v49  ;;  %v5991_v45 = vunpack.i.h.bf16 %v14195_v35  ;;  %v5990_v39 = vunpack.i.l.bf16 %v14195_v35  ;;  %v6089_v49 = vpop.permute.xlu0 %6088 }
 0x2d9   : > { %v3945_v21 = vsel %vm14191_vm2, %v3913_v11, %v6035_v56  ;;  %v3946_v40 = vsel %vm14192_vm12, %v3914_v18, %v6036_v2  ;;  %vm14193_vm11 = vmmov %vm14191_vm2  ;;  %v6060_v56 = vunpack.i.l.bf16 %v11357_v37  ;;  %v6237_v2 = vpack.i.bf16 %v2870_v20, %v2869_v27  ;;  %v14203_v27 = vld [vmem:[#allocation94_spill] sm:$0xff] }
 0x2da   : > { %v3853_v24 = vsel %vm14193_vm11, %v3820_v43, %v6066_v42  ;;  %vm14194_vm4 = vmmov %vm14191_vm2  ;;  %v6099_v42 = vpop.permute.xlu1 %6098  ;;  %v6076_v43 = vunpack.i.h.bf16 %v11400_v8  ;;  %v6086_v11 = vunpack.i.h.bf16 %v6084_v32  ;;  %vm14202_vm11 = vnez %v14201_v54  ;;  %v14214_v54 = vld [vmem:[#allocation85_spill] sm:$0xff] }
 0x2db   : > { %v3852_v6 = vsel %vm14194_vm4, %v3819_v3, %v6065_v58  ;;  %vm14197_vm8 = vmmov %vm14196_vm13  ;;  %v6075_v3 = vunpack.i.l.bf16 %v11400_v8  ;;  %v6101_v23 = vunpack.i.h.bf16 %v6099_v42  ;;  %v6100_v37 = vunpack.i.l.bf16 %v6099_v42  ;;  %6238 = vrot.lane.b32.xlu1 %v6237_v2, %s6413_s20 }
 0x2dc   : > { %v11446_v61 = vsel %vm14196_vm13, %v3852_v6, %v6080_v10  ;;  %v11449_v59 = vsel %vm14197_vm8, %v3853_v24, %v6081_v1  ;;  %vm14198_vm2 = vmmov %vm14197_vm8  ;;  %v14200_v1 = vld [vmem:[#allocation27_spill] sm:$0xff]  ;;  %vm14204_vm4 = vnez %v14203_v27  ;;  %v14207_v24 = vld [vmem:[#allocation86_spill] sm:$0xff] }
 0x2dd   : > { %v3977_v22 = vsel %vm14198_vm2, %v3945_v21, %v5990_v39  ;;  %vm14199_vm12 = vmmov %vm14198_vm2  ;;  %v14206_v10 = vld [vmem:[#allocation31_spill] sm:$0xff]  ;;  %vm14208_vm8 = vnez %v14207_v24  ;;  %v14209_v6 = vld [vmem:[#allocation44_spill] sm:$0xff]  ;;  %vm14211_vm2 = vcmask 261120  }
 0x2de   : > { %v3978_v18 = vsel %vm14199_vm12, %v3946_v40, %v5991_v45  ;;  %vm14205_vm13 = vmand %vm14202_vm11, %vm14204_vm4  ;;  %v2734_v8 = vsel %vm14208_vm8, %v14206_v10, 0.0  ;;  %v6247_v35 = vpack.i.bf16 %v14209_v6, %v2901_v9  ;;  %v14210_v21 = vld [vmem:[#allocation120_spill] sm:$0xff]  ;;  %v14212_v45 = vld [vmem:[#allocation113_spill] sm:$0xff]  ;;  %v6104_v42 = vpop.permute.xlu1 %6103  ;;  %vm14222_vm8 = vcmask 523264  }
 0x2df   : > { %v2733_v20 = vsel %vm14205_vm13, %v14200_v1, 0.0  ;;  %v3916_v40 = vsel %vm14211_vm2, %v14210_v21, %v6061_v57  ;;  %vm14213_vm12 = vmmov %vm14211_vm2  ;;  %v4016_v39 = vpack.c.bf16 %v3978_v18, %v3977_v22  ;;  %v14215_v27 = vld [vmem:[#allocation41_spill] sm:$0xff]  ;;  %v14219_v24 = vld [vmem:[#allocation16_spill] sm:$0xff]  ;;  %v6106_v57 = vunpack.i.h.bf16 %v6104_v42 }
 0x2e0   : > { %v3915_v32 = vsel %vm14213_vm12, %v14212_v45, %v6060_v56  ;;  %vm14216_vm11 = vnez %v14215_v27  ;;  %vm14217_vm4 = vmmov %vm14211_vm2  ;;  %v14220_v9 = vld [vmem:[#allocation99_spill] sm:$0xff]  ;;  %v6105_v21 = vunpack.i.l.bf16 %v6104_v42  ;;  %v6071_v45 = vunpack.i.h.bf16 %v11398_v38  ;;  %6248 = vrot.lane.b32.xlu1 %v6247_v35, %s6412_s19 }
 0x2e1   : > { %v2776_v1 = vsel %vm14216_vm11, %v14214_v54, 0.0  ;;  %v3822_v58 = vsel %vm14217_vm4, %v2734_v8, %v6076_v43  ;;  %vm14218_vm13 = vmmov %vm14211_vm2  ;;  %v14221_v6 = vpack.c.bf16 %v14219_v24, %v14220_v9  ;;  %v3947_v56 = vsel %vm14222_vm8, %v3915_v32, %v6085_v53  ;;  %v14228_v53 = vld [vmem:[#allocation87_spill] sm:$0xff]  ;;  %v14234_v24 = vld [vmem:[#allocation45_spill] sm:$0xff] }
 0x2e2   : > { %v3821_v10 = vsel %vm14218_vm13, %v2733_v20, %v6075_v3  ;;  %vm14223_vm2 = vmmov %vm14222_vm8  ;;  %v6070_v43 = vunpack.i.l.bf16 %v11398_v38  ;;  %v6094_v3 = vpop.permute.xlu0 %6093  ;;  %vm14226_vm4 = vcmask 785408   ;;  %v14236_v9 = vld [vmem:[#allocation17_spill] sm:$0xff] }
 0x2e3   : > { %4317 = vmatmul.mubr.bf16.gmra.mxu1 %v14221_v6  ;;  %v3948_v22 = vsel %vm14223_vm2, %v3916_v40, %v6086_v11  ;;  %vm14224_vm12 = vmmov %vm14223_vm2  ;;  %v14229_v11 = vld [vmem:[#allocation37_spill] sm:$0xff]  ;;  %v6090_v6 = vunpack.i.l.bf16 %v6089_v49  ;;  %v6096_v32 = vunpack.i.h.bf16 %v6094_v3 }
 0x2e4   : > { %v3854_v2 = vsel %vm14224_vm12, %v3821_v10, %v6100_v37  ;;  %vm14225_vm9 = vmmov %vm14223_vm2  ;;  %4324 = vmatprep.mubr.bf16.mxu1 %v4016_v39  ;;  %vm14230_vm8 = vnez %v14229_v11  ;;  %v6095_v39 = vunpack.i.l.bf16 %v6094_v3  ;;  %v14243_v3 = vld [vmem:[#allocation84_spill] sm:$0xff] }
 0x2e5   : > { %v3855_v18 = vsel %vm14225_vm9, %v3822_v58, %v6101_v23  ;;  %v11490_v20 = vsel %vm14226_vm4, %v3854_v2, %v6105_v21  ;;  %vm14227_vm13 = vmmov %vm14226_vm4  ;;  %v2775_v37 = vsel %vm14230_vm8, %v14228_v53, 0.0  ;;  %v6091_v23 = vunpack.i.h.bf16 %v6089_v49 }
 0x2e6   : > { %v11493_v8 = vsel %vm14227_vm13, %v3855_v18, %v6106_v57  ;;  %vm14231_vm9 = vmmov %vm14226_vm4  ;;  %v6257_v42 = vpack.i.bf16 %v2776_v1, %v2775_v37  ;;  %v14238_v21 = vpack.c.bf16 %v11254_v7, %v11251_v4  ;;  %v2871_v1 = vsel %vm14230_vm8, %v11073_v34, 0.0  ;;  %v11525_v18 = vpop.permute.xlu0 %6108  ;;  %v6119_v4 = vpop.permute.xlu1 %6118  ;;  %v14242_v34 = vld [vmem:[#allocation47_spill] sm:$0xff] }
 0x2e7   : > { %v4024_v58 = vpack.c.bf16 %v11493_v8, %v11490_v20  ;;  %v3979_v38 = vsel %vm14231_vm9, %v3947_v56, %v6070_v43  ;;  %vm14232_vm2 = vmmov %vm14226_vm4  ;;  %vm14235_vm4 = vcmask 261120   ;;  %vm14239_vm9 = vcmask 523264  }
 0x2e8   : > { %v3980_v40 = vsel %vm14232_vm2, %v3948_v22, %v6071_v45  ;;  %vm14233_vm12 = vmand %vm14216_vm11, %vm14133_vm5  ;;  %6258 = vrot.lane.b32.xlu1 %v6257_v42, %s6411_s18  ;;  %v3918_v49 = vsel %vm14235_vm4, %v14234_v24, %v6091_v23  ;;  %v6051_v22 = vunpack.i.h.bf16 %v11304_v13  ;;  %v6050_v2 = vunpack.i.l.bf16 %v11304_v13  ;;  %v14244_v13 = vld [vmem:[#allocation60_spill] sm:$0xff]  ;;  %v14249_v24 = vld [vmem:[#allocation111_spill] sm:$0xff] }
 0x2e9   : > { %v2872_v35 = vsel %vm14233_vm12, %v11066_v14, 0.0  ;;  %v4019_v10 = vpack.c.bf16 %v3980_v40, %v3979_v38  ;;  %vm14237_vm13 = vmmov %vm14235_vm4  ;;  %v2903_v43 = vsel %vm14098_vm14, %v14242_v34, 0.0  ;;  %v6056_v23 = vunpack.i.h.bf16 %v11306_v25 }
 0x2ea   : > { %v3917_v57 = vsel %vm14237_vm13, %v14236_v9, %v6090_v6  ;;  %vm14240_vm5 = vmmov %vm14239_vm9  ;;  %v6267_v56 = vpack.i.bf16 %v2872_v35, %v2871_v1  ;;  %v6277_v37 = vpack.i.bf16 %v14243_v3, %v2903_v43  ;;  %v6055_v6 = vunpack.i.l.bf16 %v11306_v25  ;;  %v6114_v42 = vpop.permute.xlu0 %6113  ;;  %v14246_v35 = vld [vmem:[#allocation34_spill] sm:$0xff]  ;;  %v14253_v9 = vld [vmem:[#allocation115_spill] sm:$0xff] }
 0x2eb   : > { %4325 = vmatmul.mubr.bf16.gmra.mxu1 %v14238_v21  ;;  %v3949_v5 = vsel %vm14239_vm9, %v3917_v57, %v6095_v39  ;;  %v3950_v14 = vsel %vm14240_vm5, %v3918_v49, %v6096_v32  ;;  %vm14241_vm12 = vmmov %vm14232_vm2  ;;  %vm14245_vm4 = vnez %v14244_v13  ;;  %v6121_v40 = vunpack.i.h.bf16 %v6119_v4  ;;  %v14254_v57 = vld [vmem:[#allocation10_spill] sm:$0xff]  ;;  %v14256_v1 = vld [vmem:[#allocation36_spill] sm:$0xff] }
 0x2ec   : > { %4332 = vmatprep.mubr.bf16.mxu1 %v4019_v10  ;;  %6268 = vrot.lane.b32.xlu1 %v6267_v56, %s6413_s20  ;;  %v3981_v7 = vsel %vm14232_vm2, %v3949_v5, %v6050_v2  ;;  %v3982_v45 = vsel %vm14241_vm12, %v3950_v14, %v6051_v22  ;;  %v2778_v38 = vsel %vm14245_vm4, %v11047_v15, 0.0  ;;  %v6120_v32 = vunpack.i.l.bf16 %v6119_v4  ;;  %v14247_v10 = vld [vmem:[#allocation107_spill] sm:$0xff]  ;;  %v14257_v5 = vld [vmem:[#allocation98_spill] sm:$0xff]  ;;  %v6129_v56 = vpop.permute.xlu1 %6128 }
 0x2ed   : > { %v4022_v39 = vpack.c.bf16 %v3982_v45, %v3981_v7  ;;  %vm14248_vm13 = vnez %v14247_v10  ;;  %vm14250_vm9 = vnez %v14249_v24  ;;  %v14252_v25 = vpack.c.bf16 %v11262_v0, %v11259_v44 }
 0x2ee   : > { %vm14251_vm5 = vmand %vm14248_vm13, %vm14250_vm9  ;;  %vm14255_vm2 = vnez %v14254_v57  ;;  %vm14258_vm12 = vnez %v14257_v5  ;;  %vm14260_vm9 = vcmask 261120   ;;  %v6131_v7 = vunpack.i.h.bf16 %v6129_v56 }
 0x2ef   : > { %v2735_v49 = vsel %vm14251_vm5, %v14246_v35, 0.0  ;;  %v2777_v21 = vsel %vm14255_vm2, %v14253_v9, 0.0  ;;  %v2736_v14 = vsel %vm14258_vm12, %v14256_v1, 0.0  ;;  %v2873_v2 = vsel %vm14255_vm2, %v11194_v63, 0.0  ;;  %vm14259_vm13 = vmand %vm14245_vm4, %vm14127_vm15  ;;  %v6124_v63 = vpop.permute.xlu0 %6123 }
 0x2f0   : > { %6278 = vrot.lane.b32.xlu1 %v6277_v37, %s6412_s19  ;;  %v6287_v22 = vpack.i.bf16 %v2778_v38, %v2777_v21  ;;  %v2874_v44 = vsel %vm14259_vm13, %v11185_v46, 0.0  ;;  %v3824_v0 = vsel %vm14260_vm9, %v2736_v14, %v6056_v23  ;;  %vm14261_vm5 = vmmov %vm14260_vm9  ;;  %v6130_v45 = vunpack.i.l.bf16 %v6129_v56 }
 0x2f1   : > { %v3823_v4 = vsel %vm14261_vm5, %v2735_v49, %v6055_v6  ;;  %vm14262_vm12 = vcmask 523264   ;;  %v6297_v38 = vpack.i.bf16 %v2874_v44, %v2873_v2  ;;  %vm14264_vm2 = vcmask 785408   ;;  %vm14270_vm15 = vmmov %vm14261_vm5 }
 0x2f2   : > { %v3856_v43 = vsel %vm14262_vm12, %v3823_v4, %v6120_v32  ;;  %vm14263_vm11 = vmmov %vm14262_vm12  ;;  %v6116_v35 = vunpack.i.h.bf16 %v6114_v42  ;;  %v6115_v46 = vunpack.i.l.bf16 %v6114_v42  ;;  %v2905_v23 = vsel %vm14141_vm3, %v11206_v12, 0.0  ;;  %v14269_v42 = vld [vmem:[#allocation38_spill] sm:$0xff] }
 0x2f3   : > { %4333 = vmatmul.mubr.bf16.gmra.mxu1 %v14252_v25  ;;  %v3857_v37 = vsel %vm14263_vm11, %v3824_v0, %v6121_v40  ;;  %vm14265_vm14 = vmmov %vm14264_vm2  ;;  %v6134_v32 = vpop.permute.xlu0 %6133  ;;  %v14266_v40 = vpack.c.bf16 %v11449_v59, %v11446_v61  ;;  %v6307_v49 = vpack.i.bf16 %v11221_v36, %v2905_v23  ;;  %v14267_v25 = vld [vmem:[#allocation39_spill] sm:$0xff]  ;;  %v6126_v5 = vunpack.i.h.bf16 %v6124_v63 }
 0x2f4   : > { %4340 = vmatprep.mubr.bf16.mxu1 %v4022_v39  ;;  %6288 = vrot.lane.b32.xlu1 %v6287_v22, %s6411_s18  ;;  %v3889_v39 = vsel %vm14264_vm2, %v3856_v43, %v6130_v45  ;;  %v3890_v50 = vsel %vm14265_vm14, %v3857_v37, %v6131_v7  ;;  %v6136_v10 = vunpack.i.h.bf16 %v6134_v32  ;;  %v6135_v24 = vunpack.i.l.bf16 %v6134_v32  ;;  %vm14268_vm14 = vmmov %vm14261_vm5  ;;  %s4876_s18 = sshll.u32 %s6479_s28, 9  ;;  %s6415_s28 = smov [#allocation2]  }
 0x2f5   : > { %v4027_v6 = vpack.c.bf16 %v3890_v50, %v3889_v39  ;;  %v3920_v21 = vsel %vm14268_vm14, %v14267_v25, %v6116_v35  ;;  %v3919_v1 = vsel %vm14270_vm15, %v14269_v42, %v6115_v46  ;;  %v6125_v14 = vunpack.i.l.bf16 %v6124_v63  ;;  %vm14271_vm2 = vmmov %vm14263_vm11  ;;  %v14275_v50 = vld [vmem:[#allocation58_spill] sm:$0xff]  ;;  %s11986_s29 = scalar_lea.hbm %s12035_s7, %s4876_s18  ;;  %s6345_s13 = sshll.u32 %s6415_s28, 4  ;;  %s6346_s13 = int_to_ptr.vmem [resolvable:$false] %s6345_s13 }
 0x2f6   : > { %v3951_v56 = vsel %vm14263_vm11, %v3919_v1, %v6135_v24  ;;  %v3952_v22 = vsel %vm14271_vm2, %v3920_v21, %v6136_v10  ;;  %vm14272_vm13 = vcmask 785408   ;;  %v6111_v37 = vunpack.i.h.bf16 %v11525_v18  ;;  %vm14276_vm12 = vmmov %vm14261_vm5  ;;  %s6347_s14 = scalar_lea.vmem %s6346_s13, 1024  ;;  %p6348_p0 = scmp.lt.s32.totalorder %s11981_s23, %s6346_s13 }
 0x2f7   : > { %v6139_v61 = vpop.permute.xlu0 %6138  ;;  %v3983_v59 = vsel %vm14272_vm13, %v3951_v56, %v6125_v14  ;;  %vm14273_vm9 = vmmov %vm14272_vm13  ;;  %v6110_v63 = vunpack.i.l.bf16 %v11525_v18  ;;  %vm14298_vm4 = vcmask 785408   ;;  %p6349_p1 = scmp.lt.s32.totalorder %s6347_s14, %s6341_s9 }
 0x2f8   : > { %6298 = vrot.lane.b32.xlu1 %v6297_v38, %s6413_s20  ;;  %v3984_v2 = vsel %vm14273_vm9, %v3952_v22, %v6126_v5  ;;  %v6141_v0 = vunpack.i.h.bf16 %v6139_v61  ;;  %v6140_v4 = vunpack.i.l.bf16 %v6139_v61  ;;  %v14274_v38 = vld [vmem:[#allocation46_spill] sm:$0xff]  ;;  %vm14277_vm14 = vmmov %vm14271_vm2 }
 0x2f9   : > { %v4025_v44 = vpack.c.bf16 %v3984_v2, %v3983_v59  ;;  %vm14278_vm15 = vmmov %vm14271_vm2  ;;  %p6350_p2 = por %p6349_p1, %p6348_p0 }
 0x2fa   : > { %v3922_v39 = vsel %vm14261_vm5, %v14274_v38, %v6141_v0  ;;  %v3921_v35 = vsel %vm14276_vm12, %v14275_v50, %v6140_v4  ;;  %vm14279_vm11 = vmmov %vm14273_vm9 }
 0x2fb   : > { %4341 = vmatmul.mubr.bf16.gmra.mxu1 %v14266_v40  ;;  %v6144_v7 = vpop.permute.xlu0 %6143  ;;  %vm14280_vm2 = vmmov %vm14273_vm9  ;;  %p6351_p3 = pnand %p6350_p2, %p6344_p13 }
 0x2fc   : > { %6308 = vrot.lane.b32.xlu1 %v6307_v49, %s6412_s19  ;;  %4348 = vmatprep.mubr.bf16.mxu1 %v4025_v44  ;;  %v6146_v45 = vunpack.i.h.bf16 %v6144_v7  ;;  %v6145_v43 = vunpack.i.l.bf16 %v6144_v7  ;;  %vm14281_vm13 = vmmov %vm14261_vm5 }
 0x2fd   : > { %vm14282_vm9 = vmmov %vm14261_vm5 }
 0x2fe   : > { %v3953_v46 = vsel %vm14277_vm14, %v3921_v35, %v6145_v43  ;;  %v3954_v23 = vsel %vm14278_vm15, %v3922_v39, %v6146_v45  ;;  %vm14283_vm5 = vmmov %vm14277_vm14  ;;  %v14292_v39 = vld [vmem:[#allocation8_spill] sm:$0xff] }
 0x2ff   : > { %v3985_v32 = vsel %vm14279_vm11, %v3953_v46, %v6110_v63  ;;  %v3986_v40 = vsel %vm14280_vm2, %v3954_v23, %v6111_v37  ;;  %v6149_v8 = vpop.permute.xlu0 %6148  ;;  %vm14284_vm12 = vmmov %vm14283_vm5  ;;  %v14287_v37 = vld [vmem:[#allocation6_spill] sm:$0xff] }
 0x300   : > { %v4028_v20 = vpack.c.bf16 %v3986_v40, %v3985_v32  ;;  %v6151_v18 = vunpack.i.h.bf16 %v6149_v8  ;;  %v6150_v10 = vunpack.i.l.bf16 %v6149_v8  ;;  %vm14285_vm14 = vmmov %vm14280_vm2  ;;  %vm14288_vm11 = vnez %v14287_v37  ;;  %v14289_v63 = vld [vmem:[#allocation18_spill] sm:$0xff]  ;;  %v14308_v37 = vld [vmem:[#allocation108_spill] sm:$0xff] }
 0x301   : > { %vm14286_vm15 = vmmov %vm14280_vm2  ;;  %vm14290_vm2 = vnez %v14289_v63  ;;  %v14312_v63 = vld [vmem:[#allocation43_spill] sm:$0xff] }
 0x302   : > { %v3924_v21 = vsel %vm14281_vm13, %v10547_v31, %v6151_v18  ;;  %v3923_v42 = vsel %vm14282_vm9, %v14116_v33, %v6150_v10  ;;  %vm14291_vm13 = vmand %vm14288_vm11, %vm14290_vm2  ;;  %vm14293_vm9 = vnez %v14292_v39 }
 0x303   : > { %4349 = vmatmul.mubr.bf16.gmra.mxu1 %v4024_v58  ;;  %v6174_v58 = vpop.permute.xlu0 %6173  ;;  %v2715_v38 = vsel %vm14291_vm13, %v11206_v12, 0.0  ;;  %v2716_v50 = vsel %vm14293_vm9, %v11221_v36, 0.0  ;;  %vm14299_vm11 = vmmov %vm14298_vm4  ;;  %v6333_v36 = vld [vmem:[%s12031_s3 + $0x80] sm:$0xff]  }
 0x304   : > { %4356 = vmatprep.mubr.bf16.mxu1 %v4028_v20  ;;  %v6176_v24 = vunpack.i.h.bf16 %v6174_v58  ;;  %v6175_v49 = vunpack.i.l.bf16 %v6174_v58 }
 0x306   : > { %v3955_v14 = vsel %vm14283_vm5, %v3923_v42, %v6175_v49  ;;  %v3956_v56 = vsel %vm14284_vm12, %v3924_v21, %v6176_v24  ;;  %vm14294_vm5 = vcmask 261120   ;;  %v14300_v42 = vld [vmem:[#allocation117_spill] sm:$0xff] }
 0x307   : > { %v6184_v25 = vpop.permute.xlu0 %6183  ;;  %vm14295_vm12 = vmmov %vm14294_vm5 }
 0x308   : > { %v6186_v1 = vunpack.i.h.bf16 %v6184_v25  ;;  %v6185_v5 = vunpack.i.l.bf16 %v6184_v25  ;;  %vm14302_vm2 = vmmov %vm14294_vm5 }
 0x309   : > { %vm14304_vm13 = vmmov %vm14302_vm2 }
 0x30a   : > { %v3988_v22 = vsel %vm14286_vm15, %v3956_v56, %v6186_v1  ;;  %v14301_v1 = vld [vmem:[#allocation19_spill] sm:$0xff] }
 0x30b   : > { %4357 = vmatmul.mubr.bf16.gmra.mxu1 %v4027_v6  ;;  %v3987_v6 = vsel %vm14285_vm14, %v3955_v14, %v6185_v5  ;;  %v6194_v59 = vpop.permute.xlu0 %6193  ;;  %vm14296_vm14 = vcmask 523264  }
 0x30c   : > { %v4031_v61 = vpack.c.bf16 %v3988_v22, %v3987_v6  ;;  %vm14297_vm15 = vmmov %vm14296_vm14  ;;  %v6196_v49 = vunpack.i.h.bf16 %v6194_v59  ;;  %v6195_v25 = vunpack.i.l.bf16 %v6194_v59 }
 0x30d   : > { %vm14305_vm9 = vmmov %vm14296_vm14 }
 0x30e   : > { %4364 = vmatprep.mubr.bf16.mxu1 %v4031_v61 }
 0x30f   : > { %v6204_v2 = vpop.permute.xlu0 %6203 }
 0x310   : > { %v6206_v5 = vunpack.i.h.bf16 %v6204_v2  ;;  %v6205_v14 = vunpack.i.l.bf16 %v6204_v2  ;;  %v14307_v2 = vld [vmem:[#allocation40_spill] sm:$0xff] }
 0x313   : > { %v6214_v44 = vpop.permute.xlu0 %6213 }
 0x314   : > { %v6216_v61 = vunpack.i.h.bf16 %v6214_v44 }
 0x319   : > { %v6154_v0 = vpop.permute.xlu1 %6153 }
 0x31a   : > { %v6156_v33 = vunpack.i.h.bf16 %v6154_v0  ;;  %v6155_v7 = vunpack.i.l.bf16 %v6154_v0  ;;  %v6215_v0 = vunpack.i.l.bf16 %v6214_v44 }
 0x31b   : > { %v11608_v31 = vpop.permute.xlu0 %6223 }
 0x31c   : > { %v3804_v46 = vsel %vm14294_vm5, %v2716_v50, %v6156_v33  ;;  %v3803_v23 = vsel %vm14295_vm12, %v2715_v38, %v6155_v7  ;;  %v3925_v7 = vsel %vm14304_vm13, %v14159_v29, %v6195_v25  ;;  %vm14306_vm5 = vmmov %vm14305_vm9  ;;  %vm14309_vm12 = vnez %v14308_v37  ;;  %v14313_v38 = vld [vmem:[#allocation106_spill] sm:$0xff] }
 0x31d   : > { %vm14316_vm13 = vmmov %vm14306_vm5  ;;  %v6226_v25 = vunpack.i.h.bf16 %v11608_v31 }
 0x31f   : > { %v6159_v4 = vpop.permute.xlu1 %6158 }
 0x320   : > { %v6161_v45 = vunpack.i.h.bf16 %v6159_v4  ;;  %v6160_v43 = vunpack.i.l.bf16 %v6159_v4 }
 0x322   : > { %v3836_v8 = vsel %vm14296_vm14, %v3803_v23, %v6160_v43  ;;  %v3837_v58 = vsel %vm14297_vm15, %v3804_v46, %v6161_v45  ;;  %v3957_v45 = vsel %vm14305_vm9, %v3925_v7, %v6205_v14  ;;  %vm14310_vm14 = vnez %v13948_v51  ;;  %vm14317_vm9 = vmmov %vm14306_vm5  ;;  %v14318_v51 = vld [vmem:[#allocation12_spill] sm:$0xff] }
 0x323   : > { %v11621_v32 = vpop.permute.xlu0 %6233  ;;  %vm14311_vm15 = vmand %vm14309_vm12, %vm14310_vm14  ;;  %vm14320_vm12 = vcmask 785408  }
 0x324   : > { %v2737_v44 = vsel %vm14311_vm15, %v14307_v2, 0.0  ;;  %vm14321_vm14 = vmmov %vm14320_vm12  ;;  %v6235_v14 = vunpack.i.l.bf16 %v11621_v32 }
 0x325   : > { %vm14323_vm15 = vmmov %vm14302_vm2 }
 0x326   : > { %v6164_v35 = vpop.permute.xlu1 %6163 }
 0x327   : > { %v6166_v40 = vunpack.i.h.bf16 %v6164_v35  ;;  %v6165_v20 = vunpack.i.l.bf16 %v6164_v35  ;;  %v11630_v21 = vpop.permute.xlu0 %6243 }
 0x329   : > { %v3870_v18 = vsel %vm14298_vm4, %v3837_v58, %v6166_v40  ;;  %v3869_v12 = vsel %vm14299_vm11, %v3836_v8, %v6165_v20  ;;  %vm14303_vm4 = vmmov %vm14302_vm2  ;;  %vm14314_vm11 = vnez %v14313_v38  ;;  %v3989_v8 = vsel %vm14320_vm12, %v3957_v45, %v6215_v0  ;;  %v14329_v45 = vld [vmem:[#allocation28_spill] sm:$0xff] }
 0x32a   : > { %v3997_v10 = vpack.c.bf16 %v3870_v18, %v3869_v12  ;;  %v6169_v24 = vpop.permute.xlu1 %6168  ;;  %v3926_v59 = vsel %vm14303_vm4, %v14168_v28, %v6196_v49  ;;  %v2738_v39 = vsel %vm14314_vm11, %v14312_v63, 0.0  ;;  %vm14315_vm4 = vmmov %vm14302_vm2  ;;  %v14322_v18 = vld [vmem:[#allocation93_spill] sm:$0xff]  ;;  %v6245_v0 = vunpack.i.l.bf16 %v11630_v21 }
 0x32b   : > { %v6171_v6 = vunpack.i.h.bf16 %v6169_v24  ;;  %v6170_v22 = vunpack.i.l.bf16 %v6169_v24  ;;  %v3958_v43 = vsel %vm14306_vm5, %v3926_v59, %v6206_v5  ;;  %vm14319_vm5 = vmmov %vm14302_vm2  ;;  %v6236_v5 = vunpack.i.h.bf16 %v11621_v32  ;;  %v14326_v59 = vld [vmem:[#allocation102_spill] sm:$0xff] }
 0x32c   : > { %4277 = vmatmul.mubr.bf16.vlgmr.msra.gmra.mxu0 %v3997_v10  ;;  %v3990_v58 = vsel %vm14321_vm14, %v3958_v43, %v6216_v61  ;;  %vm14324_vm11 = vmmov %vm14320_vm12  ;;  %v6246_v61 = vunpack.i.h.bf16 %v11630_v21  ;;  %vm14331_vm12 = vcmask 523264  }
 0x32d   : > { %5080 = vmatpush3.bf16.msra.mxu0 %v14300_v42  ;;  %5083 = vmatprep.mubr.msk.bf16.mxu0 %vm14302_vm2, %v14301_v1  ;;  %v3826_v50 = vsel %vm14302_vm2, %v2738_v39, %v6171_v6  ;;  %v3825_v29 = vsel %vm14315_vm4, %v2737_v44, %v6170_v22  ;;  %v11652_v35 = vpop.permute.xlu0 %6253  ;;  %vm14325_vm2 = vmmov %vm14324_vm11  ;;  %v4034_v49 = vpack.c.bf16 %v3990_v58, %v3989_v8  ;;  %v6225_v42 = vunpack.i.l.bf16 %v11608_v31 }
 0x32e   : > { %v6179_v56 = vpop.permute.xlu1 %6178  ;;  %5081 = vmatprep.subr.bf16.mxu0 %v6333_v36  ;;  %vm14332_vm14 = vmmov %vm14331_vm12 }
 0x32f   : > { %v6181_v4 = vunpack.i.h.bf16 %v6179_v56  ;;  %v6180_v33 = vunpack.i.l.bf16 %v6179_v56 }
 0x331   : > { %5082 = vmatpush3.bf16.msra.mxu0 %v6333_v36  ;;  %v3858_v40 = vsel %vm14316_vm13, %v3825_v29, %v6180_v33  ;;  %v3859_v20 = vsel %vm14317_vm9, %v3826_v50, %v6181_v4  ;;  %vm14327_vm13 = vmmov %vm14315_vm4 }
 0x332   : > { %v3928_v31 = vsel %vm14327_vm13, %v14214_v54, %v6226_v25  ;;  %vm14328_vm9 = vmmov %vm14315_vm4  ;;  %v2740_v54 = vsel %vm14021_vm6, %v14120_v52, 0.0 }
 0x333   : > { %v6264_v1 = vpop.permute.xlu0 %6263  ;;  %v3927_v7 = vsel %vm14328_vm9, %v14228_v53, %v6225_v42  ;;  %v3960_v43 = vsel %vm14332_vm14, %v3928_v31, %v6236_v5  ;;  %vm14338_vm9 = vcmask 785408  }
 0x334   : > { %5084 = vmatmul.mubr.msk.bf16.vlgmr.msra.gmra.mxu0 %vm14319_vm5, %v14318_v51  ;;  %vm14330_vm5 = vmmov %vm14315_vm4  ;;  %v3959_v32 = vsel %vm14331_vm12, %v3927_v7, %v6235_v14  ;;  %v14344_v51 = vld [vmem:[#allocation30_spill] sm:$0xff]  ;;  %v6266_v8 = vunpack.i.h.bf16 %v6264_v1  ;;  %v6265_v58 = vunpack.i.l.bf16 %v6264_v1 }
 0x335   : > { %v6189_v28 = vpop.permute.xlu1 %6188  ;;  %5087 = vmatprep.mubr.msk.bf16.mxu0 %vm14323_vm15, %v14322_v18  ;;  %vm14333_vm15 = vmand %vm14118_vm7, %vm14165_vm1  ;;  %v3991_v62 = vsel %vm14338_vm9, %v3959_v32, %v6245_v0 }
 0x336   : > { %v6191_v46 = vunpack.i.h.bf16 %v6189_v28  ;;  %v6190_v23 = vunpack.i.l.bf16 %v6189_v28  ;;  %v2739_v21 = vsel %vm14333_vm15, %v10685_v41, 0.0  ;;  %vm14339_vm7 = vmmov %vm14338_vm9 }
 0x337   : > { %v6274_v53 = vpop.permute.xlu0 %6273  ;;  %v3992_v41 = vsel %vm14339_vm7, %v3960_v43, %v6246_v61  ;;  %vm14340_vm1 = vmmov %vm14339_vm7 }
 0x338   : > { %v3891_v12 = vsel %vm14324_vm11, %v3858_v40, %v6190_v23  ;;  %v3892_v10 = vsel %vm14325_vm2, %v3859_v20, %v6191_v46  ;;  %vm14334_vm11 = vmmov %vm14315_vm4  ;;  %v4037_v29 = vpack.c.bf16 %v3992_v41, %v3991_v62  ;;  %v14342_v46 = vld [vmem:[#allocation24_spill] sm:$0xff]  ;;  %v6256_v23 = vunpack.i.h.bf16 %v11652_v35 }
 0x339   : > { %v4030_v36 = vpack.c.bf16 %v3892_v10, %v3891_v12  ;;  %vm14335_vm2 = vmmov %vm14315_vm4  ;;  %v6255_v40 = vunpack.i.l.bf16 %v11652_v35 }
 0x33a   : > { %v6199_v24 = vpop.permute.xlu1 %6198  ;;  %vm14343_vm6 = vmmov %vm14335_vm2 }
 0x33b   : > { %4365 = vmatmul.mubr.bf16.gmra.mxu1 %v4030_v36  ;;  %v6201_v6 = vunpack.i.h.bf16 %v6199_v24  ;;  %v6200_v22 = vunpack.i.l.bf16 %v6199_v24  ;;  %v6276_v24 = vunpack.i.h.bf16 %v6274_v53  ;;  %v6275_v36 = vunpack.i.l.bf16 %v6274_v53  ;;  %vm14346_vm14 = vmmov %vm14335_vm2 }
 0x33c   : > { %4372 = vmatprep.mubr.bf16.mxu1 %v4034_v49  ;;  %5088 = vmatmul.mubr.msk.bf16.gmra.mxu0 %vm14315_vm4, %v14326_v59  ;;  %vm14336_vm4 = vmmov %vm14331_vm12  ;;  %v6284_v20 = vpop.permute.xlu0 %6283  ;;  %v3930_v42 = vsel %vm14346_vm14, %v11047_v15, %v6256_v23  ;;  %v14357_v59 = vld [vmem:[#allocation32_spill] sm:$0xff] }
 0x33d   : > { %5091 = vmatprep.mubr.msk.bf16.mxu0 %vm14330_vm5, %v14329_v45  ;;  %v3828_v37 = vsel %vm14334_vm11, %v2740_v54, %v6201_v6  ;;  %v3827_v44 = vsel %vm14335_vm2, %v2739_v21, %v6200_v22  ;;  %vm14337_vm13 = vmmov %vm14336_vm4  ;;  %v6286_v21 = vunpack.i.h.bf16 %v6284_v20  ;;  %v6285_v54 = vunpack.i.l.bf16 %v6284_v20 }
 0x33e   : > { %vm14341_vm5 = vmmov %vm14340_vm1 }
 0x33f   : > { %vm14345_vm12 = vmmov %vm14335_vm2 }
 0x340   : > { %v6209_v56 = vpop.permute.xlu1 %6208  ;;  %vm14347_vm15 = vmmov %vm14335_vm2 }
 0x341   : > { %v6211_v4 = vunpack.i.h.bf16 %v6209_v56  ;;  %v6210_v33 = vunpack.i.l.bf16 %v6209_v56  ;;  %v3929_v35 = vsel %vm14347_vm15, %v14253_v9, %v6255_v40  ;;  %vm14348_vm11 = vmmov %vm14336_vm4  ;;  %v14351_v56 = vld [vmem:[#allocation22_spill] sm:$0xff] }
 0x342   : > { %v3961_v5 = vsel %vm14348_vm11, %v3929_v35, %v6265_v58  ;;  %vm14349_vm2 = vmmov %vm14336_vm4  ;;  %v6294_v15 = vpop.permute.xlu0 %6293 }
 0x343   : > { %v3860_v39 = vsel %vm14336_vm4, %v3827_v44, %v6210_v33  ;;  %v3861_v60 = vsel %vm14337_vm13, %v3828_v37, %v6211_v4  ;;  %v3962_v14 = vsel %vm14349_vm2, %v3930_v42, %v6266_v8  ;;  %vm14350_vm4 = vmand %vm14161_vm0, %vm14183_vm10  ;;  %vm14352_vm13 = vnez %v14351_v56 }
 0x344   : > { %5092 = vmatmul.mubr.msk.bf16.gmra.mxu0 %vm14343_vm6, %v14342_v46  ;;  %v2741_v1 = vsel %vm14350_vm4, %v14163_v16, 0.0  ;;  %v2742_v6 = vsel %vm14352_vm13, %v14167_v17, 0.0  ;;  %vm14353_vm9 = vmmov %vm14343_vm6  ;;  %vm14358_vm0 = vcmask 785408   ;;  %v14360_v17 = vld [vmem:[#allocation71_spill] sm:$0xff]  ;;  %v6296_v53 = vunpack.i.h.bf16 %v6294_v15  ;;  %v14370_v46 = vld [vmem:[#allocation70_spill] sm:$0xff] }
 0x345   : > { %v6219_v2 = vpop.permute.xlu1 %6218  ;;  %5095 = vmatprep.mubr.msk.bf16.mxu0 %vm14345_vm12, %v14344_v51  ;;  %vm14354_vm7 = vmmov %vm14343_vm6  ;;  %v3993_v16 = vsel %vm14358_vm0, %v3961_v5, %v6275_v36  ;;  %v6295_v37 = vunpack.i.l.bf16 %v6294_v15  ;;  %v14376_v51 = vld [vmem:[#allocation44_spill] sm:$0xff]  ;;  %v14385_v5 = vld [vmem:[#allocation110_spill] sm:$0xff] }
 0x346   : > { %v6221_v63 = vunpack.i.h.bf16 %v6219_v2  ;;  %v6220_v38 = vunpack.i.l.bf16 %v6219_v2  ;;  %vm14359_vm10 = vmmov %vm14358_vm0  ;;  %v6304_v2 = vpop.permute.xlu0 %6303 }
 0x347   : > { %v3994_v55 = vsel %vm14359_vm10, %v3962_v14, %v6276_v24  ;;  %vm14361_vm12 = vmmov %vm14343_vm6  ;;  %v14387_v14 = vld [vmem:[#allocation114_spill] sm:$0xff] }
 0x348   : > { %v3893_v28 = vsel %vm14340_vm1, %v3860_v39, %v6220_v38  ;;  %v3894_v47 = vsel %vm14341_vm5, %v3861_v60, %v6221_v63  ;;  %vm14355_vm1 = vmmov %vm14349_vm2  ;;  %v4040_v43 = vpack.c.bf16 %v3994_v55, %v3993_v16  ;;  %v6306_v39 = vunpack.i.h.bf16 %v6304_v2 }
 0x349   : > { %v6229_v52 = vpop.permute.xlu1 %6228  ;;  %v4033_v50 = vpack.c.bf16 %v3894_v47, %v3893_v28  ;;  %vm14356_vm5 = vmmov %vm14355_vm1  ;;  %v6305_v60 = vunpack.i.l.bf16 %v6304_v2  ;;  %v14364_v28 = vld [vmem:[#allocation72_spill] sm:$0xff]  ;;  %v14366_v47 = vld [vmem:[#allocation95_spill] sm:$0xff] }
 0x34a   : > { %v6231_v12 = vunpack.i.h.bf16 %v6229_v52  ;;  %v6230_v10 = vunpack.i.l.bf16 %v6229_v52  ;;  %vm14362_vm14 = vmmov %vm14358_vm0 }
 0x34b   : > { %4373 = vmatmul.mubr.bf16.gmra.mxu1 %v4033_v50  ;;  %vm14363_vm15 = vmmov %vm14358_vm0  ;;  %v14368_v50 = vld [vmem:[#allocation66_spill] sm:$0xff] }
 0x34c   : > { %4380 = vmatprep.mubr.bf16.mxu1 %v4037_v29  ;;  %v3830_v61 = vsel %vm14353_vm9, %v2742_v6, %v6231_v12  ;;  %v3829_v9 = vsel %vm14354_vm7, %v2741_v1, %v6230_v10  ;;  %5096 = vmatmul.mubr.msk.bf16.gmra.mxu0 %vm14343_vm6, %v14357_v59  ;;  %vm14365_vm11 = vmmov %vm14343_vm6 }
 0x34d   : > { %v6239_v18 = vpop.permute.xlu1 %6238  ;;  %5099 = vmatprep.mubr.msk.bf16.mxu0 %vm14361_vm12, %v14360_v17  ;;  %vm14367_vm2 = vmmov %vm14343_vm6  ;;  %vm14377_vm6 = vnez %v14215_v27  ;;  %v14402_v17 = vld [vmem:[#allocation53_spill] sm:$0xff] }
 0x34e   : > { %v6241_v49 = vunpack.i.h.bf16 %v6239_v18  ;;  %v6240_v25 = vunpack.i.l.bf16 %v6239_v18  ;;  %v3932_v52 = vsel %vm14367_vm2, %v14366_v47, %v6286_v21  ;;  %vm14369_vm4 = vmmov %vm14367_vm2  ;;  %v2744_v8 = vsel %vm14377_vm6, %v14376_v51, 0.0 }
 0x34f   : > { %v3931_v29 = vsel %vm14369_vm4, %v14368_v50, %v6285_v54  ;;  %vm14371_vm13 = vmmov %vm14367_vm2 }
 0x350   : > { %v3862_v33 = vsel %vm14355_vm1, %v3829_v9, %v6240_v25  ;;  %v3863_v19 = vsel %vm14356_vm5, %v3830_v61, %v6241_v49  ;;  %vm14372_vm9 = vmmov %vm14355_vm1 }
 0x351   : > { %v3964_v23 = vsel %vm14372_vm9, %v3932_v52, %v6296_v53  ;;  %vm14373_vm7 = vmmov %vm14355_vm1  ;;  %vm14374_vm1 = vnez %v14097_v48  ;;  %vm14389_vm9 = vnez %v14254_v57  ;;  %v14396_v57 = vld [vmem:[#allocation105_spill] sm:$0xff] }
 0x352   : > { %v6249_v22 = vpop.permute.xlu1 %6248  ;;  %v3963_v40 = vsel %vm14373_vm7, %v3931_v29, %v6295_v37  ;;  %vm14375_vm5 = vmand %vm14230_vm8, %vm14374_vm1  ;;  %vm14391_vm1 = vnez %v14244_v13 }
 0x353   : > { %v6251_v0 = vunpack.i.h.bf16 %v6249_v22  ;;  %v6250_v4 = vunpack.i.l.bf16 %v6249_v22  ;;  %v2743_v20 = vsel %vm14375_vm5, %v14181_v26, 0.0  ;;  %vm14378_vm0 = vmmov %vm14367_vm2  ;;  %v3995_v11 = vsel %vm14363_vm15, %v3963_v40, %v6305_v60 }
 0x354   : > { %5100 = vmatmul.mubr.msk.bf16.gmra.mxu0 %vm14365_vm11, %v14364_v28  ;;  %vm14379_vm10 = vmmov %vm14378_vm0  ;;  %v2746_v9 = vsel %vm14391_vm1, %v14243_v3, 0.0 }
 0x355   : > { %v3895_v31 = vsel %vm14362_vm14, %v3862_v33, %v6250_v4  ;;  %v3896_v7 = vsel %vm14363_vm15, %v3863_v19, %v6251_v0  ;;  %5103 = vmatprep.mubr.msk.bf16.mxu0 %vm14371_vm13, %v14370_v46  ;;  %vm14380_vm12 = vmmov %vm14373_vm7 }
 0x356   : > { %v4036_v32 = vpack.c.bf16 %v3896_v7, %v3895_v31  ;;  %vm14381_vm14 = vmmov %vm14373_vm7 }
 0x357   : > { %vm14382_vm11 = vmmov %vm14363_vm15 }
 0x358   : > { %4381 = vmatmul.mubr.bf16.gmra.mxu1 %v4036_v32  ;;  %v3996_v48 = vsel %vm14382_vm11, %v3964_v23, %v6306_v39  ;;  %vm14383_vm8 = vmmov %vm14382_vm11 }
 0x359   : > { %4388 = vmatprep.mubr.bf16.mxu1 %v4040_v43  ;;  %vm14384_vm2 = vmmov %vm14383_vm8  ;;  %v4043_v35 = vpack.c.bf16 %v3996_v48, %v3995_v11 }
 0x35a   : > { %v6259_v45 = vpop.permute.xlu1 %6258  ;;  %vm14386_vm4 = vmmov %vm14378_vm0 }
 0x35b   : > { %v6261_v63 = vunpack.i.h.bf16 %v6259_v45  ;;  %v6260_v38 = vunpack.i.l.bf16 %v6259_v45  ;;  %vm14388_vm13 = vmmov %vm14378_vm0 }
 0x35c   : > { %5104 = vmatmul.mubr.msk.bf16.gmra.mxu0 %vm14386_vm4, %v14385_v5  ;;  %vm14390_vm7 = vmand %vm14389_vm9, %vm14141_vm3 }
 0x35d   : > { %v3832_v18 = vsel %vm14378_vm0, %v2744_v8, %v6261_v63  ;;  %v3831_v12 = vsel %vm14379_vm10, %v2743_v20, %v6260_v38  ;;  %5107 = vmatprep.mubr.msk.bf16.mxu0 %vm14388_vm13, %v14387_v14  ;;  %v2745_v61 = vsel %vm14390_vm7, %v14242_v34, 0.0  ;;  %vm14392_vm5 = vmmov %vm14378_vm0 }
 0x35e   : > { %v6269_v44 = vpop.permute.xlu1 %6268  ;;  %vm14393_vm6 = vmmov %vm14378_vm0 }
 0x35f   : > { %v6271_v62 = vunpack.i.h.bf16 %v6269_v44  ;;  %v6270_v41 = vunpack.i.l.bf16 %v6269_v44  ;;  %vm14394_vm0 = vmmov %vm14380_vm12 }
 0x360   : > { %vm14395_vm10 = vmmov %vm14394_vm0 }
 0x361   : > { %v3864_v36 = vsel %vm14380_vm12, %v3831_v12, %v6270_v41  ;;  %v3865_v49 = vsel %vm14381_vm14, %v3832_v18, %v6271_v62  ;;  %vm14397_vm12 = vmmov %vm14386_vm4 }
 0x362   : > { %v6279_v58 = vpop.permute.xlu1 %6278  ;;  %vm14399_vm3 = vmmov %vm14386_vm4 }
 0x363   : > { %v6281_v10 = vunpack.i.h.bf16 %v6279_v58  ;;  %v6280_v24 = vunpack.i.l.bf16 %v6279_v58  ;;  %vm14400_vm14 = vmmov %vm14384_vm2 }
 0x364   : > { %5108 = vmatmul.mubr.msk.bf16.gmra.mxu0 %vm14397_vm12, %v14396_v57  ;;  %vm14401_vm15 = vmmov %vm14384_vm2 }
 0x365   : > { %v3897_v26 = vsel %vm14383_vm8, %v3864_v36, %v6280_v24  ;;  %v3898_v27 = vsel %vm14384_vm2, %v3865_v49, %v6281_v10  ;;  %5111 = vmatprep.mubr.msk.bf16.mxu0 %vm14399_vm3, %v14398_v30  ;;  %vm14403_vm11 = vmmov %vm14399_vm3 }
 0x366   : > { %v6289_v25 = vpop.permute.xlu1 %6288  ;;  %v4039_v42 = vpack.c.bf16 %v3898_v27, %v3897_v26  ;;  %vm14404_vm8 = vmmov %vm14399_vm3 }
 0x367   : > { %v6291_v56 = vunpack.i.h.bf16 %v6289_v25  ;;  %v6290_v6 = vunpack.i.l.bf16 %v6289_v25  ;;  %vm14405_vm2 = vmmov %vm14399_vm3 }
 0x368   : > { %4389 = vmatmul.mubr.bf16.gmra.mxu1 %v4039_v42  ;;  %vm14406_vm4 = vmmov %vm14405_vm2 }
 0x369   : > { %4396 = vmatprep.mubr.bf16.mxu1 %v4043_v35  ;;  %v3834_v4 = vsel %vm14392_vm5, %v2746_v9, %v6291_v56  ;;  %v3833_v33 = vsel %vm14393_vm6, %v2745_v61, %v6290_v6  ;;  %vm14407_vm13 = vmmov %vm14405_vm2 }
 0x36a   : > { %v6299_v1 = vpop.permute.xlu1 %6298  ;;  %vm14408_vm9 = vmmov %vm14405_vm2 }
 0x36b   : > { %v6301_v22 = vunpack.i.h.bf16 %v6299_v1  ;;  %v6300_v15 = vunpack.i.l.bf16 %v6299_v1  ;;  %vm14409_vm7 = vmmov %vm14405_vm2 }
 0x36c   : > { %5112 = vmatmul.mubr.msk.bf16.gmra.mxu0 %vm14403_vm11, %v14402_v17  ;;  %vm14410_vm1 = vmmov %vm14405_vm2 }
 0x36d   : > { %v3866_v16 = vsel %vm14394_vm0, %v3833_v33, %v6300_v15  ;;  %v3867_v55 = vsel %vm14395_vm10, %v3834_v4, %v6301_v22  ;;  %vm14411_vm5 = vmmov %vm14410_vm1 }
 0x36e   : > { %v6309_v0 = vpop.permute.xlu1 %6308  ;;  %vm14412_vm6 = vmmov %vm14410_vm1 }
 0x36f   : > { %v6311_v19 = vunpack.i.h.bf16 %v6309_v0  ;;  %v6310_v59 = vunpack.i.l.bf16 %v6309_v0  ;;  %vm14413_vm0 = vmmov %vm14410_vm1 }
 0x370   : > { %vm14414_vm10 = vmmov %vm14413_vm0 }
 0x371   : > { %v3899_v34 = vsel %vm14400_vm14, %v3866_v16, %v6310_v59  ;;  %v3900_v3 = vsel %vm14401_vm15, %v3867_v55, %v6311_v19  ;;  %vm14415_vm12 = vmmov %vm14413_vm0 }
 0x372   : > { %v4042_v13 = vpack.c.bf16 %v3900_v3, %v3899_v34  ;;  %vm14416_vm3 = vmmov %vm14413_vm0 }
 0x373   : > { %vm14417_vm14 = vmmov %vm14413_vm0 }
 0x374   : > { %4397 = vmatmul.mubr.bf16.gmra.mxu1 %v4042_v13  ;;  %vm14418_vm15 = vmmov %vm14413_vm0 }
 0x375   : > { %vm14419_vm11 = vmmov %vm14413_vm0 }
 0x377   : > { %v4917_v31 = vpop.f32.mrf.mxu1 }
 0x379   : > { %v4918_v7 = vpop.f32.mrf.mxu1 }
 0x37a   : > { %v11782_v45 = vadd.f32 %v4918_v7, %v4917_v31  ;;  %v11825_v31 = vld [vmem:[%s12032_s4] ss:$0 sm:$0xff] }
 0x37b   : > { %v4920_v32 = vpop.f32.mrf.mxu1 }
 0x37d   : > { %v4921_v43 = vpop.f32.mrf.mxu1 }
 0x37e   : > { %v11784_v21 = vadd.f32 %v4921_v43, %v4920_v32  ;;  %v11830_v32 = vld [vmem:[%s12033_s5] sm:$0xff]  }
 0x37f   : > { %5041 = vmatprep.mubr.msk.bf16.mxu0 %vm14404_vm8, %v11830_v32  ;;  %vm14420_vm8 = vmmov %vm14413_vm0 }
 0x386   : > { %v4923_v54 = vpop.f32.mrf.mxu1 }
 0x388   : > { %v4924_v2 = vpop.f32.mrf.mxu1 }
 0x389   : > { %v11786_v53 = vadd.f32 %v4924_v2, %v4923_v54  ;;  %v4287_v54 = vadd.f32 %v11782_v45, %v11825_v31  ;;  %v4616_v45 = vld [vmem:[%s12034_s6] sm:$0xff] }
 0x38a   : > { %v4926_v37 = vpop.f32.mrf.mxu1 }
 0x38c   : > { %v4927_v44 = vpop.f32.mrf.mxu1 }
 0x38d   : > { %v11788_v63 = vadd.f32 %v4927_v44, %v4926_v37 }
 0x38e   : > { %v4929_v38 = vpop.f32.mrf.mxu1 }
 0x390   : > { %v4930_v39 = vpop.f32.mrf.mxu1 }
 0x391   : > { %v11790_v60 = vadd.f32 %v4930_v39, %v4929_v38 }
 0x392   : > { %v4932_v62 = vpop.f32.mrf.mxu1 }
 0x394   : > { %v4933_v41 = vpop.f32.mrf.mxu1 }
 0x395   : > { %v11792_v28 = vadd.f32 %v4933_v41, %v4932_v62  ;;  %v4290_v62 = vadd.f32 %v11784_v21, %v11825_v31 }
 0x397   : > { %v4935_v47 = vpop.f32.mrf.mxu1 }
 0x399   : > { %v4936_v52 = vpop.f32.mrf.mxu1 }
 0x39a   : > { %v11794_v50 = vadd.f32 %v4936_v52, %v4935_v47 }
 0x39b   : > { %v4938_v29 = vpop.f32.mrf.mxu1 }
 0x39d   : > { %v4939_v46 = vpop.f32.mrf.mxu1 }
 0x39e   : > { %v11796_v23 = vadd.f32 %v4939_v46, %v4938_v29  ;;  %v4617_v46 = vld [vmem:[%s12034_s6 + $0x8] sm:$0xff] }
 0x3a3   : > { %v4941_v40 = vpop.f32.mrf.mxu1 }
 0x3a5   : > { %v4942_v20 = vpop.f32.mrf.mxu1 }
 0x3a6   : > { %v11798_v51 = vadd.f32 %v4942_v20, %v4941_v40 }
 0x3a7   : > { %v4944_v8 = vpop.f32.mrf.mxu1 }
 0x3a9   : > { %v4945_v58 = vpop.f32.mrf.mxu1 }
 0x3aa   : > { %v11800_v18 = vadd.f32 %v4945_v58, %v4944_v8  ;;  %v6414_v8 = vmov 0  }
 0x3ab   : > { %v4947_v12 = vpop.f32.mrf.mxu1  ;;  %6312 = vset.pattern.permute.xlu0 %v6414_v8  ;;  %6313 = vset.pattern.permute.xlu1 %v6414_v8 }
 0x3ac   : > { %4620 = vperm.xlu0 %6312, %v4616_v45   ;;  %4625 = vperm.xlu1 %6313, %v4617_v46  }
 0x3ad   : > { %v4948_v10 = vpop.f32.mrf.mxu1 }
 0x3ae   : > { %v11802_v24 = vadd.f32 %v4948_v10, %v4947_v12  ;;  %v4303_v10 = vadd.f32 %v11790_v60, %v11825_v31  ;;  %v4306_v60 = vadd.f32 %v11792_v28, %v11825_v31 }
 0x3af   : > { %v4950_v36 = vpop.f32.mrf.mxu1 }
 0x3b1   : > { %v4951_v49 = vpop.f32.mrf.mxu1 }
 0x3b2   : > { %v11804_v11 = vadd.f32 %v4951_v49, %v4950_v36  ;;  %v4295_v49 = vadd.f32 %v11786_v53, %v11825_v31 }
 0x3b3   : > { %v4953_v48 = vpop.f32.mrf.mxu1 }
 0x3b5   : > { %v4954_v26 = vpop.f32.mrf.mxu1 }
 0x3b6   : > { %v11806_v27 = vadd.f32 %v4954_v26, %v4953_v48 }
 0x3b7   : > { %v4956_v25 = vpop.f32.mrf.mxu1 }
 0x3b9   : > { %v4957_v42 = vpop.f32.mrf.mxu1 }
 0x3ba   : > { %v11808_v35 = vadd.f32 %v4957_v42, %v4956_v25 }
 0x3bb   : > { %v4959_v5 = vpop.f32.mrf.mxu1 }
 0x3bd   : > { %v4960_v14 = vpop.f32.mrf.mxu1 }
 0x3be   : > { %v11810_v1 = vadd.f32 %v4960_v14, %v4959_v5 }
 0x3bf   : > { %v4962_v56 = vpop.f32.mrf.mxu1 }
 0x3c1   : > { %v4963_v6 = vpop.f32.mrf.mxu1 }
 0x3c2   : > { %v11812_v22 = vadd.f32 %v4963_v6, %v4962_v56 }
 0x3c3   : > { %v4965_v15 = vpop.f32.mrf.mxu1 }
 0x3c5   : > { %v4966_v61 = vpop.f32.mrf.mxu1 }
 0x3c6   : > { %v11814_v9 = vadd.f32 %v4966_v61, %v4965_v15 }
 0x3c7   : > { %v4968_v0 = vpop.f32.mrf.mxu1 }
 0x3c9   : > { %v4969_v4 = vpop.f32.mrf.mxu1 }
 0x3ca   : > { %v11816_v33 = vadd.f32 %v4969_v4, %v4968_v0  ;;  %v4298_v0 = vadd.f32 %v11788_v63, %v11825_v31 }
 0x3cb   : > { %v4971_v19 = vpop.f32.mrf.mxu1 }
 0x3cd   : > { %v4972_v59 = vpop.f32.mrf.mxu1 }
 0x3ce   : > { %v11818_v16 = vadd.f32 %v4972_v59, %v4971_v19 }
 0x3cf   : > { %v4974_v55 = vpop.f32.mrf.mxu1 }
 0x3d1   : > { %v4975_v57 = vpop.f32.mrf.mxu1 }
 0x3d2   : > { %v11820_v30 = vadd.f32 %v4975_v57, %v4974_v55 }
 0x3ec   : > { %v4911_v34 = vpop.f32.mrf.mxu0 }
 0x3ee   : > { %v4912_v3 = vpop.f32.mrf.mxu0 }
 0x3ef   : > { %v4913_v13 = vadd.f32 %v4912_v3, %v4911_v34  ;;  %v4311_v3 = vadd.f32 %v11794_v50, %v11825_v31  ;;  %v4314_v50 = vadd.f32 %v11796_v23, %v11825_v31 }
 0x3f0   : > { %v4914_v17 = vpop.f32.mrf.mxu0 }
 0x3f1   : > { %v4279_v44 = vadd.f32 %v4913_v13, %v11825_v31 }
 0x3f2   : > { %v4915_v7 = vpop.f32.mrf.mxu0 }
 0x3f3   : > { %v4916_v43 = vadd.f32 %v4915_v7, %v4914_v17  ;;  %v4319_v7 = vadd.f32 %v11798_v51, %v11825_v31 }
 0x3f4   : > { %v5085_v2 = vpop.f32.mrf.mxu0 }
 0x3f5   : > { %v4448_v37 = vadd.f32 %v5085_v2, %v4287_v54  ;;  %v4282_v29 = vadd.f32 %v4916_v43, %v11825_v31 }
 0x3f6   : > { %v4439_v38 = vpop.f32.mrf.mxu0 }
 0x3f7   : > { %v4440_v39 = vadd.f32 %v4439_v38, %v4279_v44  ;;  %v4568_v21 = vmax.f32 %v4448_v37, 0.0  ;;  %v4322_v44 = vadd.f32 %v11800_v18, %v11825_v31 }
 0x3f8   : > { %v5086_v47 = vpop.f32.mrf.mxu0 }
 0x3f9   : > { %v4451_v52 = vadd.f32 %v5086_v47, %v4290_v62  ;;  %v4566_v48 = vmax.f32 %v4440_v39, 0.0 }
 0x3fa   : > { %v4442_v20 = vpop.f32.mrf.mxu0 }
 0x3fb   : > { %v11839_v41 = vpop.f32.mrf.mxu1  ;;  %v4569_v58 = vmax.f32 %v4451_v52, 0.0  ;;  %v4443_v12 = vadd.f32 %v4442_v20, %v4282_v29 }
 0x3fc   : > { %v5089_v36 = vpop.f32.mrf.mxu0 }
 0x3fd   : > { %v11848_v40 = vpop.f32.mrf.mxu1  ;;  %v11854_v26 = vpack.c.bf16 %v4569_v58, %v4568_v21  ;;  %v4567_v25 = vmax.f32 %v4443_v12, 0.0  ;;  %v4464_v42 = vadd.f32 %v5089_v36, %v4303_v10  ;;  %v4335_v21 = vadd.f32 %v11806_v27, %v11825_v31 }
 0x3fe   : > { %v4455_v14 = vpop.f32.mrf.mxu0  ;;  %v4327_v10 = vadd.f32 %v11802_v24, %v11825_v31  ;;  %v4338_v36 = vadd.f32 %v11808_v35, %v11825_v31  ;;  %v4330_v27 = vadd.f32 %v11804_v11, %v11825_v31  ;;  %v4351_v24 = vadd.f32 %v11814_v9, %v11825_v31 }
 0x3ff   : > { %v11856_v5 = vpop.f32.mrf.mxu1  ;;  %v11858_v56 = vpack.c.bf16 %v4567_v25, %v4566_v48  ;;  %v4456_v6 = vadd.f32 %v4455_v14, %v4295_v49  ;;  %v4572_v19 = vmax.f32 %v4464_v42, 0.0  ;;  %v4343_v35 = vadd.f32 %v11810_v1, %v11825_v31 }
 0x400   : > { %v5090_v15 = vpop.f32.mrf.mxu0  ;;  %v4346_v9 = vadd.f32 %v11812_v22, %v11825_v31 }
 0x401   : > { %v4467_v61 = vadd.f32 %v5090_v15, %v4306_v60  ;;  %v11864_v53 = vpop.f32.mrf.mxu1  ;;  %v4570_v13 = vmax.f32 %v4456_v6, 0.0 }
 0x402   : > { %v4458_v4 = vpop.f32.mrf.mxu0 }
 0x403   : > { %v4573_v59 = vmax.f32 %v4467_v61, 0.0  ;;  %v4459_v55 = vadd.f32 %v4458_v4, %v4298_v0 }
 0x404   : > { %v5093_v34 = vpop.f32.mrf.mxu0 }
 0x405   : > { %v11870_v17 = vpack.c.bf16 %v4573_v59, %v4572_v19  ;;  %v4571_v28 = vmax.f32 %v4459_v55, 0.0  ;;  %v4480_v2 = vadd.f32 %v5093_v34, %v4319_v7 }
 0x406   : > { %v4471_v43 = vpop.f32.mrf.mxu0 }
 0x407   : > { %v11876_v54 = vpack.c.bf16 %v4571_v28, %v4570_v13  ;;  %v4472_v37 = vadd.f32 %v4471_v43, %v4311_v3  ;;  %v4576_v52 = vmax.f32 %v4480_v2, 0.0  ;;  %v4354_v28 = vadd.f32 %v11816_v33, %v11825_v31 }
 0x408   : > { %v5094_v38 = vpop.f32.mrf.mxu0 }
 0x409   : > { %v4483_v39 = vadd.f32 %v5094_v38, %v4322_v44  ;;  %v4574_v46 = vmax.f32 %v4472_v37, 0.0 }
 0x40a   : > { %v4474_v47 = vpop.f32.mrf.mxu0 }
 0x40b   : > { %v11866_v57 = vpop.f32.mrf.mxu1  ;;  %v4577_v51 = vmax.f32 %v4483_v39, 0.0  ;;  %v4475_v29 = vadd.f32 %v4474_v47, %v4314_v50 }
 0x40c   : > { %v5097_v45 = vpop.f32.mrf.mxu0 }
 0x40d   : > { %v11874_v63 = vpop.f32.mrf.mxu1  ;;  %v11884_v20 = vpack.c.bf16 %v4577_v51, %v4576_v52  ;;  %v4575_v8 = vmax.f32 %v4475_v29, 0.0  ;;  %v4496_v23 = vadd.f32 %v5097_v45, %v4335_v21  ;;  %v4362_v21 = vadd.f32 %v11820_v30, %v11825_v31 }
 0x40e   : > { %v4487_v58 = vpop.f32.mrf.mxu0 }
 0x40f   : > { %v11882_v62 = vpop.f32.mrf.mxu1  ;;  %v11890_v12 = vpack.c.bf16 %v4575_v8, %v4574_v46  ;;  %v4488_v25 = vadd.f32 %v4487_v58, %v4327_v10  ;;  %v4580_v60 = vmax.f32 %v4496_v23, 0.0  ;;  %v4359_v46 = vadd.f32 %v11818_v16, %v11825_v31 }
 0x410   : > { %v5098_v48 = vpop.f32.mrf.mxu0 }
 0x411   : > { %v11888_v18 = vpop.f32.mrf.mxu1  ;;  %v4499_v42 = vadd.f32 %v5098_v48, %v4338_v36  ;;  %v4578_v4 = vmax.f32 %v4488_v25, 0.0 }
 0x412   : > { %v4490_v6 = vpop.f32.mrf.mxu0 }
 0x413   : > { %v4581_v15 = vmax.f32 %v4499_v42, 0.0  ;;  %v4491_v61 = vadd.f32 %v4490_v6, %v4330_v27 }
 0x414   : > { %v5101_v0 = vpop.f32.mrf.mxu0 }
 0x415   : > { %v11906_v19 = vpack.c.bf16 %v4581_v15, %v4580_v60  ;;  %v4579_v59 = vmax.f32 %v4491_v61, 0.0  ;;  %v4512_v55 = vadd.f32 %v5101_v0, %v4351_v24 }
 0x416   : > { %v4503_v11 = vpop.f32.mrf.mxu0 }
 0x417   : > { %v11908_v3 = vpack.c.bf16 %v4579_v59, %v4578_v4  ;;  %v4504_v13 = vadd.f32 %v4503_v11, %v4343_v35  ;;  %v4584_v37 = vmax.f32 %v4512_v55, 0.0 }
 0x418   : > { %v11896_v49 = vpop.f32.mrf.mxu1  ;;  %v5102_v7 = vpop.f32.mrf.mxu0 }
 0x419   : > { %v4515_v43 = vadd.f32 %v5102_v7, %v4354_v28  ;;  %v4582_v47 = vmax.f32 %v4504_v13, 0.0 }
 0x41a   : > { %v11900_v14 = vpop.f32.mrf.mxu1  ;;  %v4506_v1 = vpop.f32.mrf.mxu0 }
 0x41b   : > { %v4585_v44 = vmax.f32 %v4515_v43, 0.0  ;;  %v4507_v38 = vadd.f32 %v4506_v1, %v4346_v9 }
 0x41c   : > { %v4992_v34 = vpop.f32.mrf.mxu1  ;;  %v11914_v50 = vpop.f32.mrf.mxu0 }
 0x41d   : > { %v11916_v52 = vpack.c.bf16 %v4585_v44, %v4584_v37  ;;  %v4583_v51 = vmax.f32 %v4507_v38, 0.0 }
 0x41e   : > { %v4993_v2 = vpop.f32.mrf.mxu1  ;;  %v4519_v45 = vpop.f32.mrf.mxu0 }
 0x41f   : > { %v11918_v33 = vpack.c.bf16 %v4583_v51, %v4582_v47  ;;  %v4520_v8 = vadd.f32 %v4519_v45, %v4359_v46  ;;  %v4994_v44 = vadd.f32 %v4993_v2, %v4992_v34  ;;  %v4658_v34 = vsel %vm14406_vm4, %v11906_v19, 0 }
 0x420   : > { %v11922_v22 = vpop.f32.mrf.mxu0  ;;  %v4985_v2 = vadd.f32 %v11874_v63, %v11866_v57  ;;  %v4655_v19 = vsel %vm14408_vm9, %v11908_v3, 0  ;;  %v4979_v57 = vadd.f32 %v11848_v40, %v11839_v41  ;;  %v4652_v3 = vsel %vm14410_vm1, %v11884_v20, 0 }
 0x421   : > { %v4586_v48 = vmax.f32 %v4520_v8, 0.0  ;;  %v4386_v8 = vadd.f32 %v4994_v44, %v11825_v31  ;;  %v4649_v40 = vsel %vm14412_vm6, %v11890_v12, 0  ;;  %v4643_v20 = vsel %vm14416_vm3, %v11876_v54, 0 }
 0x422   : > { %v4522_v23 = vpop.f32.mrf.mxu0  ;;  %v4640_v12 = vsel %vm14418_vm15, %v11854_v26, 0 }
 0x423   : > { %v4523_v10 = vadd.f32 %v4522_v23, %v4362_v21 }
 0x424   : > { %v5109_v36 = vpop.f32.mrf.mxu0 }
 0x425   : > { %v4587_v25 = vmax.f32 %v4523_v10, 0.0 }
 0x426   : > { %v4535_v27 = vpop.f32.mrf.mxu0 }
 0x427   : > { %v11926_v6 = vpack.c.bf16 %v4587_v25, %v4586_v48  ;;  %v4621_v54 = vpop.permute.xlu0 %4620 }
 0x428   : > { %v4995_v39 = vpop.f32.mrf.mxu1  ;;  %v5110_v15 = vpop.f32.mrf.mxu0 }
 0x429   : > { %v4547_v10 = vadd.f32 %v5110_v15, %v4386_v8  ;;  %v4375_v15 = vadd.f32 %v4985_v2, %v11825_v31 }
 0x42a   : > { %v4996_v29 = vpop.f32.mrf.mxu1  ;;  %v4538_v16 = vpop.f32.mrf.mxu0 }
 0x42b   : > { %v4997_v4 = vadd.f32 %v4996_v29, %v4995_v39  ;;  %v4991_v39 = vadd.f32 %v11900_v14, %v11896_v49  ;;  %v4988_v49 = vadd.f32 %v11888_v18, %v11882_v62  ;;  %v4593_v25 = vmax.f32 %v4547_v10, 0.0 }
 0x42c   : > { %v4998_v58 = vpop.f32.mrf.mxu1  ;;  %v5113_v35 = vpop.f32.mrf.mxu0  ;;  %v4982_v62 = vadd.f32 %v11864_v53, %v11856_v5  ;;  %v4536_v18 = vadd.f32 %v4535_v27, %v4375_v15 }
 0x42d   : > { %v4391_v43 = vadd.f32 %v4997_v4, %v11825_v31  ;;  %v4383_v23 = vadd.f32 %v4991_v39, %v11825_v31 }
 0x42e   : > { %v4999_v42 = vpop.f32.mrf.mxu1  ;;  %v4551_v11 = vpop.f32.mrf.mxu0 }
 0x42f   : > { %v5000_v59 = vadd.f32 %v4999_v42, %v4998_v58  ;;  %v4552_v38 = vadd.f32 %v4551_v11, %v4391_v43  ;;  %v4544_v14 = vadd.f32 %v5109_v36, %v4383_v23  ;;  %v4370_v36 = vadd.f32 %v4982_v62, %v11825_v31 }
 0x430   : > { %v5114_v28 = vpop.f32.mrf.mxu0 }
 0x431   : > { %v4394_v1 = vadd.f32 %v5000_v59, %v11825_v31  ;;  %v4594_v21 = vmax.f32 %v4552_v38, 0.0  ;;  %v4592_v42 = vmax.f32 %v4544_v14, 0.0 }
 0x432   : > { %v4554_v37 = vpop.f32.mrf.mxu0 }
 0x433   : > { %v4555_v51 = vadd.f32 %v4554_v37, %v4394_v1 }
 0x434   : > { %v5001_v60 = vpop.f32.mrf.mxu1 }
 0x435   : > { %v4595_v46 = vmax.f32 %v4555_v51, 0.0 }
 0x436   : > { %v5002_v61 = vpop.f32.mrf.mxu1 }
 0x437   : > { %v5003_v24 = vadd.f32 %v5002_v61, %v5001_v60  ;;  %v4614_v48 = vpack.c.bf16 %v4595_v46, %v4594_v21  ;;  %v4378_v60 = vadd.f32 %v4988_v49, %v11825_v31  ;;  %v4613_v61 = vpack.c.bf16 %v4593_v25, %v4592_v42 }
 0x438   : > { %v5004_v0 = vpop.f32.mrf.mxu1 }
 0x439   : > { %v4399_v30 = vadd.f32 %v5003_v24, %v11825_v31  ;;  %v4539_v24 = vadd.f32 %v4538_v16, %v4378_v60  ;;  %v4531_v16 = vadd.f32 %v11922_v22, %v4370_v36 }
 0x43a   : > { %v5005_v55 = vpop.f32.mrf.mxu1 }
 0x43b   : > { %v5006_v13 = vadd.f32 %v5005_v55, %v5004_v0  ;;  %v4560_v7 = vadd.f32 %v5113_v35, %v4399_v30  ;;  %v4591_v63 = vmax.f32 %v4539_v24, 0.0  ;;  %v4590_v0 = vmax.f32 %v4536_v18, 0.0 }
 0x43c   : > { %v4367_v35 = vadd.f32 %v4979_v57, %v11825_v31  ;;  %v4589_v53 = vmax.f32 %v4531_v16, 0.0 }
 0x43d   : > { %v4402_v9 = vadd.f32 %v5006_v13, %v11825_v31  ;;  %v4596_v29 = vmax.f32 %v4560_v7, 0.0  ;;  %v4612_v4 = vpack.c.bf16 %v4591_v63, %v4590_v0  ;;  %v4646_v31 = vsel %vm14414_vm10, %v11870_v17, 0 }
 0x43e   : > { %v4528_v5 = vadd.f32 %v11914_v50, %v4367_v35  ;;  %v4637_v17 = vsel %vm14420_vm8, %v11858_v56, 0 }
 0x43f   : > { %v4563_v47 = vadd.f32 %v5114_v28, %v4402_v9 }
 0x440   : > { %v4588_v27 = vmax.f32 %v4528_v5, 0.0 }
 0x441   : > { %v4597_v45 = vmax.f32 %v4563_v47, 0.0 }
 0x442   : > { %v4611_v41 = vpack.c.bf16 %v4589_v53, %v4588_v27 }
 0x443   : > { %v4615_v58 = vpack.c.bf16 %v4597_v45, %v4596_v29 }
 0x445   : > { %5131 = vmatprep.subr.msk.bf16.mxu0 %vm14405_vm2, %v4615_v58  ;;  %vm14421_vm2 = vmmov %vm14413_vm0 }
 0x446   : > { %5026 = vmatpush3.bf16.xpose.msra.mxu0 %v4658_v34 }
 0x447   : > { %5132 = vmatprep.subr.msk.bf16.mxu0 %vm14407_vm13, %v4614_v48 }
 0x44e   : > { %5028 = vmatpush3.bf16.xpose.msra.mxu0 %v4655_v19 }
 0x44f   : > { %5133 = vmatprep.subr.msk.bf16.mxu0 %vm14409_vm7, %v4613_v61 }
 0x456   : > { %5030 = vmatpush3.bf16.xpose.msra.mxu0 %v4652_v3 }
 0x457   : > { %5134 = vmatprep.subr.msk.bf16.mxu0 %vm14411_vm5, %v4612_v4 }
 0x45e   : > { %5032 = vmatpush3.bf16.xpose.msra.mxu0 %v4649_v40 }
 0x45f   : > { %5135 = vmatprep.subr.msk.bf16.mxu0 %vm14413_vm0, %v4611_v41 }
 0x466   : > { %5034 = vmatpush3.bf16.xpose.msra.mxu0 %v4646_v31 }
 0x467   : > { %5136 = vmatprep.subr.msk.bf16.mxu0 %vm14415_vm12, %v11926_v6  ;;  %v4626_v6 = vpop.permute.xlu1 %4625 }
 0x46e   : > { %5036 = vmatpush3.bf16.xpose.msra.mxu0 %v4643_v20 }
 0x46f   : > { %5137 = vmatprep.subr.msk.bf16.mxu0 %vm14417_vm14, %v11916_v52 }
 0x476   : > { %5038 = vmatpush3.bf16.xpose.msra.mxu0 %v4640_v12 }
 0x477   : > { %5138 = vmatprep.subr.msk.bf16.mxu0 %vm14419_vm11, %v11918_v33 }
 0x47e   : > { %5040 = vmatpush3.bf16.xpose.msra.mxu0 %v4637_v17 }
 0x485   : > { %5042 = vmatmul.mubr.msk.bf16.vlgmr.msra.gmra.mxu0 %vm14421_vm2, %v11830_v32 }
 0x545   : > { %v4718_v50 = vpop.f32.mrf.mxu0 }
 0x546   : > { %v4719_v52 = vadd.f32 %v4718_v50, %v4621_v54 }
 0x547   : > { %v4720_v22 = vpop.f32.mrf.mxu0 }
 0x548   : > { %4727 = vst [vmem:[%s271_s22] sm:$0xff] %v4719_v52  ;;  %v4721_v26 = vadd.f32 %v4720_v22, %v4621_v54 }
 0x549   : > { %v4722_v33 = vpop.f32.mrf.mxu0 }
 0x54a   : > { %4728 = vst [vmem:[%s271_s22 + $0x8] sm:$0xff] %v4721_v26  ;;  %v4723_v56 = vadd.f32 %v4722_v33, %v4626_v6 }
 0x54b   : > { %v4724_v32 = vpop.f32.mrf.mxu0 }
 0x54c   : > { %4729 = vst [vmem:[%s271_s22 + $0x10] sm:$0xff] %v4723_v56  ;;  %v4725_v59 = vadd.f32 %v4724_v32, %v4626_v6 }
 0x54e   : > { %4730 = vst [vmem:[%s271_s22 + $0x18] sm:$0xff] %v4725_v59 }
 0x54f   : > { %6354 = shalt.err (!%p6351_p3)
}
 0x550   : > { %s6355_s15 = scalar_lea.hbm %s11986_s29, 512  ;;  %s6359_s21 = scalar_lea.hbm %s12035_s7, 1024 }
 0x551   : > { %p6356_p4 = scmp.ne.s32.totalorder %s11986_s29, %s6355_s15  ;;  %p6360_p9 = scmp.lt.s32.totalorder %s11986_s29, %s12035_s7 }
 0x552   : > { %p6361_p10 = scmp.lt.s32.totalorder %s6359_s21, %s6355_s15 }
 0x553   : > { %p6357_p7 = pnand %p6356_p4, %p6496_p5 }
 0x554   : > { %p6362_p11 = por %p6361_p10, %p6360_p9 }
 0x555   : > { %p6358_p8 = pneg %p6357_p7 }
 0x557   : > { %p6363_p12 = pnand %p6362_p11, %p6358_p8 }
 0x559   : > { %6366 = shalt.err (!%p6363_p12)
}
 0x55a   : > { %s6416_s19 = smov 256   ;;  %s6417_s20 = smov 16  }
 0x55b   : > { %5139 = dma.vmem_to_hbm [thread:$0]  (%p6496_p5), %s11981_s23, 512, %s11986_s29, %s11988_s8, %s6416_s19, %s6416_s19, %s6417_s20  }
 0x55c PF: > { %p5145_p13 = scmp.ge.s32.totalorder %s6401_s27, 2  ;;  %s4760_s9 = sand.u32 1, %s6389_s24  }
 0x55d   : > { %s4761_s28 = scalar_lea.sflag [#allocation3], %s4760_s9 }
 0x55e   : > { %p5142_p0 = pnand %p5145_p13, %p6500_p6 }
 0x560   : > { %p5143_p1 = pneg %p5142_p0 }
 0x562   : > { %6384 = dma.done.wait (%p5143_p1), %s4761_s28, 512  }
 0x563   : > { %6386 = vsyncadd (%p5143_p1), %s4761_s28, 4294966784  ;;  %p17_p2 = scmp.ge.s32.totalorder %s6483_s30, 4   ;;  %s14422_s24 = smov %s6393_s25 }
 0x564   : > { %s14423_s25 = smov %s6397_s26  ;;  %s14424_s26 = smov %s6494_s10 }
 0x565   : > { %s14425_s27 = smov %s6483_s30  ;;  %19 = sbr.rel (!%p17_p2) target bundleno = 3 (0x3), region = 83 }
 0x56a   :  { %4766 = vsyncpa [#allocation3], 1 }
 0x56b   :  { %4768 = vsyncpa [#allocation3 + $0x1], 1 }

</bundles_post_ra>
